<compile_context>
chip_gen: v7x
topology: tpu7x:2x2x1
jax: 0.10.0
libtpu: 0.0.40
codegen_flags: <defaults>
</compile_context>

<pallas_src>
import functools
import math

import jax
import jax.numpy as jnp
import numpy as np
from jax.experimental import pallas as pl
from jax.experimental.pallas import tpu as pltpu

LANE = 128          # lane-padded feature width used everywhere inside the kernel
N_ACTIONS = 4
BOARD_SIZE = 16     # config().sim.env.size (conv branch)
TAU = 1.0           # config().learning.gumbel_softmax.tau
NEG_INF = -1e9


def _round_up(n, m):
    return ((n + m - 1) // m) * m


# ----------------------------------------------------------------------------
# Fused Pallas kernel: 4 convs + 4 FCs + gumbel-softmax, all VMEM-resident.
# ----------------------------------------------------------------------------
def _actor_fused_kernel(*refs, n_conv, n_fc, tau):
    idx = 0
    x_ref = refs[idx]; idx += 1
    conv_layers = []
    for _ in range(n_conv):
        conv_layers.append((refs[idx], refs[idx + 1], refs[idx + 2]))
        idx += 3
    fc_layers = []
    for _ in range(n_fc):
        fc_layers.append((refs[idx], refs[idx + 1]))
        idx += 2
    gn_ref = refs[idx]; idx += 1
    o_ref = refs[idx]

    x = x_ref[...]                                           # (rows, 128) f32

    # --- conv stack: y = relu( sum_t (G_t @ x) @ W_t + b ) -------------------
    for g_ref, w_ref, b_ref in conv_layers:
        r_out = g_ref.shape[1]
        acc = jnp.zeros((r_out, LANE), jnp.float32)
        for t in range(9):                                   # static unroll over taps
            tap = jnp.dot(g_ref[t], x, preferred_element_type=jnp.float32)
            acc = acc + jnp.dot(tap, w_ref[t], preferred_element_type=jnp.float32)
        x = jnp.maximum(acc + b_ref[...], 0.0)

    # --- FC stack (final spatial is 1x1, so rows == padded batch) ------------
    for i, (w_ref, b_ref) in enumerate(fc_layers):
        x = jnp.dot(x, w_ref[...], preferred_element_type=jnp.float32) + b_ref[...]
        if i < n_fc - 1:
            x = jnp.maximum(x, 0.0)

    # --- fused gumbel-softmax epilogue (padded lanes carry -1e9 in gn_ref) ---
    z = (x + gn_ref[...]) * (1.0 / tau)
    z = z - jnp.max(z, axis=-1, keepdims=True)
    e = jnp.exp(z)
    denom = jnp.sum(e, axis=-1, keepdims=True)
    r = pl.reciprocal(denom, approx=True)                    # EUP slot (free)
    r = r * (2.0 - denom * r)                                # one Newton step
    o_ref[...] = (e * r).astype(o_ref.dtype)


# ----------------------------------------------------------------------------
# Wrapper-side constant construction (gather matrices, padded weights).
# ----------------------------------------------------------------------------
def _build_gather_mats(batch, board, n_conv):
    """Per conv layer: 9 (rows_out_pad, rows_in_pad) 0/1 gather matrices.

    Activation rows are (b, h, w) flattened; rows padded up to a multiple of 8
    select nothing, so they stay zero through the conv stack.
    """
    mats = []
    h = w = board
    r_in_pad = _round_up(batch * h * w, 8)
    for _ in range(n_conv):
        ho, wo = (h - 1) // 2 + 1, (w - 1) // 2 + 1          # 3x3, stride 2, pad 1
        r_out = batch * ho * wo
        r_out_pad = _round_up(max(r_out, 8), 8)
        g = np.zeros((9, r_out_pad, r_in_pad), np.float32)
        for b in range(batch):
            for oh in range(ho):
                for ow in range(wo):
                    ro = b * ho * wo + oh * wo + ow
                    for ki in range(3):
                        hi = 2 * oh + ki - 1
                        if not (0 <= hi < h):
                            continue
                        for kj in range(3):
                            wi = 2 * ow + kj - 1
                            if not (0 <= wi < w):
                                continue
                            g[ki * 3 + kj, ro, b * h * w + hi * w + wi] = 1.0
        mats.append(jnp.asarray(g))
        h, w = ho, wo
        r_in_pad = r_out_pad
    return mats, (h, w), r_in_pad


def _pack_params(params):
    """Zero-pad all weights/biases to 128-lane-aligned kernel layouts."""
    conv_packed = []
    for w, b in params["conv"]:                              # w: (3, 3, cin, cout)
        cin, cout = w.shape[2], w.shape[3]
        wp = jnp.zeros((9, LANE, LANE), jnp.float32)
        wp = wp.at[:, :cin, :cout].set(w.reshape(9, cin, cout))   # tap-major (ki*3+kj)
        bp = jnp.zeros((1, LANE), jnp.float32).at[0, :cout].set(b)
        conv_packed.append((wp, bp))
    fc_packed = []
    for w, b in params["fc"]:                                # w: (fin, fout)
        fin, fout = w.shape
        wp = jnp.zeros((LANE, LANE), jnp.float32).at[:fin, :fout].set(w)
        bp = jnp.zeros((1, LANE), jnp.float32).at[0, :fout].set(b)
        fc_packed.append((wp, bp))
    return conv_packed, fc_packed


# ----------------------------------------------------------------------------
# Parameter init (deterministic, synthetic)
# ----------------------------------------------------------------------------
def init_params(key):
    conv_dims = [(1, 16), (16, 32), (32, 32), (32, 32)]      # 3x3, stride 2, pad 1
    fc_dims = [(32, 128), (128, 64), (64, 16), (16, 4)]      # board 16 -> out_dim 32
    params = {"conv": [], "fc": []}
    for cin, cout in conv_dims:
        key, kw, kb = jax.random.split(key, 3)
        scale = 1.0 / math.sqrt(3 * 3 * cin)
        w = jax.random.normal(kw, (3, 3, cin, cout), jnp.float32) * scale
        b = jax.random.normal(kb, (cout,), jnp.float32) * scale
        params["conv"].append((w, b))
    for fin, fout in fc_dims:
        key, kw, kb = jax.random.split(key, 3)
        scale = 1.0 / math.sqrt(fin)
        w = jax.random.normal(kw, (fin, fout), jnp.float32) * scale
        b = jax.random.normal(kb, (fout,), jnp.float32) * scale
        params["fc"].append((w, b))
    return params


# ----------------------------------------------------------------------------
# Forward pass (mirrors Actor.forward, conv branch) — single pallas_call.
# ----------------------------------------------------------------------------
def actor_forward(params, x_nchw, gumbel_noise, tau=TAU, board_size=BOARD_SIZE):
    batch = x_nchw.shape[0]
    n_conv = len(params["conv"])
    n_fc = len(params["fc"])

    conv_packed, fc_packed = _pack_params(params)
    gmats, (hf, wf), r_final = _build_gather_mats(batch, board_size, n_conv)
    assert hf == 1 and wf == 1, "fused flatten assumes the conv stack ends at 1x1"

    # Input: NCHW (B, 1, H, W) -> (B*H*W, 128); channel 0 real, rest zero.
    n_rows0 = gmats[0].shape[2]
    x_flat = x_nchw.astype(jnp.float32).reshape(-1)          # (b, h, w) order (C == 1)
    x0 = jnp.zeros((n_rows0, LANE), jnp.float32).at[: x_flat.shape[0], 0].set(x_flat)

    # Gumbel noise in the kernel's padded (rows, 128) layout; padded lanes get
    # -1e9 so they vanish inside the fused softmax.
    gn = jnp.zeros((r_final, LANE), jnp.float32)
    gn = gn.at[:, N_ACTIONS:].set(NEG_INF)
    gn = gn.at[:batch, :N_ACTIONS].set(gumbel_noise.astype(jnp.float32))

    args = [x0]
    for g, (wp, bp) in zip(gmats, conv_packed):
        args += [g, wp, bp]
    for wp, bp in fc_packed:
        args += [wp, bp]
    args.append(gn)

    kernel = functools.partial(_actor_fused_kernel, n_conv=n_conv, n_fc=n_fc,
                               tau=float(tau))
    out_full = pl.pallas_call(
        kernel,
        out_shape=jax.ShapeDtypeStruct((r_final, LANE), jnp.float32),
        in_specs=[pl.BlockSpec(memory_space=pltpu.MemorySpace.VMEM)] * len(args),
        out_specs=pl.BlockSpec(memory_space=pltpu.MemorySpace.VMEM),
        compiler_params=pltpu.CompilerParams(vmem_limit_bytes=32 * 1024 * 1024),
    )(*args)
    return out_full[:batch, :N_ACTIONS]


# ----------------------------------------------------------------------------
# Plain-JAX reference (for a correctness cross-check in __main__)
# ----------------------------------------------------------------------------
def actor_reference(params, x_nchw, gumbel_noise, tau=TAU):
    x = jnp.transpose(x_nchw, (0, 2, 3, 1)).astype(jnp.float32)      # NHWC
    for w, b in params["conv"]:
        x = jax.lax.conv_general_dilated(
            x, w, window_strides=(2, 2), padding=((1, 1), (1, 1)),
            dimension_numbers=("NHWC", "HWIO", "NHWC"))
        x = jnp.maximum(x + b, 0.0)
    out = x.reshape(x.shape[0], -1)                                  # (B, 32); 1x1 spatial
    for i, (w, b) in enumerate(params["fc"]):
        out = out @ w + b
        if i < len(params["fc"]) - 1:
            out = jnp.maximum(out, 0.0)
    return jax.nn.softmax((out + gumbel_noise) / tau, axis=-1)


if __name__ == "__main__":
    key = jax.random.PRNGKey(0)
    key, k_params, k_x, k_g = jax.random.split(key, 4)

    params = init_params(k_params)
    x = jax.random.normal(k_x, (2, 1, BOARD_SIZE, BOARD_SIZE), jnp.float32)  # NCHW
    gumbel_noise = jax.random.gumbel(k_g, (2, N_ACTIONS), jnp.float32)

    out = actor_forward(params, x, gumbel_noise, tau=TAU)
    out = jax.block_until_ready(out)

    assert out.shape == (2, N_ACTIONS)
    assert bool(jnp.all(jnp.isfinite(out)))
    assert bool(jnp.allclose(jnp.sum(out, axis=-1), 1.0, atol=1e-4))

    ref = actor_reference(params, x, gumbel_noise, tau=TAU)
    assert bool(jnp.allclose(out, ref, atol=2e-2))

    print("KERNEL_OK")
</pallas_src>

<mosaic_0001>
module attributes {stable_mosaic.version = 11 : i64} {
  func.func @_actor_fused_kernel(%arg0: memref<512x128xf32, #tpu.memory_space<vmem>>, %arg1: memref<9x128x512xf32, #tpu.memory_space<vmem>>, %arg2: memref<9x128x128xf32, #tpu.memory_space<vmem>>, %arg3: memref<1x128xf32, #tpu.memory_space<vmem>>, %arg4: memref<9x32x128xf32, #tpu.memory_space<vmem>>, %arg5: memref<9x128x128xf32, #tpu.memory_space<vmem>>, %arg6: memref<1x128xf32, #tpu.memory_space<vmem>>, %arg7: memref<9x8x32xf32, #tpu.memory_space<vmem>>, %arg8: memref<9x128x128xf32, #tpu.memory_space<vmem>>, %arg9: memref<1x128xf32, #tpu.memory_space<vmem>>, %arg10: memref<9x8x8xf32, #tpu.memory_space<vmem>>, %arg11: memref<9x128x128xf32, #tpu.memory_space<vmem>>, %arg12: memref<1x128xf32, #tpu.memory_space<vmem>>, %arg13: memref<128x128xf32, #tpu.memory_space<vmem>>, %arg14: memref<1x128xf32, #tpu.memory_space<vmem>>, %arg15: memref<128x128xf32, #tpu.memory_space<vmem>>, %arg16: memref<1x128xf32, #tpu.memory_space<vmem>>, %arg17: memref<128x128xf32, #tpu.memory_space<vmem>>, %arg18: memref<1x128xf32, #tpu.memory_space<vmem>>, %arg19: memref<128x128xf32, #tpu.memory_space<vmem>>, %arg20: memref<1x128xf32, #tpu.memory_space<vmem>>, %arg21: memref<8x128xf32, #tpu.memory_space<vmem>>, %arg22: memref<8x128xf32, #tpu.memory_space<vmem>>) attributes {dimension_semantics = [], scalar_prefetch = 0 : i64, scratch_operands = 0 : i64, tpu.core_type = #tpu.core_type<tc>} {
    %c0 = arith.constant 0 : index
    %c0_0 = arith.constant 0 : index
    %0 = vector.load %arg0[%c0, %c0_0] : memref<512x128xf32, #tpu.memory_space<vmem>>, vector<512x128xf32>
    %cst = arith.constant 0.000000e+00 : f32
    %1 = vector.broadcast %cst : f32 to vector<128x128xf32>
    %c0_1 = arith.constant 0 : index
    %c0_2 = arith.constant 0 : index
    %c0_3 = arith.constant 0 : index
    %2 = vector.load %arg1[%c0_1, %c0_2, %c0_3] : memref<9x128x512xf32, #tpu.memory_space<vmem>>, vector<1x128x512xf32>
    %3 = vector.shape_cast %2 : vector<1x128x512xf32> to vector<128x512xf32>
    %cst_4 = arith.constant dense<0.000000e+00> : vector<128x128xf32>
    %4 = tpu.matmul %3, %0, %cst_4 {dimension_numbers = #tpu.dot_dimension_numbers<[1], [0], [0], [1], [0, 0, 1, 1], [], []>} : vector<128x512xf32>, vector<512x128xf32>, vector<128x128xf32> -> vector<128x128xf32>
    %c0_5 = arith.constant 0 : index
    %c0_6 = arith.constant 0 : index
    %c0_7 = arith.constant 0 : index
    %5 = vector.load %arg2[%c0_5, %c0_6, %c0_7] : memref<9x128x128xf32, #tpu.memory_space<vmem>>, vector<1x128x128xf32>
    %6 = vector.shape_cast %5 : vector<1x128x128xf32> to vector<128x128xf32>
    %cst_8 = arith.constant dense<0.000000e+00> : vector<128x128xf32>
    %7 = tpu.matmul %4, %6, %cst_8 {dimension_numbers = #tpu.dot_dimension_numbers<[1], [0], [0], [1], [0, 0, 1, 1], [], []>} : vector<128x128xf32>, vector<128x128xf32>, vector<128x128xf32> -> vector<128x128xf32>
    %8 = arith.addf %1, %7 : vector<128x128xf32>
    %c1 = arith.constant 1 : index
    %c0_9 = arith.constant 0 : index
    %c0_10 = arith.constant 0 : index
    %9 = vector.load %arg1[%c1, %c0_9, %c0_10] : memref<9x128x512xf32, #tpu.memory_space<vmem>>, vector<1x128x512xf32>
    %10 = vector.shape_cast %9 : vector<1x128x512xf32> to vector<128x512xf32>
    %cst_11 = arith.constant dense<0.000000e+00> : vector<128x128xf32>
    %11 = tpu.matmul %10, %0, %cst_11 {dimension_numbers = #tpu.dot_dimension_numbers<[1], [0], [0], [1], [0, 0, 1, 1], [], []>} : vector<128x512xf32>, vector<512x128xf32>, vector<128x128xf32> -> vector<128x128xf32>
    %c1_12 = arith.constant 1 : index
    %c0_13 = arith.constant 0 : index
    %c0_14 = arith.constant 0 : index
    %12 = vector.load %arg2[%c1_12, %c0_13, %c0_14] : memref<9x128x128xf32, #tpu.memory_space<vmem>>, vector<1x128x128xf32>
    %13 = vector.shape_cast %12 : vector<1x128x128xf32> to vector<128x128xf32>
    %cst_15 = arith.constant dense<0.000000e+00> : vector<128x128xf32>
    %14 = tpu.matmul %11, %13, %cst_15 {dimension_numbers = #tpu.dot_dimension_numbers<[1], [0], [0], [1], [0, 0, 1, 1], [], []>} : vector<128x128xf32>, vector<128x128xf32>, vector<128x128xf32> -> vector<128x128xf32>
    %15 = arith.addf %8, %14 : vector<128x128xf32>
    %c2 = arith.constant 2 : index
    %c0_16 = arith.constant 0 : index
    %c0_17 = arith.constant 0 : index
    %16 = vector.load %arg1[%c2, %c0_16, %c0_17] : memref<9x128x512xf32, #tpu.memory_space<vmem>>, vector<1x128x512xf32>
    %17 = vector.shape_cast %16 : vector<1x128x512xf32> to vector<128x512xf32>
    %cst_18 = arith.constant dense<0.000000e+00> : vector<128x128xf32>
    %18 = tpu.matmul %17, %0, %cst_18 {dimension_numbers = #tpu.dot_dimension_numbers<[1], [0], [0], [1], [0, 0, 1, 1], [], []>} : vector<128x512xf32>, vector<512x128xf32>, vector<128x128xf32> -> vector<128x128xf32>
    %c2_19 = arith.constant 2 : index
    %c0_20 = arith.constant 0 : index
    %c0_21 = arith.constant 0 : index
    %19 = vector.load %arg2[%c2_19, %c0_20, %c0_21] : memref<9x128x128xf32, #tpu.memory_space<vmem>>, vector<1x128x128xf32>
    %20 = vector.shape_cast %19 : vector<1x128x128xf32> to vector<128x128xf32>
    %cst_22 = arith.constant dense<0.000000e+00> : vector<128x128xf32>
    %21 = tpu.matmul %18, %20, %cst_22 {dimension_numbers = #tpu.dot_dimension_numbers<[1], [0], [0], [1], [0, 0, 1, 1], [], []>} : vector<128x128xf32>, vector<128x128xf32>, vector<128x128xf32> -> vector<128x128xf32>
    %22 = arith.addf %15, %21 : vector<128x128xf32>
    %c3 = arith.constant 3 : index
    %c0_23 = arith.constant 0 : index
    %c0_24 = arith.constant 0 : index
    %23 = vector.load %arg1[%c3, %c0_23, %c0_24] : memref<9x128x512xf32, #tpu.memory_space<vmem>>, vector<1x128x512xf32>
    %24 = vector.shape_cast %23 : vector<1x128x512xf32> to vector<128x512xf32>
    %cst_25 = arith.constant dense<0.000000e+00> : vector<128x128xf32>
    %25 = tpu.matmul %24, %0, %cst_25 {dimension_numbers = #tpu.dot_dimension_numbers<[1], [0], [0], [1], [0, 0, 1, 1], [], []>} : vector<128x512xf32>, vector<512x128xf32>, vector<128x128xf32> -> vector<128x128xf32>
    %c3_26 = arith.constant 3 : index
    %c0_27 = arith.constant 0 : index
    %c0_28 = arith.constant 0 : index
    %26 = vector.load %arg2[%c3_26, %c0_27, %c0_28] : memref<9x128x128xf32, #tpu.memory_space<vmem>>, vector<1x128x128xf32>
    %27 = vector.shape_cast %26 : vector<1x128x128xf32> to vector<128x128xf32>
    %cst_29 = arith.constant dense<0.000000e+00> : vector<128x128xf32>
    %28 = tpu.matmul %25, %27, %cst_29 {dimension_numbers = #tpu.dot_dimension_numbers<[1], [0], [0], [1], [0, 0, 1, 1], [], []>} : vector<128x128xf32>, vector<128x128xf32>, vector<128x128xf32> -> vector<128x128xf32>
    %29 = arith.addf %22, %28 : vector<128x128xf32>
    %c4 = arith.constant 4 : index
    %c0_30 = arith.constant 0 : index
    %c0_31 = arith.constant 0 : index
    %30 = vector.load %arg1[%c4, %c0_30, %c0_31] : memref<9x128x512xf32, #tpu.memory_space<vmem>>, vector<1x128x512xf32>
    %31 = vector.shape_cast %30 : vector<1x128x512xf32> to vector<128x512xf32>
    %cst_32 = arith.constant dense<0.000000e+00> : vector<128x128xf32>
    %32 = tpu.matmul %31, %0, %cst_32 {dimension_numbers = #tpu.dot_dimension_numbers<[1], [0], [0], [1], [0, 0, 1, 1], [], []>} : vector<128x512xf32>, vector<512x128xf32>, vector<128x128xf32> -> vector<128x128xf32>
    %c4_33 = arith.constant 4 : index
    %c0_34 = arith.constant 0 : index
    %c0_35 = arith.constant 0 : index
    %33 = vector.load %arg2[%c4_33, %c0_34, %c0_35] : memref<9x128x128xf32, #tpu.memory_space<vmem>>, vector<1x128x128xf32>
    %34 = vector.shape_cast %33 : vector<1x128x128xf32> to vector<128x128xf32>
    %cst_36 = arith.constant dense<0.000000e+00> : vector<128x128xf32>
    %35 = tpu.matmul %32, %34, %cst_36 {dimension_numbers = #tpu.dot_dimension_numbers<[1], [0], [0], [1], [0, 0, 1, 1], [], []>} : vector<128x128xf32>, vector<128x128xf32>, vector<128x128xf32> -> vector<128x128xf32>
    %36 = arith.addf %29, %35 : vector<128x128xf32>
    %c5 = arith.constant 5 : index
    %c0_37 = arith.constant 0 : index
    %c0_38 = arith.constant 0 : index
    %37 = vector.load %arg1[%c5, %c0_37, %c0_38] : memref<9x128x512xf32, #tpu.memory_space<vmem>>, vector<1x128x512xf32>
    %38 = vector.shape_cast %37 : vector<1x128x512xf32> to vector<128x512xf32>
    %cst_39 = arith.constant dense<0.000000e+00> : vector<128x128xf32>
    %39 = tpu.matmul %38, %0, %cst_39 {dimension_numbers = #tpu.dot_dimension_numbers<[1], [0], [0], [1], [0, 0, 1, 1], [], []>} : vector<128x512xf32>, vector<512x128xf32>, vector<128x128xf32> -> vector<128x128xf32>
    %c5_40 = arith.constant 5 : index
    %c0_41 = arith.constant 0 : index
    %c0_42 = arith.constant 0 : index
    %40 = vector.load %arg2[%c5_40, %c0_41, %c0_42] : memref<9x128x128xf32, #tpu.memory_space<vmem>>, vector<1x128x128xf32>
    %41 = vector.shape_cast %40 : vector<1x128x128xf32> to vector<128x128xf32>
    %cst_43 = arith.constant dense<0.000000e+00> : vector<128x128xf32>
    %42 = tpu.matmul %39, %41, %cst_43 {dimension_numbers = #tpu.dot_dimension_numbers<[1], [0], [0], [1], [0, 0, 1, 1], [], []>} : vector<128x128xf32>, vector<128x128xf32>, vector<128x128xf32> -> vector<128x128xf32>
    %43 = arith.addf %36, %42 : vector<128x128xf32>
    %c6 = arith.constant 6 : index
    %c0_44 = arith.constant 0 : index
    %c0_45 = arith.constant 0 : index
    %44 = vector.load %arg1[%c6, %c0_44, %c0_45] : memref<9x128x512xf32, #tpu.memory_space<vmem>>, vector<1x128x512xf32>
    %45 = vector.shape_cast %44 : vector<1x128x512xf32> to vector<128x512xf32>
    %cst_46 = arith.constant dense<0.000000e+00> : vector<128x128xf32>
    %46 = tpu.matmul %45, %0, %cst_46 {dimension_numbers = #tpu.dot_dimension_numbers<[1], [0], [0], [1], [0, 0, 1, 1], [], []>} : vector<128x512xf32>, vector<512x128xf32>, vector<128x128xf32> -> vector<128x128xf32>
    %c6_47 = arith.constant 6 : index
    %c0_48 = arith.constant 0 : index
    %c0_49 = arith.constant 0 : index
    %47 = vector.load %arg2[%c6_47, %c0_48, %c0_49] : memref<9x128x128xf32, #tpu.memory_space<vmem>>, vector<1x128x128xf32>
    %48 = vector.shape_cast %47 : vector<1x128x128xf32> to vector<128x128xf32>
    %cst_50 = arith.constant dense<0.000000e+00> : vector<128x128xf32>
    %49 = tpu.matmul %46, %48, %cst_50 {dimension_numbers = #tpu.dot_dimension_numbers<[1], [0], [0], [1], [0, 0, 1, 1], [], []>} : vector<128x128xf32>, vector<128x128xf32>, vector<128x128xf32> -> vector<128x128xf32>
    %50 = arith.addf %43, %49 : vector<128x128xf32>
    %c7 = arith.constant 7 : index
    %c0_51 = arith.constant 0 : index
    %c0_52 = arith.constant 0 : index
    %51 = vector.load %arg1[%c7, %c0_51, %c0_52] : memref<9x128x512xf32, #tpu.memory_space<vmem>>, vector<1x128x512xf32>
    %52 = vector.shape_cast %51 : vector<1x128x512xf32> to vector<128x512xf32>
    %cst_53 = arith.constant dense<0.000000e+00> : vector<128x128xf32>
    %53 = tpu.matmul %52, %0, %cst_53 {dimension_numbers = #tpu.dot_dimension_numbers<[1], [0], [0], [1], [0, 0, 1, 1], [], []>} : vector<128x512xf32>, vector<512x128xf32>, vector<128x128xf32> -> vector<128x128xf32>
    %c7_54 = arith.constant 7 : index
    %c0_55 = arith.constant 0 : index
    %c0_56 = arith.constant 0 : index
    %54 = vector.load %arg2[%c7_54, %c0_55, %c0_56] : memref<9x128x128xf32, #tpu.memory_space<vmem>>, vector<1x128x128xf32>
    %55 = vector.shape_cast %54 : vector<1x128x128xf32> to vector<128x128xf32>
    %cst_57 = arith.constant dense<0.000000e+00> : vector<128x128xf32>
    %56 = tpu.matmul %53, %55, %cst_57 {dimension_numbers = #tpu.dot_dimension_numbers<[1], [0], [0], [1], [0, 0, 1, 1], [], []>} : vector<128x128xf32>, vector<128x128xf32>, vector<128x128xf32> -> vector<128x128xf32>
    %57 = arith.addf %50, %56 : vector<128x128xf32>
    %c8 = arith.constant 8 : index
    %c0_58 = arith.constant 0 : index
    %c0_59 = arith.constant 0 : index
    %58 = vector.load %arg1[%c8, %c0_58, %c0_59] : memref<9x128x512xf32, #tpu.memory_space<vmem>>, vector<1x128x512xf32>
    %59 = vector.shape_cast %58 : vector<1x128x512xf32> to vector<128x512xf32>
    %cst_60 = arith.constant dense<0.000000e+00> : vector<128x128xf32>
    %60 = tpu.matmul %59, %0, %cst_60 {dimension_numbers = #tpu.dot_dimension_numbers<[1], [0], [0], [1], [0, 0, 1, 1], [], []>} : vector<128x512xf32>, vector<512x128xf32>, vector<128x128xf32> -> vector<128x128xf32>
    %c8_61 = arith.constant 8 : index
    %c0_62 = arith.constant 0 : index
    %c0_63 = arith.constant 0 : index
    %61 = vector.load %arg2[%c8_61, %c0_62, %c0_63] : memref<9x128x128xf32, #tpu.memory_space<vmem>>, vector<1x128x128xf32>
    %62 = vector.shape_cast %61 : vector<1x128x128xf32> to vector<128x128xf32>
    %cst_64 = arith.constant dense<0.000000e+00> : vector<128x128xf32>
    %63 = tpu.matmul %60, %62, %cst_64 {dimension_numbers = #tpu.dot_dimension_numbers<[1], [0], [0], [1], [0, 0, 1, 1], [], []>} : vector<128x128xf32>, vector<128x128xf32>, vector<128x128xf32> -> vector<128x128xf32>
    %64 = arith.addf %57, %63 : vector<128x128xf32>
    %c0_65 = arith.constant 0 : index
    %c0_66 = arith.constant 0 : index
    %65 = vector.load %arg3[%c0_65, %c0_66] : memref<1x128xf32, #tpu.memory_space<vmem>>, vector<1x128xf32>
    %66 = vector.broadcast %65 : vector<1x128xf32> to vector<128x128xf32>
    %67 = arith.addf %64, %66 : vector<128x128xf32>
    %cst_67 = arith.constant 0.000000e+00 : f32
    %68 = vector.broadcast %cst_67 : f32 to vector<128x128xf32>
    %69 = arith.maximumf %67, %68 : vector<128x128xf32>
    %cst_68 = arith.constant 0.000000e+00 : f32
    %70 = vector.broadcast %cst_68 : f32 to vector<32x128xf32>
    %c0_69 = arith.constant 0 : index
    %c0_70 = arith.constant 0 : index
    %c0_71 = arith.constant 0 : index
    %71 = vector.load %arg4[%c0_69, %c0_70, %c0_71] : memref<9x32x128xf32, #tpu.memory_space<vmem>>, vector<1x32x128xf32>
    %72 = vector.shape_cast %71 : vector<1x32x128xf32> to vector<32x128xf32>
    %cst_72 = arith.constant dense<0.000000e+00> : vector<32x128xf32>
    %73 = tpu.matmul %72, %69, %cst_72 {dimension_numbers = #tpu.dot_dimension_numbers<[1], [0], [0], [1], [0, 0, 1, 1], [], []>} : vector<32x128xf32>, vector<128x128xf32>, vector<32x128xf32> -> vector<32x128xf32>
    %c0_73 = arith.constant 0 : index
    %c0_74 = arith.constant 0 : index
    %c0_75 = arith.constant 0 : index
    %74 = vector.load %arg5[%c0_73, %c0_74, %c0_75] : memref<9x128x128xf32, #tpu.memory_space<vmem>>, vector<1x128x128xf32>
    %75 = vector.shape_cast %74 : vector<1x128x128xf32> to vector<128x128xf32>
    %cst_76 = arith.constant dense<0.000000e+00> : vector<32x128xf32>
    %76 = tpu.matmul %73, %75, %cst_76 {dimension_numbers = #tpu.dot_dimension_numbers<[1], [0], [0], [1], [0, 0, 1, 1], [], []>} : vector<32x128xf32>, vector<128x128xf32>, vector<32x128xf32> -> vector<32x128xf32>
    %77 = arith.addf %70, %76 : vector<32x128xf32>
    %c1_77 = arith.constant 1 : index
    %c0_78 = arith.constant 0 : index
    %c0_79 = arith.constant 0 : index
    %78 = vector.load %arg4[%c1_77, %c0_78, %c0_79] : memref<9x32x128xf32, #tpu.memory_space<vmem>>, vector<1x32x128xf32>
    %79 = vector.shape_cast %78 : vector<1x32x128xf32> to vector<32x128xf32>
    %cst_80 = arith.constant dense<0.000000e+00> : vector<32x128xf32>
    %80 = tpu.matmul %79, %69, %cst_80 {dimension_numbers = #tpu.dot_dimension_numbers<[1], [0], [0], [1], [0, 0, 1, 1], [], []>} : vector<32x128xf32>, vector<128x128xf32>, vector<32x128xf32> -> vector<32x128xf32>
    %c1_81 = arith.constant 1 : index
    %c0_82 = arith.constant 0 : index
    %c0_83 = arith.constant 0 : index
    %81 = vector.load %arg5[%c1_81, %c0_82, %c0_83] : memref<9x128x128xf32, #tpu.memory_space<vmem>>, vector<1x128x128xf32>
    %82 = vector.shape_cast %81 : vector<1x128x128xf32> to vector<128x128xf32>
    %cst_84 = arith.constant dense<0.000000e+00> : vector<32x128xf32>
    %83 = tpu.matmul %80, %82, %cst_84 {dimension_numbers = #tpu.dot_dimension_numbers<[1], [0], [0], [1], [0, 0, 1, 1], [], []>} : vector<32x128xf32>, vector<128x128xf32>, vector<32x128xf32> -> vector<32x128xf32>
    %84 = arith.addf %77, %83 : vector<32x128xf32>
    %c2_85 = arith.constant 2 : index
    %c0_86 = arith.constant 0 : index
    %c0_87 = arith.constant 0 : index
    %85 = vector.load %arg4[%c2_85, %c0_86, %c0_87] : memref<9x32x128xf32, #tpu.memory_space<vmem>>, vector<1x32x128xf32>
    %86 = vector.shape_cast %85 : vector<1x32x128xf32> to vector<32x128xf32>
    %cst_88 = arith.constant dense<0.000000e+00> : vector<32x128xf32>
    %87 = tpu.matmul %86, %69, %cst_88 {dimension_numbers = #tpu.dot_dimension_numbers<[1], [0], [0], [1], [0, 0, 1, 1], [], []>} : vector<32x128xf32>, vector<128x128xf32>, vector<32x128xf32> -> vector<32x128xf32>
    %c2_89 = arith.constant 2 : index
    %c0_90 = arith.constant 0 : index
    %c0_91 = arith.constant 0 : index
    %88 = vector.load %arg5[%c2_89, %c0_90, %c0_91] : memref<9x128x128xf32, #tpu.memory_space<vmem>>, vector<1x128x128xf32>
    %89 = vector.shape_cast %88 : vector<1x128x128xf32> to vector<128x128xf32>
    %cst_92 = arith.constant dense<0.000000e+00> : vector<32x128xf32>
    %90 = tpu.matmul %87, %89, %cst_92 {dimension_numbers = #tpu.dot_dimension_numbers<[1], [0], [0], [1], [0, 0, 1, 1], [], []>} : vector<32x128xf32>, vector<128x128xf32>, vector<32x128xf32> -> vector<32x128xf32>
    %91 = arith.addf %84, %90 : vector<32x128xf32>
    %c3_93 = arith.constant 3 : index
    %c0_94 = arith.constant 0 : index
    %c0_95 = arith.constant 0 : index
    %92 = vector.load %arg4[%c3_93, %c0_94, %c0_95] : memref<9x32x128xf32, #tpu.memory_space<vmem>>, vector<1x32x128xf32>
    %93 = vector.shape_cast %92 : vector<1x32x128xf32> to vector<32x128xf32>
    %cst_96 = arith.constant dense<0.000000e+00> : vector<32x128xf32>
    %94 = tpu.matmul %93, %69, %cst_96 {dimension_numbers = #tpu.dot_dimension_numbers<[1], [0], [0], [1], [0, 0, 1, 1], [], []>} : vector<32x128xf32>, vector<128x128xf32>, vector<32x128xf32> -> vector<32x128xf32>
    %c3_97 = arith.constant 3 : index
    %c0_98 = arith.constant 0 : index
    %c0_99 = arith.constant 0 : index
    %95 = vector.load %arg5[%c3_97, %c0_98, %c0_99] : memref<9x128x128xf32, #tpu.memory_space<vmem>>, vector<1x128x128xf32>
    %96 = vector.shape_cast %95 : vector<1x128x128xf32> to vector<128x128xf32>
    %cst_100 = arith.constant dense<0.000000e+00> : vector<32x128xf32>
    %97 = tpu.matmul %94, %96, %cst_100 {dimension_numbers = #tpu.dot_dimension_numbers<[1], [0], [0], [1], [0, 0, 1, 1], [], []>} : vector<32x128xf32>, vector<128x128xf32>, vector<32x128xf32> -> vector<32x128xf32>
    %98 = arith.addf %91, %97 : vector<32x128xf32>
    %c4_101 = arith.constant 4 : index
    %c0_102 = arith.constant 0 : index
    %c0_103 = arith.constant 0 : index
    %99 = vector.load %arg4[%c4_101, %c0_102, %c0_103] : memref<9x32x128xf32, #tpu.memory_space<vmem>>, vector<1x32x128xf32>
    %100 = vector.shape_cast %99 : vector<1x32x128xf32> to vector<32x128xf32>
    %cst_104 = arith.constant dense<0.000000e+00> : vector<32x128xf32>
    %101 = tpu.matmul %100, %69, %cst_104 {dimension_numbers = #tpu.dot_dimension_numbers<[1], [0], [0], [1], [0, 0, 1, 1], [], []>} : vector<32x128xf32>, vector<128x128xf32>, vector<32x128xf32> -> vector<32x128xf32>
    %c4_105 = arith.constant 4 : index
    %c0_106 = arith.constant 0 : index
    %c0_107 = arith.constant 0 : index
    %102 = vector.load %arg5[%c4_105, %c0_106, %c0_107] : memref<9x128x128xf32, #tpu.memory_space<vmem>>, vector<1x128x128xf32>
    %103 = vector.shape_cast %102 : vector<1x128x128xf32> to vector<128x128xf32>
    %cst_108 = arith.constant dense<0.000000e+00> : vector<32x128xf32>
    %104 = tpu.matmul %101, %103, %cst_108 {dimension_numbers = #tpu.dot_dimension_numbers<[1], [0], [0], [1], [0, 0, 1, 1], [], []>} : vector<32x128xf32>, vector<128x128xf32>, vector<32x128xf32> -> vector<32x128xf32>
    %105 = arith.addf %98, %104 : vector<32x128xf32>
    %c5_109 = arith.constant 5 : index
    %c0_110 = arith.constant 0 : index
    %c0_111 = arith.constant 0 : index
    %106 = vector.load %arg4[%c5_109, %c0_110, %c0_111] : memref<9x32x128xf32, #tpu.memory_space<vmem>>, vector<1x32x128xf32>
    %107 = vector.shape_cast %106 : vector<1x32x128xf32> to vector<32x128xf32>
    %cst_112 = arith.constant dense<0.000000e+00> : vector<32x128xf32>
    %108 = tpu.matmul %107, %69, %cst_112 {dimension_numbers = #tpu.dot_dimension_numbers<[1], [0], [0], [1], [0, 0, 1, 1], [], []>} : vector<32x128xf32>, vector<128x128xf32>, vector<32x128xf32> -> vector<32x128xf32>
    %c5_113 = arith.constant 5 : index
    %c0_114 = arith.constant 0 : index
    %c0_115 = arith.constant 0 : index
    %109 = vector.load %arg5[%c5_113, %c0_114, %c0_115] : memref<9x128x128xf32, #tpu.memory_space<vmem>>, vector<1x128x128xf32>
    %110 = vector.shape_cast %109 : vector<1x128x128xf32> to vector<128x128xf32>
    %cst_116 = arith.constant dense<0.000000e+00> : vector<32x128xf32>
    %111 = tpu.matmul %108, %110, %cst_116 {dimension_numbers = #tpu.dot_dimension_numbers<[1], [0], [0], [1], [0, 0, 1, 1], [], []>} : vector<32x128xf32>, vector<128x128xf32>, vector<32x128xf32> -> vector<32x128xf32>
    %112 = arith.addf %105, %111 : vector<32x128xf32>
    %c6_117 = arith.constant 6 : index
    %c0_118 = arith.constant 0 : index
    %c0_119 = arith.constant 0 : index
    %113 = vector.load %arg4[%c6_117, %c0_118, %c0_119] : memref<9x32x128xf32, #tpu.memory_space<vmem>>, vector<1x32x128xf32>
    %114 = vector.shape_cast %113 : vector<1x32x128xf32> to vector<32x128xf32>
    %cst_120 = arith.constant dense<0.000000e+00> : vector<32x128xf32>
    %115 = tpu.matmul %114, %69, %cst_120 {dimension_numbers = #tpu.dot_dimension_numbers<[1], [0], [0], [1], [0, 0, 1, 1], [], []>} : vector<32x128xf32>, vector<128x128xf32>, vector<32x128xf32> -> vector<32x128xf32>
    %c6_121 = arith.constant 6 : index
    %c0_122 = arith.constant 0 : index
    %c0_123 = arith.constant 0 : index
    %116 = vector.load %arg5[%c6_121, %c0_122, %c0_123] : memref<9x128x128xf32, #tpu.memory_space<vmem>>, vector<1x128x128xf32>
    %117 = vector.shape_cast %116 : vector<1x128x128xf32> to vector<128x128xf32>
    %cst_124 = arith.constant dense<0.000000e+00> : vector<32x128xf32>
    %118 = tpu.matmul %115, %117, %cst_124 {dimension_numbers = #tpu.dot_dimension_numbers<[1], [0], [0], [1], [0, 0, 1, 1], [], []>} : vector<32x128xf32>, vector<128x128xf32>, vector<32x128xf32> -> vector<32x128xf32>
    %119 = arith.addf %112, %118 : vector<32x128xf32>
    %c7_125 = arith.constant 7 : index
    %c0_126 = arith.constant 0 : index
    %c0_127 = arith.constant 0 : index
    %120 = vector.load %arg4[%c7_125, %c0_126, %c0_127] : memref<9x32x128xf32, #tpu.memory_space<vmem>>, vector<1x32x128xf32>
    %121 = vector.shape_cast %120 : vector<1x32x128xf32> to vector<32x128xf32>
    %cst_128 = arith.constant dense<0.000000e+00> : vector<32x128xf32>
    %122 = tpu.matmul %121, %69, %cst_128 {dimension_numbers = #tpu.dot_dimension_numbers<[1], [0], [0], [1], [0, 0, 1, 1], [], []>} : vector<32x128xf32>, vector<128x128xf32>, vector<32x128xf32> -> vector<32x128xf32>
    %c7_129 = arith.constant 7 : index
    %c0_130 = arith.constant 0 : index
    %c0_131 = arith.constant 0 : index
    %123 = vector.load %arg5[%c7_129, %c0_130, %c0_131] : memref<9x128x128xf32, #tpu.memory_space<vmem>>, vector<1x128x128xf32>
    %124 = vector.shape_cast %123 : vector<1x128x128xf32> to vector<128x128xf32>
    %cst_132 = arith.constant dense<0.000000e+00> : vector<32x128xf32>
    %125 = tpu.matmul %122, %124, %cst_132 {dimension_numbers = #tpu.dot_dimension_numbers<[1], [0], [0], [1], [0, 0, 1, 1], [], []>} : vector<32x128xf32>, vector<128x128xf32>, vector<32x128xf32> -> vector<32x128xf32>
    %126 = arith.addf %119, %125 : vector<32x128xf32>
    %c8_133 = arith.constant 8 : index
    %c0_134 = arith.constant 0 : index
    %c0_135 = arith.constant 0 : index
    %127 = vector.load %arg4[%c8_133, %c0_134, %c0_135] : memref<9x32x128xf32, #tpu.memory_space<vmem>>, vector<1x32x128xf32>
    %128 = vector.shape_cast %127 : vector<1x32x128xf32> to vector<32x128xf32>
    %cst_136 = arith.constant dense<0.000000e+00> : vector<32x128xf32>
    %129 = tpu.matmul %128, %69, %cst_136 {dimension_numbers = #tpu.dot_dimension_numbers<[1], [0], [0], [1], [0, 0, 1, 1], [], []>} : vector<32x128xf32>, vector<128x128xf32>, vector<32x128xf32> -> vector<32x128xf32>
    %c8_137 = arith.constant 8 : index
    %c0_138 = arith.constant 0 : index
    %c0_139 = arith.constant 0 : index
    %130 = vector.load %arg5[%c8_137, %c0_138, %c0_139] : memref<9x128x128xf32, #tpu.memory_space<vmem>>, vector<1x128x128xf32>
    %131 = vector.shape_cast %130 : vector<1x128x128xf32> to vector<128x128xf32>
    %cst_140 = arith.constant dense<0.000000e+00> : vector<32x128xf32>
    %132 = tpu.matmul %129, %131, %cst_140 {dimension_numbers = #tpu.dot_dimension_numbers<[1], [0], [0], [1], [0, 0, 1, 1], [], []>} : vector<32x128xf32>, vector<128x128xf32>, vector<32x128xf32> -> vector<32x128xf32>
    %133 = arith.addf %126, %132 : vector<32x128xf32>
    %c0_141 = arith.constant 0 : index
    %c0_142 = arith.constant 0 : index
    %134 = vector.load %arg6[%c0_141, %c0_142] : memref<1x128xf32, #tpu.memory_space<vmem>>, vector<1x128xf32>
    %135 = vector.broadcast %134 : vector<1x128xf32> to vector<32x128xf32>
    %136 = arith.addf %133, %135 : vector<32x128xf32>
    %cst_143 = arith.constant 0.000000e+00 : f32
    %137 = vector.broadcast %cst_143 : f32 to vector<32x128xf32>
    %138 = arith.maximumf %136, %137 : vector<32x128xf32>
    %cst_144 = arith.constant 0.000000e+00 : f32
    %139 = vector.broadcast %cst_144 : f32 to vector<8x128xf32>
    %c0_145 = arith.constant 0 : index
    %c0_146 = arith.constant 0 : index
    %c0_147 = arith.constant 0 : index
    %140 = vector.load %arg7[%c0_145, %c0_146, %c0_147] : memref<9x8x32xf32, #tpu.memory_space<vmem>>, vector<1x8x32xf32>
    %141 = vector.shape_cast %140 : vector<1x8x32xf32> to vector<8x32xf32>
    %cst_148 = arith.constant dense<0.000000e+00> : vector<8x128xf32>
    %142 = tpu.matmul %141, %138, %cst_148 {dimension_numbers = #tpu.dot_dimension_numbers<[1], [0], [0], [1], [0, 0, 1, 1], [], []>} : vector<8x32xf32>, vector<32x128xf32>, vector<8x128xf32> -> vector<8x128xf32>
    %c0_149 = arith.constant 0 : index
    %c0_150 = arith.constant 0 : index
    %c0_151 = arith.constant 0 : index
    %143 = vector.load %arg8[%c0_149, %c0_150, %c0_151] : memref<9x128x128xf32, #tpu.memory_space<vmem>>, vector<1x128x128xf32>
    %144 = vector.shape_cast %143 : vector<1x128x128xf32> to vector<128x128xf32>
    %cst_152 = arith.constant dense<0.000000e+00> : vector<8x128xf32>
    %145 = tpu.matmul %142, %144, %cst_152 {dimension_numbers = #tpu.dot_dimension_numbers<[1], [0], [0], [1], [0, 0, 1, 1], [], []>} : vector<8x128xf32>, vector<128x128xf32>, vector<8x128xf32> -> vector<8x128xf32>
    %146 = arith.addf %139, %145 : vector<8x128xf32>
    %c1_153 = arith.constant 1 : index
    %c0_154 = arith.constant 0 : index
    %c0_155 = arith.constant 0 : index
    %147 = vector.load %arg7[%c1_153, %c0_154, %c0_155] : memref<9x8x32xf32, #tpu.memory_space<vmem>>, vector<1x8x32xf32>
    %148 = vector.shape_cast %147 : vector<1x8x32xf32> to vector<8x32xf32>
    %cst_156 = arith.constant dense<0.000000e+00> : vector<8x128xf32>
    %149 = tpu.matmul %148, %138, %cst_156 {dimension_numbers = #tpu.dot_dimension_numbers<[1], [0], [0], [1], [0, 0, 1, 1], [], []>} : vector<8x32xf32>, vector<32x128xf32>, vector<8x128xf32> -> vector<8x128xf32>
    %c1_157 = arith.constant 1 : index
    %c0_158 = arith.constant 0 : index
    %c0_159 = arith.constant 0 : index
    %150 = vector.load %arg8[%c1_157, %c0_158, %c0_159] : memref<9x128x128xf32, #tpu.memory_space<vmem>>, vector<1x128x128xf32>
    %151 = vector.shape_cast %150 : vector<1x128x128xf32> to vector<128x128xf32>
    %cst_160 = arith.constant dense<0.000000e+00> : vector<8x128xf32>
    %152 = tpu.matmul %149, %151, %cst_160 {dimension_numbers = #tpu.dot_dimension_numbers<[1], [0], [0], [1], [0, 0, 1, 1], [], []>} : vector<8x128xf32>, vector<128x128xf32>, vector<8x128xf32> -> vector<8x128xf32>
    %153 = arith.addf %146, %152 : vector<8x128xf32>
    %c2_161 = arith.constant 2 : index
    %c0_162 = arith.constant 0 : index
    %c0_163 = arith.constant 0 : index
    %154 = vector.load %arg7[%c2_161, %c0_162, %c0_163] : memref<9x8x32xf32, #tpu.memory_space<vmem>>, vector<1x8x32xf32>
    %155 = vector.shape_cast %154 : vector<1x8x32xf32> to vector<8x32xf32>
    %cst_164 = arith.constant dense<0.000000e+00> : vector<8x128xf32>
    %156 = tpu.matmul %155, %138, %cst_164 {dimension_numbers = #tpu.dot_dimension_numbers<[1], [0], [0], [1], [0, 0, 1, 1], [], []>} : vector<8x32xf32>, vector<32x128xf32>, vector<8x128xf32> -> vector<8x128xf32>
    %c2_165 = arith.constant 2 : index
    %c0_166 = arith.constant 0 : index
    %c0_167 = arith.constant 0 : index
    %157 = vector.load %arg8[%c2_165, %c0_166, %c0_167] : memref<9x128x128xf32, #tpu.memory_space<vmem>>, vector<1x128x128xf32>
    %158 = vector.shape_cast %157 : vector<1x128x128xf32> to vector<128x128xf32>
    %cst_168 = arith.constant dense<0.000000e+00> : vector<8x128xf32>
    %159 = tpu.matmul %156, %158, %cst_168 {dimension_numbers = #tpu.dot_dimension_numbers<[1], [0], [0], [1], [0, 0, 1, 1], [], []>} : vector<8x128xf32>, vector<128x128xf32>, vector<8x128xf32> -> vector<8x128xf32>
    %160 = arith.addf %153, %159 : vector<8x128xf32>
    %c3_169 = arith.constant 3 : index
    %c0_170 = arith.constant 0 : index
    %c0_171 = arith.constant 0 : index
    %161 = vector.load %arg7[%c3_169, %c0_170, %c0_171] : memref<9x8x32xf32, #tpu.memory_space<vmem>>, vector<1x8x32xf32>
    %162 = vector.shape_cast %161 : vector<1x8x32xf32> to vector<8x32xf32>
    %cst_172 = arith.constant dense<0.000000e+00> : vector<8x128xf32>
    %163 = tpu.matmul %162, %138, %cst_172 {dimension_numbers = #tpu.dot_dimension_numbers<[1], [0], [0], [1], [0, 0, 1, 1], [], []>} : vector<8x32xf32>, vector<32x128xf32>, vector<8x128xf32> -> vector<8x128xf32>
    %c3_173 = arith.constant 3 : index
    %c0_174 = arith.constant 0 : index
    %c0_175 = arith.constant 0 : index
    %164 = vector.load %arg8[%c3_173, %c0_174, %c0_175] : memref<9x128x128xf32, #tpu.memory_space<vmem>>, vector<1x128x128xf32>
    %165 = vector.shape_cast %164 : vector<1x128x128xf32> to vector<128x128xf32>
    %cst_176 = arith.constant dense<0.000000e+00> : vector<8x128xf32>
    %166 = tpu.matmul %163, %165, %cst_176 {dimension_numbers = #tpu.dot_dimension_numbers<[1], [0], [0], [1], [0, 0, 1, 1], [], []>} : vector<8x128xf32>, vector<128x128xf32>, vector<8x128xf32> -> vector<8x128xf32>
    %167 = arith.addf %160, %166 : vector<8x128xf32>
    %c4_177 = arith.constant 4 : index
    %c0_178 = arith.constant 0 : index
    %c0_179 = arith.constant 0 : index
    %168 = vector.load %arg7[%c4_177, %c0_178, %c0_179] : memref<9x8x32xf32, #tpu.memory_space<vmem>>, vector<1x8x32xf32>
    %169 = vector.shape_cast %168 : vector<1x8x32xf32> to vector<8x32xf32>
    %cst_180 = arith.constant dense<0.000000e+00> : vector<8x128xf32>
    %170 = tpu.matmul %169, %138, %cst_180 {dimension_numbers = #tpu.dot_dimension_numbers<[1], [0], [0], [1], [0, 0, 1, 1], [], []>} : vector<8x32xf32>, vector<32x128xf32>, vector<8x128xf32> -> vector<8x128xf32>
    %c4_181 = arith.constant 4 : index
    %c0_182 = arith.constant 0 : index
    %c0_183 = arith.constant 0 : index
    %171 = vector.load %arg8[%c4_181, %c0_182, %c0_183] : memref<9x128x128xf32, #tpu.memory_space<vmem>>, vector<1x128x128xf32>
    %172 = vector.shape_cast %171 : vector<1x128x128xf32> to vector<128x128xf32>
    %cst_184 = arith.constant dense<0.000000e+00> : vector<8x128xf32>
    %173 = tpu.matmul %170, %172, %cst_184 {dimension_numbers = #tpu.dot_dimension_numbers<[1], [0], [0], [1], [0, 0, 1, 1], [], []>} : vector<8x128xf32>, vector<128x128xf32>, vector<8x128xf32> -> vector<8x128xf32>
    %174 = arith.addf %167, %173 : vector<8x128xf32>
    %c5_185 = arith.constant 5 : index
    %c0_186 = arith.constant 0 : index
    %c0_187 = arith.constant 0 : index
    %175 = vector.load %arg7[%c5_185, %c0_186, %c0_187] : memref<9x8x32xf32, #tpu.memory_space<vmem>>, vector<1x8x32xf32>
    %176 = vector.shape_cast %175 : vector<1x8x32xf32> to vector<8x32xf32>
    %cst_188 = arith.constant dense<0.000000e+00> : vector<8x128xf32>
    %177 = tpu.matmul %176, %138, %cst_188 {dimension_numbers = #tpu.dot_dimension_numbers<[1], [0], [0], [1], [0, 0, 1, 1], [], []>} : vector<8x32xf32>, vector<32x128xf32>, vector<8x128xf32> -> vector<8x128xf32>
    %c5_189 = arith.constant 5 : index
    %c0_190 = arith.constant 0 : index
    %c0_191 = arith.constant 0 : index
    %178 = vector.load %arg8[%c5_189, %c0_190, %c0_191] : memref<9x128x128xf32, #tpu.memory_space<vmem>>, vector<1x128x128xf32>
    %179 = vector.shape_cast %178 : vector<1x128x128xf32> to vector<128x128xf32>
    %cst_192 = arith.constant dense<0.000000e+00> : vector<8x128xf32>
    %180 = tpu.matmul %177, %179, %cst_192 {dimension_numbers = #tpu.dot_dimension_numbers<[1], [0], [0], [1], [0, 0, 1, 1], [], []>} : vector<8x128xf32>, vector<128x128xf32>, vector<8x128xf32> -> vector<8x128xf32>
    %181 = arith.addf %174, %180 : vector<8x128xf32>
    %c6_193 = arith.constant 6 : index
    %c0_194 = arith.constant 0 : index
    %c0_195 = arith.constant 0 : index
    %182 = vector.load %arg7[%c6_193, %c0_194, %c0_195] : memref<9x8x32xf32, #tpu.memory_space<vmem>>, vector<1x8x32xf32>
    %183 = vector.shape_cast %182 : vector<1x8x32xf32> to vector<8x32xf32>
    %cst_196 = arith.constant dense<0.000000e+00> : vector<8x128xf32>
    %184 = tpu.matmul %183, %138, %cst_196 {dimension_numbers = #tpu.dot_dimension_numbers<[1], [0], [0], [1], [0, 0, 1, 1], [], []>} : vector<8x32xf32>, vector<32x128xf32>, vector<8x128xf32> -> vector<8x128xf32>
    %c6_197 = arith.constant 6 : index
    %c0_198 = arith.constant 0 : index
    %c0_199 = arith.constant 0 : index
    %185 = vector.load %arg8[%c6_197, %c0_198, %c0_199] : memref<9x128x128xf32, #tpu.memory_space<vmem>>, vector<1x128x128xf32>
    %186 = vector.shape_cast %185 : vector<1x128x128xf32> to vector<128x128xf32>
    %cst_200 = arith.constant dense<0.000000e+00> : vector<8x128xf32>
    %187 = tpu.matmul %184, %186, %cst_200 {dimension_numbers = #tpu.dot_dimension_numbers<[1], [0], [0], [1], [0, 0, 1, 1], [], []>} : vector<8x128xf32>, vector<128x128xf32>, vector<8x128xf32> -> vector<8x128xf32>
    %188 = arith.addf %181, %187 : vector<8x128xf32>
    %c7_201 = arith.constant 7 : index
    %c0_202 = arith.constant 0 : index
    %c0_203 = arith.constant 0 : index
    %189 = vector.load %arg7[%c7_201, %c0_202, %c0_203] : memref<9x8x32xf32, #tpu.memory_space<vmem>>, vector<1x8x32xf32>
    %190 = vector.shape_cast %189 : vector<1x8x32xf32> to vector<8x32xf32>
    %cst_204 = arith.constant dense<0.000000e+00> : vector<8x128xf32>
    %191 = tpu.matmul %190, %138, %cst_204 {dimension_numbers = #tpu.dot_dimension_numbers<[1], [0], [0], [1], [0, 0, 1, 1], [], []>} : vector<8x32xf32>, vector<32x128xf32>, vector<8x128xf32> -> vector<8x128xf32>
    %c7_205 = arith.constant 7 : index
    %c0_206 = arith.constant 0 : index
    %c0_207 = arith.constant 0 : index
    %192 = vector.load %arg8[%c7_205, %c0_206, %c0_207] : memref<9x128x128xf32, #tpu.memory_space<vmem>>, vector<1x128x128xf32>
    %193 = vector.shape_cast %192 : vector<1x128x128xf32> to vector<128x128xf32>
    %cst_208 = arith.constant dense<0.000000e+00> : vector<8x128xf32>
    %194 = tpu.matmul %191, %193, %cst_208 {dimension_numbers = #tpu.dot_dimension_numbers<[1], [0], [0], [1], [0, 0, 1, 1], [], []>} : vector<8x128xf32>, vector<128x128xf32>, vector<8x128xf32> -> vector<8x128xf32>
    %195 = arith.addf %188, %194 : vector<8x128xf32>
    %c8_209 = arith.constant 8 : index
    %c0_210 = arith.constant 0 : index
    %c0_211 = arith.constant 0 : index
    %196 = vector.load %arg7[%c8_209, %c0_210, %c0_211] : memref<9x8x32xf32, #tpu.memory_space<vmem>>, vector<1x8x32xf32>
    %197 = vector.shape_cast %196 : vector<1x8x32xf32> to vector<8x32xf32>
    %cst_212 = arith.constant dense<0.000000e+00> : vector<8x128xf32>
    %198 = tpu.matmul %197, %138, %cst_212 {dimension_numbers = #tpu.dot_dimension_numbers<[1], [0], [0], [1], [0, 0, 1, 1], [], []>} : vector<8x32xf32>, vector<32x128xf32>, vector<8x128xf32> -> vector<8x128xf32>
    %c8_213 = arith.constant 8 : index
    %c0_214 = arith.constant 0 : index
    %c0_215 = arith.constant 0 : index
    %199 = vector.load %arg8[%c8_213, %c0_214, %c0_215] : memref<9x128x128xf32, #tpu.memory_space<vmem>>, vector<1x128x128xf32>
    %200 = vector.shape_cast %199 : vector<1x128x128xf32> to vector<128x128xf32>
    %cst_216 = arith.constant dense<0.000000e+00> : vector<8x128xf32>
    %201 = tpu.matmul %198, %200, %cst_216 {dimension_numbers = #tpu.dot_dimension_numbers<[1], [0], [0], [1], [0, 0, 1, 1], [], []>} : vector<8x128xf32>, vector<128x128xf32>, vector<8x128xf32> -> vector<8x128xf32>
    %202 = arith.addf %195, %201 : vector<8x128xf32>
    %c0_217 = arith.constant 0 : index
    %c0_218 = arith.constant 0 : index
    %203 = vector.load %arg9[%c0_217, %c0_218] : memref<1x128xf32, #tpu.memory_space<vmem>>, vector<1x128xf32>
    %204 = vector.broadcast %203 : vector<1x128xf32> to vector<8x128xf32>
    %205 = arith.addf %202, %204 : vector<8x128xf32>
    %cst_219 = arith.constant 0.000000e+00 : f32
    %206 = vector.broadcast %cst_219 : f32 to vector<8x128xf32>
    %207 = arith.maximumf %205, %206 : vector<8x128xf32>
    %cst_220 = arith.constant 0.000000e+00 : f32
    %208 = vector.broadcast %cst_220 : f32 to vector<8x128xf32>
    %c0_221 = arith.constant 0 : index
    %c0_222 = arith.constant 0 : index
    %c0_223 = arith.constant 0 : index
    %209 = vector.load %arg10[%c0_221, %c0_222, %c0_223] : memref<9x8x8xf32, #tpu.memory_space<vmem>>, vector<1x8x8xf32>
    %210 = vector.shape_cast %209 : vector<1x8x8xf32> to vector<8x8xf32>
    %cst_224 = arith.constant dense<0.000000e+00> : vector<8x128xf32>
    %211 = tpu.matmul %210, %207, %cst_224 {dimension_numbers = #tpu.dot_dimension_numbers<[1], [0], [0], [1], [0, 0, 1, 1], [], []>} : vector<8x8xf32>, vector<8x128xf32>, vector<8x128xf32> -> vector<8x128xf32>
    %c0_225 = arith.constant 0 : index
    %c0_226 = arith.constant 0 : index
    %c0_227 = arith.constant 0 : index
    %212 = vector.load %arg11[%c0_225, %c0_226, %c0_227] : memref<9x128x128xf32, #tpu.memory_space<vmem>>, vector<1x128x128xf32>
    %213 = vector.shape_cast %212 : vector<1x128x128xf32> to vector<128x128xf32>
    %cst_228 = arith.constant dense<0.000000e+00> : vector<8x128xf32>
    %214 = tpu.matmul %211, %213, %cst_228 {dimension_numbers = #tpu.dot_dimension_numbers<[1], [0], [0], [1], [0, 0, 1, 1], [], []>} : vector<8x128xf32>, vector<128x128xf32>, vector<8x128xf32> -> vector<8x128xf32>
    %215 = arith.addf %208, %214 : vector<8x128xf32>
    %c1_229 = arith.constant 1 : index
    %c0_230 = arith.constant 0 : index
    %c0_231 = arith.constant 0 : index
    %216 = vector.load %arg10[%c1_229, %c0_230, %c0_231] : memref<9x8x8xf32, #tpu.memory_space<vmem>>, vector<1x8x8xf32>
    %217 = vector.shape_cast %216 : vector<1x8x8xf32> to vector<8x8xf32>
    %cst_232 = arith.constant dense<0.000000e+00> : vector<8x128xf32>
    %218 = tpu.matmul %217, %207, %cst_232 {dimension_numbers = #tpu.dot_dimension_numbers<[1], [0], [0], [1], [0, 0, 1, 1], [], []>} : vector<8x8xf32>, vector<8x128xf32>, vector<8x128xf32> -> vector<8x128xf32>
    %c1_233 = arith.constant 1 : index
    %c0_234 = arith.constant 0 : index
    %c0_235 = arith.constant 0 : index
    %219 = vector.load %arg11[%c1_233, %c0_234, %c0_235] : memref<9x128x128xf32, #tpu.memory_space<vmem>>, vector<1x128x128xf32>
    %220 = vector.shape_cast %219 : vector<1x128x128xf32> to vector<128x128xf32>
    %cst_236 = arith.constant dense<0.000000e+00> : vector<8x128xf32>
    %221 = tpu.matmul %218, %220, %cst_236 {dimension_numbers = #tpu.dot_dimension_numbers<[1], [0], [0], [1], [0, 0, 1, 1], [], []>} : vector<8x128xf32>, vector<128x128xf32>, vector<8x128xf32> -> vector<8x128xf32>
    %222 = arith.addf %215, %221 : vector<8x128xf32>
    %c2_237 = arith.constant 2 : index
    %c0_238 = arith.constant 0 : index
    %c0_239 = arith.constant 0 : index
    %223 = vector.load %arg10[%c2_237, %c0_238, %c0_239] : memref<9x8x8xf32, #tpu.memory_space<vmem>>, vector<1x8x8xf32>
    %224 = vector.shape_cast %223 : vector<1x8x8xf32> to vector<8x8xf32>
    %cst_240 = arith.constant dense<0.000000e+00> : vector<8x128xf32>
    %225 = tpu.matmul %224, %207, %cst_240 {dimension_numbers = #tpu.dot_dimension_numbers<[1], [0], [0], [1], [0, 0, 1, 1], [], []>} : vector<8x8xf32>, vector<8x128xf32>, vector<8x128xf32> -> vector<8x128xf32>
    %c2_241 = arith.constant 2 : index
    %c0_242 = arith.constant 0 : index
    %c0_243 = arith.constant 0 : index
    %226 = vector.load %arg11[%c2_241, %c0_242, %c0_243] : memref<9x128x128xf32, #tpu.memory_space<vmem>>, vector<1x128x128xf32>
    %227 = vector.shape_cast %226 : vector<1x128x128xf32> to vector<128x128xf32>
    %cst_244 = arith.constant dense<0.000000e+00> : vector<8x128xf32>
    %228 = tpu.matmul %225, %227, %cst_244 {dimension_numbers = #tpu.dot_dimension_numbers<[1], [0], [0], [1], [0, 0, 1, 1], [], []>} : vector<8x128xf32>, vector<128x128xf32>, vector<8x128xf32> -> vector<8x128xf32>
    %229 = arith.addf %222, %228 : vector<8x128xf32>
    %c3_245 = arith.constant 3 : index
    %c0_246 = arith.constant 0 : index
    %c0_247 = arith.constant 0 : index
    %230 = vector.load %arg10[%c3_245, %c0_246, %c0_247] : memref<9x8x8xf32, #tpu.memory_space<vmem>>, vector<1x8x8xf32>
    %231 = vector.shape_cast %230 : vector<1x8x8xf32> to vector<8x8xf32>
    %cst_248 = arith.constant dense<0.000000e+00> : vector<8x128xf32>
    %232 = tpu.matmul %231, %207, %cst_248 {dimension_numbers = #tpu.dot_dimension_numbers<[1], [0], [0], [1], [0, 0, 1, 1], [], []>} : vector<8x8xf32>, vector<8x128xf32>, vector<8x128xf32> -> vector<8x128xf32>
    %c3_249 = arith.constant 3 : index
    %c0_250 = arith.constant 0 : index
    %c0_251 = arith.constant 0 : index
    %233 = vector.load %arg11[%c3_249, %c0_250, %c0_251] : memref<9x128x128xf32, #tpu.memory_space<vmem>>, vector<1x128x128xf32>
    %234 = vector.shape_cast %233 : vector<1x128x128xf32> to vector<128x128xf32>
    %cst_252 = arith.constant dense<0.000000e+00> : vector<8x128xf32>
    %235 = tpu.matmul %232, %234, %cst_252 {dimension_numbers = #tpu.dot_dimension_numbers<[1], [0], [0], [1], [0, 0, 1, 1], [], []>} : vector<8x128xf32>, vector<128x128xf32>, vector<8x128xf32> -> vector<8x128xf32>
    %236 = arith.addf %229, %235 : vector<8x128xf32>
    %c4_253 = arith.constant 4 : index
    %c0_254 = arith.constant 0 : index
    %c0_255 = arith.constant 0 : index
    %237 = vector.load %arg10[%c4_253, %c0_254, %c0_255] : memref<9x8x8xf32, #tpu.memory_space<vmem>>, vector<1x8x8xf32>
    %238 = vector.shape_cast %237 : vector<1x8x8xf32> to vector<8x8xf32>
    %cst_256 = arith.constant dense<0.000000e+00> : vector<8x128xf32>
    %239 = tpu.matmul %238, %207, %cst_256 {dimension_numbers = #tpu.dot_dimension_numbers<[1], [0], [0], [1], [0, 0, 1, 1], [], []>} : vector<8x8xf32>, vector<8x128xf32>, vector<8x128xf32> -> vector<8x128xf32>
    %c4_257 = arith.constant 4 : index
    %c0_258 = arith.constant 0 : index
    %c0_259 = arith.constant 0 : index
    %240 = vector.load %arg11[%c4_257, %c0_258, %c0_259] : memref<9x128x128xf32, #tpu.memory_space<vmem>>, vector<1x128x128xf32>
    %241 = vector.shape_cast %240 : vector<1x128x128xf32> to vector<128x128xf32>
    %cst_260 = arith.constant dense<0.000000e+00> : vector<8x128xf32>
    %242 = tpu.matmul %239, %241, %cst_260 {dimension_numbers = #tpu.dot_dimension_numbers<[1], [0], [0], [1], [0, 0, 1, 1], [], []>} : vector<8x128xf32>, vector<128x128xf32>, vector<8x128xf32> -> vector<8x128xf32>
    %243 = arith.addf %236, %242 : vector<8x128xf32>
    %c5_261 = arith.constant 5 : index
    %c0_262 = arith.constant 0 : index
    %c0_263 = arith.constant 0 : index
    %244 = vector.load %arg10[%c5_261, %c0_262, %c0_263] : memref<9x8x8xf32, #tpu.memory_space<vmem>>, vector<1x8x8xf32>
    %245 = vector.shape_cast %244 : vector<1x8x8xf32> to vector<8x8xf32>
    %cst_264 = arith.constant dense<0.000000e+00> : vector<8x128xf32>
    %246 = tpu.matmul %245, %207, %cst_264 {dimension_numbers = #tpu.dot_dimension_numbers<[1], [0], [0], [1], [0, 0, 1, 1], [], []>} : vector<8x8xf32>, vector<8x128xf32>, vector<8x128xf32> -> vector<8x128xf32>
    %c5_265 = arith.constant 5 : index
    %c0_266 = arith.constant 0 : index
    %c0_267 = arith.constant 0 : index
    %247 = vector.load %arg11[%c5_265, %c0_266, %c0_267] : memref<9x128x128xf32, #tpu.memory_space<vmem>>, vector<1x128x128xf32>
    %248 = vector.shape_cast %247 : vector<1x128x128xf32> to vector<128x128xf32>
    %cst_268 = arith.constant dense<0.000000e+00> : vector<8x128xf32>
    %249 = tpu.matmul %246, %248, %cst_268 {dimension_numbers = #tpu.dot_dimension_numbers<[1], [0], [0], [1], [0, 0, 1, 1], [], []>} : vector<8x128xf32>, vector<128x128xf32>, vector<8x128xf32> -> vector<8x128xf32>
    %250 = arith.addf %243, %249 : vector<8x128xf32>
    %c6_269 = arith.constant 6 : index
    %c0_270 = arith.constant 0 : index
    %c0_271 = arith.constant 0 : index
    %251 = vector.load %arg10[%c6_269, %c0_270, %c0_271] : memref<9x8x8xf32, #tpu.memory_space<vmem>>, vector<1x8x8xf32>
    %252 = vector.shape_cast %251 : vector<1x8x8xf32> to vector<8x8xf32>
    %cst_272 = arith.constant dense<0.000000e+00> : vector<8x128xf32>
    %253 = tpu.matmul %252, %207, %cst_272 {dimension_numbers = #tpu.dot_dimension_numbers<[1], [0], [0], [1], [0, 0, 1, 1], [], []>} : vector<8x8xf32>, vector<8x128xf32>, vector<8x128xf32> -> vector<8x128xf32>
    %c6_273 = arith.constant 6 : index
    %c0_274 = arith.constant 0 : index
    %c0_275 = arith.constant 0 : index
    %254 = vector.load %arg11[%c6_273, %c0_274, %c0_275] : memref<9x128x128xf32, #tpu.memory_space<vmem>>, vector<1x128x128xf32>
    %255 = vector.shape_cast %254 : vector<1x128x128xf32> to vector<128x128xf32>
    %cst_276 = arith.constant dense<0.000000e+00> : vector<8x128xf32>
    %256 = tpu.matmul %253, %255, %cst_276 {dimension_numbers = #tpu.dot_dimension_numbers<[1], [0], [0], [1], [0, 0, 1, 1], [], []>} : vector<8x128xf32>, vector<128x128xf32>, vector<8x128xf32> -> vector<8x128xf32>
    %257 = arith.addf %250, %256 : vector<8x128xf32>
    %c7_277 = arith.constant 7 : index
    %c0_278 = arith.constant 0 : index
    %c0_279 = arith.constant 0 : index
    %258 = vector.load %arg10[%c7_277, %c0_278, %c0_279] : memref<9x8x8xf32, #tpu.memory_space<vmem>>, vector<1x8x8xf32>
    %259 = vector.shape_cast %258 : vector<1x8x8xf32> to vector<8x8xf32>
    %cst_280 = arith.constant dense<0.000000e+00> : vector<8x128xf32>
    %260 = tpu.matmul %259, %207, %cst_280 {dimension_numbers = #tpu.dot_dimension_numbers<[1], [0], [0], [1], [0, 0, 1, 1], [], []>} : vector<8x8xf32>, vector<8x128xf32>, vector<8x128xf32> -> vector<8x128xf32>
    %c7_281 = arith.constant 7 : index
    %c0_282 = arith.constant 0 : index
    %c0_283 = arith.constant 0 : index
    %261 = vector.load %arg11[%c7_281, %c0_282, %c0_283] : memref<9x128x128xf32, #tpu.memory_space<vmem>>, vector<1x128x128xf32>
    %262 = vector.shape_cast %261 : vector<1x128x128xf32> to vector<128x128xf32>
    %cst_284 = arith.constant dense<0.000000e+00> : vector<8x128xf32>
    %263 = tpu.matmul %260, %262, %cst_284 {dimension_numbers = #tpu.dot_dimension_numbers<[1], [0], [0], [1], [0, 0, 1, 1], [], []>} : vector<8x128xf32>, vector<128x128xf32>, vector<8x128xf32> -> vector<8x128xf32>
    %264 = arith.addf %257, %263 : vector<8x128xf32>
    %c8_285 = arith.constant 8 : index
    %c0_286 = arith.constant 0 : index
    %c0_287 = arith.constant 0 : index
    %265 = vector.load %arg10[%c8_285, %c0_286, %c0_287] : memref<9x8x8xf32, #tpu.memory_space<vmem>>, vector<1x8x8xf32>
    %266 = vector.shape_cast %265 : vector<1x8x8xf32> to vector<8x8xf32>
    %cst_288 = arith.constant dense<0.000000e+00> : vector<8x128xf32>
    %267 = tpu.matmul %266, %207, %cst_288 {dimension_numbers = #tpu.dot_dimension_numbers<[1], [0], [0], [1], [0, 0, 1, 1], [], []>} : vector<8x8xf32>, vector<8x128xf32>, vector<8x128xf32> -> vector<8x128xf32>
    %c8_289 = arith.constant 8 : index
    %c0_290 = arith.constant 0 : index
    %c0_291 = arith.constant 0 : index
    %268 = vector.load %arg11[%c8_289, %c0_290, %c0_291] : memref<9x128x128xf32, #tpu.memory_space<vmem>>, vector<1x128x128xf32>
    %269 = vector.shape_cast %268 : vector<1x128x128xf32> to vector<128x128xf32>
    %cst_292 = arith.constant dense<0.000000e+00> : vector<8x128xf32>
    %270 = tpu.matmul %267, %269, %cst_292 {dimension_numbers = #tpu.dot_dimension_numbers<[1], [0], [0], [1], [0, 0, 1, 1], [], []>} : vector<8x128xf32>, vector<128x128xf32>, vector<8x128xf32> -> vector<8x128xf32>
    %271 = arith.addf %264, %270 : vector<8x128xf32>
    %c0_293 = arith.constant 0 : index
    %c0_294 = arith.constant 0 : index
    %272 = vector.load %arg12[%c0_293, %c0_294] : memref<1x128xf32, #tpu.memory_space<vmem>>, vector<1x128xf32>
    %273 = vector.broadcast %272 : vector<1x128xf32> to vector<8x128xf32>
    %274 = arith.addf %271, %273 : vector<8x128xf32>
    %cst_295 = arith.constant 0.000000e+00 : f32
    %275 = vector.broadcast %cst_295 : f32 to vector<8x128xf32>
    %276 = arith.maximumf %274, %275 : vector<8x128xf32>
    %c0_296 = arith.constant 0 : index
    %c0_297 = arith.constant 0 : index
    %277 = vector.load %arg13[%c0_296, %c0_297] : memref<128x128xf32, #tpu.memory_space<vmem>>, vector<128x128xf32>
    %cst_298 = arith.constant dense<0.000000e+00> : vector<8x128xf32>
    %278 = tpu.matmul %276, %277, %cst_298 {dimension_numbers = #tpu.dot_dimension_numbers<[1], [0], [0], [1], [0, 0, 1, 1], [], []>} : vector<8x128xf32>, vector<128x128xf32>, vector<8x128xf32> -> vector<8x128xf32>
    %c0_299 = arith.constant 0 : index
    %c0_300 = arith.constant 0 : index
    %279 = vector.load %arg14[%c0_299, %c0_300] : memref<1x128xf32, #tpu.memory_space<vmem>>, vector<1x128xf32>
    %280 = vector.broadcast %279 : vector<1x128xf32> to vector<8x128xf32>
    %281 = arith.addf %278, %280 : vector<8x128xf32>
    %cst_301 = arith.constant 0.000000e+00 : f32
    %282 = vector.broadcast %cst_301 : f32 to vector<8x128xf32>
    %283 = arith.maximumf %281, %282 : vector<8x128xf32>
    %c0_302 = arith.constant 0 : index
    %c0_303 = arith.constant 0 : index
    %284 = vector.load %arg15[%c0_302, %c0_303] : memref<128x128xf32, #tpu.memory_space<vmem>>, vector<128x128xf32>
    %cst_304 = arith.constant dense<0.000000e+00> : vector<8x128xf32>
    %285 = tpu.matmul %283, %284, %cst_304 {dimension_numbers = #tpu.dot_dimension_numbers<[1], [0], [0], [1], [0, 0, 1, 1], [], []>} : vector<8x128xf32>, vector<128x128xf32>, vector<8x128xf32> -> vector<8x128xf32>
    %c0_305 = arith.constant 0 : index
    %c0_306 = arith.constant 0 : index
    %286 = vector.load %arg16[%c0_305, %c0_306] : memref<1x128xf32, #tpu.memory_space<vmem>>, vector<1x128xf32>
    %287 = vector.broadcast %286 : vector<1x128xf32> to vector<8x128xf32>
    %288 = arith.addf %285, %287 : vector<8x128xf32>
    %cst_307 = arith.constant 0.000000e+00 : f32
    %289 = vector.broadcast %cst_307 : f32 to vector<8x128xf32>
    %290 = arith.maximumf %288, %289 : vector<8x128xf32>
    %c0_308 = arith.constant 0 : index
    %c0_309 = arith.constant 0 : index
    %291 = vector.load %arg17[%c0_308, %c0_309] : memref<128x128xf32, #tpu.memory_space<vmem>>, vector<128x128xf32>
    %cst_310 = arith.constant dense<0.000000e+00> : vector<8x128xf32>
    %292 = tpu.matmul %290, %291, %cst_310 {dimension_numbers = #tpu.dot_dimension_numbers<[1], [0], [0], [1], [0, 0, 1, 1], [], []>} : vector<8x128xf32>, vector<128x128xf32>, vector<8x128xf32> -> vector<8x128xf32>
    %c0_311 = arith.constant 0 : index
    %c0_312 = arith.constant 0 : index
    %293 = vector.load %arg18[%c0_311, %c0_312] : memref<1x128xf32, #tpu.memory_space<vmem>>, vector<1x128xf32>
    %294 = vector.broadcast %293 : vector<1x128xf32> to vector<8x128xf32>
    %295 = arith.addf %292, %294 : vector<8x128xf32>
    %cst_313 = arith.constant 0.000000e+00 : f32
    %296 = vector.broadcast %cst_313 : f32 to vector<8x128xf32>
    %297 = arith.maximumf %295, %296 : vector<8x128xf32>
    %c0_314 = arith.constant 0 : index
    %c0_315 = arith.constant 0 : index
    %298 = vector.load %arg19[%c0_314, %c0_315] : memref<128x128xf32, #tpu.memory_space<vmem>>, vector<128x128xf32>
    %cst_316 = arith.constant dense<0.000000e+00> : vector<8x128xf32>
    %299 = tpu.matmul %297, %298, %cst_316 {dimension_numbers = #tpu.dot_dimension_numbers<[1], [0], [0], [1], [0, 0, 1, 1], [], []>} : vector<8x128xf32>, vector<128x128xf32>, vector<8x128xf32> -> vector<8x128xf32>
    %c0_317 = arith.constant 0 : index
    %c0_318 = arith.constant 0 : index
    %300 = vector.load %arg20[%c0_317, %c0_318] : memref<1x128xf32, #tpu.memory_space<vmem>>, vector<1x128xf32>
    %301 = vector.broadcast %300 : vector<1x128xf32> to vector<8x128xf32>
    %302 = arith.addf %299, %301 : vector<8x128xf32>
    %c0_319 = arith.constant 0 : index
    %c0_320 = arith.constant 0 : index
    %303 = vector.load %arg21[%c0_319, %c0_320] : memref<8x128xf32, #tpu.memory_space<vmem>>, vector<8x128xf32>
    %304 = arith.addf %302, %303 : vector<8x128xf32>
    %cst_321 = arith.constant 1.000000e+00 : f32
    %305 = vector.broadcast %cst_321 : f32 to vector<8x128xf32>
    %306 = arith.mulf %304, %305 : vector<8x128xf32>
    %cst_322 = arith.constant dense<0xFF800000> : vector<8xf32>
    %307 = vector.multi_reduction <maximumf>, %306, %cst_322 [1] : vector<8x128xf32> to vector<8xf32>
    %308 = vector.shape_cast %307 : vector<8xf32> to vector<8x1xf32>
    %309 = vector.broadcast %308 : vector<8x1xf32> to vector<8x128xf32>
    %310 = arith.subf %306, %309 : vector<8x128xf32>
    %311 = math.exp %310 : vector<8x128xf32>
    %cst_323 = arith.constant dense<0.000000e+00> : vector<8xf32>
    %312 = vector.multi_reduction <add>, %311, %cst_323 [1] : vector<8x128xf32> to vector<8xf32>
    %313 = vector.shape_cast %312 : vector<8xf32> to vector<8x1xf32>
    %314 = tpu.reciprocal %313 {approx = true} : vector<8x1xf32> -> vector<8x1xf32>
    %315 = arith.mulf %313, %314 : vector<8x1xf32>
    %cst_324 = arith.constant 2.000000e+00 : f32
    %316 = vector.broadcast %cst_324 : f32 to vector<8x1xf32>
    %317 = arith.subf %316, %315 : vector<8x1xf32>
    %318 = arith.mulf %314, %317 : vector<8x1xf32>
    %319 = vector.broadcast %318 : vector<8x1xf32> to vector<8x128xf32>
    %320 = arith.mulf %311, %319 : vector<8x128xf32>
    %c0_325 = arith.constant 0 : index
    %c0_326 = arith.constant 0 : index
    %321 = vector.load %arg22[%c0_325, %c0_326] : memref<8x128xf32, #tpu.memory_space<vmem>>, vector<8x128xf32>
    tpu.vector_store %arg22[%c0_325, %c0_326], %320 {strides = array<i32>} : memref<8x128xf32, #tpu.memory_space<vmem>>, vector<8x128xf32>,
    return
  }
}

</mosaic_0001>

<bundles_post_ra>
// kernel: tpu_custom_call.1
= control target key start
LH: loop header
LB: loop body
LE: loop exit
PB: predicated region body
PF: predicated region fallthrough
CT: control target
= control target key end

     0   :  { %s19582_s0 = inlined_call_operand.hbm [shape: f32[512,128], index: 0, kind: input, shape index: {}]   ;;  %s19583_s1 = inlined_call_operand.hbm [shape: f32[9,128,512], index: 1, kind: input, shape index: {}]   ;;  %s19584_s2 = inlined_call_operand.hbm [shape: f32[9,128,128], index: 2, kind: input, shape index: {}]   ;;  %s19585_s3 = inlined_call_operand.hbm [shape: f32[1,128], index: 3, kind: input, shape index: {}]   ;;  %s19586_s4 = inlined_call_operand.hbm [shape: f32[9,32,128], index: 4, kind: input, shape index: {}]   ;;  %s19587_s5 = inlined_call_operand.hbm [shape: f32[9,128,128], index: 5, kind: input, shape index: {}]   ;;  %s19588_s6 = inlined_call_operand.hbm [shape: f32[1,128], index: 6, kind: input, shape index: {}]   ;;  %s19589_s7 = inlined_call_operand.hbm [shape: f32[9,8,32], index: 7, kind: input, shape index: {}]   ;;  %s19590_s8 = inlined_call_operand.hbm [shape: f32[9,128,128], index: 8, kind: input, shape index: {}]   ;;  %s19591_s9 = inlined_call_operand.hbm [shape: f32[1,128], index: 9, kind: input, shape index: {}]   ;;  %s19592_s10 = inlined_call_operand.vmem [shape: f32[9,8,8], index: 10, kind: input, shape index: {}]   ;;  %s19593_s11 = inlined_call_operand.hbm [shape: f32[9,128,128], index: 11, kind: input, shape index: {}]   ;;  %s19594_s12 = inlined_call_operand.hbm [shape: f32[1,128], index: 12, kind: input, shape index: {}]   ;;  %s19595_s13 = inlined_call_operand.hbm [shape: f32[128,128], index: 13, kind: input, shape index: {}]   ;;  %s19596_s14 = inlined_call_operand.hbm [shape: f32[1,128], index: 14, kind: input, shape index: {}]   ;;  %s19597_s15 = inlined_call_operand.hbm [shape: f32[128,128], index: 15, kind: input, shape index: {}]   ;;  %s19598_s16 = inlined_call_operand.hbm [shape: f32[1,128], index: 16, kind: input, shape index: {}]   ;;  %s19599_s17 = inlined_call_operand.hbm [shape: f32[128,128], index: 17, kind: input, shape index: {}]   ;;  %s19600_s18 = inlined_call_operand.hbm [shape: f32[1,128], index: 18, kind: input, shape index: {}]   ;;  %s19601_s19 = inlined_call_operand.hbm [shape: f32[128,128], index: 19, kind: input, shape index: {}]   ;;  %s19602_s20 = inlined_call_operand.hbm [shape: f32[1,128], index: 20, kind: input, shape index: {}]   ;;  %s19603_s21 = inlined_call_operand.hbm [shape: f32[8,128], index: 21, kind: input, shape index: {}]   ;;  %s19604_s22 = inlined_call_operand.hbm [shape: f32[8,128], index: 22, kind: output, shape index: {}]  }
   0x1   :  { %19663 = sst [smem:[#allocation73_spill]] %s19582_s0 }
   0x2   :  { %19664 = sst [smem:[#allocation74_spill]] %s19583_s1 }
   0x3   :  { %19665 = sst [smem:[#allocation75_spill]] %s19584_s2 }
   0x4   :  { %19666 = sst [smem:[#allocation76_spill]] %s19585_s3 }
   0x5   :  { %19667 = sst [smem:[#allocation77_spill]] %s19586_s4 }
   0x6   :  { %19668 = sst [smem:[#allocation78_spill]] %s19587_s5 }
   0x7   :  { %19669 = sst [smem:[#allocation79_spill]] %s19588_s6 }
   0x8   :  { %19670 = sst [smem:[#allocation80_spill]] %s19592_s10 }
   0x9   :  { %19671 = sst [smem:[#allocation81_spill]] %s19604_s22 }
   0xa   :  { %27 = vsyncpa [#allocation3], 0 }
   0xb   :  { %28 = vsyncpa [#allocation6], 0 }
   0xc   :  { %29 = vsyncpa [#allocation9], 0 }
   0xd   :  { %30 = vsyncpa [#allocation12], 0 }
   0xe   :  { %31 = vsyncpa [#allocation15], 0 }
   0xf   :  { %32 = vsyncpa [#allocation18], 0 }
  0x10   :  { %33 = vsyncpa [#allocation21], 0 }
  0x11   :  { %34 = vsyncpa [#allocation24], 0 }
  0x12   :  { %35 = vsyncpa [#allocation27], 0 }
  0x13   :  { %36 = vsyncpa [#allocation30], 0 }
  0x14   :  { %37 = vsyncpa [#allocation33], 0 }
  0x15   :  { %38 = vsyncpa [#allocation4], 0  ;;  %s17718_s3 = smov [#allocation5]   ;;  %s19672_s4 = sld [smem:[#allocation74_spill]] }
  0x16   :  { %s56_s28 = sshll.u32 %s17718_s3, 4  ;;  %s57_s28 = int_to_ptr.vmem [resolvable:$true] %s56_s28 }
  0x1b   :  { %s17210_s0 = scalar_lea.hbm %s19672_s4, 73728 }
  0x1c   :  { %p17211_p0 = scmp.ne.s32.totalorder %s19672_s4, %s17210_s0  ;;  %p17214_p1 = scmp.lt.u32.totalorder %s17210_s0, %s19672_s4 }
  0x1e   :  { %p17216_p2 = pnand %p17214_p1, %p17211_p0 }
  0x20   :  { %17219 = shalt.err (!%p17216_p2)
}
  0x21   :  { %s17220_s6 = scalar_lea.vmem %s57_s28, 73728  ;;  %p17225_p4 = scmp.lt.s32.totalorder %s57_s28, %s57_s28 }
  0x22   :  { %p17221_p3 = scmp.ne.s32.totalorder %s57_s28, %s17220_s6  ;;  %p17226_p5 = scmp.lt.s32.totalorder %s17220_s6, %s17220_s6 }
  0x24   :  { %p17227_p6 = por %p17226_p5, %p17225_p4 }
  0x26   :  { %p17228_p7 = pnand %p17227_p6, %p17221_p3 }
  0x28   :  { %17231 = shalt.err (!%p17228_p7)
}
  0x29   :  { %s17719_s25 = smov 512   ;;  %s17720_s26 = smov 32  }
  0x2a   :  { %62 = dma.hbm_to_vmem [thread:$0]  %s19672_s4, 73728, %s57_s28, [#allocation6], %s17719_s25, %s17719_s25, %s17720_s26  }
  0x2b   :  { %s17721_s3 = smov [#allocation8]   ;;  %s19673_s23 = sld [smem:[#allocation76_spill]] }
  0x2c   :  { %s81_s29 = sshll.u32 %s17721_s3, 4  ;;  %s82_s29 = int_to_ptr.vmem [resolvable:$true] %s81_s29 }
  0x31   :  { %s17232_s1 = scalar_lea.hbm %s19673_s23, 16 }
  0x32   :  { %p17233_p8 = scmp.ne.s32.totalorder %s19673_s23, %s17232_s1  ;;  %p17236_p9 = scmp.lt.u32.totalorder %s17232_s1, %s19673_s23 }
  0x34   :  { %p17238_p10 = pnand %p17236_p9, %p17233_p8 }
  0x36   :  { %17241 = shalt.err (!%p17238_p10)
}
  0x37   :  { %s17242_s10 = scalar_lea.vmem %s82_s29, 16  ;;  %s17246_s28 = scalar_lea.vmem %s82_s29, 32 }
  0x38   :  { %p17243_p11 = scmp.ne.s32.totalorder %s82_s29, %s17242_s10  ;;  %p17247_p12 = scmp.lt.s32.totalorder %s82_s29, %s82_s29 }
  0x39   :  { %p17248_p13 = scmp.lt.s32.totalorder %s17246_s28, %s17242_s10 }
  0x3b   :  { %p17249_p0 = por %p17248_p13, %p17247_p12 }
  0x3d   :  { %p17250_p1 = pnand %p17249_p0, %p17243_p11 }
  0x3f   :  { %17253 = shalt.err (!%p17250_p1)
}
  0x40   :  { %84 = dma.hbm_to_vmem [thread:$0]  %s19673_s23, 16, %s82_s29, [#allocation9]  }
  0x41   :  { %s17722_s26 = smov [#allocation11]   ;;  %s17723_s27 = smov [#allocation14]  }
  0x42   :  { %s102_s2 = sshll.u32 %s17722_s26, 4  ;;  %s124_s3 = sshll.u32 %s17723_s27, 4  ;;  %s103_s2 = int_to_ptr.vmem [resolvable:$true] %s102_s2  ;;  %s17886_s3 = int_to_ptr.vmem [resolvable:$true] %s124_s3 }
  0x43   :  { %s19674_s0 = sld [smem:[#allocation78_spill]] }
  0x49   :  { %s17254_s1 = scalar_lea.hbm %s19674_s0, 18432 }
  0x4a   :  { %p17255_p2 = scmp.ne.s32.totalorder %s19674_s0, %s17254_s1  ;;  %p17258_p3 = scmp.lt.u32.totalorder %s17254_s1, %s19674_s0 }
  0x4c   :  { %p17260_p4 = pnand %p17258_p3, %p17255_p2 }
  0x4e   :  { %17263 = shalt.err (!%p17260_p4)
}
  0x4f   :  { %s17264_s29 = scalar_lea.vmem %s103_s2, 18432  ;;  %p17269_p6 = scmp.lt.s32.totalorder %s103_s2, %s103_s2 }
  0x50   :  { %p17265_p5 = scmp.ne.s32.totalorder %s103_s2, %s17264_s29  ;;  %p17270_p7 = scmp.lt.s32.totalorder %s17264_s29, %s17264_s29 }
  0x52   :  { %p17271_p8 = por %p17270_p7, %p17269_p6 }
  0x54   :  { %p17272_p9 = pnand %p17271_p8, %p17265_p5 }
  0x56   :  { %17275 = shalt.err (!%p17272_p9)
}
  0x57   :  { %s17724_s23 = smov 128   ;;  %s17725_s28 = smov 8  }
  0x58   :  { %108 = dma.hbm_to_vmem [thread:$0]  %s19674_s0, 18432, %s103_s2, [#allocation12], %s17724_s23, %s17724_s23, %s17725_s28  }
  0x59   :  { %s17276_s22 = scalar_lea.hbm %s19589_s7, 1152 }
  0x5a   :  { %p17277_p10 = scmp.ne.s32.totalorder %s19589_s7, %s17276_s22  ;;  %p17280_p11 = scmp.lt.u32.totalorder %s17276_s22, %s19589_s7 }
  0x5c   :  { %p17282_p12 = pnand %p17280_p11, %p17277_p10 }
  0x5e   :  { %17285 = shalt.err (!%p17282_p12)
}
  0x5f   :  { %s17286_s24 = scalar_lea.vmem %s17886_s3, 1152  ;;  %p17291_p0 = scmp.lt.s32.totalorder %s17886_s3, %s17886_s3 }
  0x60   :  { %p17287_p13 = scmp.ne.s32.totalorder %s17886_s3, %s17286_s24  ;;  %p17292_p1 = scmp.lt.s32.totalorder %s17286_s24, %s17286_s24 }
  0x62   :  { %p17293_p2 = por %p17292_p1, %p17291_p0 }
  0x64   :  { %p17294_p3 = pnand %p17293_p2, %p17287_p13 }
  0x66   :  { %17297 = shalt.err (!%p17294_p3)
}
  0x67   :  { %130 = dma.hbm_to_vmem [thread:$0]  %s19589_s7, 1152, %s17886_s3, [#allocation15], %s17724_s23, %s17724_s23, %s17725_s28  }
  0x68   :  { %s17726_s6 = smov [#allocation17]   ;;  %s17727_s4 = smov [#allocation20]  }
  0x69   :  { %s149_s29 = sshll.u32 %s17726_s6, 4  ;;  %s173_s25 = sshll.u32 %s17727_s4, 4  ;;  %s150_s29 = int_to_ptr.vmem [resolvable:$true] %s149_s29  ;;  %s174_s25 = int_to_ptr.vmem [resolvable:$true] %s173_s25 }
  0x6a   :  { %s17298_s22 = scalar_lea.hbm %s19591_s9, 16 }
  0x6b   :  { %p17299_p4 = scmp.ne.s32.totalorder %s19591_s9, %s17298_s22  ;;  %p17302_p5 = scmp.lt.u32.totalorder %s17298_s22, %s19591_s9 }
  0x6d   :  { %p17304_p6 = pnand %p17302_p5, %p17299_p4 }
  0x6f   :  { %17307 = shalt.err (!%p17304_p6)
}
  0x70   :  { %s17308_s7 = scalar_lea.vmem %s150_s29, 16  ;;  %s17312_s3 = scalar_lea.vmem %s150_s29, 32 }
  0x71   :  { %p17309_p7 = scmp.ne.s32.totalorder %s150_s29, %s17308_s7  ;;  %p17313_p8 = scmp.lt.s32.totalorder %s150_s29, %s150_s29 }
  0x72   :  { %p17314_p9 = scmp.lt.s32.totalorder %s17312_s3, %s17308_s7 }
  0x74   :  { %p17315_p10 = por %p17314_p9, %p17313_p8 }
  0x76   :  { %p17316_p11 = pnand %p17315_p10, %p17309_p7 }
  0x78   :  { %17319 = shalt.err (!%p17316_p11)
}
  0x79   :  { %152 = dma.hbm_to_vmem [thread:$0]  %s19591_s9, 16, %s150_s29, [#allocation18]  }
  0x7a   :  { %s17320_s4 = scalar_lea.hbm %s19594_s12, 16 }
  0x7b   :  { %p17321_p12 = scmp.ne.s32.totalorder %s19594_s12, %s17320_s4  ;;  %p17324_p13 = scmp.lt.u32.totalorder %s17320_s4, %s19594_s12 }
  0x7d   :  { %p17326_p0 = pnand %p17324_p13, %p17321_p12 }
  0x7f   :  { %17329 = shalt.err (!%p17326_p0)
}
  0x80   :  { %s17330_s1 = scalar_lea.vmem %s174_s25, 16  ;;  %s17334_s5 = scalar_lea.vmem %s174_s25, 32 }
  0x81   :  { %p17331_p1 = scmp.ne.s32.totalorder %s174_s25, %s17330_s1  ;;  %p17335_p2 = scmp.lt.s32.totalorder %s174_s25, %s174_s25 }
  0x82   :  { %p17336_p3 = scmp.lt.s32.totalorder %s17334_s5, %s17330_s1 }
  0x84   :  { %p17337_p4 = por %p17336_p3, %p17335_p2 }
  0x86   :  { %p17338_p5 = pnand %p17337_p4, %p17331_p1 }
  0x88   :  { %17341 = shalt.err (!%p17338_p5)
}
  0x89   :  { %176 = dma.hbm_to_vmem [thread:$0]  %s19594_s12, 16, %s174_s25, [#allocation21]  }
  0x8a   :  { %s17728_s10 = smov [#allocation23]   ;;  %s17729_s3 = smov [#allocation26]  }
  0x8b   :  { %s195_s7 = sshll.u32 %s17728_s10, 4  ;;  %s217_s24 = sshll.u32 %s17729_s3, 4  ;;  %s196_s7 = int_to_ptr.vmem [resolvable:$true] %s195_s7  ;;  %s218_s24 = int_to_ptr.vmem [resolvable:$true] %s217_s24 }
  0x8c   :  { %s17342_s6 = scalar_lea.hbm %s19596_s14, 16 }
  0x8d   :  { %p17343_p6 = scmp.ne.s32.totalorder %s19596_s14, %s17342_s6  ;;  %p17346_p7 = scmp.lt.u32.totalorder %s17342_s6, %s19596_s14 }
  0x8f   :  { %p17348_p8 = pnand %p17346_p7, %p17343_p6 }
  0x91   :  { %17351 = shalt.err (!%p17348_p8)
}
  0x92   :  { %s17352_s12 = scalar_lea.vmem %s196_s7, 16  ;;  %s17356_s25 = scalar_lea.vmem %s196_s7, 32 }
  0x93   :  { %p17353_p9 = scmp.ne.s32.totalorder %s196_s7, %s17352_s12  ;;  %p17357_p10 = scmp.lt.s32.totalorder %s196_s7, %s196_s7 }
  0x94   :  { %p17358_p11 = scmp.lt.s32.totalorder %s17356_s25, %s17352_s12 }
  0x96   :  { %p17359_p12 = por %p17358_p11, %p17357_p10 }
  0x98   :  { %p17360_p13 = pnand %p17359_p12, %p17353_p9 }
  0x9a   :  { %17363 = shalt.err (!%p17360_p13)
}
  0x9b   :  { %198 = dma.hbm_to_vmem [thread:$0]  %s19596_s14, 16, %s196_s7, [#allocation24]  }
  0x9c   :  { %s17364_s29 = scalar_lea.hbm %s19598_s16, 16 }
  0x9d   :  { %p17365_p0 = scmp.ne.s32.totalorder %s19598_s16, %s17364_s29  ;;  %p17368_p1 = scmp.lt.u32.totalorder %s17364_s29, %s19598_s16 }
  0x9f   :  { %p17370_p2 = pnand %p17368_p1, %p17365_p0 }
  0xa1   :  { %17373 = shalt.err (!%p17370_p2)
}
  0xa2   :  { %s17374_s6 = scalar_lea.vmem %s218_s24, 16  ;;  %s17378_s4 = scalar_lea.vmem %s218_s24, 32 }
  0xa3   :  { %p17375_p3 = scmp.ne.s32.totalorder %s218_s24, %s17374_s6  ;;  %p17379_p4 = scmp.lt.s32.totalorder %s218_s24, %s218_s24 }
  0xa4   :  { %p17380_p5 = scmp.lt.s32.totalorder %s17378_s4, %s17374_s6 }
  0xa6   :  { %p17381_p6 = por %p17380_p5, %p17379_p4 }
  0xa8   :  { %p17382_p7 = pnand %p17381_p6, %p17375_p3 }
  0xaa   :  { %17385 = shalt.err (!%p17382_p7)
}
  0xab   :  { %220 = dma.hbm_to_vmem [thread:$0]  %s19598_s16, 16, %s218_s24, [#allocation27]  }
  0xac   :  { %s17730_s26 = smov [#allocation29]   ;;  %s17731_s22 = smov [#allocation32]  }
  0xad   :  { %s239_s27 = sshll.u32 %s17730_s26, 4  ;;  %s261_s12 = sshll.u32 %s17731_s22, 4  ;;  %s240_s27 = int_to_ptr.vmem [resolvable:$true] %s239_s27  ;;  %s262_s12 = int_to_ptr.vmem [resolvable:$true] %s261_s12 }
  0xae   :  { %s17386_s1 = scalar_lea.hbm %s19600_s18, 16 }
  0xaf   :  { %p17387_p8 = scmp.ne.s32.totalorder %s19600_s18, %s17386_s1  ;;  %p17390_p9 = scmp.lt.u32.totalorder %s17386_s1, %s19600_s18 }
  0xb1   :  { %p17392_p10 = pnand %p17390_p9, %p17387_p8 }
  0xb3   :  { %17395 = shalt.err (!%p17392_p10)
}
  0xb4   :  { %s17396_s16 = scalar_lea.vmem %s240_s27, 16  ;;  %s17400_s24 = scalar_lea.vmem %s240_s27, 32 }
  0xb5   :  { %p17397_p11 = scmp.ne.s32.totalorder %s240_s27, %s17396_s16  ;;  %p17401_p12 = scmp.lt.s32.totalorder %s240_s27, %s240_s27 }
  0xb6   :  { %p17402_p13 = scmp.lt.s32.totalorder %s17400_s24, %s17396_s16 }
  0xb8   :  { %p17403_p0 = por %p17402_p13, %p17401_p12 }
  0xba   :  { %p17404_p1 = pnand %p17403_p0, %p17397_p11 }
  0xbc   :  { %17407 = shalt.err (!%p17404_p1)
}
  0xbd   :  { %242 = dma.hbm_to_vmem [thread:$0]  %s19600_s18, 16, %s240_s27, [#allocation30]  }
  0xbe   :  { %s17408_s4 = scalar_lea.hbm %s19602_s20, 16 }
  0xbf   :  { %p17409_p2 = scmp.ne.s32.totalorder %s19602_s20, %s17408_s4  ;;  %p17412_p3 = scmp.lt.u32.totalorder %s17408_s4, %s19602_s20 }
  0xc1   :  { %p17414_p4 = pnand %p17412_p3, %p17409_p2 }
  0xc3   :  { %17417 = shalt.err (!%p17414_p4)
}
  0xc4   :  { %s17418_s25 = scalar_lea.vmem %s262_s12, 16  ;;  %s17422_s30 = scalar_lea.vmem %s262_s12, 32 }
  0xc5   :  { %p17419_p5 = scmp.ne.s32.totalorder %s262_s12, %s17418_s25  ;;  %p17423_p6 = scmp.lt.s32.totalorder %s262_s12, %s262_s12 }
  0xc6   :  { %p17424_p7 = scmp.lt.s32.totalorder %s17422_s30, %s17418_s25 }
  0xc8   :  { %p17425_p8 = por %p17424_p7, %p17423_p6 }
  0xca   :  { %p17426_p9 = pnand %p17425_p8, %p17419_p5 }
  0xcc   :  { %17429 = shalt.err (!%p17426_p9)
}
  0xcd   :  { %264 = dma.hbm_to_vmem [thread:$0]  %s19602_s20, 16, %s262_s12, [#allocation33]  }
  0xce   :  { %s17732_s1 = smov [#allocation2]   ;;  %s17733_s9 = smov [#allocation7]  }
  0xcf   :  { %s44_s5 = sshll.u32 %s17732_s1, 4  ;;  %s68_s29 = sshll.u32 %s17733_s9, 4  ;;  %s45_s5 = int_to_ptr.vmem [resolvable:$true] %s44_s5  ;;  %s17995_s29 = int_to_ptr.vmem [resolvable:$true] %s68_s29 }
  0xd0   :  { %s19675_s24 = sld [smem:[#allocation73_spill]] }
  0xd6   :  { %s17430_s3 = scalar_lea.hbm %s19675_s24, 8192 }
  0xd7   :  { %p17431_p10 = scmp.ne.s32.totalorder %s19675_s24, %s17430_s3  ;;  %p17434_p11 = scmp.lt.u32.totalorder %s17430_s3, %s19675_s24 }
  0xd9   :  { %p17436_p12 = pnand %p17434_p11, %p17431_p10 }
  0xdb   :  { %17439 = shalt.err (!%p17436_p12)
}
  0xdc   :  { %s17440_s20 = scalar_lea.vmem %s45_s5, 8192  ;;  %p17445_p0 = scmp.lt.s32.totalorder %s45_s5, %s45_s5 }
  0xdd   :  { %p17441_p13 = scmp.ne.s32.totalorder %s45_s5, %s17440_s20  ;;  %p17446_p1 = scmp.lt.s32.totalorder %s17440_s20, %s17440_s20 }
  0xdf   :  { %p17447_p2 = por %p17446_p1, %p17445_p0 }
  0xe1   :  { %p17448_p3 = pnand %p17447_p2, %p17441_p13 }
  0xe3   :  { %17451 = shalt.err (!%p17448_p3)
}
  0xe4   :  { %50 = dma.hbm_to_vmem [thread:$0]  %s19675_s24, 8192, %s45_s5, [#allocation3], %s17724_s23, %s17724_s23, %s17725_s28  }
  0xe5   :  { %s19676_s22 = sld [smem:[#allocation75_spill]] }
  0xeb   :  { %s17452_s25 = scalar_lea.hbm %s19676_s22, 18432 }
  0xec   :  { %p17453_p4 = scmp.ne.s32.totalorder %s19676_s22, %s17452_s25  ;;  %p17456_p5 = scmp.lt.u32.totalorder %s17452_s25, %s19676_s22 }
  0xee   :  { %p17458_p6 = pnand %p17456_p5, %p17453_p4 }
  0xf0   :  { %17461 = shalt.err (!%p17458_p6)
}
  0xf1   :  { %s17462_s9 = scalar_lea.vmem %s17995_s29, 18432  ;;  %p17467_p8 = scmp.lt.s32.totalorder %s17995_s29, %s17995_s29 }
  0xf2   :  { %p17463_p7 = scmp.ne.s32.totalorder %s17995_s29, %s17462_s9  ;;  %p17468_p9 = scmp.lt.s32.totalorder %s17462_s9, %s17462_s9 }
  0xf4   :  { %p17469_p10 = por %p17468_p9, %p17467_p8 }
  0xf6   :  { %p17470_p11 = pnand %p17469_p10, %p17463_p7 }
  0xf8   :  { %17473 = shalt.err (!%p17470_p11)
}
  0xf9   :  { %74 = dma.hbm_to_vmem [thread:$0]  %s19676_s22, 18432, %s17995_s29, [#allocation6], %s17724_s23, %s17724_s23, %s17725_s28  }
  0xfa   :  { %s17734_s16 = smov [#allocation10]   ;;  %s17735_s3 = smov [#allocation13]  }
  0xfb   :  { %s90_s24 = sshll.u32 %s17734_s16, 4  ;;  %s115_s2 = sshll.u32 %s17735_s3, 4  ;;  %s91_s24 = int_to_ptr.vmem [resolvable:$true] %s90_s24  ;;  %s116_s2 = int_to_ptr.vmem [resolvable:$true] %s115_s2 }
  0xfc   :  { %s19677_s4 = sld [smem:[#allocation77_spill]] }
 0x102   :  { %s17474_s20 = scalar_lea.hbm %s19677_s4, 4608 }
 0x103   :  { %p17475_p12 = scmp.ne.s32.totalorder %s19677_s4, %s17474_s20  ;;  %p17478_p13 = scmp.lt.u32.totalorder %s17474_s20, %s19677_s4 }
 0x105   :  { %p17480_p0 = pnand %p17478_p13, %p17475_p12 }
 0x107   :  { %17483 = shalt.err (!%p17480_p0)
}
 0x108   :  { %s17484_s29 = scalar_lea.vmem %s91_s24, 4608  ;;  %p17489_p2 = scmp.lt.s32.totalorder %s91_s24, %s91_s24 }
 0x109   :  { %p17485_p1 = scmp.ne.s32.totalorder %s91_s24, %s17484_s29  ;;  %p17490_p3 = scmp.lt.s32.totalorder %s17484_s29, %s17484_s29 }
 0x10b   :  { %p17491_p4 = por %p17490_p3, %p17489_p2 }
 0x10d   :  { %p17492_p5 = pnand %p17491_p4, %p17485_p1 }
 0x10f   :  { %17495 = shalt.err (!%p17492_p5)
}
 0x110   :  { %96 = dma.hbm_to_vmem [thread:$0]  %s19677_s4, 4608, %s91_s24, [#allocation9], %s17724_s23, %s17724_s23, %s17725_s28  }
 0x111   :  { %s19678_s27 = sld [smem:[#allocation79_spill]] }
 0x117   :  { %s17496_s1 = scalar_lea.hbm %s19678_s27, 16 }
 0x118   :  { %p17497_p6 = scmp.ne.s32.totalorder %s19678_s27, %s17496_s1  ;;  %p17500_p7 = scmp.lt.u32.totalorder %s17496_s1, %s19678_s27 }
 0x11a   :  { %p17502_p8 = pnand %p17500_p7, %p17497_p6 }
 0x11c   :  { %17505 = shalt.err (!%p17502_p8)
}
 0x11d   :  { %s17506_s3 = scalar_lea.vmem %s116_s2, 16  ;;  %s17510_s0 = scalar_lea.vmem %s116_s2, 32 }
 0x11e   :  { %p17507_p9 = scmp.ne.s32.totalorder %s116_s2, %s17506_s3  ;;  %p17511_p10 = scmp.lt.s32.totalorder %s116_s2, %s116_s2 }
 0x11f   :  { %p17512_p11 = scmp.lt.s32.totalorder %s17510_s0, %s17506_s3 }
 0x121   :  { %p17513_p12 = por %p17512_p11, %p17511_p10 }
 0x123   :  { %p17514_p13 = pnand %p17513_p12, %p17507_p9 }
 0x125   :  { %17517 = shalt.err (!%p17514_p13)
}
 0x126   :  { %118 = dma.hbm_to_vmem [thread:$0]  %s19678_s27, 16, %s116_s2, [#allocation12]  }
 0x127   :  { %s17736_s4 = smov [#allocation16]   ;;  %s17737_s12 = smov [#allocation19]  }
 0x128   :  { %s136_s20 = sshll.u32 %s17736_s4, 4  ;;  %s160_s14 = sshll.u32 %s17737_s12, 4  ;;  %s137_s20 = int_to_ptr.vmem [resolvable:$true] %s136_s20  ;;  %s18059_s14 = int_to_ptr.vmem [resolvable:$true] %s160_s14 }
 0x129   :  { %s17518_s29 = scalar_lea.hbm %s19590_s8, 18432 }
 0x12a   :  { %p17519_p0 = scmp.ne.s32.totalorder %s19590_s8, %s17518_s29  ;;  %p17522_p1 = scmp.lt.u32.totalorder %s17518_s29, %s19590_s8 }
 0x12c   :  { %p17524_p2 = pnand %p17522_p1, %p17519_p0 }
 0x12e   :  { %17527 = shalt.err (!%p17524_p2)
}
 0x12f   :  { %s17528_s2 = scalar_lea.vmem %s137_s20, 18432  ;;  %p17533_p4 = scmp.lt.s32.totalorder %s137_s20, %s137_s20 }
 0x130   :  { %p17529_p3 = scmp.ne.s32.totalorder %s137_s20, %s17528_s2  ;;  %p17534_p5 = scmp.lt.s32.totalorder %s17528_s2, %s17528_s2 }
 0x132   :  { %p17535_p6 = por %p17534_p5, %p17533_p4 }
 0x134   :  { %p17536_p7 = pnand %p17535_p6, %p17529_p3 }
 0x136   :  { %17539 = shalt.err (!%p17536_p7)
}
 0x137   :  { %142 = dma.hbm_to_vmem [thread:$0]  %s19590_s8, 18432, %s137_s20, [#allocation15], %s17724_s23, %s17724_s23, %s17725_s28  }
 0x138   :  { %s17540_s10 = scalar_lea.hbm %s19593_s11, 18432 }
 0x139   :  { %p17541_p8 = scmp.ne.s32.totalorder %s19593_s11, %s17540_s10  ;;  %p17544_p9 = scmp.lt.u32.totalorder %s17540_s10, %s19593_s11 }
 0x13b   :  { %p17546_p10 = pnand %p17544_p9, %p17541_p8 }
 0x13d   :  { %17549 = shalt.err (!%p17546_p10)
}
 0x13e   :  { %s17550_s6 = scalar_lea.vmem %s18059_s14, 18432  ;;  %p17555_p12 = scmp.lt.s32.totalorder %s18059_s14, %s18059_s14 }
 0x13f   :  { %p17551_p11 = scmp.ne.s32.totalorder %s18059_s14, %s17550_s6  ;;  %p17556_p13 = scmp.lt.s32.totalorder %s17550_s6, %s17550_s6 }
 0x141   :  { %p17557_p0 = por %p17556_p13, %p17555_p12 }
 0x143   :  { %p17558_p1 = pnand %p17557_p0, %p17551_p11 }
 0x145   :  { %17561 = shalt.err (!%p17558_p1)
}
 0x146   :  { %166 = dma.hbm_to_vmem [thread:$0]  %s19593_s11, 18432, %s18059_s14, [#allocation18], %s17724_s23, %s17724_s23, %s17725_s28  }
 0x147   :  { %s17738_s20 = smov [#allocation22]   ;;  %s17739_s7 = smov [#allocation25]  }
 0x148   :  { %s182_s12 = sshll.u32 %s17738_s20, 4  ;;  %s204_s26 = sshll.u32 %s17739_s7, 4  ;;  %s183_s12 = int_to_ptr.vmem [resolvable:$true] %s182_s12  ;;  %s18096_s26 = int_to_ptr.vmem [resolvable:$true] %s204_s26 }
 0x149   :  { %s17562_s25 = scalar_lea.hbm %s19595_s13, 2048 }
 0x14a   :  { %p17563_p2 = scmp.ne.s32.totalorder %s19595_s13, %s17562_s25  ;;  %p17566_p3 = scmp.lt.u32.totalorder %s17562_s25, %s19595_s13 }
 0x14c   :  { %p17568_p4 = pnand %p17566_p3, %p17563_p2 }
 0x14e   :  { %17571 = shalt.err (!%p17568_p4)
}
 0x14f   :  { %s17572_s11 = scalar_lea.vmem %s183_s12, 2048  ;;  %p17577_p6 = scmp.lt.s32.totalorder %s183_s12, %s183_s12 }
 0x150   :  { %p17573_p5 = scmp.ne.s32.totalorder %s183_s12, %s17572_s11  ;;  %p17578_p7 = scmp.lt.s32.totalorder %s17572_s11, %s17572_s11 }
 0x152   :  { %p17579_p8 = por %p17578_p7, %p17577_p6 }
 0x154   :  { %p17580_p9 = pnand %p17579_p8, %p17573_p5 }
 0x156   :  { %17583 = shalt.err (!%p17580_p9)
}
 0x157   :  { %188 = dma.hbm_to_vmem [thread:$0]  %s19595_s13, 2048, %s183_s12, [#allocation21], %s17724_s23, %s17724_s23, %s17725_s28  }
 0x158   :  { %s17584_s10 = scalar_lea.hbm %s19597_s15, 2048 }
 0x159   :  { %p17585_p10 = scmp.ne.s32.totalorder %s19597_s15, %s17584_s10  ;;  %p17588_p11 = scmp.lt.u32.totalorder %s17584_s10, %s19597_s15 }
 0x15b   :  { %p17590_p12 = pnand %p17588_p11, %p17585_p10 }
 0x15d   :  { %17593 = shalt.err (!%p17590_p12)
}
 0x15e   :  { %s17594_s6 = scalar_lea.vmem %s18096_s26, 2048  ;;  %p17599_p0 = scmp.lt.s32.totalorder %s18096_s26, %s18096_s26 }
 0x15f   :  { %p17595_p13 = scmp.ne.s32.totalorder %s18096_s26, %s17594_s6  ;;  %p17600_p1 = scmp.lt.s32.totalorder %s17594_s6, %s17594_s6 }
 0x161   :  { %p17601_p2 = por %p17600_p1, %p17599_p0 }
 0x163   :  { %p17602_p3 = pnand %p17601_p2, %p17595_p13 }
 0x165   :  { %17605 = shalt.err (!%p17602_p3)
}
 0x166   :  { %210 = dma.hbm_to_vmem [thread:$0]  %s19597_s15, 2048, %s18096_s26, [#allocation24], %s17724_s23, %s17724_s23, %s17725_s28  }
 0x167   :  { %s17740_s4 = smov [#allocation28]   ;;  %s17741_s12 = smov [#allocation31]  }
 0x168   :  { %s226_s20 = sshll.u32 %s17740_s4, 4  ;;  %s248_s7 = sshll.u32 %s17741_s12, 4  ;;  %s227_s20 = int_to_ptr.vmem [resolvable:$true] %s226_s20  ;;  %s18133_s7 = int_to_ptr.vmem [resolvable:$true] %s248_s7 }
 0x169   :  { %s17606_s25 = scalar_lea.hbm %s19599_s17, 2048 }
 0x16a   :  { %p17607_p4 = scmp.ne.s32.totalorder %s19599_s17, %s17606_s25  ;;  %p17610_p5 = scmp.lt.u32.totalorder %s17606_s25, %s19599_s17 }
 0x16c   :  { %p17612_p6 = pnand %p17610_p5, %p17607_p4 }
 0x16e   :  { %17615 = shalt.err (!%p17612_p6)
}
 0x16f   :  { %s17616_s15 = scalar_lea.vmem %s227_s20, 2048  ;;  %p17621_p8 = scmp.lt.s32.totalorder %s227_s20, %s227_s20 }
 0x170   :  { %p17617_p7 = scmp.ne.s32.totalorder %s227_s20, %s17616_s15  ;;  %p17622_p9 = scmp.lt.s32.totalorder %s17616_s15, %s17616_s15 }
 0x172   :  { %p17623_p10 = por %p17622_p9, %p17621_p8 }
 0x174   :  { %p17624_p11 = pnand %p17623_p10, %p17617_p7 }
 0x176   :  { %17627 = shalt.err (!%p17624_p11)
}
 0x177   :  { %232 = dma.hbm_to_vmem [thread:$0]  %s19599_s17, 2048, %s227_s20, [#allocation27], %s17724_s23, %s17724_s23, %s17725_s28  }
 0x178   :  { %s17628_s9 = scalar_lea.hbm %s19601_s19, 2048 }
 0x179   :  { %p17629_p12 = scmp.ne.s32.totalorder %s19601_s19, %s17628_s9  ;;  %p17632_p13 = scmp.lt.u32.totalorder %s17628_s9, %s19601_s19 }
 0x17b   :  { %p17634_p0 = pnand %p17632_p13, %p17629_p12 }
 0x17d   :  { %17637 = shalt.err (!%p17634_p0)
}
 0x17e   :  { %s17638_s0 = scalar_lea.vmem %s18133_s7, 2048  ;;  %p17643_p2 = scmp.lt.s32.totalorder %s18133_s7, %s18133_s7 }
 0x17f   :  { %p17639_p1 = scmp.ne.s32.totalorder %s18133_s7, %s17638_s0  ;;  %p17644_p3 = scmp.lt.s32.totalorder %s17638_s0, %s17638_s0 }
 0x181   :  { %p17645_p4 = por %p17644_p3, %p17643_p2 }
 0x183   :  { %p17646_p5 = pnand %p17645_p4, %p17639_p1 }
 0x185   :  { %17649 = shalt.err (!%p17646_p5)
}
 0x186   :  { %254 = dma.hbm_to_vmem [thread:$0]  %s19601_s19, 2048, %s18133_s7, [#allocation30], %s17724_s23, %s17724_s23, %s17725_s28  }
 0x187   :  { %s17742_s6 = smov [#allocation34]   ;;  %s17650_s20 = scalar_lea.hbm %s19603_s21, 128 }
 0x188   :  { %s271_s13 = sshll.u32 %s17742_s6, 4  ;;  %p17651_p6 = scmp.ne.s32.totalorder %s19603_s21, %s17650_s20  ;;  %s272_s13 = int_to_ptr.vmem [resolvable:$true] %s271_s13 }
 0x189   :  { %p17654_p7 = scmp.lt.u32.totalorder %s17650_s20, %s19603_s21 }
 0x18b   :  { %p17656_p8 = pnand %p17654_p7, %p17651_p6 }
 0x18d   :  { %17659 = shalt.err (!%p17656_p8)
}
 0x18e   :  { %s17660_s30 = scalar_lea.vmem %s272_s13, 128  ;;  %p17665_p10 = scmp.lt.s32.totalorder %s272_s13, %s272_s13 }
 0x18f   :  { %p17661_p9 = scmp.ne.s32.totalorder %s272_s13, %s17660_s30  ;;  %p17666_p11 = scmp.lt.s32.totalorder %s17660_s30, %s17660_s30 }
 0x191   :  { %p17667_p12 = por %p17666_p11, %p17665_p10 }
 0x193   :  { %p17668_p13 = pnand %p17667_p12, %p17661_p9 }
 0x195   :  { %17671 = shalt.err (!%p17668_p13)
}
 0x196   :  { %274 = dma.hbm_to_vmem [thread:$0]  %s19603_s21, 128, %s272_s13, [#allocation33]  }
 0x197   :  { %17694 = dma.done.wait [#allocation3], 8192  }
 0x198   :  { %17695 = vsyncadd [#allocation3], 4294959104 }
 0x199   :  { %17696 = dma.done.wait [#allocation6], 92160  }
 0x19a   :  { %17697 = vsyncadd [#allocation6], 4294875136 }
 0x19b   :  { %17698 = dma.done.wait [#allocation9], 4624  }
 0x19c   :  { %17699 = vsyncadd [#allocation9], 4294962672 }
 0x19d   :  { %17700 = dma.done.wait [#allocation12], 18448  }
 0x19e   :  { %17701 = vsyncadd [#allocation12], 4294948848 }
 0x19f   :  { %17702 = dma.done.wait [#allocation15], 19584  }
 0x1a0   :  { %17703 = vsyncadd [#allocation15], 4294947712 }
 0x1a1   :  { %17704 = dma.done.wait [#allocation18], 18448  }
 0x1a2   :  { %17705 = vsyncadd [#allocation18], 4294948848 }
 0x1a3   :  { %17706 = dma.done.wait [#allocation21], 2064  }
 0x1a4   :  { %17707 = vsyncadd [#allocation21], 4294965232 }
 0x1a5   :  { %17708 = dma.done.wait [#allocation24], 2064  }
 0x1a6   :  { %17709 = vsyncadd [#allocation24], 4294965232 }
 0x1a7   :  { %17710 = dma.done.wait [#allocation27], 2064  }
 0x1a8   :  { %17711 = vsyncadd [#allocation27], 4294965232 }
 0x1a9   :  { %17712 = dma.done.wait [#allocation30], 2064  }
 0x1aa   :  { %17713 = vsyncadd [#allocation30], 4294965232 }
 0x1ab   :  { %17714 = dma.done.wait [#allocation33], 144  }
 0x1ac   :  { %17715 = vsyncadd [#allocation33], 4294967152  ;;  %v354_v0 = vld [vmem:[#allocation2 + $0x80] sm:$0xff]  ;;  %v355_v1 = vld [vmem:[#allocation2 + $0x88] sm:$0xff]  ;;  %vm17744_vm0 = vmmov 0   ;;  %vm6974_vm1 = vcmask 261120  }
 0x1ad   :  { %v386_v2 = vld [vmem:[#allocation2 + $0x180] sm:$0xff]  ;;  %v18182_v3 = vpack.c.bf16 %v355_v1, %v354_v0  ;;  %v387_v4 = vld [vmem:[#allocation2 + $0x188] sm:$0xff]  ;;  %v356_v11 = vld [vmem:[#allocation2 + $0x90] sm:$0xff]  ;;  %s19733_s7 = sld [smem:[#allocation80_spill]]  ;;  %vm8447_vm2 = vcmask 64512   ;;  %s17746_s6 = smov [#allocation35]  }
 0x1ae   :  { %v338_v5 = vld [vmem:[#allocation2] sm:$0xff]  ;;  %v339_v6 = vld [vmem:[#allocation2 + $0x8] sm:$0xff]  ;;  %v18184_v7 = vpack.c.bf16 %v387_v4, %v386_v2  ;;  %v357_v13 = vld [vmem:[#allocation2 + $0x98] sm:$0xff]  ;;  %s10315_s13 = sshll.u32 %s17746_s6, 4  ;;  %s10316_s13 = int_to_ptr.vmem [resolvable:$true] %s10315_s13 }
 0x1af   :  { %19679 = vst [vmem:[#allocation48_spill] sm:$0xff] %v18182_v3  ;;  %v18186_v8 = vpack.c.bf16 %v339_v6, %v338_v5  ;;  %v370_v9 = vld [vmem:[#allocation2 + $0x100] sm:$0xff]  ;;  %v371_v10 = vld [vmem:[#allocation2 + $0x108] sm:$0xff]  ;;  %14996 = vmatprep.subr.bf16.mxu0 %v18182_v3  ;;  %v388_v14 = vld [vmem:[#allocation2 + $0x190] sm:$0xff]  ;;  %v18193_v16 = vpack.c.bf16 %v357_v13, %v356_v11  ;;  %s17672_s8 = scalar_lea.vmem %s10316_s13, 128  ;;  %p17677_p1 = scmp.lt.s32.totalorder %s10316_s13, %s10316_s13 }
 0x1b0   :  { %19680 = vst [vmem:[#allocation49_spill] sm:$0xff] %v18184_v7  ;;  %v18189_v12 = vpack.c.bf16 %v371_v10, %v370_v9  ;;  %v389_v15 = vld [vmem:[#allocation2 + $0x198] sm:$0xff]  ;;  %15028 = vmatprep.subr.bf16.mxu1 %v18184_v7  ;;  %v340_v18 = vld [vmem:[#allocation2 + $0x10] sm:$0xff]  ;;  %v358_v23 = vld [vmem:[#allocation2 + $0xa0] sm:$0xff]  ;;  %p17673_p0 = scmp.ne.s32.totalorder %s10316_s13, %s17672_s8  ;;  %p17678_p2 = scmp.lt.s32.totalorder %s17672_s8, %s17672_s8 }
 0x1b1   :  { %14998 = vmatpush3.bf16.msra.mxu0 %v18186_v8  ;;  %v18195_v17 = vpack.c.bf16 %v389_v15, %v388_v14  ;;  %v341_v19 = vld [vmem:[#allocation2 + $0x18] sm:$0xff]  ;;  %v372_v20 = vld [vmem:[#allocation2 + $0x110] sm:$0xff]  ;;  %v359_v24 = vld [vmem:[#allocation2 + $0xa8] sm:$0xff] }
 0x1b2   :  { %19681 = vst [vmem:[#allocation50_spill] sm:$0xff] %v18189_v12  ;;  %15030 = vmatpush3.bf16.msra.mxu1 %v18189_v12  ;;  %v18198_v21 = vpack.c.bf16 %v341_v19, %v340_v18  ;;  %v373_v22 = vld [vmem:[#allocation2 + $0x118] sm:$0xff]  ;;  %15000 = vmatprep.subr.bf16.mxu0 %v18193_v16  ;;  %v18204_v26 = vpack.c.bf16 %v359_v24, %v358_v23  ;;  %v390_v27 = vld [vmem:[#allocation2 + $0x1a0] sm:$0xff]  ;;  %v391_v28 = vld [vmem:[#allocation2 + $0x1a8] sm:$0xff]  ;;  %p17679_p3 = por %p17678_p2, %p17677_p1 }
 0x1b3   :  { %19682 = vst [vmem:[#allocation51_spill] sm:$0xff] %v18195_v17  ;;  %15032 = vmatprep.subr.bf16.mxu1 %v18195_v17  ;;  %v18202_v25 = vpack.c.bf16 %v373_v22, %v372_v20  ;;  %v342_v29 = vld [vmem:[#allocation2 + $0x20] sm:$0xff]  ;;  %v18206_v30 = vpack.c.bf16 %v391_v28, %v390_v27  ;;  %v343_v31 = vld [vmem:[#allocation2 + $0x28] sm:$0xff]  ;;  %v360_v35 = vld [vmem:[#allocation2 + $0xb0] sm:$0xff] }
 0x1b4   :  { %v374_v32 = vld [vmem:[#allocation2 + $0x120] sm:$0xff]  ;;  %v375_v33 = vld [vmem:[#allocation2 + $0x128] sm:$0xff]  ;;  %v18209_v34 = vpack.c.bf16 %v343_v31, %v342_v29  ;;  %v361_v36 = vld [vmem:[#allocation2 + $0xb8] sm:$0xff]  ;;  %p17680_p4 = pnand %p17679_p3, %p17673_p0 }
 0x1b5   :  { %19683 = vst [vmem:[#allocation52_spill] sm:$0xff] %v18202_v25  ;;  %19684 = vst [vmem:[#allocation53_spill] sm:$0xff] %v18206_v30  ;;  %15002 = vmatpush3.bf16.msra.mxu0 %v18198_v21  ;;  %v392_v37 = vld [vmem:[#allocation2 + $0x1b0] sm:$0xff]  ;;  %v18213_v38 = vpack.c.bf16 %v375_v33, %v374_v32  ;;  %v18215_v39 = vpack.c.bf16 %v361_v36, %v360_v35  ;;  %v393_v40 = vld [vmem:[#allocation2 + $0x1b8] sm:$0xff] }
 0x1b6   :  { %15034 = vmatpush3.bf16.msra.mxu1 %v18202_v25  ;;  %15004 = vmatprep.subr.bf16.mxu0 %v18204_v26  ;;  %v344_v41 = vld [vmem:[#allocation2 + $0x30] sm:$0xff]  ;;  %v345_v42 = vld [vmem:[#allocation2 + $0x38] sm:$0xff]  ;;  %v18218_v43 = vpack.c.bf16 %v393_v40, %v392_v37  ;;  %v362_v46 = vld [vmem:[#allocation2 + $0xc0] sm:$0xff] }
 0x1b7   :  { %19685 = vst [vmem:[#allocation54_spill] sm:$0xff] %v18213_v38  ;;  %15036 = vmatprep.subr.bf16.mxu1 %v18206_v30  ;;  %v376_v44 = vld [vmem:[#allocation2 + $0x130] sm:$0xff]  ;;  %v377_v45 = vld [vmem:[#allocation2 + $0x138] sm:$0xff]  ;;  %v363_v47 = vld [vmem:[#allocation2 + $0xc8] sm:$0xff]  ;;  %v18221_v50 = vpack.c.bf16 %v345_v42, %v344_v41 }
 0x1b8   :  { %19686 = vst [vmem:[#allocation55_spill] sm:$0xff] %v18218_v43  ;;  %v394_v48 = vld [vmem:[#allocation2 + $0x1c0] sm:$0xff]  ;;  %v395_v49 = vld [vmem:[#allocation2 + $0x1c8] sm:$0xff]  ;;  %v18225_v51 = vpack.c.bf16 %v377_v45, %v376_v44  ;;  %v18227_v52 = vpack.c.bf16 %v363_v47, %v362_v46  ;;  %v364_v58 = vld [vmem:[#allocation2 + $0xd0] sm:$0xff] }
 0x1b9   :  { %15006 = vmatpush3.bf16.msra.mxu0 %v18209_v34  ;;  %v346_v53 = vld [vmem:[#allocation2 + $0x40] sm:$0xff]  ;;  %v347_v54 = vld [vmem:[#allocation2 + $0x48] sm:$0xff]  ;;  %v18230_v56 = vpack.c.bf16 %v395_v49, %v394_v48  ;;  %v365_v59 = vld [vmem:[#allocation2 + $0xd8] sm:$0xff] }
 0x1ba   :  { %15038 = vmatpush3.bf16.msra.mxu1 %v18213_v38  ;;  %15008 = vmatprep.subr.bf16.mxu0 %v18215_v39  ;;  %19687 = vst [vmem:[#allocation56_spill] sm:$0xff] %v18225_v51  ;;  %v378_v55 = vld [vmem:[#allocation2 + $0x140] sm:$0xff]  ;;  %v379_v57 = vld [vmem:[#allocation2 + $0x148] sm:$0xff]  ;;  %v396_v60 = vld [vmem:[#allocation2 + $0x1d0] sm:$0xff]  ;;  %v18233_v62 = vpack.c.bf16 %v347_v54, %v346_v53  ;;  %v18239_v0 = vpack.c.bf16 %v365_v59, %v364_v58 }
 0x1bb   :  { %15040 = vmatprep.subr.bf16.mxu1 %v18218_v43  ;;  %19688 = vst [vmem:[#allocation57_spill] sm:$0xff] %v18230_v56  ;;  %v397_v61 = vld [vmem:[#allocation2 + $0x1d8] sm:$0xff]  ;;  %v18237_v63 = vpack.c.bf16 %v379_v57, %v378_v55  ;;  %v348_v1 = vld [vmem:[#allocation2 + $0x50] sm:$0xff]  ;;  %v366_v9 = vld [vmem:[#allocation2 + $0xe0] sm:$0xff] }
 0x1bc   :  { %19689 = vst [vmem:[#allocation58_spill] sm:$0xff] %v18233_v62  ;;  %19691 = vst [vmem:[#allocation60_spill] sm:$0xff] %v18239_v0  ;;  %v349_v2 = vld [vmem:[#allocation2 + $0x58] sm:$0xff]  ;;  %v380_v4 = vld [vmem:[#allocation2 + $0x150] sm:$0xff]  ;;  %v18242_v5 = vpack.c.bf16 %v397_v61, %v396_v60 }
 0x1bd   :  { %15010 = vmatpush3.bf16.msra.mxu0 %v18221_v50  ;;  %19690 = vst [vmem:[#allocation59_spill] sm:$0xff] %v18237_v63  ;;  %v381_v6 = vld [vmem:[#allocation2 + $0x158] sm:$0xff]  ;;  %v367_v10 = vld [vmem:[#allocation2 + $0xe8] sm:$0xff]  ;;  %v398_v11 = vld [vmem:[#allocation2 + $0x1e0] sm:$0xff]  ;;  %v18245_v14 = vpack.c.bf16 %v349_v2, %v348_v1 }
 0x1be   :  { %15042 = vmatpush3.bf16.msra.mxu1 %v18225_v51  ;;  %15012 = vmatprep.subr.bf16.mxu0 %v18227_v52  ;;  %19692 = vst [vmem:[#allocation61_spill] sm:$0xff] %v18242_v5  ;;  %v399_v13 = vld [vmem:[#allocation2 + $0x1e8] sm:$0xff]  ;;  %v350_v15 = vld [vmem:[#allocation2 + $0x60] sm:$0xff]  ;;  %v18249_v19 = vpack.c.bf16 %v381_v6, %v380_v4  ;;  %v18251_v20 = vpack.c.bf16 %v367_v10, %v366_v9  ;;  %v405_v24 = vld [vmem:[#allocation5 + $0x18] sm:$0xff] }
 0x1bf   :  { %15044 = vmatprep.subr.bf16.mxu1 %v18230_v56  ;;  %19693 = vst [vmem:[#allocation62_spill] sm:$0xff] %v18245_v14  ;;  %v351_v18 = vld [vmem:[#allocation2 + $0x68] sm:$0xff]  ;;  %v382_v22 = vld [vmem:[#allocation2 + $0x160] sm:$0xff]  ;;  %v18254_v27 = vpack.c.bf16 %v399_v13, %v398_v11  ;;  %v368_v29 = vld [vmem:[#allocation2 + $0xf0] sm:$0xff]  ;;  %675 = vmatprep.mubr.f32.mxu1 %v405_v24 }
 0x1c0   :  { %19694 = vst [vmem:[#allocation63_spill] sm:$0xff] %v18249_v19  ;;  %19695 = vst [vmem:[#allocation64_spill] sm:$0xff] %v18251_v20  ;;  %v403_v23 = vld [vmem:[#allocation5 + $0x8] sm:$0xff]  ;;  %v369_v31 = vld [vmem:[#allocation2 + $0xf8] sm:$0xff]  ;;  %v18257_v35 = vpack.c.bf16 %v351_v18, %v350_v15 }
 0x1c1   :  { %15014 = vmatpush3.bf16.msra.mxu0 %v18233_v62  ;;  %19696 = vst [vmem:[#allocation65_spill] sm:$0xff] %v18254_v27  ;;  %v383_v28 = vld [vmem:[#allocation2 + $0x168] sm:$0xff]  ;;  %530 = vmatprep.mubr.f32.mxu0 %v403_v23  ;;  %v400_v32 = vld [vmem:[#allocation2 + $0x1f0] sm:$0xff]  ;;  %v401_v33 = vld [vmem:[#allocation2 + $0x1f8] sm:$0xff]  ;;  %v18263_v37 = vpack.c.bf16 %v369_v31, %v368_v29 }
 0x1c2   :  { %15046 = vmatpush3.bf16.msra.mxu1 %v18237_v63  ;;  %15016 = vmatprep.subr.bf16.mxu0 %v18239_v0  ;;  %19697 = vst [vmem:[#allocation66_spill] sm:$0xff] %v18257_v35  ;;  %v18261_v36 = vpack.c.bf16 %v383_v28, %v382_v22  ;;  %v352_v40 = vld [vmem:[#allocation2 + $0x70] sm:$0xff]  ;;  %v353_v41 = vld [vmem:[#allocation2 + $0x78] sm:$0xff]  ;;  %v18266_v42 = vpack.c.bf16 %v401_v33, %v400_v32  ;;  %v402_v48 = vld [vmem:[#allocation5] sm:$0xff] }
 0x1c3   :  { %15048 = vmatprep.subr.bf16.mxu1 %v18242_v5  ;;  %19699 = vst [vmem:[#allocation68_spill] sm:$0xff] %v18263_v37  ;;  %v384_v44 = vld [vmem:[#allocation2 + $0x170] sm:$0xff]  ;;  %v385_v45 = vld [vmem:[#allocation2 + $0x178] sm:$0xff]  ;;  %v18269_v46 = vpack.c.bf16 %v353_v41, %v352_v40  ;;  %v407_v53 = vld [vmem:[#allocation5 + $0x28] sm:$0xff] }
 0x1c4   :  { %19698 = vst [vmem:[#allocation67_spill] sm:$0xff] %v18261_v36  ;;  %19700 = vst [vmem:[#allocation69_spill] sm:$0xff] %v18266_v42  ;;  %v18273_v47 = vpack.c.bf16 %v385_v45, %v384_v44  ;;  %v404_v49 = vld [vmem:[#allocation5 + $0x10] sm:$0xff]  ;;  %v409_v54 = vld [vmem:[#allocation5 + $0x38] sm:$0xff] }
 0x1c5   :  { %15018 = vmatpush3.bf16.msra.mxu0 %v18245_v14  ;;  %19701 = vst [vmem:[#allocation70_spill] sm:$0xff] %v18269_v46  ;;  %v406_v55 = vld [vmem:[#allocation5 + $0x20] sm:$0xff]  ;;  %v408_v57 = vld [vmem:[#allocation5 + $0x30] sm:$0xff]  ;;  %v411_v58 = vld [vmem:[#allocation5 + $0x48] sm:$0xff] }
 0x1c6   :  { %15050 = vmatpush3.bf16.msra.mxu1 %v18249_v19  ;;  %15020 = vmatprep.subr.bf16.mxu0 %v18251_v20  ;;  %19702 = vst [vmem:[#allocation71_spill] sm:$0xff] %v18273_v47  ;;  %v413_v59 = vld [vmem:[#allocation5 + $0x58] sm:$0xff]  ;;  %v410_v60 = vld [vmem:[#allocation5 + $0x40] sm:$0xff]  ;;  %v412_v61 = vld [vmem:[#allocation5 + $0x50] sm:$0xff] }
 0x1c7   :  { %15052 = vmatprep.subr.bf16.mxu1 %v18254_v27  ;;  %v415_v1 = vld [vmem:[#allocation5 + $0x68] sm:$0xff]  ;;  %v417_v2 = vld [vmem:[#allocation5 + $0x78] sm:$0xff]  ;;  %v414_v4 = vld [vmem:[#allocation5 + $0x60] sm:$0xff] }
 0x1c8   :  { %v416_v6 = vld [vmem:[#allocation5 + $0x70] sm:$0xff]  ;;  %v419_v9 = vld [vmem:[#allocation5 + $0x88] sm:$0xff]  ;;  %v421_v10 = vld [vmem:[#allocation5 + $0x98] sm:$0xff] }
 0x1c9   :  { %15022 = vmatpush3.bf16.msra.mxu0 %v18257_v35  ;;  %v418_v11 = vld [vmem:[#allocation5 + $0x80] sm:$0xff]  ;;  %v420_v13 = vld [vmem:[#allocation5 + $0x90] sm:$0xff]  ;;  %v423_v15 = vld [vmem:[#allocation5 + $0xa8] sm:$0xff] }
 0x1ca   :  { %15054 = vmatpush3.bf16.msra.mxu1 %v18261_v36  ;;  %15024 = vmatprep.subr.bf16.mxu0 %v18263_v37  ;;  %v425_v18 = vld [vmem:[#allocation5 + $0xb8] sm:$0xff]  ;;  %v422_v22 = vld [vmem:[#allocation5 + $0xa0] sm:$0xff]  ;;  %v424_v23 = vld [vmem:[#allocation5 + $0xb0] sm:$0xff] }
 0x1cb   :  { %15056 = vmatprep.subr.bf16.mxu1 %v18266_v42  ;;  %v427_v24 = vld [vmem:[#allocation5 + $0xc8] sm:$0xff]  ;;  %v429_v28 = vld [vmem:[#allocation5 + $0xd8] sm:$0xff]  ;;  %v426_v29 = vld [vmem:[#allocation5 + $0xc0] sm:$0xff] }
 0x1cc   :  { %v428_v31 = vld [vmem:[#allocation5 + $0xd0] sm:$0xff]  ;;  %v431_v32 = vld [vmem:[#allocation5 + $0xe8] sm:$0xff]  ;;  %v433_v33 = vld [vmem:[#allocation5 + $0xf8] sm:$0xff] }
 0x1cd   :  { %15026 = vmatpush3.bf16.msra.mxu0 %v18269_v46  ;;  %v430_v40 = vld [vmem:[#allocation5 + $0xe0] sm:$0xff]  ;;  %v432_v41 = vld [vmem:[#allocation5 + $0xf0] sm:$0xff]  ;;  %v435_v44 = vld [vmem:[#allocation5 + $0x108] sm:$0xff] }
 0x1ce   :  { %15058 = vmatpush3.bf16.msra.mxu1 %v18273_v47  ;;  %15060 = vmatprep.subr.bf16.mxu0 %v18182_v3  ;;  %v437_v45 = vld [vmem:[#allocation5 + $0x118] sm:$0xff] }
 0x1cf   :  { %15092 = vmatprep.subr.bf16.mxu1 %v18184_v7 }
 0x1d0   :  { %531 = vmatmul.mubr.f32.vlgmr.msra.gmra.mrb[0].mxu0 %v402_v48  ;;  %v434_v48 = vld [vmem:[#allocation5 + $0x100] sm:$0xff] }
 0x1d1   :  { %676 = vmatmul.mubr.f32.vlgmr.msra.gmra.mrb[0].mxu1 %v404_v49  ;;  %535 = vmatprep.mubr.f32.mxu0 %v407_v53  ;;  %v436_v49 = vld [vmem:[#allocation5 + $0x110] sm:$0xff]  ;;  %v439_v53 = vld [vmem:[#allocation5 + $0x128] sm:$0xff] }
 0x1d2   :  { %680 = vmatprep.mubr.f32.mxu1 %v409_v54  ;;  %15062 = vmatpush3.bf16.msra.mxu0 %v18186_v8  ;;  %v441_v54 = vld [vmem:[#allocation5 + $0x138] sm:$0xff] }
 0x1d3   :  { %15094 = vmatpush3.bf16.msra.mxu1 %v18189_v12  ;;  %15064 = vmatprep.subr.bf16.mxu0 %v18193_v16 }
 0x1d4   :  { %536 = vmatmul.mubr.f32.gmra.mrb[2].mxu0 %v406_v55  ;;  %15096 = vmatprep.subr.bf16.mxu1 %v18195_v17  ;;  %v438_v55 = vld [vmem:[#allocation5 + $0x120] sm:$0xff] }
 0x1d5   :  { %681 = vmatmul.mubr.f32.gmra.mrb[2].mxu1 %v408_v57  ;;  %540 = vmatprep.mubr.f32.mxu0 %v411_v58  ;;  %v440_v57 = vld [vmem:[#allocation5 + $0x130] sm:$0xff]  ;;  %v443_v58 = vld [vmem:[#allocation5 + $0x148] sm:$0xff] }
 0x1d6   :  { %685 = vmatprep.mubr.f32.mxu1 %v413_v59  ;;  %15066 = vmatpush3.bf16.msra.mxu0 %v18198_v21  ;;  %v445_v59 = vld [vmem:[#allocation5 + $0x158] sm:$0xff] }
 0x1d7   :  { %15098 = vmatpush3.bf16.msra.mxu1 %v18202_v25  ;;  %15068 = vmatprep.subr.bf16.mxu0 %v18204_v26 }
 0x1d8   :  { %541 = vmatmul.mubr.f32.gmra.mrb[4].mxu0 %v410_v60  ;;  %15100 = vmatprep.subr.bf16.mxu1 %v18206_v30  ;;  %v442_v60 = vld [vmem:[#allocation5 + $0x140] sm:$0xff] }
 0x1d9   :  { %686 = vmatmul.mubr.f32.gmra.mrb[4].mxu1 %v412_v61  ;;  %545 = vmatprep.mubr.f32.mxu0 %v415_v1  ;;  %v444_v61 = vld [vmem:[#allocation5 + $0x150] sm:$0xff]  ;;  %v447_v1 = vld [vmem:[#allocation5 + $0x168] sm:$0xff] }
 0x1da   :  { %690 = vmatprep.mubr.f32.mxu1 %v417_v2  ;;  %15070 = vmatpush3.bf16.msra.mxu0 %v18209_v34  ;;  %v449_v2 = vld [vmem:[#allocation5 + $0x178] sm:$0xff] }
 0x1db   :  { %15102 = vmatpush3.bf16.msra.mxu1 %v18213_v38  ;;  %15072 = vmatprep.subr.bf16.mxu0 %v18215_v39 }
 0x1dc   :  { %546 = vmatmul.mubr.f32.gmra.mrb[6].mxu0 %v414_v4  ;;  %15104 = vmatprep.subr.bf16.mxu1 %v18218_v43  ;;  %v446_v4 = vld [vmem:[#allocation5 + $0x160] sm:$0xff] }
 0x1dd   :  { %691 = vmatmul.mubr.f32.gmra.mrb[6].mxu1 %v416_v6  ;;  %550 = vmatprep.mubr.f32.mxu0 %v419_v9  ;;  %v448_v6 = vld [vmem:[#allocation5 + $0x170] sm:$0xff]  ;;  %v451_v9 = vld [vmem:[#allocation5 + $0x188] sm:$0xff] }
 0x1de   :  { %695 = vmatprep.mubr.f32.mxu1 %v421_v10  ;;  %15074 = vmatpush3.bf16.msra.mxu0 %v18221_v50  ;;  %v453_v10 = vld [vmem:[#allocation5 + $0x198] sm:$0xff] }
 0x1df   :  { %15106 = vmatpush3.bf16.msra.mxu1 %v18225_v51  ;;  %15076 = vmatprep.subr.bf16.mxu0 %v18227_v52 }
 0x1e0   :  { %551 = vmatmul.mubr.f32.gmra.mrb[8].mxu0 %v418_v11  ;;  %15108 = vmatprep.subr.bf16.mxu1 %v18230_v56  ;;  %v450_v11 = vld [vmem:[#allocation5 + $0x180] sm:$0xff] }
 0x1e1   :  { %696 = vmatmul.mubr.f32.gmra.mrb[8].mxu1 %v420_v13  ;;  %555 = vmatprep.mubr.f32.mxu0 %v423_v15  ;;  %v452_v13 = vld [vmem:[#allocation5 + $0x190] sm:$0xff]  ;;  %v455_v15 = vld [vmem:[#allocation5 + $0x1a8] sm:$0xff] }
 0x1e2   :  { %700 = vmatprep.mubr.f32.mxu1 %v425_v18  ;;  %15078 = vmatpush3.bf16.msra.mxu0 %v18233_v62  ;;  %v457_v18 = vld [vmem:[#allocation5 + $0x1b8] sm:$0xff] }
 0x1e3   :  { %15110 = vmatpush3.bf16.msra.mxu1 %v18237_v63  ;;  %15080 = vmatprep.subr.bf16.mxu0 %v18239_v0 }
 0x1e4   :  { %556 = vmatmul.mubr.f32.gmra.mrb[10].mxu0 %v422_v22  ;;  %15112 = vmatprep.subr.bf16.mxu1 %v18242_v5  ;;  %v454_v22 = vld [vmem:[#allocation5 + $0x1a0] sm:$0xff] }
 0x1e5   :  { %701 = vmatmul.mubr.f32.gmra.mrb[10].mxu1 %v424_v23  ;;  %560 = vmatprep.mubr.f32.mxu0 %v427_v24  ;;  %v456_v23 = vld [vmem:[#allocation5 + $0x1b0] sm:$0xff]  ;;  %v459_v24 = vld [vmem:[#allocation5 + $0x1c8] sm:$0xff] }
 0x1e6   :  { %705 = vmatprep.mubr.f32.mxu1 %v429_v28  ;;  %15082 = vmatpush3.bf16.msra.mxu0 %v18245_v14  ;;  %v461_v28 = vld [vmem:[#allocation5 + $0x1d8] sm:$0xff] }
 0x1e7   :  { %15114 = vmatpush3.bf16.msra.mxu1 %v18249_v19  ;;  %15084 = vmatprep.subr.bf16.mxu0 %v18251_v20 }
 0x1e8   :  { %561 = vmatmul.mubr.f32.gmra.mrb[12].mxu0 %v426_v29  ;;  %15116 = vmatprep.subr.bf16.mxu1 %v18254_v27  ;;  %v458_v29 = vld [vmem:[#allocation5 + $0x1c0] sm:$0xff] }
 0x1e9   :  { %706 = vmatmul.mubr.f32.gmra.mrb[12].mxu1 %v428_v31  ;;  %565 = vmatprep.mubr.f32.mxu0 %v431_v32  ;;  %v460_v31 = vld [vmem:[#allocation5 + $0x1d0] sm:$0xff]  ;;  %v463_v32 = vld [vmem:[#allocation5 + $0x1e8] sm:$0xff] }
 0x1ea   :  { %710 = vmatprep.mubr.f32.mxu1 %v433_v33  ;;  %15086 = vmatpush3.bf16.msra.mxu0 %v18257_v35  ;;  %v465_v33 = vld [vmem:[#allocation5 + $0x1f8] sm:$0xff] }
 0x1eb   :  { %15118 = vmatpush3.bf16.msra.mxu1 %v18261_v36  ;;  %15088 = vmatprep.subr.bf16.mxu0 %v18263_v37 }
 0x1ec   :  { %566 = vmatmul.mubr.f32.gmra.mrb[14].mxu0 %v430_v40  ;;  %15120 = vmatprep.subr.bf16.mxu1 %v18266_v42  ;;  %v462_v40 = vld [vmem:[#allocation5 + $0x1e0] sm:$0xff] }
 0x1ed   :  { %711 = vmatmul.mubr.f32.gmra.mrb[14].mxu1 %v432_v41  ;;  %570 = vmatprep.mubr.f32.mxu0 %v435_v44  ;;  %v464_v41 = vld [vmem:[#allocation5 + $0x1f0] sm:$0xff]  ;;  %v774_v44 = vld [vmem:[#allocation5 + $0x208] sm:$0xff] }
 0x1ee   :  { %715 = vmatprep.mubr.f32.mxu1 %v437_v45  ;;  %15090 = vmatpush3.bf16.msra.mxu0 %v18269_v46  ;;  %v776_v45 = vld [vmem:[#allocation5 + $0x218] sm:$0xff] }
 0x1ef   :  { %15122 = vmatpush3.bf16.msra.mxu1 %v18273_v47 }
 0x1f0   :  { %571 = vmatmul.mubr.f32.gmra.mrb[16].mxu0 %v434_v48  ;;  %15188 = vmatprep.subr.bf16.mxu1 %v18182_v3  ;;  %v773_v48 = vld [vmem:[#allocation5 + $0x200] sm:$0xff] }
 0x1f1   :  { %716 = vmatmul.mubr.f32.gmra.mrb[16].mxu1 %v436_v49  ;;  %575 = vmatprep.mubr.f32.mxu0 %v439_v53  ;;  %v775_v49 = vld [vmem:[#allocation5 + $0x210] sm:$0xff]  ;;  %v778_v53 = vld [vmem:[#allocation5 + $0x228] sm:$0xff] }
 0x1f2   :  { %720 = vmatprep.mubr.f32.mxu1 %v441_v54  ;;  %v780_v54 = vld [vmem:[#allocation5 + $0x238] sm:$0xff] }
 0x1f4   :  { %576 = vmatmul.mubr.f32.gmra.mrb[18].mxu0 %v438_v55  ;;  %v777_v55 = vld [vmem:[#allocation5 + $0x220] sm:$0xff] }
 0x1f5   :  { %721 = vmatmul.mubr.f32.gmra.mrb[18].mxu1 %v440_v57  ;;  %580 = vmatprep.mubr.f32.mxu0 %v443_v58  ;;  %v779_v57 = vld [vmem:[#allocation5 + $0x230] sm:$0xff]  ;;  %v782_v58 = vld [vmem:[#allocation5 + $0x248] sm:$0xff] }
 0x1f6   :  { %725 = vmatprep.mubr.f32.mxu1 %v445_v59  ;;  %v784_v59 = vld [vmem:[#allocation5 + $0x258] sm:$0xff] }
 0x1f8   :  { %581 = vmatmul.mubr.f32.gmra.mrb[20].mxu0 %v442_v60  ;;  %v781_v60 = vld [vmem:[#allocation5 + $0x240] sm:$0xff] }
 0x1f9   :  { %726 = vmatmul.mubr.f32.gmra.mrb[20].mxu1 %v444_v61  ;;  %585 = vmatprep.mubr.f32.mxu0 %v447_v1  ;;  %v783_v61 = vld [vmem:[#allocation5 + $0x250] sm:$0xff]  ;;  %v786_v1 = vld [vmem:[#allocation5 + $0x268] sm:$0xff] }
 0x1fa   :  { %730 = vmatprep.mubr.f32.mxu1 %v449_v2  ;;  %v788_v2 = vld [vmem:[#allocation5 + $0x278] sm:$0xff] }
 0x1fc   :  { %586 = vmatmul.mubr.f32.gmra.mrb[22].mxu0 %v446_v4  ;;  %v785_v4 = vld [vmem:[#allocation5 + $0x260] sm:$0xff] }
 0x1fd   :  { %731 = vmatmul.mubr.f32.gmra.mrb[22].mxu1 %v448_v6  ;;  %590 = vmatprep.mubr.f32.mxu0 %v451_v9  ;;  %v787_v6 = vld [vmem:[#allocation5 + $0x270] sm:$0xff]  ;;  %v790_v9 = vld [vmem:[#allocation5 + $0x288] sm:$0xff] }
 0x1fe   :  { %735 = vmatprep.mubr.f32.mxu1 %v453_v10  ;;  %v792_v10 = vld [vmem:[#allocation5 + $0x298] sm:$0xff] }
 0x200   :  { %591 = vmatmul.mubr.f32.gmra.mrb[24].mxu0 %v450_v11  ;;  %v789_v11 = vld [vmem:[#allocation5 + $0x280] sm:$0xff] }
 0x201   :  { %736 = vmatmul.mubr.f32.gmra.mrb[24].mxu1 %v452_v13  ;;  %595 = vmatprep.mubr.f32.mxu0 %v455_v15  ;;  %v791_v13 = vld [vmem:[#allocation5 + $0x290] sm:$0xff]  ;;  %v794_v15 = vld [vmem:[#allocation5 + $0x2a8] sm:$0xff] }
 0x202   :  { %740 = vmatprep.mubr.f32.mxu1 %v457_v18  ;;  %v796_v18 = vld [vmem:[#allocation5 + $0x2b8] sm:$0xff] }
 0x204   :  { %596 = vmatmul.mubr.f32.gmra.mrb[26].mxu0 %v454_v22  ;;  %v793_v22 = vld [vmem:[#allocation5 + $0x2a0] sm:$0xff] }
 0x205   :  { %741 = vmatmul.mubr.f32.gmra.mrb[26].mxu1 %v456_v23  ;;  %600 = vmatprep.mubr.f32.mxu0 %v459_v24  ;;  %v795_v23 = vld [vmem:[#allocation5 + $0x2b0] sm:$0xff]  ;;  %v798_v24 = vld [vmem:[#allocation5 + $0x2c8] sm:$0xff] }
 0x206   :  { %745 = vmatprep.mubr.f32.mxu1 %v461_v28  ;;  %v800_v28 = vld [vmem:[#allocation5 + $0x2d8] sm:$0xff] }
 0x208   :  { %601 = vmatmul.mubr.f32.gmra.mrb[28].mxu0 %v458_v29  ;;  %v797_v29 = vld [vmem:[#allocation5 + $0x2c0] sm:$0xff] }
 0x209   :  { %746 = vmatmul.mubr.f32.gmra.mrb[28].mxu1 %v460_v31  ;;  %605 = vmatprep.mubr.f32.mxu0 %v463_v32  ;;  %v799_v31 = vld [vmem:[#allocation5 + $0x2d0] sm:$0xff]  ;;  %v802_v32 = vld [vmem:[#allocation5 + $0x2e8] sm:$0xff] }
 0x20a   :  { %750 = vmatprep.mubr.f32.mxu1 %v465_v33  ;;  %v804_v33 = vld [vmem:[#allocation5 + $0x2f8] sm:$0xff] }
 0x20c   :  { %606 = vmatmul.mubr.f32.gmra.mrb[30].mxu0 %v462_v40  ;;  %v801_v40 = vld [vmem:[#allocation5 + $0x2e0] sm:$0xff] }
 0x20d   :  { %751 = vmatmul.mubr.f32.gmra.mrb[30].mxu1 %v464_v41  ;;  %901 = vmatprep.mubr.f32.mxu0 %v774_v44  ;;  %v803_v41 = vld [vmem:[#allocation5 + $0x2f0] sm:$0xff]  ;;  %v806_v44 = vld [vmem:[#allocation5 + $0x308] sm:$0xff] }
 0x20e   :  { %1046 = vmatprep.mubr.f32.mxu1 %v776_v45  ;;  %v808_v45 = vld [vmem:[#allocation5 + $0x318] sm:$0xff] }
 0x210   :  { %902 = vmatmul.mubr.f32.vlgmr.msra.gmra.mrb[32].mxu0 %v773_v48  ;;  %v805_v48 = vld [vmem:[#allocation5 + $0x300] sm:$0xff] }
 0x211   :  { %1047 = vmatmul.mubr.f32.vlgmr.msra.gmra.mrb[32].mxu1 %v775_v49  ;;  %906 = vmatprep.mubr.f32.mxu0 %v778_v53  ;;  %v807_v49 = vld [vmem:[#allocation5 + $0x310] sm:$0xff]  ;;  %v810_v53 = vld [vmem:[#allocation5 + $0x328] sm:$0xff] }
 0x212   :  { %1051 = vmatprep.mubr.f32.mxu1 %v780_v54  ;;  %15190 = vmatpush3.bf16.msra.mxu1 %v18186_v8  ;;  %v812_v54 = vld [vmem:[#allocation5 + $0x338] sm:$0xff] }
 0x213   :  { %15192 = vmatprep.subr.bf16.mxu1 %v18193_v16 }
 0x214   :  { %907 = vmatmul.mubr.f32.gmra.mrb[34].mxu0 %v777_v55  ;;  %v809_v55 = vld [vmem:[#allocation5 + $0x320] sm:$0xff] }
 0x215   :  { %1052 = vmatmul.mubr.f32.gmra.mrb[34].mxu1 %v779_v57  ;;  %911 = vmatprep.mubr.f32.mxu0 %v782_v58  ;;  %v811_v57 = vld [vmem:[#allocation5 + $0x330] sm:$0xff]  ;;  %v814_v58 = vld [vmem:[#allocation5 + $0x348] sm:$0xff] }
 0x216   :  { %1056 = vmatprep.mubr.f32.mxu1 %v784_v59  ;;  %15194 = vmatpush3.bf16.msra.mxu1 %v18198_v21  ;;  %v816_v59 = vld [vmem:[#allocation5 + $0x358] sm:$0xff] }
 0x217   :  { %15196 = vmatprep.subr.bf16.mxu1 %v18204_v26 }
 0x218   :  { %912 = vmatmul.mubr.f32.gmra.mrb[36].mxu0 %v781_v60  ;;  %v813_v60 = vld [vmem:[#allocation5 + $0x340] sm:$0xff] }
 0x219   :  { %1057 = vmatmul.mubr.f32.gmra.mrb[36].mxu1 %v783_v61  ;;  %916 = vmatprep.mubr.f32.mxu0 %v786_v1  ;;  %v815_v61 = vld [vmem:[#allocation5 + $0x350] sm:$0xff]  ;;  %v818_v1 = vld [vmem:[#allocation5 + $0x368] sm:$0xff] }
 0x21a   :  { %1061 = vmatprep.mubr.f32.mxu1 %v788_v2  ;;  %15198 = vmatpush3.bf16.msra.mxu1 %v18209_v34  ;;  %v820_v2 = vld [vmem:[#allocation5 + $0x378] sm:$0xff] }
 0x21b   :  { %15200 = vmatprep.subr.bf16.mxu1 %v18215_v39 }
 0x21c   :  { %917 = vmatmul.mubr.f32.gmra.mrb[38].mxu0 %v785_v4  ;;  %v817_v4 = vld [vmem:[#allocation5 + $0x360] sm:$0xff] }
 0x21d   :  { %1062 = vmatmul.mubr.f32.gmra.mrb[38].mxu1 %v787_v6  ;;  %921 = vmatprep.mubr.f32.mxu0 %v790_v9  ;;  %v819_v6 = vld [vmem:[#allocation5 + $0x370] sm:$0xff]  ;;  %v822_v9 = vld [vmem:[#allocation5 + $0x388] sm:$0xff] }
 0x21e   :  { %1066 = vmatprep.mubr.f32.mxu1 %v792_v10  ;;  %15202 = vmatpush3.bf16.msra.mxu1 %v18221_v50  ;;  %v824_v10 = vld [vmem:[#allocation5 + $0x398] sm:$0xff] }
 0x21f   :  { %15204 = vmatprep.subr.bf16.mxu1 %v18227_v52 }
 0x220   :  { %922 = vmatmul.mubr.f32.gmra.mrb[40].mxu0 %v789_v11  ;;  %v821_v11 = vld [vmem:[#allocation5 + $0x380] sm:$0xff] }
 0x221   :  { %1067 = vmatmul.mubr.f32.gmra.mrb[40].mxu1 %v791_v13  ;;  %926 = vmatprep.mubr.f32.mxu0 %v794_v15  ;;  %v823_v13 = vld [vmem:[#allocation5 + $0x390] sm:$0xff]  ;;  %v826_v15 = vld [vmem:[#allocation5 + $0x3a8] sm:$0xff] }
 0x222   :  { %1071 = vmatprep.mubr.f32.mxu1 %v796_v18  ;;  %15206 = vmatpush3.bf16.msra.mxu1 %v18233_v62  ;;  %v828_v18 = vld [vmem:[#allocation5 + $0x3b8] sm:$0xff] }
 0x223   :  { %15208 = vmatprep.subr.bf16.mxu1 %v18239_v0 }
 0x224   :  { %927 = vmatmul.mubr.f32.gmra.mrb[42].mxu0 %v793_v22  ;;  %v825_v22 = vld [vmem:[#allocation5 + $0x3a0] sm:$0xff] }
 0x225   :  { %1072 = vmatmul.mubr.f32.gmra.mrb[42].mxu1 %v795_v23  ;;  %931 = vmatprep.mubr.f32.mxu0 %v798_v24  ;;  %v827_v23 = vld [vmem:[#allocation5 + $0x3b0] sm:$0xff]  ;;  %v830_v24 = vld [vmem:[#allocation5 + $0x3c8] sm:$0xff] }
 0x226   :  { %1076 = vmatprep.mubr.f32.mxu1 %v800_v28  ;;  %15210 = vmatpush3.bf16.msra.mxu1 %v18245_v14  ;;  %v832_v28 = vld [vmem:[#allocation5 + $0x3d8] sm:$0xff] }
 0x227   :  { %15212 = vmatprep.subr.bf16.mxu1 %v18251_v20 }
 0x228   :  { %932 = vmatmul.mubr.f32.gmra.mrb[44].mxu0 %v797_v29  ;;  %v829_v29 = vld [vmem:[#allocation5 + $0x3c0] sm:$0xff] }
 0x229   :  { %1077 = vmatmul.mubr.f32.gmra.mrb[44].mxu1 %v799_v31  ;;  %936 = vmatprep.mubr.f32.mxu0 %v802_v32  ;;  %v831_v31 = vld [vmem:[#allocation5 + $0x3d0] sm:$0xff]  ;;  %v834_v32 = vld [vmem:[#allocation5 + $0x3e8] sm:$0xff] }
 0x22a   :  { %1081 = vmatprep.mubr.f32.mxu1 %v804_v33  ;;  %15214 = vmatpush3.bf16.msra.mxu1 %v18257_v35  ;;  %v836_v33 = vld [vmem:[#allocation5 + $0x3f8] sm:$0xff] }
 0x22b   :  { %15216 = vmatprep.subr.bf16.mxu1 %v18263_v37 }
 0x22c   :  { %937 = vmatmul.mubr.f32.gmra.mrb[46].mxu0 %v801_v40  ;;  %v833_v40 = vld [vmem:[#allocation5 + $0x3e0] sm:$0xff] }
 0x22d   :  { %1082 = vmatmul.mubr.f32.gmra.mrb[46].mxu1 %v803_v41  ;;  %941 = vmatprep.mubr.f32.mxu0 %v806_v44  ;;  %v835_v41 = vld [vmem:[#allocation5 + $0x3f0] sm:$0xff]  ;;  %v1436_v44 = vld [vmem:[#allocation5 + $0x408] sm:$0xff] }
 0x22e   :  { %1086 = vmatprep.mubr.f32.mxu1 %v808_v45  ;;  %15218 = vmatpush3.bf16.msra.mxu1 %v18269_v46  ;;  %v1128_v45 = vld [vmem:[#allocation7 + $0x80] sm:$0xff] }
 0x22f   :  { %15284 = vmatprep.subr.bf16.mxu1 %v18182_v3 }
 0x230   :  { %942 = vmatmul.mubr.f32.gmra.mrb[48].mxu0 %v805_v48  ;;  %v1129_v48 = vld [vmem:[#allocation7 + $0x88] sm:$0xff] }
 0x231   :  { %1087 = vmatmul.mubr.f32.gmra.mrb[48].mxu1 %v807_v49  ;;  %946 = vmatprep.mubr.f32.mxu0 %v810_v53  ;;  %v15123_v49 = vpack.c.bf16 %v1129_v48, %v1128_v45  ;;  %v1435_v53 = vld [vmem:[#allocation5 + $0x400] sm:$0xff] }
 0x232   :  { %1091 = vmatprep.mubr.f32.mxu1 %v812_v54  ;;  %v1440_v54 = vld [vmem:[#allocation5 + $0x428] sm:$0xff]  ;;  %v1459_v48 = vld [vmem:[#allocation5 + $0x4c0] sm:$0xff] }
 0x233   :  { %15124 = vmatprep.subr.bf16.mxu0 %v15123_v49 }
 0x234   :  { %947 = vmatmul.mubr.f32.gmra.mrb[50].mxu0 %v809_v55  ;;  %v1130_v55 = vld [vmem:[#allocation7 + $0x90] sm:$0xff] }
 0x235   :  { %1092 = vmatmul.mubr.f32.gmra.mrb[50].mxu1 %v811_v57  ;;  %951 = vmatprep.mubr.f32.mxu0 %v814_v58  ;;  %v1131_v57 = vld [vmem:[#allocation7 + $0x98] sm:$0xff] }
 0x236   :  { %1096 = vmatprep.mubr.f32.mxu1 %v816_v59  ;;  %15126 = vmatpush3.bf16.msra.mxu0 %v15123_v49  ;;  %v15127_v58 = vpack.c.bf16 %v1131_v57, %v1130_v55  ;;  %v1439_v59 = vld [vmem:[#allocation5 + $0x420] sm:$0xff]  ;;  %v1464_v49 = vld [vmem:[#allocation5 + $0x4e8] sm:$0xff] }
 0x237   :  { %v1463_v57 = vld [vmem:[#allocation5 + $0x4e0] sm:$0xff] }
 0x238   :  { %952 = vmatmul.mubr.f32.gmra.mrb[52].mxu0 %v813_v60  ;;  %v1444_v60 = vld [vmem:[#allocation5 + $0x448] sm:$0xff]  ;;  %15128 = vmatprep.subr.bf16.mxu0 %v15127_v58 }
 0x239   :  { %1097 = vmatmul.mubr.f32.gmra.mrb[52].mxu1 %v815_v61  ;;  %956 = vmatprep.mubr.f32.mxu0 %v818_v1  ;;  %v1132_v61 = vld [vmem:[#allocation7 + $0xa0] sm:$0xff]  ;;  %v1133_v1 = vld [vmem:[#allocation7 + $0xa8] sm:$0xff] }
 0x23a   :  { %1101 = vmatprep.mubr.f32.mxu1 %v820_v2  ;;  %15130 = vmatpush3.bf16.msra.mxu0 %v15127_v58  ;;  %v15131_v2 = vpack.c.bf16 %v1133_v1, %v1132_v61  ;;  %v1468_v58 = vld [vmem:[#allocation5 + $0x508] sm:$0xff]  ;;  %v1471_v61 = vld [vmem:[#allocation5 + $0x520] sm:$0xff] }
 0x23b   :  { %v1476_v1 = vld [vmem:[#allocation5 + $0x548] sm:$0xff] }
 0x23c   :  { %957 = vmatmul.mubr.f32.gmra.mrb[54].mxu0 %v817_v4  ;;  %v1443_v4 = vld [vmem:[#allocation5 + $0x440] sm:$0xff]  ;;  %15132 = vmatprep.subr.bf16.mxu0 %v15131_v2 }
 0x23d   :  { %1102 = vmatmul.mubr.f32.gmra.mrb[54].mxu1 %v819_v6  ;;  %961 = vmatprep.mubr.f32.mxu0 %v822_v9  ;;  %v1448_v6 = vld [vmem:[#allocation5 + $0x468] sm:$0xff]  ;;  %v1134_v9 = vld [vmem:[#allocation7 + $0xb0] sm:$0xff] }
 0x23e   :  { %1106 = vmatprep.mubr.f32.mxu1 %v824_v10  ;;  %v1135_v10 = vld [vmem:[#allocation7 + $0xb8] sm:$0xff]  ;;  %15134 = vmatpush3.bf16.msra.mxu0 %v15131_v2  ;;  %v1475_v2 = vld [vmem:[#allocation5 + $0x540] sm:$0xff] }
 0x240   :  { %962 = vmatmul.mubr.f32.gmra.mrb[56].mxu0 %v821_v11  ;;  %v15135_v11 = vpack.c.bf16 %v1135_v10, %v1134_v9  ;;  %v1484_v9 = vld [vmem:[#allocation5 + $0x588] sm:$0xff]  ;;  %v1483_v10 = vld [vmem:[#allocation5 + $0x580] sm:$0xff] }
 0x241   :  { %1107 = vmatmul.mubr.f32.gmra.mrb[56].mxu1 %v823_v13  ;;  %966 = vmatprep.mubr.f32.mxu0 %v826_v15  ;;  %v1447_v13 = vld [vmem:[#allocation5 + $0x460] sm:$0xff]  ;;  %v1452_v15 = vld [vmem:[#allocation5 + $0x488] sm:$0xff] }
 0x242   :  { %1111 = vmatprep.mubr.f32.mxu1 %v828_v18  ;;  %15136 = vmatprep.subr.bf16.mxu0 %v15135_v11  ;;  %v1136_v18 = vld [vmem:[#allocation7 + $0xc0] sm:$0xff] }
 0x243   :  { %15138 = vmatpush3.bf16.msra.mxu0 %v15135_v11  ;;  %v1488_v11 = vld [vmem:[#allocation5 + $0x5a8] sm:$0xff] }
 0x244   :  { %967 = vmatmul.mubr.f32.gmra.mrb[58].mxu0 %v825_v22  ;;  %v1137_v22 = vld [vmem:[#allocation7 + $0xc8] sm:$0xff] }
 0x245   :  { %1112 = vmatmul.mubr.f32.gmra.mrb[58].mxu1 %v827_v23  ;;  %971 = vmatprep.mubr.f32.mxu0 %v830_v24  ;;  %v15139_v23 = vpack.c.bf16 %v1137_v22, %v1136_v18  ;;  %v1451_v24 = vld [vmem:[#allocation5 + $0x480] sm:$0xff]  ;;  %v1496_v22 = vld [vmem:[#allocation5 + $0x5e8] sm:$0xff] }
 0x246   :  { %1116 = vmatprep.mubr.f32.mxu1 %v832_v28  ;;  %v1456_v28 = vld [vmem:[#allocation5 + $0x4a8] sm:$0xff]  ;;  %v1491_v18 = vld [vmem:[#allocation5 + $0x5c0] sm:$0xff] }
 0x247   :  { %15140 = vmatprep.subr.bf16.mxu0 %v15139_v23 }
 0x248   :  { %972 = vmatmul.mubr.f32.gmra.mrb[60].mxu0 %v829_v29  ;;  %v1138_v29 = vld [vmem:[#allocation7 + $0xd0] sm:$0xff] }
 0x249   :  { %1117 = vmatmul.mubr.f32.gmra.mrb[60].mxu1 %v831_v31  ;;  %976 = vmatprep.mubr.f32.mxu0 %v834_v32  ;;  %v1139_v31 = vld [vmem:[#allocation7 + $0xd8] sm:$0xff] }
 0x24a   :  { %1121 = vmatprep.mubr.f32.mxu1 %v836_v33  ;;  %15142 = vmatpush3.bf16.msra.mxu0 %v15139_v23  ;;  %v15143_v32 = vpack.c.bf16 %v1139_v31, %v1138_v29  ;;  %v1455_v33 = vld [vmem:[#allocation5 + $0x4a0] sm:$0xff]  ;;  %v1969_v31 = vld [vmem:[#allocation5 + $0x608] sm:$0xff] }
 0x24b   :  { %v756_v23 = vld [vmem:[#allocation7] sm:$0xff] }
 0x24c   :  { %977 = vmatmul.mubr.f32.gmra.mrb[62].mxu0 %v833_v40  ;;  %v1460_v40 = vld [vmem:[#allocation5 + $0x4c8] sm:$0xff]  ;;  %15144 = vmatprep.subr.bf16.mxu0 %v15143_v32  ;;  %v1495_v29 = vld [vmem:[#allocation5 + $0x5e0] sm:$0xff] }
 0x24d   :  { %1122 = vmatmul.mubr.f32.gmra.mrb[62].mxu1 %v835_v41  ;;  %v1140_v41 = vld [vmem:[#allocation7 + $0xe0] sm:$0xff] }
 0x24e   :  { %1563 = vmatprep.mubr.f32.mxu1 %v1436_v44  ;;  %v1141_v44 = vld [vmem:[#allocation7 + $0xe8] sm:$0xff]  ;;  %15146 = vmatpush3.bf16.msra.mxu0 %v15143_v32  ;;  %v1968_v32 = vld [vmem:[#allocation5 + $0x600] sm:$0xff] }
 0x24f   :  { %v15147_v45 = vpack.c.bf16 %v1141_v44, %v1140_v41  ;;  %v1977_v41 = vld [vmem:[#allocation5 + $0x648] sm:$0xff]  ;;  %v1976_v44 = vld [vmem:[#allocation5 + $0x640] sm:$0xff] }
 0x251   :  { %1564 = vmatmul.mubr.f32.vlgmr.msra.gmra.mrb[64].mxu1 %v1435_v53  ;;  %15148 = vmatprep.subr.bf16.mxu0 %v15147_v45  ;;  %v1142_v53 = vld [vmem:[#allocation7 + $0xf0] sm:$0xff] }
 0x252   :  { %1568 = vmatprep.mubr.f32.mxu1 %v1440_v54  ;;  %15286 = vmatpush3.bf16.msra.mxu1 %v18186_v8  ;;  %v1143_v54 = vld [vmem:[#allocation7 + $0xf8] sm:$0xff] }
 0x253   :  { %15288 = vmatprep.subr.bf16.mxu1 %v18193_v16  ;;  %15150 = vmatpush3.bf16.msra.mxu0 %v15147_v45  ;;  %v15151_v55 = vpack.c.bf16 %v1143_v54, %v1142_v53  ;;  %v1981_v45 = vld [vmem:[#allocation5 + $0x668] sm:$0xff]  ;;  %v1984_v53 = vld [vmem:[#allocation5 + $0x680] sm:$0xff] }
 0x254   :  { %v1989_v54 = vld [vmem:[#allocation5 + $0x6a8] sm:$0xff] }
 0x255   :  { %1569 = vmatmul.mubr.f32.gmra.mrb[66].mxu1 %v1439_v59  ;;  %15152 = vmatprep.subr.bf16.mxu0 %v15151_v55  ;;  %v1467_v59 = vld [vmem:[#allocation5 + $0x500] sm:$0xff] }
 0x256   :  { %1573 = vmatprep.mubr.f32.mxu1 %v1444_v60  ;;  %15290 = vmatpush3.bf16.msra.mxu1 %v18198_v21  ;;  %v1472_v60 = vld [vmem:[#allocation5 + $0x528] sm:$0xff] }
 0x257   :  { %15292 = vmatprep.subr.bf16.mxu1 %v18204_v26  ;;  %15154 = vmatpush3.bf16.msra.mxu0 %v15151_v55  ;;  %v1988_v55 = vld [vmem:[#allocation5 + $0x6a0] sm:$0xff] }
 0x259   :  { %1574 = vmatmul.mubr.f32.gmra.mrb[68].mxu1 %v1443_v4  ;;  %v1480_v4 = vld [vmem:[#allocation5 + $0x568] sm:$0xff] }
 0x25a   :  { %1578 = vmatprep.mubr.f32.mxu1 %v1448_v6  ;;  %15294 = vmatpush3.bf16.msra.mxu1 %v18209_v34  ;;  %v1479_v6 = vld [vmem:[#allocation5 + $0x560] sm:$0xff] }
 0x25b   :  { %15296 = vmatprep.subr.bf16.mxu1 %v18215_v39 }
 0x25d   :  { %1579 = vmatmul.mubr.f32.gmra.mrb[70].mxu1 %v1447_v13  ;;  %v1487_v13 = vld [vmem:[#allocation5 + $0x5a0] sm:$0xff] }
 0x25e   :  { %1583 = vmatprep.mubr.f32.mxu1 %v1452_v15  ;;  %15298 = vmatpush3.bf16.msra.mxu1 %v18221_v50  ;;  %v1492_v15 = vld [vmem:[#allocation5 + $0x5c8] sm:$0xff] }
 0x25f   :  { %15300 = vmatprep.subr.bf16.mxu1 %v18227_v52 }
 0x261   :  { %1584 = vmatmul.mubr.f32.gmra.mrb[72].mxu1 %v1451_v24  ;;  %v757_v24 = vld [vmem:[#allocation7 + $0x8] sm:$0xff] }
 0x262   :  { %1588 = vmatprep.mubr.f32.mxu1 %v1456_v28  ;;  %15302 = vmatpush3.bf16.msra.mxu1 %v18233_v62  ;;  %v18343_v28 = vpack.c.bf16 %v757_v24, %v756_v23  ;;  %v1996_v23 = vld [vmem:[#allocation5 + $0x6e0] sm:$0xff] }
 0x263   :  { %15304 = vmatprep.subr.bf16.mxu1 %v18239_v0 }
 0x264   :  { %15156 = vmatprep.subr.bf16.mxu0 %v18343_v28 }
 0x265   :  { %1589 = vmatmul.mubr.f32.gmra.mrb[74].mxu1 %v1455_v33  ;;  %v1973_v33 = vld [vmem:[#allocation5 + $0x628] sm:$0xff] }
 0x266   :  { %1593 = vmatprep.mubr.f32.mxu1 %v1460_v40  ;;  %15306 = vmatpush3.bf16.msra.mxu1 %v18245_v14  ;;  %v1972_v40 = vld [vmem:[#allocation5 + $0x620] sm:$0xff] }
 0x267   :  { %15308 = vmatprep.subr.bf16.mxu1 %v18251_v20  ;;  %v758_v20 = vld [vmem:[#allocation7 + $0x10] sm:$0xff] }
 0x269   :  { %1594 = vmatmul.mubr.f32.gmra.mrb[76].mxu1 %v1459_v48  ;;  %v1980_v48 = vld [vmem:[#allocation5 + $0x660] sm:$0xff] }
 0x26a   :  { %1598 = vmatprep.mubr.f32.mxu1 %v1464_v49  ;;  %15310 = vmatpush3.bf16.msra.mxu1 %v18257_v35  ;;  %v1985_v49 = vld [vmem:[#allocation5 + $0x688] sm:$0xff] }
 0x26b   :  { %15312 = vmatprep.subr.bf16.mxu1 %v18263_v37 }
 0x26d   :  { %1599 = vmatmul.mubr.f32.gmra.mrb[78].mxu1 %v1463_v57 }
 0x26e   :  { %1603 = vmatprep.mubr.f32.mxu1 %v1468_v58  ;;  %15314 = vmatpush3.bf16.msra.mxu1 %v18269_v46  ;;  %v1993_v58 = vld [vmem:[#allocation5 + $0x6c8] sm:$0xff] }
 0x26f   :  { %15316 = vmatprep.subr.bf16.mxu1 %v18184_v7 }
 0x271   :  { %1604 = vmatmul.mubr.f32.gmra.mrb[80].mxu1 %v1467_v59 }
 0x272   :  { %1608 = vmatprep.mubr.f32.mxu1 %v1472_v60 }
 0x275   :  { %1609 = vmatmul.mubr.f32.gmra.mrb[82].mxu1 %v1471_v61 }
 0x276   :  { %1613 = vmatprep.mubr.f32.mxu1 %v1476_v1 }
 0x279   :  { %1614 = vmatmul.mubr.f32.gmra.mrb[84].mxu1 %v1475_v2 }
 0x27a   :  { %1618 = vmatprep.mubr.f32.mxu1 %v1480_v4  ;;  %v1992_v4 = vld [vmem:[#allocation5 + $0x6c0] sm:$0xff] }
 0x27d   :  { %1619 = vmatmul.mubr.f32.gmra.mrb[86].mxu1 %v1479_v6 }
 0x27e   :  { %1623 = vmatprep.mubr.f32.mxu1 %v1484_v9  ;;  %v1997_v9 = vld [vmem:[#allocation5 + $0x6e8] sm:$0xff] }
 0x281   :  { %1624 = vmatmul.mubr.f32.gmra.mrb[88].mxu1 %v1483_v10 }
 0x282   :  { %1628 = vmatprep.mubr.f32.mxu1 %v1488_v11 }
 0x285   :  { %1629 = vmatmul.mubr.f32.gmra.mrb[90].mxu1 %v1487_v13 }
 0x286   :  { %1633 = vmatprep.mubr.f32.mxu1 %v1492_v15 }
 0x289   :  { %1634 = vmatmul.mubr.f32.gmra.mrb[92].mxu1 %v1491_v18 }
 0x28a   :  { %1638 = vmatprep.mubr.f32.mxu1 %v1496_v22 }
 0x28d   :  { %1639 = vmatmul.mubr.f32.gmra.mrb[94].mxu1 %v1495_v29  ;;  %v2001_v29 = vld [vmem:[#allocation5 + $0x708] sm:$0xff] }
 0x28e   :  { %2096 = vmatprep.mubr.f32.mxu1 %v1969_v31 }
 0x291   :  { %2097 = vmatmul.mubr.f32.vlgmr.msra.gmra.mrb[96].mxu1 %v1968_v32 }
 0x292   :  { %2101 = vmatprep.mubr.f32.mxu1 %v1973_v33  ;;  %15318 = vmatpush3.bf16.msra.mxu1 %v18189_v12 }
 0x293   :  { %15320 = vmatprep.subr.bf16.mxu1 %v18195_v17 }
 0x295   :  { %2102 = vmatmul.mubr.f32.gmra.mrb[98].mxu1 %v1972_v40 }
 0x296   :  { %2106 = vmatprep.mubr.f32.mxu1 %v1977_v41  ;;  %15322 = vmatpush3.bf16.msra.mxu1 %v18202_v25 }
 0x297   :  { %15324 = vmatprep.subr.bf16.mxu1 %v18206_v30 }
 0x299   :  { %2107 = vmatmul.mubr.f32.gmra.mrb[100].mxu1 %v1976_v44 }
 0x29a   :  { %2111 = vmatprep.mubr.f32.mxu1 %v1981_v45  ;;  %15326 = vmatpush3.bf16.msra.mxu1 %v18213_v38  ;;  %v2000_v45 = vld [vmem:[#allocation5 + $0x700] sm:$0xff] }
 0x29b   :  { %15328 = vmatprep.subr.bf16.mxu1 %v18218_v43 }
 0x29d   :  { %2112 = vmatmul.mubr.f32.gmra.mrb[102].mxu1 %v1980_v48 }
 0x29e   :  { %2116 = vmatprep.mubr.f32.mxu1 %v1985_v49  ;;  %15330 = vmatpush3.bf16.msra.mxu1 %v18225_v51  ;;  %v2005_v49 = vld [vmem:[#allocation5 + $0x728] sm:$0xff] }
 0x29f   :  { %15332 = vmatprep.subr.bf16.mxu1 %v18230_v56 }
 0x2a1   :  { %2117 = vmatmul.mubr.f32.gmra.mrb[104].mxu1 %v1984_v53 }
 0x2a2   :  { %2121 = vmatprep.mubr.f32.mxu1 %v1989_v54  ;;  %15334 = vmatpush3.bf16.msra.mxu1 %v18237_v63 }
 0x2a3   :  { %v10400_v57 = vpop.f32.mrb[0].mxu0  ;;  %15336 = vmatprep.subr.bf16.mxu1 %v18242_v5 }
 0x2a4   :  { %v10480_v59 = vpop.f32.mrb[0].mxu1  ;;  %v10401_v60 = vpop.f32.mrb[1].mxu0 }
 0x2a5   :  { %v10402_v61 = vadd.f32 %v10401_v60, %v10400_v57  ;;  %v10481_v1 = vpop.f32.mrb[1].mxu1  ;;  %2122 = vmatmul.mubr.f32.gmra.mrb[106].mxu1 %v1988_v55  ;;  %v2004_v60 = vld [vmem:[#allocation5 + $0x720] sm:$0xff] }
 0x2a6   :  { %v10482_v2 = vadd.f32 %v10481_v1, %v10480_v59  ;;  %2126 = vmatprep.mubr.f32.mxu1 %v1993_v58  ;;  %15338 = vmatpush3.bf16.msra.mxu1 %v18249_v19  ;;  %v2009_v1 = vld [vmem:[#allocation5 + $0x748] sm:$0xff] }
 0x2a7   :  { %v10403_v6 = vpop.f32.mrb[2].mxu0  ;;  %15340 = vmatprep.subr.bf16.mxu1 %v18254_v27 }
 0x2a8   :  { %v10483_v10 = vpop.f32.mrb[2].mxu1  ;;  %v10404_v11 = vpop.f32.mrb[3].mxu0  ;;  %v18358_v13 = vadd.f32 %v10482_v2, %v10402_v61 }
 0x2a9   :  { %v10405_v15 = vadd.f32 %v10404_v11, %v10403_v6  ;;  %v10484_v18 = vpop.f32.mrb[3].mxu1  ;;  %2127 = vmatmul.mubr.f32.gmra.mrb[108].mxu1 %v1992_v4 }
 0x2aa   :  { %v10485_v22 = vadd.f32 %v10484_v18, %v10483_v10  ;;  %2131 = vmatprep.mubr.f32.mxu1 %v1997_v9  ;;  %15342 = vmatpush3.bf16.msra.mxu1 %v18261_v36 }
 0x2ab   :  { %v10406_v24 = vpop.f32.mrb[4].mxu0  ;;  %15344 = vmatprep.subr.bf16.mxu1 %v18266_v42 }
 0x2ac   :  { %v18362_v31 = vadd.f32 %v10485_v22, %v10405_v15  ;;  %v10486_v32 = vpop.f32.mrb[4].mxu1  ;;  %v10407_v33 = vpop.f32.mrb[5].mxu0  ;;  %v2008_v15 = vld [vmem:[#allocation5 + $0x740] sm:$0xff]  ;;  %v2013_v22 = vld [vmem:[#allocation5 + $0x768] sm:$0xff] }
 0x2ad   :  { %v10408_v40 = vadd.f32 %v10407_v33, %v10406_v24  ;;  %v10487_v41 = vpop.f32.mrb[5].mxu1  ;;  %2132 = vmatmul.mubr.f32.gmra.mrb[110].mxu1 %v1996_v23 }
 0x2ae   :  { %v10488_v44 = vadd.f32 %v10487_v41, %v10486_v32  ;;  %2136 = vmatprep.mubr.f32.mxu1 %v2001_v29  ;;  %15346 = vmatpush3.bf16.msra.mxu1 %v18273_v47  ;;  %v2012_v41 = vld [vmem:[#allocation5 + $0x760] sm:$0xff] }
 0x2af   :  { %v10409_v48 = vpop.f32.mrb[6].mxu0  ;;  %15412 = vmatprep.subr.bf16.mxu1 %v18184_v7 }
 0x2b0   :  { %v10489_v53 = vpop.f32.mrb[6].mxu1  ;;  %v10410_v54 = vpop.f32.mrb[7].mxu0  ;;  %v18366_v55 = vadd.f32 %v10488_v44, %v10408_v40 }
 0x2b1   :  { %v10411_v57 = vadd.f32 %v10410_v54, %v10409_v48  ;;  %v10490_v58 = vpop.f32.mrb[7].mxu1  ;;  %2137 = vmatmul.mubr.f32.gmra.mrb[112].mxu1 %v2000_v45  ;;  %v2017_v45 = vld [vmem:[#allocation5 + $0x788] sm:$0xff] }
 0x2b2   :  { %v10491_v59 = vadd.f32 %v10490_v58, %v10489_v53  ;;  %2141 = vmatprep.mubr.f32.mxu1 %v2005_v49 }
 0x2b3   :  { %v10412_v61 = vpop.f32.mrb[8].mxu0 }
 0x2b4   :  { %v10492_v2 = vpop.f32.mrb[8].mxu1  ;;  %v10413_v4 = vpop.f32.mrb[9].mxu0  ;;  %v18368_v6 = vadd.f32 %v10491_v59, %v10411_v57  ;;  %v2016_v59 = vld [vmem:[#allocation5 + $0x780] sm:$0xff] }
 0x2b5   :  { %v10414_v9 = vadd.f32 %v10413_v4, %v10412_v61  ;;  %v10493_v10 = vpop.f32.mrb[9].mxu1  ;;  %2142 = vmatmul.mubr.f32.gmra.mrb[114].mxu1 %v2004_v60  ;;  %v2021_v61 = vld [vmem:[#allocation5 + $0x7a8] sm:$0xff] }
 0x2b6   :  { %v10494_v11 = vadd.f32 %v10493_v10, %v10492_v2  ;;  %2146 = vmatprep.mubr.f32.mxu1 %v2009_v1 }
 0x2b7   :  { %v10415_v18 = vpop.f32.mrb[10].mxu0 }
 0x2b8   :  { %v10495_v23 = vpop.f32.mrb[10].mxu1  ;;  %v10416_v24 = vpop.f32.mrb[11].mxu0  ;;  %v18370_v29 = vadd.f32 %v10494_v11, %v10414_v9 }
 0x2b9   :  { %v10417_v32 = vadd.f32 %v10416_v24, %v10415_v18  ;;  %v10496_v33 = vpop.f32.mrb[11].mxu1  ;;  %2147 = vmatmul.mubr.f32.gmra.mrb[116].mxu1 %v2008_v15  ;;  %v2020_v15 = vld [vmem:[#allocation5 + $0x7a0] sm:$0xff] }
 0x2ba   :  { %v10497_v40 = vadd.f32 %v10496_v33, %v10495_v23  ;;  %2151 = vmatprep.mubr.f32.mxu1 %v2013_v22  ;;  %v2025_v22 = vld [vmem:[#allocation5 + $0x7c8] sm:$0xff] }
 0x2bb   :  { %v10418_v44 = vpop.f32.mrb[12].mxu0 }
 0x2bc   :  { %v10498_v48 = vpop.f32.mrb[12].mxu1  ;;  %v10419_v49 = vpop.f32.mrb[13].mxu0  ;;  %v18372_v53 = vadd.f32 %v10497_v40, %v10417_v32 }
 0x2bd   :  { %v10420_v54 = vadd.f32 %v10419_v49, %v10418_v44  ;;  %v10499_v57 = vpop.f32.mrb[13].mxu1  ;;  %2152 = vmatmul.mubr.f32.gmra.mrb[118].mxu1 %v2012_v41  ;;  %v2024_v44 = vld [vmem:[#allocation5 + $0x7c0] sm:$0xff] }
 0x2be   :  { %v10500_v58 = vadd.f32 %v10499_v57, %v10498_v48  ;;  %2156 = vmatprep.mubr.f32.mxu1 %v2017_v45  ;;  %v2029_v48 = vld [vmem:[#allocation5 + $0x7e8] sm:$0xff] }
 0x2bf   :  { %v10421_v60 = vpop.f32.mrb[14].mxu0 }
 0x2c0   :  { %v10501_v1 = vpop.f32.mrb[14].mxu1  ;;  %v10422_v2 = vpop.f32.mrb[15].mxu0  ;;  %v18374_v4 = vadd.f32 %v10500_v58, %v10420_v54 }
 0x2c1   :  { %v10423_v9 = vadd.f32 %v10422_v2, %v10421_v60  ;;  %v10502_v10 = vpop.f32.mrb[15].mxu1  ;;  %2157 = vmatmul.mubr.f32.gmra.mrb[120].mxu1 %v2016_v59  ;;  %v1971_v2 = vld [vmem:[#allocation5 + $0x618] sm:$0xff] }
 0x2c2   :  { %v10503_v11 = vadd.f32 %v10502_v10, %v10501_v1  ;;  %2161 = vmatprep.mubr.f32.mxu1 %v2021_v61  ;;  %v2028_v61 = vld [vmem:[#allocation5 + $0x7e0] sm:$0xff] }
 0x2c3   :  { %v10424_v18 = vpop.f32.mrb[16].mxu0 }
 0x2c4   :  { %v10504_v23 = vpop.f32.mrb[16].mxu1  ;;  %v10425_v24 = vpop.f32.mrb[17].mxu0  ;;  %v18376_v32 = vadd.f32 %v10503_v11, %v10423_v9 }
 0x2c5   :  { %v10426_v33 = vadd.f32 %v10425_v24, %v10424_v18  ;;  %v10505_v40 = vpop.f32.mrb[17].mxu1  ;;  %2162 = vmatmul.mubr.f32.gmra.mrb[122].mxu1 %v2020_v15 }
 0x2c6   :  { %v10506_v41 = vadd.f32 %v10505_v40, %v10504_v23  ;;  %2166 = vmatprep.mubr.f32.mxu1 %v2025_v22  ;;  %v1970_v23 = vld [vmem:[#allocation5 + $0x610] sm:$0xff] }
 0x2c7   :  { %v10427_v45 = vpop.f32.mrb[18].mxu0 }
 0x2c8   :  { %v10507_v49 = vpop.f32.mrb[18].mxu1  ;;  %v10428_v54 = vpop.f32.mrb[19].mxu0  ;;  %v18378_v57 = vadd.f32 %v10506_v41, %v10426_v33  ;;  %v1975_v33 = vld [vmem:[#allocation5 + $0x638] sm:$0xff] }
 0x2c9   :  { %v10429_v58 = vadd.f32 %v10428_v54, %v10427_v45  ;;  %v10508_v59 = vpop.f32.mrb[19].mxu1  ;;  %2167 = vmatmul.mubr.f32.gmra.mrb[124].mxu1 %v2024_v44  ;;  %v1974_v54 = vld [vmem:[#allocation5 + $0x630] sm:$0xff] }
 0x2ca   :  { %v10509_v60 = vadd.f32 %v10508_v59, %v10507_v49  ;;  %2171 = vmatprep.mubr.f32.mxu1 %v2029_v48  ;;  %v1979_v59 = vld [vmem:[#allocation5 + $0x658] sm:$0xff] }
 0x2cb   :  { %v10430_v1 = vpop.f32.mrb[20].mxu0 }
 0x2cc   :  { %v10510_v9 = vpop.f32.mrb[20].mxu1  ;;  %v10431_v10 = vpop.f32.mrb[21].mxu0  ;;  %v18380_v11 = vadd.f32 %v10509_v60, %v10429_v58 }
 0x2cd   :  { %v10432_v15 = vadd.f32 %v10431_v10, %v10430_v1  ;;  %v10511_v18 = vpop.f32.mrb[21].mxu1  ;;  %2172 = vmatmul.mubr.f32.gmra.mrb[126].mxu1 %v2028_v61 }
 0x2ce   :  { %v10512_v22 = vadd.f32 %v10511_v18, %v10510_v9  ;;  %2241 = vmatprep.mubr.f32.mxu1 %v1971_v2 }
 0x2cf   :  { %v10433_v24 = vpop.f32.mrb[22].mxu0 }
 0x2d0   :  { %v10513_v40 = vpop.f32.mrb[22].mxu1  ;;  %v10434_v41 = vpop.f32.mrb[23].mxu0  ;;  %v18382_v44 = vadd.f32 %v10512_v22, %v10432_v15  ;;  %v1978_v15 = vld [vmem:[#allocation5 + $0x650] sm:$0xff]  ;;  %v1983_v22 = vld [vmem:[#allocation5 + $0x678] sm:$0xff] }
 0x2d1   :  { %v10435_v45 = vadd.f32 %v10434_v41, %v10433_v24  ;;  %v10514_v48 = vpop.f32.mrb[23].mxu1  ;;  %2242 = vmatmul.mubr.f32.vlgmr.msra.gmra.mrb[128].mxu1 %v1970_v23 }
 0x2d2   :  { %v10515_v49 = vadd.f32 %v10514_v48, %v10513_v40  ;;  %2246 = vmatprep.mubr.f32.mxu1 %v1975_v33  ;;  %15414 = vmatpush3.bf16.msra.mxu1 %v18189_v12  ;;  %v1982_v48 = vld [vmem:[#allocation5 + $0x670] sm:$0xff] }
 0x2d3   :  { %v10436_v58 = vpop.f32.mrb[24].mxu0  ;;  %15416 = vmatprep.subr.bf16.mxu1 %v18195_v17 }
 0x2d4   :  { %v10516_v60 = vpop.f32.mrb[24].mxu1  ;;  %v10437_v61 = vpop.f32.mrb[25].mxu0  ;;  %v18386_v1 = vadd.f32 %v10515_v49, %v10435_v45 }
 0x2d5   :  { %v10438_v2 = vadd.f32 %v10437_v61, %v10436_v58  ;;  %v10517_v9 = vpop.f32.mrb[25].mxu1  ;;  %2247 = vmatmul.mubr.f32.gmra.mrb[130].mxu1 %v1974_v54  ;;  %v1987_v54 = vld [vmem:[#allocation5 + $0x698] sm:$0xff] }
 0x2d6   :  { %v10518_v10 = vadd.f32 %v10517_v9, %v10516_v60  ;;  %2251 = vmatprep.mubr.f32.mxu1 %v1979_v59  ;;  %15418 = vmatpush3.bf16.msra.mxu1 %v18202_v25 }
 0x2d7   :  { %v10439_v18 = vpop.f32.mrb[26].mxu0  ;;  %15420 = vmatprep.subr.bf16.mxu1 %v18206_v30 }
 0x2d8   :  { %v10519_v23 = vpop.f32.mrb[26].mxu1  ;;  %v10440_v24 = vpop.f32.mrb[27].mxu0  ;;  %v18390_v33 = vadd.f32 %v10518_v10, %v10438_v2  ;;  %v1986_v10 = vld [vmem:[#allocation5 + $0x690] sm:$0xff] }
 0x2d9   :  { %v10441_v40 = vadd.f32 %v10440_v24, %v10439_v18  ;;  %v10520_v41 = vpop.f32.mrb[27].mxu1  ;;  %2252 = vmatmul.mubr.f32.gmra.mrb[132].mxu1 %v1978_v15  ;;  %v1991_v18 = vld [vmem:[#allocation5 + $0x6b8] sm:$0xff] }
 0x2da   :  { %v10521_v45 = vadd.f32 %v10520_v41, %v10519_v23  ;;  %2256 = vmatprep.mubr.f32.mxu1 %v1983_v22  ;;  %15422 = vmatpush3.bf16.msra.mxu1 %v18213_v38 }
 0x2db   :  { %v10442_v49 = vpop.f32.mrb[28].mxu0  ;;  %15424 = vmatprep.subr.bf16.mxu1 %v18218_v43 }
 0x2dc   :  { %v10522_v58 = vpop.f32.mrb[28].mxu1  ;;  %v10443_v59 = vpop.f32.mrb[29].mxu0  ;;  %v18394_v60 = vadd.f32 %v10521_v45, %v10441_v40  ;;  %v1990_v45 = vld [vmem:[#allocation5 + $0x6b0] sm:$0xff] }
 0x2dd   :  { %v10444_v61 = vadd.f32 %v10443_v59, %v10442_v49  ;;  %v10523_v9 = vpop.f32.mrb[29].mxu1  ;;  %2257 = vmatmul.mubr.f32.gmra.mrb[134].mxu1 %v1982_v48  ;;  %v1995_v49 = vld [vmem:[#allocation5 + $0x6d8] sm:$0xff] }
 0x2de   :  { %v10524_v2 = vadd.f32 %v10523_v9, %v10522_v58  ;;  %2261 = vmatprep.mubr.f32.mxu1 %v1987_v54  ;;  %15426 = vmatpush3.bf16.msra.mxu1 %v18225_v51 }
 0x2df   :  { %v10445_v15 = vpop.f32.mrb[30].mxu0  ;;  %15428 = vmatprep.subr.bf16.mxu1 %v18230_v56 }
 0x2e0   :  { %v10525_v22 = vpop.f32.mrb[30].mxu1  ;;  %v10446_v23 = vpop.f32.mrb[31].mxu0  ;;  %v18398_v24 = vadd.f32 %v10524_v2, %v10444_v61  ;;  %v1994_v2 = vld [vmem:[#allocation5 + $0x6d0] sm:$0xff] }
 0x2e1   :  { %v10447_v41 = vadd.f32 %v10446_v23, %v10445_v15  ;;  %v10526_v46 = vpop.f32.mrb[31].mxu1  ;;  %2262 = vmatmul.mubr.f32.gmra.mrb[136].mxu1 %v1986_v10  ;;  %v1999_v10 = vld [vmem:[#allocation5 + $0x6f8] sm:$0xff] }
 0x2e2   :  { %v10527_v40 = vadd.f32 %v10526_v46, %v10525_v22  ;;  %2266 = vmatprep.mubr.f32.mxu1 %v1991_v18  ;;  %15430 = vmatpush3.bf16.msra.mxu1 %v18237_v63 }
 0x2e3   :  { %v10560_v48 = vpop.f32.mrb[32].mxu0  ;;  %15432 = vmatprep.subr.bf16.mxu1 %v18242_v5 }
 0x2e4   :  { %v10640_v54 = vpop.f32.mrb[32].mxu1  ;;  %v10561_v58 = vpop.f32.mrb[33].mxu0  ;;  %v18402_v59 = vadd.f32 %v10527_v40, %v10447_v41  ;;  %v759_v41 = vld [vmem:[#allocation7 + $0x18] sm:$0xff] }
 0x2e5   :  { %v10562_v9 = vadd.f32 %v10561_v58, %v10560_v48  ;;  %v10641_v37 = vpop.f32.mrb[33].mxu1  ;;  %2267 = vmatmul.mubr.f32.gmra.mrb[138].mxu1 %v1990_v45  ;;  %v2003_v48 = vld [vmem:[#allocation5 + $0x718] sm:$0xff]  ;;  %v15159_v14 = vpack.c.bf16 %v759_v41, %v758_v20 }
 0x2e6   :  { %v10642_v61 = vadd.f32 %v10641_v37, %v10640_v54  ;;  %2271 = vmatprep.mubr.f32.mxu1 %v1995_v49  ;;  %15434 = vmatpush3.bf16.msra.mxu1 %v18249_v19  ;;  %v1998_v37 = vld [vmem:[#allocation5 + $0x6f0] sm:$0xff] }
 0x2e7   :  { %v10563_v46 = vpop.f32.mrb[34].mxu0  ;;  %15436 = vmatprep.subr.bf16.mxu1 %v18254_v27 }
 0x2e8   :  { %v10643_v15 = vpop.f32.mrb[34].mxu1  ;;  %v10564_v18 = vpop.f32.mrb[35].mxu0  ;;  %v1049_v22 = vadd.f32 %v10642_v61, %v10562_v9 }
 0x2e9   :  { %v10565_v23 = vadd.f32 %v10564_v18, %v10563_v46  ;;  %v10644_v35 = vpop.f32.mrb[35].mxu1  ;;  %2272 = vmatmul.mubr.f32.gmra.mrb[140].mxu1 %v1994_v2  ;;  %v760_v46 = vld [vmem:[#allocation7 + $0x20] sm:$0xff]  ;;  %v761_v18 = vld [vmem:[#allocation7 + $0x28] sm:$0xff] }
 0x2ea   :  { %v10645_v40 = vadd.f32 %v10644_v35, %v10643_v15  ;;  %12925 = vmatprep.mubr.f32.mxu0 %v1049_v22  ;;  %2276 = vmatprep.mubr.f32.mxu1 %v1999_v10  ;;  %v2002_v35 = vld [vmem:[#allocation5 + $0x710] sm:$0xff]  ;;  %v2007_v15 = vld [vmem:[#allocation5 + $0x738] sm:$0xff]  ;;  %v15163_v41 = vpack.c.bf16 %v761_v18, %v760_v46 }
 0x2eb   :  { %v10566_v45 = vpop.f32.mrb[36].mxu0  ;;  %15438 = vmatpush3.bf16.msra.mxu1 %v18261_v36 }
 0x2ec   :  { %v1054_v49 = vadd.f32 %v10645_v40, %v10565_v23  ;;  %v10646_v54 = vpop.f32.mrb[36].mxu1  ;;  %v10567_v58 = vpop.f32.mrb[37].mxu0  ;;  %15440 = vmatprep.subr.bf16.mxu1 %v18266_v42 }
 0x2ed   :  { %v10568_v9 = vadd.f32 %v10567_v58, %v10566_v45  ;;  %v10647_v61 = vpop.f32.mrb[37].mxu1  ;;  %2277 = vmatmul.mubr.f32.gmra.mrb[142].mxu1 %v1998_v37  ;;  %v762_v37 = vld [vmem:[#allocation7 + $0x30] sm:$0xff]  ;;  %v2011_v58 = vld [vmem:[#allocation5 + $0x758] sm:$0xff] }
 0x2ee   :  { %v10648_v2 = vadd.f32 %v10647_v61, %v10646_v54  ;;  %12926 = vmatmul.mubr.f32.vlgmr.msra.gmra.mrb[64].mxu0 %v1054_v49  ;;  %2281 = vmatprep.mubr.f32.mxu1 %v2003_v48  ;;  %v763_v54 = vld [vmem:[#allocation7 + $0x38] sm:$0xff]  ;;  %v2006_v49 = vld [vmem:[#allocation5 + $0x730] sm:$0xff] }
 0x2ef   :  { %v10569_v10 = vpop.f32.mrb[38].mxu0  ;;  %15158 = vmatpush3.bf16.msra.mxu0 %v18343_v28  ;;  %15442 = vmatpush3.bf16.msra.mxu1 %v18273_v47 }
 0x2f0   :  { %v10649_v22 = vpop.f32.mrb[38].mxu1  ;;  %v10570_v23 = vpop.f32.mrb[39].mxu0  ;;  %v1059_v20 = vadd.f32 %v10648_v2, %v10568_v9  ;;  %15160 = vmatprep.subr.bf16.mxu0 %v15159_v14  ;;  %15476 = vmatprep.subr.bf16.mxu1 %v18182_v3  ;;  %v15167_v9 = vpack.c.bf16 %v763_v54, %v762_v37  ;;  %v764_v2 = vld [vmem:[#allocation7 + $0x40] sm:$0xff]  ;;  %v766_v37 = vld [vmem:[#allocation7 + $0x50] sm:$0xff] }
 0x2f1   :  { %v10571_v40 = vadd.f32 %v10570_v23, %v10569_v10  ;;  %v10650_v45 = vpop.f32.mrb[39].mxu1  ;;  %2282 = vmatmul.mubr.f32.gmra.mrb[144].mxu1 %v2002_v35  ;;  %v765_v10 = vld [vmem:[#allocation7 + $0x48] sm:$0xff]  ;;  %v2010_v35 = vld [vmem:[#allocation5 + $0x750] sm:$0xff] }
 0x2f2   :  { %v10651_v48 = vadd.f32 %v10650_v45, %v10649_v22  ;;  %12928 = vmatprep.mubr.f32.mxu0 %v1059_v20  ;;  %2286 = vmatprep.mubr.f32.mxu1 %v2007_v15  ;;  %v2015_v15 = vld [vmem:[#allocation5 + $0x778] sm:$0xff]  ;;  %v15171_v3 = vpack.c.bf16 %v765_v10, %v764_v2  ;;  %v768_v2 = vld [vmem:[#allocation7 + $0x60] sm:$0xff]  ;;  %v769_v10 = vld [vmem:[#allocation7 + $0x68] sm:$0xff] }
 0x2f3   :  { %v10572_v28 = vpop.f32.mrb[40].mxu0  ;;  %15162 = vmatpush3.bf16.msra.mxu0 %v15159_v14 }
 0x2f4   :  { %v10652_v61 = vpop.f32.mrb[40].mxu1  ;;  %v10573_v0 = vpop.f32.mrb[41].mxu0  ;;  %v1064_v62 = vadd.f32 %v10651_v48, %v10571_v40  ;;  %15164 = vmatprep.subr.bf16.mxu0 %v15163_v41 }
 0x2f5   :  { %v10574_v46 = vadd.f32 %v10573_v0, %v10572_v28  ;;  %v10653_v18 = vpop.f32.mrb[41].mxu1  ;;  %2287 = vmatmul.mubr.f32.gmra.mrb[146].mxu1 %v2006_v49  ;;  %v767_v0 = vld [vmem:[#allocation7 + $0x58] sm:$0xff]  ;;  %v2014_v49 = vld [vmem:[#allocation5 + $0x770] sm:$0xff] }
 0x2f6   :  { %v10654_v23 = vadd.f32 %v10653_v18, %v10652_v61  ;;  %12929 = vmatmul.mubr.f32.gmra.mrb[66].mxu0 %v1064_v62  ;;  %2291 = vmatprep.mubr.f32.mxu1 %v2011_v58  ;;  %v2019_v28 = vld [vmem:[#allocation5 + $0x798] sm:$0xff]  ;;  %v15175_v18 = vpack.c.bf16 %v767_v0, %v766_v37  ;;  %v770_v37 = vld [vmem:[#allocation7 + $0x70] sm:$0xff] }
 0x2f7   :  { %v10575_v22 = vpop.f32.mrb[42].mxu0  ;;  %15166 = vmatpush3.bf16.msra.mxu0 %v15163_v41  ;;  %v771_v0 = vld [vmem:[#allocation7 + $0x78] sm:$0xff] }
 0x2f8   :  { %v10655_v20 = vpop.f32.mrb[42].mxu1  ;;  %v10576_v14 = vpop.f32.mrb[43].mxu0  ;;  %v1069_v45 = vadd.f32 %v10654_v23, %v10574_v46  ;;  %15168 = vmatprep.subr.bf16.mxu0 %v15167_v9 }
 0x2f9   :  { %v10577_v40 = vadd.f32 %v10576_v14, %v10575_v22  ;;  %v10656_v48 = vpop.f32.mrb[43].mxu1  ;;  %2292 = vmatmul.mubr.f32.gmra.mrb[148].mxu1 %v2010_v35  ;;  %v2018_v35 = vld [vmem:[#allocation5 + $0x790] sm:$0xff] }
 0x2fa   :  { %v10657_v54 = vadd.f32 %v10656_v48, %v10655_v20  ;;  %12931 = vmatprep.mubr.f32.mxu0 %v1069_v45  ;;  %2296 = vmatprep.mubr.f32.mxu1 %v2015_v15  ;;  %v2023_v15 = vld [vmem:[#allocation5 + $0x7b8] sm:$0xff]  ;;  %v15179_v48 = vpack.c.bf16 %v769_v10, %v768_v2  ;;  %v2026_v10 = vld [vmem:[#allocation5 + $0x7d0] sm:$0xff] }
 0x2fb   :  { %v10578_v62 = vpop.f32.mrb[44].mxu0  ;;  %15170 = vmatpush3.bf16.msra.mxu0 %v15167_v9 }
 0x2fc   :  { %v10658_v58 = vpop.f32.mrb[44].mxu1  ;;  %v10579_v41 = vpop.f32.mrb[45].mxu0  ;;  %v1074_v61 = vadd.f32 %v10657_v54, %v10577_v40  ;;  %15172 = vmatprep.subr.bf16.mxu0 %v15171_v3 }
 0x2fd   :  { %v10580_v46 = vadd.f32 %v10579_v41, %v10578_v62  ;;  %v10659_v23 = vpop.f32.mrb[45].mxu1  ;;  %2297 = vmatmul.mubr.f32.gmra.mrb[150].mxu1 %v2014_v49  ;;  %v2022_v49 = vld [vmem:[#allocation5 + $0x7b0] sm:$0xff] }
 0x2fe   :  { %v10660_v22 = vadd.f32 %v10659_v23, %v10658_v58  ;;  %12932 = vmatmul.mubr.f32.gmra.mrb[68].mxu0 %v1074_v61  ;;  %2301 = vmatprep.mubr.f32.mxu1 %v2019_v28  ;;  %v2027_v28 = vld [vmem:[#allocation5 + $0x7d8] sm:$0xff]  ;;  %v15183_v23 = vpack.c.bf16 %v771_v0, %v770_v37 }
 0x2ff   :  { %v10581_v20 = vpop.f32.mrb[46].mxu0  ;;  %15174 = vmatpush3.bf16.msra.mxu0 %v15171_v3 }
 0x300   :  { %v10661_v14 = vpop.f32.mrb[46].mxu1  ;;  %v10582_v9 = vpop.f32.mrb[47].mxu0  ;;  %v1079_v45 = vadd.f32 %v10660_v22, %v10580_v46  ;;  %15176 = vmatprep.subr.bf16.mxu0 %v15175_v18 }
 0x301   :  { %v10583_v40 = vadd.f32 %v10582_v9, %v10581_v20  ;;  %v10662_v54 = vpop.f32.mrb[47].mxu1  ;;  %2302 = vmatmul.mubr.f32.gmra.mrb[152].mxu1 %v2018_v35  ;;  %v2031_v20 = vld [vmem:[#allocation5 + $0x7f8] sm:$0xff] }
 0x302   :  { %v10663_v62 = vadd.f32 %v10662_v54, %v10661_v14  ;;  %12934 = vmatprep.mubr.f32.mxu0 %v1079_v45  ;;  %2306 = vmatprep.mubr.f32.mxu1 %v2023_v15  ;;  %v2030_v54 = vld [vmem:[#allocation5 + $0x7f0] sm:$0xff] }
 0x303   :  { %v10584_v58 = vpop.f32.mrb[48].mxu0  ;;  %15178 = vmatpush3.bf16.msra.mxu0 %v15175_v18 }
 0x304   :  { %v10664_v41 = vpop.f32.mrb[48].mxu1  ;;  %v10585_v3 = vpop.f32.mrb[49].mxu0  ;;  %v1084_v61 = vadd.f32 %v10663_v62, %v10583_v40  ;;  %15180 = vmatprep.subr.bf16.mxu0 %v15179_v48 }
 0x305   :  { %v10586_v46 = vadd.f32 %v10585_v3, %v10584_v58  ;;  %v10665_v22 = vpop.f32.mrb[49].mxu1  ;;  %2307 = vmatmul.mubr.f32.gmra.mrb[154].mxu1 %v2022_v49 }
 0x306   :  { %v10666_v2 = vadd.f32 %v10665_v22, %v10664_v41  ;;  %12935 = vmatmul.mubr.f32.gmra.mrb[70].mxu0 %v1084_v61  ;;  %2311 = vmatprep.mubr.f32.mxu1 %v2027_v28 }
 0x307   :  { %v10587_v35 = vpop.f32.mrb[50].mxu0  ;;  %15182 = vmatpush3.bf16.msra.mxu0 %v15179_v48 }
 0x308   :  { %v10667_v15 = vpop.f32.mrb[50].mxu1  ;;  %v10588_v14 = vpop.f32.mrb[51].mxu0  ;;  %v1089_v9 = vadd.f32 %v10666_v2, %v10586_v46  ;;  %15184 = vmatprep.subr.bf16.mxu0 %v15183_v23 }
 0x309   :  { %v10589_v18 = vadd.f32 %v10588_v14, %v10587_v35  ;;  %v10668_v45 = vpop.f32.mrb[51].mxu1  ;;  %2312 = vmatmul.mubr.f32.gmra.mrb[156].mxu1 %v2026_v10 }
 0x30a   :  { %v10669_v40 = vadd.f32 %v10668_v45, %v10667_v15  ;;  %12937 = vmatprep.mubr.f32.mxu0 %v1089_v9  ;;  %2316 = vmatprep.mubr.f32.mxu1 %v2031_v20 }
 0x30b   :  { %v10590_v37 = vpop.f32.mrb[52].mxu0  ;;  %15186 = vmatpush3.bf16.msra.mxu0 %v15183_v23 }
 0x30c   :  { %v10670_v0 = vpop.f32.mrb[52].mxu1  ;;  %v10591_v62 = vpop.f32.mrb[53].mxu0  ;;  %v1094_v49 = vadd.f32 %v10669_v40, %v10589_v18  ;;  %15220 = vmatprep.subr.bf16.mxu0 %v18184_v7  ;;  %v2327_v7 = vld [vmem:[#allocation7 + $0x1a0] sm:$0xff] }
 0x30d   :  { %v10592_v48 = vadd.f32 %v10591_v62, %v10590_v37  ;;  %v10671_v58 = vpop.f32.mrb[53].mxu1  ;;  %2317 = vmatmul.mubr.f32.gmra.mrb[158].mxu1 %v2030_v54 }
 0x30e   :  { %v10672_v28 = vadd.f32 %v10671_v58, %v10670_v0  ;;  %12938 = vmatmul.mubr.f32.gmra.mrb[72].mxu0 %v1094_v49 }
 0x30f   :  { %v10593_v41 = vpop.f32.mrb[54].mxu0 }
 0x310   :  { %v10673_v3 = vpop.f32.mrb[54].mxu1  ;;  %v10594_v61 = vpop.f32.mrb[55].mxu0  ;;  %v1099_v46 = vadd.f32 %v10672_v28, %v10592_v48 }
 0x311   :  { %v10595_v22 = vadd.f32 %v10594_v61, %v10593_v41  ;;  %v10674_v2 = vpop.f32.mrb[55].mxu1 }
 0x312   :  { %v10675_v10 = vadd.f32 %v10674_v2, %v10673_v3  ;;  %12940 = vmatprep.mubr.f32.mxu0 %v1099_v46 }
 0x313   :  { %v10596_v35 = vpop.f32.mrb[56].mxu0 }
 0x314   :  { %v10676_v23 = vpop.f32.mrb[56].mxu1  ;;  %v10597_v20 = vpop.f32.mrb[57].mxu0  ;;  %v1104_v15 = vadd.f32 %v10675_v10, %v10595_v22 }
 0x315   :  { %v10598_v14 = vadd.f32 %v10597_v20, %v10596_v35  ;;  %v10677_v9 = vpop.f32.mrb[57].mxu1 }
 0x316   :  { %v10678_v18 = vadd.f32 %v10677_v9, %v10676_v23  ;;  %12941 = vmatmul.mubr.f32.gmra.mrb[74].mxu0 %v1104_v15 }
 0x317   :  { %v10599_v45 = vpop.f32.mrb[58].mxu0 }
 0x318   :  { %v10679_v40 = vpop.f32.mrb[58].mxu1  ;;  %v10600_v54 = vpop.f32.mrb[59].mxu0  ;;  %v1109_v37 = vadd.f32 %v10678_v18, %v10598_v14 }
 0x319   :  { %v10601_v0 = vadd.f32 %v10600_v54, %v10599_v45  ;;  %v10680_v62 = vpop.f32.mrb[59].mxu1 }
 0x31a   :  { %v10681_v49 = vadd.f32 %v10680_v62, %v10679_v40  ;;  %12943 = vmatprep.mubr.f32.mxu0 %v1109_v37 }
 0x31b   :  { %v10602_v48 = vpop.f32.mrb[60].mxu0 }
 0x31c   :  { %v10682_v58 = vpop.f32.mrb[60].mxu1  ;;  %v10603_v28 = vpop.f32.mrb[61].mxu0  ;;  %v1114_v41 = vadd.f32 %v10681_v49, %v10601_v0 }
 0x31d   :  { %v10604_v3 = vadd.f32 %v10603_v28, %v10602_v48  ;;  %v10683_v61 = vpop.f32.mrb[61].mxu1 }
 0x31e   :  { %v10684_v46 = vadd.f32 %v10683_v61, %v10682_v58  ;;  %12944 = vmatmul.mubr.f32.gmra.mrb[76].mxu0 %v1114_v41 }
 0x31f   :  { %v10605_v22 = vpop.f32.mrb[62].mxu0 }
 0x320   :  { %v10685_v2 = vpop.f32.mrb[62].mxu1  ;;  %v10606_v10 = vpop.f32.mrb[63].mxu0  ;;  %v1119_v35 = vadd.f32 %v10684_v46, %v10604_v3  ;;  %v1790_v3 = vld [vmem:[#allocation7 + $0x100] sm:$0xff] }
 0x321   :  { %v10607_v23 = vadd.f32 %v10606_v10, %v10605_v22  ;;  %v10686_v20 = vpop.f32.mrb[63].mxu1  ;;  %v1793_v10 = vld [vmem:[#allocation7 + $0x118] sm:$0xff] }
 0x322   :  { %v10687_v15 = vadd.f32 %v10686_v20, %v10685_v2  ;;  %12946 = vmatprep.mubr.f32.mxu0 %v1119_v35  ;;  %v1792_v2 = vld [vmem:[#allocation7 + $0x110] sm:$0xff] }
 0x323   :  { %v15255_v20 = vpack.c.bf16 %v1793_v10, %v1792_v2  ;;  %v1800_v2 = vld [vmem:[#allocation7 + $0x150] sm:$0xff]  ;;  %v1801_v10 = vld [vmem:[#allocation7 + $0x158] sm:$0xff] }
 0x324   :  { %v1124_v14 = vadd.f32 %v10687_v15, %v10607_v23  ;;  %v10784_v9 = vpop.f32.mrb[64].mxu1  ;;  %v1442_v23 = vld [vmem:[#allocation5 + $0x438] sm:$0xff] }
 0x325   :  { %v10785_v18 = vpop.f32.mrb[65].mxu1 }
 0x326   :  { %12947 = vmatmul.mubr.f32.gmra.mrb[78].mxu0 %v1124_v14  ;;  %v18412_v45 = vadd.f32 %v10785_v18, %v10784_v9  ;;  %v1794_v14 = vld [vmem:[#allocation7 + $0x120] sm:$0xff]  ;;  %v1795_v9 = vld [vmem:[#allocation7 + $0x128] sm:$0xff] }
 0x327   :  { %12981 = vmatprep.mubr.f32.mxu0 %v18358_v13 }
 0x328   :  { %v10787_v40 = vpop.f32.mrb[66].mxu1 }
 0x329   :  { %v10788_v54 = vpop.f32.mrb[67].mxu1 }
 0x32a   :  { %12982 = vmatmul.mubr.f32.vlgmr.msra.gmra.mrb[64].mxu0 %v18362_v31  ;;  %v18416_v37 = vadd.f32 %v10788_v54, %v10787_v40  ;;  %v1441_v40 = vld [vmem:[#allocation5 + $0x430] sm:$0xff] }
 0x32b   :  { %12984 = vmatprep.mubr.f32.mxu0 %v18366_v55  ;;  %15222 = vmatpush3.bf16.msra.mxu0 %v18189_v12 }
 0x32c   :  { %15224 = vmatprep.subr.bf16.mxu0 %v18195_v17  ;;  %v10790_v0 = vpop.f32.mrb[68].mxu1  ;;  %v2540_v17 = vld [vmem:[#allocation5 + $0x938] sm:$0xff] }
 0x32d   :  { %v10791_v62 = vpop.f32.mrb[69].mxu1 }
 0x32e   :  { %12985 = vmatmul.mubr.f32.gmra.mrb[66].mxu0 %v18368_v6  ;;  %v18422_v49 = vadd.f32 %v10791_v62, %v10790_v0  ;;  %v15259_v0 = vpack.c.bf16 %v1795_v9, %v1794_v14 }
 0x32f   :  { %12987 = vmatprep.mubr.f32.mxu0 %v18370_v29  ;;  %15226 = vmatpush3.bf16.msra.mxu0 %v18202_v25 }
 0x330   :  { %15228 = vmatprep.subr.bf16.mxu0 %v18206_v30  ;;  %v10793_v13 = vpop.f32.mrb[70].mxu1  ;;  %v2325_v30 = vld [vmem:[#allocation7 + $0x190] sm:$0xff] }
 0x331   :  { %v10794_v31 = vpop.f32.mrb[71].mxu1 }
 0x332   :  { %12988 = vmatmul.mubr.f32.gmra.mrb[68].mxu0 %v18372_v53  ;;  %v18428_v55 = vadd.f32 %v10794_v31, %v10793_v13  ;;  %v1796_v13 = vld [vmem:[#allocation7 + $0x130] sm:$0xff]  ;;  %v1797_v31 = vld [vmem:[#allocation7 + $0x138] sm:$0xff] }
 0x333   :  { %12990 = vmatprep.mubr.f32.mxu0 %v18374_v4  ;;  %15230 = vmatpush3.bf16.msra.mxu0 %v18213_v38 }
 0x334   :  { %15232 = vmatprep.subr.bf16.mxu0 %v18218_v43  ;;  %v10796_v6 = vpop.f32.mrb[72].mxu1 }
 0x335   :  { %v10797_v48 = vpop.f32.mrb[73].mxu1 }
 0x336   :  { %12991 = vmatmul.mubr.f32.gmra.mrb[70].mxu0 %v18376_v32  ;;  %v18434_v29 = vadd.f32 %v10797_v48, %v10796_v6  ;;  %v1445_v48 = vld [vmem:[#allocation5 + $0x450] sm:$0xff] }
 0x337   :  { %12993 = vmatprep.mubr.f32.mxu0 %v18378_v57  ;;  %15234 = vmatpush3.bf16.msra.mxu0 %v18225_v51 }
 0x338   :  { %15236 = vmatprep.subr.bf16.mxu0 %v18230_v56  ;;  %v10799_v53 = vpop.f32.mrb[74].mxu1 }
 0x339   :  { %v10800_v58 = vpop.f32.mrb[75].mxu1 }
 0x33a   :  { %12994 = vmatmul.mubr.f32.gmra.mrb[72].mxu0 %v18380_v11  ;;  %v18440_v4 = vadd.f32 %v10800_v58, %v10799_v53  ;;  %v1450_v53 = vld [vmem:[#allocation5 + $0x478] sm:$0xff] }
 0x33b   :  { %12996 = vmatprep.mubr.f32.mxu0 %v18382_v44  ;;  %15238 = vmatpush3.bf16.msra.mxu0 %v18237_v63  ;;  %v1791_v44 = vld [vmem:[#allocation7 + $0x108] sm:$0xff] }
 0x33c   :  { %15240 = vmatprep.subr.bf16.mxu0 %v18242_v5  ;;  %v10802_v32 = vpop.f32.mrb[76].mxu1  ;;  %v15251_v46 = vpack.c.bf16 %v1791_v44, %v1790_v3  ;;  %v1449_v44 = vld [vmem:[#allocation5 + $0x470] sm:$0xff] }
 0x33d   :  { %v10803_v28 = vpop.f32.mrb[77].mxu1 }
 0x33e   :  { %12997 = vmatmul.mubr.f32.gmra.mrb[74].mxu0 %v18386_v1  ;;  %v18446_v57 = vadd.f32 %v10803_v28, %v10802_v32  ;;  %v1438_v1 = vld [vmem:[#allocation5 + $0x418] sm:$0xff]  ;;  %v15263_v32 = vpack.c.bf16 %v1797_v31, %v1796_v13  ;;  %v1461_v13 = vld [vmem:[#allocation5 + $0x4d0] sm:$0xff] }
 0x33f   :  { %12999 = vmatprep.mubr.f32.mxu0 %v18390_v33  ;;  %15242 = vmatpush3.bf16.msra.mxu0 %v18249_v19  ;;  %v1466_v31 = vld [vmem:[#allocation5 + $0x4f8] sm:$0xff] }
 0x340   :  { %15244 = vmatprep.subr.bf16.mxu0 %v18254_v27  ;;  %v10805_v11 = vpop.f32.mrb[78].mxu1 }
 0x341   :  { %v10806_v41 = vpop.f32.mrb[79].mxu1 }
 0x342   :  { %13000 = vmatmul.mubr.f32.gmra.mrb[76].mxu0 %v18394_v60  ;;  %v18452_v61 = vadd.f32 %v10806_v41, %v10805_v11  ;;  %v1437_v60 = vld [vmem:[#allocation5 + $0x410] sm:$0xff]  ;;  %v1798_v11 = vld [vmem:[#allocation7 + $0x140] sm:$0xff]  ;;  %v1799_v41 = vld [vmem:[#allocation7 + $0x148] sm:$0xff] }
 0x343   :  { %13002 = vmatprep.mubr.f32.mxu0 %v18398_v24  ;;  %15246 = vmatpush3.bf16.msra.mxu0 %v18261_v36 }
 0x344   :  { %15248 = vmatprep.subr.bf16.mxu0 %v18266_v42  ;;  %v10808_v33 = vpop.f32.mrb[80].mxu1 }
 0x345   :  { %v10809_v22 = vpop.f32.mrb[81].mxu1 }
 0x346   :  { %13003 = vmatmul.mubr.f32.gmra.mrb[78].mxu0 %v18402_v59  ;;  %v18458_v35 = vadd.f32 %v10809_v22, %v10808_v33  ;;  %v1446_v59 = vld [vmem:[#allocation5 + $0x458] sm:$0xff] }
 0x347   :  { %15250 = vmatpush3.bf16.msra.mxu0 %v18273_v47  ;;  %1708 = vmatprep.mubr.f32.mxu0 %v1438_v1  ;;  %v1454_v1 = vld [vmem:[#allocation5 + $0x498] sm:$0xff] }
 0x348   :  { %v10811_v24 = vpop.f32.mrb[82].mxu1  ;;  %15252 = vmatprep.subr.bf16.mxu0 %v15251_v46 }
 0x349   :  { %v10812_v15 = vpop.f32.mrb[83].mxu1 }
 0x34a   :  { %1709 = vmatmul.mubr.f32.vlgmr.msra.gmra.mrb[80].mxu0 %v1437_v60  ;;  %v18461_v18 = vadd.f32 %v10812_v15, %v10811_v24  ;;  %v1458_v24 = vld [vmem:[#allocation5 + $0x4b8] sm:$0xff]  ;;  %v15271_v15 = vpack.c.bf16 %v1801_v10, %v1800_v2  ;;  %v1473_v10 = vld [vmem:[#allocation5 + $0x530] sm:$0xff] }
 0x34b   :  { %1713 = vmatprep.mubr.f32.mxu0 %v1442_v23  ;;  %15254 = vmatpush3.bf16.msra.mxu0 %v15251_v46  ;;  %v15267_v46 = vpack.c.bf16 %v1799_v41, %v1798_v11  ;;  %v1453_v23 = vld [vmem:[#allocation5 + $0x490] sm:$0xff] }
 0x34c   :  { %v10814_v54 = vpop.f32.mrb[84].mxu1  ;;  %15256 = vmatprep.subr.bf16.mxu0 %v15255_v20 }
 0x34d   :  { %v10815_v62 = vpop.f32.mrb[85].mxu1 }
 0x34e   :  { %1714 = vmatmul.mubr.f32.gmra.mrb[82].mxu0 %v1441_v40  ;;  %v18463_v6 = vadd.f32 %v10815_v62, %v10814_v54  ;;  %v1457_v40 = vld [vmem:[#allocation5 + $0x4b0] sm:$0xff] }
 0x34f   :  { %1718 = vmatprep.mubr.f32.mxu0 %v1446_v59  ;;  %15258 = vmatpush3.bf16.msra.mxu0 %v15255_v20  ;;  %v1462_v59 = vld [vmem:[#allocation5 + $0x4d8] sm:$0xff] }
 0x350   :  { %v10817_v58 = vpop.f32.mrb[86].mxu1  ;;  %15260 = vmatprep.subr.bf16.mxu0 %v15259_v0 }
 0x351   :  { %v10818_v28 = vpop.f32.mrb[87].mxu1 }
 0x352   :  { %1719 = vmatmul.mubr.f32.gmra.mrb[84].mxu0 %v1445_v48  ;;  %v18465_v3 = vadd.f32 %v10818_v28, %v10817_v58  ;;  %v1470_v28 = vld [vmem:[#allocation5 + $0x518] sm:$0xff] }
 0x353   :  { %1723 = vmatprep.mubr.f32.mxu0 %v1450_v53  ;;  %15262 = vmatpush3.bf16.msra.mxu0 %v15259_v0 }
 0x354   :  { %v10820_v33 = vpop.f32.mrb[88].mxu1  ;;  %15264 = vmatprep.subr.bf16.mxu0 %v15263_v32 }
 0x355   :  { %v10821_v22 = vpop.f32.mrb[89].mxu1 }
 0x356   :  { %1724 = vmatmul.mubr.f32.gmra.mrb[86].mxu0 %v1449_v44  ;;  %v18467_v60 = vadd.f32 %v10821_v22, %v10820_v33  ;;  %v1474_v33 = vld [vmem:[#allocation5 + $0x538] sm:$0xff] }
 0x357   :  { %1728 = vmatprep.mubr.f32.mxu0 %v1454_v1  ;;  %15266 = vmatpush3.bf16.msra.mxu0 %v15263_v32  ;;  %v1465_v32 = vld [vmem:[#allocation5 + $0x4f0] sm:$0xff] }
 0x358   :  { %v10823_v20 = vpop.f32.mrb[90].mxu1  ;;  %15268 = vmatprep.subr.bf16.mxu0 %v15267_v46  ;;  %v1469_v1 = vld [vmem:[#allocation5 + $0x510] sm:$0xff] }
 0x359   :  { %v10824_v14 = vpop.f32.mrb[91].mxu1 }
 0x35a   :  { %1729 = vmatmul.mubr.f32.gmra.mrb[88].mxu0 %v1453_v23  ;;  %v18469_v9 = vadd.f32 %v10824_v14, %v10823_v20  ;;  %v1478_v23 = vld [vmem:[#allocation5 + $0x558] sm:$0xff] }
 0x35b   :  { %1733 = vmatprep.mubr.f32.mxu0 %v1458_v24  ;;  %15270 = vmatpush3.bf16.msra.mxu0 %v15267_v46  ;;  %v1482_v14 = vld [vmem:[#allocation5 + $0x578] sm:$0xff] }
 0x35c   :  { %v10826_v54 = vpop.f32.mrb[92].mxu1  ;;  %15272 = vmatprep.subr.bf16.mxu0 %v15271_v15 }
 0x35d   :  { %v10827_v0 = vpop.f32.mrb[93].mxu1 }
 0x35e   :  { %1734 = vmatmul.mubr.f32.gmra.mrb[90].mxu0 %v1457_v40  ;;  %v18471_v62 = vadd.f32 %v10827_v0, %v10826_v54  ;;  %v1481_v54 = vld [vmem:[#allocation5 + $0x570] sm:$0xff]  ;;  %v1486_v0 = vld [vmem:[#allocation5 + $0x598] sm:$0xff] }
 0x35f   :  { %1738 = vmatprep.mubr.f32.mxu0 %v1462_v59  ;;  %15274 = vmatpush3.bf16.msra.mxu0 %v15271_v15  ;;  %v1477_v15 = vld [vmem:[#allocation5 + $0x550] sm:$0xff] }
 0x360   :  { %v10829_v48 = vpop.f32.mrb[94].mxu1 }
 0x361   :  { %v10830_v53 = vpop.f32.mrb[95].mxu1 }
 0x362   :  { %1739 = vmatmul.mubr.f32.gmra.mrb[92].mxu0 %v1461_v13  ;;  %v18473_v58 = vadd.f32 %v10830_v53, %v10829_v48  ;;  %v1485_v53 = vld [vmem:[#allocation5 + $0x590] sm:$0xff] }
 0x363   :  { %1743 = vmatprep.mubr.f32.mxu0 %v1466_v31 }
 0x364   :  { %v10976_v11 = vpop.f32.mrb[96].mxu1 }
 0x365   :  { %v10977_v41 = vpop.f32.mrb[97].mxu1 }
 0x366   :  { %1744 = vmatmul.mubr.f32.gmra.mrb[94].mxu0 %v1465_v32  ;;  %v18475_v44 = vadd.f32 %v10977_v41, %v10976_v11  ;;  %v1490_v32 = vld [vmem:[#allocation5 + $0x5b8] sm:$0xff] }
 0x367   :  { %1748 = vmatprep.mubr.f32.mxu0 %v1470_v28 }
 0x368   :  { %v10979_v46 = vpop.f32.mrb[98].mxu1 }
 0x369   :  { %v10980_v22 = vpop.f32.mrb[99].mxu1 }
 0x36a   :  { %1749 = vmatmul.mubr.f32.gmra.mrb[96].mxu0 %v1469_v1  ;;  %v18477_v2 = vadd.f32 %v10980_v22, %v10979_v46  ;;  %v1489_v1 = vld [vmem:[#allocation5 + $0x5b0] sm:$0xff] }
 0x36b   :  { %1753 = vmatprep.mubr.f32.mxu0 %v1474_v33  ;;  %v1494_v33 = vld [vmem:[#allocation5 + $0x5d8] sm:$0xff] }
 0x36c   :  { %v10982_v24 = vpop.f32.mrb[100].mxu1 }
 0x36d   :  { %v10983_v20 = vpop.f32.mrb[101].mxu1 }
 0x36e   :  { %1754 = vmatmul.mubr.f32.gmra.mrb[98].mxu0 %v1473_v10 }
 0x36f   :  { %1758 = vmatprep.mubr.f32.mxu0 %v1478_v23  ;;  %v1493_v23 = vld [vmem:[#allocation5 + $0x5d0] sm:$0xff] }
 0x370   :  { %v10985_v40 = vpop.f32.mrb[102].mxu1 }
 0x371   :  { %v10986_v59 = vpop.f32.mrb[103].mxu1 }
 0x372   :  { %1759 = vmatmul.mubr.f32.gmra.mrb[100].mxu0 %v1477_v15  ;;  %v1498_v15 = vld [vmem:[#allocation5 + $0x5f8] sm:$0xff] }
 0x373   :  { %1763 = vmatprep.mubr.f32.mxu0 %v1482_v14 }
 0x374   :  { %v10988_v13 = vpop.f32.mrb[104].mxu1 }
 0x375   :  { %v10989_v31 = vpop.f32.mrb[105].mxu1 }
 0x376   :  { %1764 = vmatmul.mubr.f32.gmra.mrb[102].mxu0 %v1481_v54  ;;  %v18479_v48 = vadd.f32 %v10989_v31, %v10988_v13  ;;  %v1497_v13 = vld [vmem:[#allocation5 + $0x5f0] sm:$0xff] }
 0x377   :  { %1768 = vmatprep.mubr.f32.mxu0 %v1486_v0 }
 0x378   :  { %v10991_v28 = vpop.f32.mrb[106].mxu1 }
 0x379   :  { %v10992_v11 = vpop.f32.mrb[107].mxu1 }
 0x37a   :  { %1769 = vmatmul.mubr.f32.gmra.mrb[104].mxu0 %v1485_v53  ;;  %v18481_v41 = vadd.f32 %v10992_v11, %v10991_v28  ;;  %v10984_v28 = vadd.f32 %v10983_v20, %v10982_v24 }
 0x37b   :  { %1773 = vmatprep.mubr.f32.mxu0 %v1490_v32 }
 0x37c   :  { %v10994_v46 = vpop.f32.mrb[108].mxu1 }
 0x37d   :  { %v10995_v22 = vpop.f32.mrb[109].mxu1 }
 0x37e   :  { %1774 = vmatmul.mubr.f32.gmra.mrb[106].mxu0 %v1489_v1  ;;  %v18483_v10 = vadd.f32 %v10995_v22, %v10994_v46 }
 0x37f   :  { %1778 = vmatprep.mubr.f32.mxu0 %v1494_v33  ;;  %v10987_v33 = vadd.f32 %v10986_v59, %v10985_v40 }
 0x380   :  { %v10997_v14 = vpop.f32.mrb[110].mxu1 }
 0x381   :  { %v10998_v54 = vpop.f32.mrb[111].mxu1 }
 0x382   :  { %1779 = vmatmul.mubr.f32.gmra.mrb[108].mxu0 %v1493_v23  ;;  %v18485_v0 = vadd.f32 %v10998_v54, %v10997_v14 }
 0x383   :  { %1783 = vmatprep.mubr.f32.mxu0 %v1498_v15 }
 0x384   :  { %v11000_v31 = vpop.f32.mrb[112].mxu1 }
 0x385   :  { %v11001_v53 = vpop.f32.mrb[113].mxu1 }
 0x386   :  { %1784 = vmatmul.mubr.f32.gmra.mrb[110].mxu0 %v1497_v13  ;;  %v18487_v32 = vadd.f32 %v11001_v53, %v11000_v31  ;;  %v1802_v53 = vld [vmem:[#allocation7 + $0x160] sm:$0xff] }
 0x388   :  { %v11003_v11 = vpop.f32.mrb[114].mxu1 }
 0x389   :  { %v11004_v1 = vpop.f32.mrb[115].mxu1 }
 0x38a   :  { %v18489_v46 = vadd.f32 %v11004_v1, %v11003_v11  ;;  %v1803_v11 = vld [vmem:[#allocation7 + $0x168] sm:$0xff] }
 0x38b   :  { %v15275_v59 = vpack.c.bf16 %v1803_v11, %v1802_v53 }
 0x38c   :  { %v11006_v22 = vpop.f32.mrb[116].mxu1 }
 0x38d   :  { %v11007_v47 = vpop.f32.mrb[117].mxu1  ;;  %15276 = vmatprep.subr.bf16.mxu0 %v15275_v59 }
 0x38e   :  { %v18491_v42 = vadd.f32 %v11007_v47, %v11006_v22  ;;  %15278 = vmatpush3.bf16.msra.mxu0 %v15275_v59  ;;  %v1804_v22 = vld [vmem:[#allocation7 + $0x170] sm:$0xff] }
 0x390   :  { %v11009_v23 = vpop.f32.mrb[118].mxu1 }
 0x391   :  { %v11010_v14 = vpop.f32.mrb[119].mxu1 }
 0x392   :  { %v18493_v54 = vadd.f32 %v11010_v14, %v11009_v23  ;;  %v1805_v23 = vld [vmem:[#allocation7 + $0x178] sm:$0xff] }
 0x393   :  { %v15279_v19 = vpack.c.bf16 %v1805_v23, %v1804_v22 }
 0x394   :  { %v11012_v15 = vpop.f32.mrb[120].mxu1 }
 0x395   :  { %v11013_v36 = vpop.f32.mrb[121].mxu1  ;;  %15280 = vmatprep.subr.bf16.mxu0 %v15279_v19 }
 0x396   :  { %v18495_v27 = vadd.f32 %v11013_v36, %v11012_v15  ;;  %15282 = vmatpush3.bf16.msra.mxu0 %v15279_v19 }
 0x398   :  { %v11015_v13 = vpop.f32.mrb[122].mxu1 }
 0x399   :  { %v11016_v31 = vpop.f32.mrb[123].mxu1 }
 0x39a   :  { %v18497_v24 = vadd.f32 %v11016_v31, %v11015_v13 }
 0x39c   :  { %v11018_v20 = vpop.f32.mrb[124].mxu1 }
 0x39d   :  { %v11019_v40 = vpop.f32.mrb[125].mxu1 }
 0x39e   :  { %v18499_v1 = vadd.f32 %v11019_v40, %v11018_v20 }
 0x3a0   :  { %v11021_v47 = vpop.f32.mrb[126].mxu1 }
 0x3a1   :  { %v11022_v14 = vpop.f32.mrb[127].mxu1 }
 0x3a2   :  { %v18501_v36 = vadd.f32 %v11022_v14, %v11021_v47 }
 0x3a4   :  { %v11056_v15 = vpop.f32.mrb[128].mxu1 }
 0x3a5   :  { %v11057_v13 = vpop.f32.mrb[129].mxu1 }
 0x3a6   :  { %v11058_v31 = vadd.f32 %v11057_v13, %v11056_v15 }
 0x3a8   :  { %v11059_v5 = vpop.f32.mrb[130].mxu1  ;;  %v18504_v63 = vadd.f32 %v11058_v31, %v18475_v44 }
 0x3a9   :  { %v11060_v20 = vpop.f32.mrb[131].mxu1 }
 0x3aa   :  { %v11061_v53 = vadd.f32 %v11060_v20, %v11059_v5 }
 0x3ac   :  { %v18507_v11 = vadd.f32 %v11061_v53, %v18477_v2  ;;  %v11062_v40 = vpop.f32.mrb[132].mxu1 }
 0x3ad   :  { %v11063_v59 = vpop.f32.mrb[133].mxu1 }
 0x3ae   :  { %v11064_v56 = vadd.f32 %v11063_v59, %v11062_v40  ;;  %v2323_v59 = vld [vmem:[#allocation7 + $0x180] sm:$0xff] }
 0x3b0   :  { %v11065_v22 = vpop.f32.mrb[134].mxu1  ;;  %v18509_v47 = vadd.f32 %v11064_v56, %v10984_v28 }
 0x3b1   :  { %v11066_v23 = vpop.f32.mrb[135].mxu1 }
 0x3b2   :  { %v11067_v14 = vadd.f32 %v11066_v23, %v11065_v22  ;;  %v2324_v22 = vld [vmem:[#allocation7 + $0x188] sm:$0xff] }
 0x3b4   :  { %v11068_v19 = vpop.f32.mrb[136].mxu1  ;;  %v18511_v51 = vadd.f32 %v11067_v14, %v10987_v33  ;;  %v18522_v14 = vpack.c.bf16 %v2324_v22, %v2323_v59 }
 0x3b5   :  { %v11069_v15 = vpop.f32.mrb[137].mxu1 }
 0x3b6   :  { %v11070_v13 = vadd.f32 %v11069_v15, %v11068_v19  ;;  %15348 = vmatprep.subr.bf16.mxu0 %v18522_v14 }
 0x3b8   :  { %v11071_v44 = vpop.f32.mrb[138].mxu1  ;;  %v18514_v31 = vadd.f32 %v11070_v13, %v18479_v48 }
 0x3b9   :  { %v11072_v5 = vpop.f32.mrb[139].mxu1 }
 0x3ba   :  { %v11073_v2 = vadd.f32 %v11072_v5, %v11071_v44 }
 0x3bc   :  { %v11074_v20 = vpop.f32.mrb[140].mxu1  ;;  %v18517_v53 = vadd.f32 %v11073_v2, %v18481_v41 }
 0x3bd   :  { %v11075_v40 = vpop.f32.mrb[141].mxu1 }
 0x3be   :  { %v11076_v56 = vadd.f32 %v11075_v40, %v11074_v20 }
 0x3c0   :  { %v11077_v28 = vpop.f32.mrb[142].mxu1  ;;  %v18520_v33 = vadd.f32 %v11076_v56, %v18483_v10 }
 0x3c1   :  { %v11078_v23 = vpop.f32.mrb[143].mxu1 }
 0x3c2   :  { %v11079_v19 = vadd.f32 %v11078_v23, %v11077_v28 }
 0x3c4   :  { %v18526_v48 = vadd.f32 %v11079_v19, %v18485_v0  ;;  %v11080_v15 = vpop.f32.mrb[144].mxu1 }
 0x3c5   :  { %v11081_v41 = vpop.f32.mrb[145].mxu1 }
 0x3c6   :  { %v11082_v13 = vadd.f32 %v11081_v41, %v11080_v15 }
 0x3c8   :  { %v18529_v44 = vadd.f32 %v11082_v13, %v18487_v32  ;;  %v11083_v5 = vpop.f32.mrb[146].mxu1 }
 0x3c9   :  { %v11084_v2 = vpop.f32.mrb[147].mxu1 }
 0x3ca   :  { %v11085_v20 = vadd.f32 %v11084_v2, %v11083_v5 }
 0x3cc   :  { %v18532_v10 = vadd.f32 %v11085_v20, %v18489_v46  ;;  %v11086_v40 = vpop.f32.mrb[148].mxu1 }
 0x3cd   :  { %v11087_v56 = vpop.f32.mrb[149].mxu1 }
 0x3ce   :  { %v11088_v28 = vadd.f32 %v11087_v56, %v11086_v40 }
 0x3d0   :  { %v18535_v59 = vadd.f32 %v11088_v28, %v18491_v42  ;;  %v11089_v0 = vpop.f32.mrb[150].mxu1 }
 0x3d1   :  { %v11090_v22 = vpop.f32.mrb[151].mxu1 }
 0x3d2   :  { %v11091_v23 = vadd.f32 %v11090_v22, %v11089_v0 }
 0x3d4   :  { %v18538_v19 = vadd.f32 %v11091_v23, %v18493_v54  ;;  %v11092_v32 = vpop.f32.mrb[152].mxu1 }
 0x3d5   :  { %v11093_v15 = vpop.f32.mrb[153].mxu1 }
 0x3d6   :  { %v11094_v41 = vadd.f32 %v11093_v15, %v11092_v32  ;;  %v2503_v32 = vld [vmem:[#allocation5 + $0x810] sm:$0xff]  ;;  %v2508_v15 = vld [vmem:[#allocation5 + $0x838] sm:$0xff] }
 0x3d8   :  { %v18541_v13 = vadd.f32 %v11094_v41, %v18495_v27  ;;  %v11095_v46 = vpop.f32.mrb[154].mxu1  ;;  %v2504_v27 = vld [vmem:[#allocation5 + $0x818] sm:$0xff]  ;;  %v2511_v41 = vld [vmem:[#allocation5 + $0x850] sm:$0xff] }
 0x3d9   :  { %v11096_v5 = vpop.f32.mrb[155].mxu1  ;;  %2774 = vmatprep.mubr.f32.mxu1 %v2504_v27  ;;  %v2527_v27 = vld [vmem:[#allocation5 + $0x8d0] sm:$0xff] }
 0x3da   :  { %v11097_v2 = vadd.f32 %v11096_v5, %v11095_v46  ;;  %2775 = vmatmul.mubr.f32.vlgmr.msra.gmra.mrb[160].mxu1 %v2503_v32  ;;  %v2515_v46 = vld [vmem:[#allocation5 + $0x870] sm:$0xff]  ;;  %v2520_v5 = vld [vmem:[#allocation5 + $0x898] sm:$0xff]  ;;  %v19707_v32 = vld [vmem:[#allocation64_spill] sm:$0xff] }
 0x3db   :  { %15478 = vmatpush3.bf16.msra.mxu1 %v18186_v8  ;;  %2779 = vmatprep.mubr.f32.mxu1 %v2508_v15  ;;  %v2532_v15 = vld [vmem:[#allocation5 + $0x8f8] sm:$0xff] }
 0x3dc   :  { %v18544_v20 = vadd.f32 %v11097_v2, %v18497_v24  ;;  %v11098_v42 = vpop.f32.mrb[156].mxu1  ;;  %v2507_v24 = vld [vmem:[#allocation5 + $0x830] sm:$0xff]  ;;  %15480 = vmatprep.subr.bf16.mxu1 %v18193_v16 }
 0x3dd   :  { %v11099_v40 = vpop.f32.mrb[157].mxu1  ;;  %v2519_v2 = vld [vmem:[#allocation5 + $0x890] sm:$0xff] }
 0x3de   :  { %v11100_v56 = vadd.f32 %v11099_v40, %v11098_v42  ;;  %2780 = vmatmul.mubr.f32.gmra.mrb[162].mxu1 %v2507_v24  ;;  %v2524_v42 = vld [vmem:[#allocation5 + $0x8b8] sm:$0xff] }
 0x3df   :  { %15482 = vmatpush3.bf16.msra.mxu1 %v18198_v21  ;;  %v19704_v40 = vld [vmem:[#allocation58_spill] sm:$0xff] }
 0x3e0   :  { %v18547_v28 = vadd.f32 %v11100_v56, %v18499_v1  ;;  %v11101_v54 = vpop.f32.mrb[158].mxu1  ;;  %v2512_v1 = vld [vmem:[#allocation5 + $0x858] sm:$0xff]  ;;  %15484 = vmatprep.subr.bf16.mxu1 %v18204_v26  ;;  %v2523_v56 = vld [vmem:[#allocation5 + $0x8b0] sm:$0xff] }
 0x3e1   :  { %v11102_v0 = vpop.f32.mrb[159].mxu1  ;;  %2784 = vmatprep.mubr.f32.mxu1 %v2512_v1  ;;  %v19708_v24 = vld [vmem:[#allocation66_spill] sm:$0xff]  ;;  %v2531_v1 = vld [vmem:[#allocation5 + $0x8f0] sm:$0xff] }
 0x3e2   :  { %v11103_v22 = vadd.f32 %v11102_v0, %v11101_v54  ;;  %2785 = vmatmul.mubr.f32.gmra.mrb[164].mxu1 %v2511_v41  ;;  %v19705_v54 = vld [vmem:[#allocation60_spill] sm:$0xff]  ;;  %v2528_v0 = vld [vmem:[#allocation5 + $0x8d8] sm:$0xff] }
 0x3e3   :  { %15486 = vmatpush3.bf16.msra.mxu1 %v18209_v34  ;;  %v19709_v41 = vld [vmem:[#allocation68_spill] sm:$0xff] }
 0x3e4   :  { %v18550_v23 = vadd.f32 %v11103_v22, %v18501_v36  ;;  %v2516_v36 = vld [vmem:[#allocation5 + $0x878] sm:$0xff]  ;;  %15488 = vmatprep.subr.bf16.mxu1 %v18215_v39 }
 0x3e5   :  { %2789 = vmatprep.mubr.f32.mxu1 %v2516_v36  ;;  %v19706_v22 = vld [vmem:[#allocation62_spill] sm:$0xff] }
 0x3e6   :  { %19703 = vst [vmem:[#allocation72_spill] sm:$0xff] %v18550_v23  ;;  %2790 = vmatmul.mubr.f32.gmra.mrb[166].mxu1 %v2515_v46 }
 0x3e7   :  { %15490 = vmatpush3.bf16.msra.mxu1 %v18221_v50  ;;  %2794 = vmatprep.mubr.f32.mxu1 %v2520_v5 }
 0x3e8   :  { %15492 = vmatprep.subr.bf16.mxu1 %v18227_v52 }
 0x3ea   :  { %2795 = vmatmul.mubr.f32.gmra.mrb[168].mxu1 %v2519_v2  ;;  %v2536_v2 = vld [vmem:[#allocation5 + $0x918] sm:$0xff] }
 0x3eb   :  { %15494 = vmatpush3.bf16.msra.mxu1 %v19704_v40  ;;  %2799 = vmatprep.mubr.f32.mxu1 %v2524_v42  ;;  %v19710_v42 = vld [vmem:[#allocation70_spill] sm:$0xff] }
 0x3ec   :  { %15496 = vmatprep.subr.bf16.mxu1 %v19705_v54 }
 0x3ee   :  { %2800 = vmatmul.mubr.f32.gmra.mrb[170].mxu1 %v2523_v56  ;;  %v2535_v56 = vld [vmem:[#allocation5 + $0x910] sm:$0xff] }
 0x3ef   :  { %15498 = vmatpush3.bf16.msra.mxu1 %v19706_v22  ;;  %2804 = vmatprep.mubr.f32.mxu1 %v2528_v0  ;;  %v19711_v0 = vld [vmem:[#allocation48_spill] sm:$0xff] }
 0x3f0   :  { %15500 = vmatprep.subr.bf16.mxu1 %v19707_v32 }
 0x3f2   :  { %2805 = vmatmul.mubr.f32.gmra.mrb[172].mxu1 %v2527_v27 }
 0x3f3   :  { %15502 = vmatpush3.bf16.msra.mxu1 %v19708_v24  ;;  %2809 = vmatprep.mubr.f32.mxu1 %v2532_v15  ;;  %v2326_v15 = vld [vmem:[#allocation7 + $0x198] sm:$0xff] }
 0x3f4   :  { %15504 = vmatprep.subr.bf16.mxu1 %v19709_v41  ;;  %v15351_v12 = vpack.c.bf16 %v2326_v15, %v2325_v30  ;;  %v2547_v15 = vld [vmem:[#allocation5 + $0x970] sm:$0xff] }
 0x3f6   :  { %2810 = vmatmul.mubr.f32.gmra.mrb[174].mxu1 %v2531_v1  ;;  %v2539_v1 = vld [vmem:[#allocation5 + $0x930] sm:$0xff] }
 0x3f7   :  { %15506 = vmatpush3.bf16.msra.mxu1 %v19710_v42  ;;  %2814 = vmatprep.mubr.f32.mxu1 %v2536_v2  ;;  %v2328_v42 = vld [vmem:[#allocation7 + $0x1a8] sm:$0xff] }
 0x3f8   :  { %15572 = vmatprep.subr.bf16.mxu1 %v19711_v0 }
 0x3fa   :  { %2815 = vmatmul.mubr.f32.gmra.mrb[176].mxu1 %v2535_v56 }
 0x3fb   :  { %2819 = vmatprep.mubr.f32.mxu1 %v2540_v17  ;;  %v15355_v17 = vpack.c.bf16 %v2328_v42, %v2327_v7  ;;  %v2552_v42 = vld [vmem:[#allocation5 + $0x998] sm:$0xff] }
 0x3fe   :  { %2820 = vmatmul.mubr.f32.gmra.mrb[178].mxu1 %v2539_v1 }
 0x41d   :  { %v10864_v36 = vpop.f32.mrb[80].mxu0 }
 0x41e   :  { %v10865_v46 = vpop.f32.mrb[81].mxu0 }
 0x41f   :  { %v10866_v5 = vadd.f32 %v10865_v46, %v10864_v36 }
 0x421   :  { %v1711_v27 = vadd.f32 %v10866_v5, %v18412_v45  ;;  %v10867_v43 = vpop.f32.mrb[82].mxu0  ;;  %v2544_v45 = vld [vmem:[#allocation5 + $0x958] sm:$0xff]  ;;  %v2543_v5 = vld [vmem:[#allocation5 + $0x950] sm:$0xff] }
 0x422   :  { %v10868_v38 = vpop.f32.mrb[83].mxu0  ;;  %2824 = vmatprep.mubr.f32.mxu1 %v2544_v45 }
 0x423   :  { %v10869_v25 = vadd.f32 %v10868_v38, %v10867_v43  ;;  %13037 = vmatprep.mubr.f32.mxu0 %v1711_v27  ;;  %2825 = vmatmul.mubr.f32.gmra.mrb[180].mxu1 %v2543_v5  ;;  %v2548_v27 = vld [vmem:[#allocation5 + $0x978] sm:$0xff] }
 0x424   :  { %2829 = vmatprep.mubr.f32.mxu1 %v2548_v27 }
 0x425   :  { %v1716_v36 = vadd.f32 %v10869_v25, %v18416_v37  ;;  %v10870_v46 = vpop.f32.mrb[84].mxu0  ;;  %v2329_v25 = vld [vmem:[#allocation7 + $0x1b0] sm:$0xff]  ;;  %v2330_v37 = vld [vmem:[#allocation7 + $0x1b8] sm:$0xff] }
 0x426   :  { %v10871_v2 = vpop.f32.mrb[85].mxu0 }
 0x427   :  { %v10872_v23 = vadd.f32 %v10871_v2, %v10870_v46  ;;  %13038 = vmatmul.mubr.f32.vlgmr.msra.gmra.mrb[64].mxu0 %v1716_v36  ;;  %v15359_v36 = vpack.c.bf16 %v2330_v37, %v2329_v25  ;;  %2830 = vmatmul.mubr.f32.gmra.mrb[182].mxu1 %v2547_v15  ;;  %v2551_v2 = vld [vmem:[#allocation5 + $0x990] sm:$0xff]  ;;  %v2556_v25 = vld [vmem:[#allocation5 + $0x9b8] sm:$0xff] }
 0x428   :  { %15350 = vmatpush3.bf16.msra.mxu0 %v18522_v14  ;;  %2834 = vmatprep.mubr.f32.mxu1 %v2552_v42  ;;  %v2555_v37 = vld [vmem:[#allocation5 + $0x9b0] sm:$0xff] }
 0x429   :  { %v1721_v38 = vadd.f32 %v10872_v23, %v18422_v49  ;;  %v10873_v43 = vpop.f32.mrb[86].mxu0  ;;  %15352 = vmatprep.subr.bf16.mxu0 %v15351_v12  ;;  %v2331_v49 = vld [vmem:[#allocation7 + $0x1c0] sm:$0xff]  ;;  %v2332_v23 = vld [vmem:[#allocation7 + $0x1c8] sm:$0xff] }
 0x42a   :  { %v10874_v56 = vpop.f32.mrb[87].mxu0  ;;  %v15363_v5 = vpack.c.bf16 %v2332_v23, %v2331_v49  ;;  %v2559_v49 = vld [vmem:[#allocation5 + $0x9d0] sm:$0xff] }
 0x42b   :  { %v10875_v30 = vadd.f32 %v10874_v56, %v10873_v43  ;;  %13040 = vmatprep.mubr.f32.mxu0 %v1721_v38  ;;  %v2334_v43 = vld [vmem:[#allocation7 + $0x1d8] sm:$0xff]  ;;  %2835 = vmatmul.mubr.f32.gmra.mrb[184].mxu1 %v2551_v2 }
 0x42c   :  { %15354 = vmatpush3.bf16.msra.mxu0 %v15351_v12  ;;  %2839 = vmatprep.mubr.f32.mxu1 %v2556_v25  ;;  %v2338_v2 = vld [vmem:[#allocation7 + $0x1f8] sm:$0xff] }
 0x42d   :  { %v1726_v1 = vadd.f32 %v10875_v30, %v18428_v55  ;;  %v10876_v14 = vpop.f32.mrb[88].mxu0  ;;  %15356 = vmatprep.subr.bf16.mxu0 %v15355_v17  ;;  %v2333_v55 = vld [vmem:[#allocation7 + $0x1d0] sm:$0xff] }
 0x42e   :  { %v10877_v46 = vpop.f32.mrb[89].mxu0  ;;  %v15367_v27 = vpack.c.bf16 %v2334_v43, %v2333_v55 }
 0x42f   :  { %v10878_v7 = vadd.f32 %v10877_v46, %v10876_v14  ;;  %13041 = vmatmul.mubr.f32.gmra.mrb[66].mxu0 %v1726_v1  ;;  %v2336_v1 = vld [vmem:[#allocation7 + $0x1e8] sm:$0xff]  ;;  %2840 = vmatmul.mubr.f32.gmra.mrb[186].mxu1 %v2555_v37  ;;  %v2560_v46 = vld [vmem:[#allocation5 + $0x9d8] sm:$0xff] }
 0x430   :  { %15358 = vmatpush3.bf16.msra.mxu0 %v15355_v17  ;;  %2844 = vmatprep.mubr.f32.mxu1 %v2560_v46 }
 0x431   :  { %v1731_v45 = vadd.f32 %v10878_v7, %v18434_v29  ;;  %v10879_v12 = vpop.f32.mrb[90].mxu0  ;;  %15360 = vmatprep.subr.bf16.mxu0 %v15359_v36  ;;  %v2335_v29 = vld [vmem:[#allocation7 + $0x1e0] sm:$0xff] }
 0x432   :  { %v10880_v38 = vpop.f32.mrb[91].mxu0  ;;  %v15371_v7 = vpack.c.bf16 %v2336_v1, %v2335_v29 }
 0x433   :  { %v10881_v56 = vadd.f32 %v10880_v38, %v10879_v12  ;;  %13043 = vmatprep.mubr.f32.mxu0 %v1731_v45  ;;  %2845 = vmatmul.mubr.f32.gmra.mrb[188].mxu1 %v2559_v49  ;;  %v2564_v12 = vld [vmem:[#allocation5 + $0x9f8] sm:$0xff]  ;;  %v2563_v38 = vld [vmem:[#allocation5 + $0x9f0] sm:$0xff] }
 0x434   :  { %15362 = vmatpush3.bf16.msra.mxu0 %v15359_v36  ;;  %2849 = vmatprep.mubr.f32.mxu1 %v2564_v12 }
 0x435   :  { %v1736_v30 = vadd.f32 %v10881_v56, %v18440_v4  ;;  %v10882_v17 = vpop.f32.mrb[92].mxu0  ;;  %15364 = vmatprep.subr.bf16.mxu0 %v15363_v5  ;;  %v2337_v4 = vld [vmem:[#allocation7 + $0x1f0] sm:$0xff] }
 0x436   :  { %v10883_v15 = vpop.f32.mrb[93].mxu0  ;;  %v15375_v43 = vpack.c.bf16 %v2338_v2, %v2337_v4 }
 0x437   :  { %v10884_v14 = vadd.f32 %v10883_v15, %v10882_v17  ;;  %13044 = vmatmul.mubr.f32.gmra.mrb[68].mxu0 %v1736_v30  ;;  %2850 = vmatmul.mubr.f32.gmra.mrb[190].mxu1 %v2563_v38 }
 0x438   :  { %15366 = vmatpush3.bf16.msra.mxu0 %v15363_v5 }
 0x439   :  { %v1741_v23 = vadd.f32 %v10884_v14, %v18446_v57  ;;  %v10885_v36 = vpop.f32.mrb[94].mxu0  ;;  %15368 = vmatprep.subr.bf16.mxu0 %v15367_v27 }
 0x43a   :  { %v10886_v42 = vpop.f32.mrb[95].mxu0 }
 0x43b   :  { %v10887_v45 = vadd.f32 %v10886_v42, %v10885_v36  ;;  %13046 = vmatprep.mubr.f32.mxu0 %v1741_v23 }
 0x43c   :  { %15370 = vmatpush3.bf16.msra.mxu0 %v15367_v27 }
 0x43d   :  { %v1746_v55 = vadd.f32 %v10887_v45, %v18452_v61  ;;  %v10888_v5 = vpop.f32.mrb[96].mxu0  ;;  %15372 = vmatprep.subr.bf16.mxu0 %v15371_v7 }
 0x43e   :  { %v10889_v56 = vpop.f32.mrb[97].mxu0 }
 0x43f   :  { %v10890_v57 = vadd.f32 %v10889_v56, %v10888_v5  ;;  %13047 = vmatmul.mubr.f32.gmra.mrb[70].mxu0 %v1746_v55 }
 0x440   :  { %15374 = vmatpush3.bf16.msra.mxu0 %v15371_v7 }
 0x441   :  { %v1751_v25 = vadd.f32 %v10890_v57, %v18458_v35  ;;  %v10891_v37 = vpop.f32.mrb[98].mxu0  ;;  %15376 = vmatprep.subr.bf16.mxu0 %v15375_v43  ;;  %v2514_v57 = vld [vmem:[#allocation5 + $0x868] sm:$0xff] }
 0x442   :  { %v10892_v30 = vpop.f32.mrb[99].mxu0 }
 0x443   :  { %v10893_v17 = vadd.f32 %v10892_v30, %v10891_v37  ;;  %13049 = vmatprep.mubr.f32.mxu0 %v1751_v25  ;;  %v2864_v37 = vld [vmem:[#allocation7 + $0x240] sm:$0xff]  ;;  %v2865_v30 = vld [vmem:[#allocation7 + $0x248] sm:$0xff] }
 0x444   :  { %15378 = vmatpush3.bf16.msra.mxu0 %v15375_v43 }
 0x445   :  { %v1756_v27 = vadd.f32 %v10893_v17, %v18461_v18  ;;  %v10894_v15 = vpop.f32.mrb[100].mxu0  ;;  %15380 = vmatprep.subr.bf16.mxu0 %v19711_v0  ;;  %v2513_v17 = vld [vmem:[#allocation5 + $0x860] sm:$0xff] }
 0x446   :  { %v10895_v61 = vpop.f32.mrb[101].mxu0 }
 0x447   :  { %v10896_v29 = vadd.f32 %v10895_v61, %v10894_v15  ;;  %13050 = vmatmul.mubr.f32.gmra.mrb[72].mxu0 %v1756_v27  ;;  %v2518_v27 = vld [vmem:[#allocation5 + $0x888] sm:$0xff]  ;;  %v15459_v15 = vpack.c.bf16 %v2865_v30, %v2864_v37  ;;  %v2866_v61 = vld [vmem:[#allocation7 + $0x250] sm:$0xff] }
 0x449   :  { %v1761_v1 = vadd.f32 %v10896_v29, %v18463_v6  ;;  %v10897_v14 = vpop.f32.mrb[102].mxu0  ;;  %v2867_v29 = vld [vmem:[#allocation7 + $0x258] sm:$0xff] }
 0x44a   :  { %v10898_v46 = vpop.f32.mrb[103].mxu0 }
 0x44b   :  { %v10899_v49 = vadd.f32 %v10898_v46, %v10897_v14  ;;  %13052 = vmatprep.mubr.f32.mxu0 %v1761_v1  ;;  %v2517_v1 = vld [vmem:[#allocation5 + $0x880] sm:$0xff]  ;;  %v2522_v14 = vld [vmem:[#allocation5 + $0x8a8] sm:$0xff]  ;;  %v15463_v46 = vpack.c.bf16 %v2867_v29, %v2866_v61 }
 0x44d   :  { %v1766_v35 = vadd.f32 %v10899_v49, %v18465_v3  ;;  %v10900_v23 = vpop.f32.mrb[104].mxu0  ;;  %v2521_v49 = vld [vmem:[#allocation5 + $0x8a0] sm:$0xff] }
 0x44e   :  { %v10901_v36 = vpop.f32.mrb[105].mxu0 }
 0x44f   :  { %v10902_v7 = vadd.f32 %v10901_v36, %v10900_v23  ;;  %13053 = vmatmul.mubr.f32.gmra.mrb[74].mxu0 %v1766_v35  ;;  %v2526_v35 = vld [vmem:[#allocation5 + $0x8c8] sm:$0xff]  ;;  %v2525_v23 = vld [vmem:[#allocation5 + $0x8c0] sm:$0xff] }
 0x450   :  { %v2530_v36 = vld [vmem:[#allocation5 + $0x8e8] sm:$0xff] }
 0x451   :  { %v1771_v18 = vadd.f32 %v10902_v7, %v18467_v60  ;;  %v10903_v42 = vpop.f32.mrb[106].mxu0  ;;  %v2502_v60 = vld [vmem:[#allocation5 + $0x808] sm:$0xff]  ;;  %v2529_v7 = vld [vmem:[#allocation5 + $0x8e0] sm:$0xff] }
 0x452   :  { %v10904_v4 = vpop.f32.mrb[107].mxu0 }
 0x453   :  { %v10905_v2 = vadd.f32 %v10904_v4, %v10903_v42  ;;  %13055 = vmatprep.mubr.f32.mxu0 %v1771_v18  ;;  %v2534_v18 = vld [vmem:[#allocation5 + $0x908] sm:$0xff]  ;;  %v2533_v42 = vld [vmem:[#allocation5 + $0x900] sm:$0xff] }
 0x454   :  { %v2538_v4 = vld [vmem:[#allocation5 + $0x928] sm:$0xff] }
 0x455   :  { %v1776_v45 = vadd.f32 %v10905_v2, %v18469_v9  ;;  %v10906_v12 = vpop.f32.mrb[108].mxu0  ;;  %v2537_v2 = vld [vmem:[#allocation5 + $0x920] sm:$0xff] }
 0x456   :  { %v10907_v6 = vpop.f32.mrb[109].mxu0 }
 0x457   :  { %v10908_v38 = vadd.f32 %v10907_v6, %v10906_v12  ;;  %13056 = vmatmul.mubr.f32.gmra.mrb[76].mxu0 %v1776_v45  ;;  %v2542_v45 = vld [vmem:[#allocation5 + $0x948] sm:$0xff]  ;;  %v2541_v12 = vld [vmem:[#allocation5 + $0x940] sm:$0xff] }
 0x458   :  { %v2546_v6 = vld [vmem:[#allocation5 + $0x968] sm:$0xff] }
 0x459   :  { %v1781_v55 = vadd.f32 %v10908_v38, %v18471_v62  ;;  %v10909_v5 = vpop.f32.mrb[110].mxu0  ;;  %v2858_v62 = vld [vmem:[#allocation7 + $0x210] sm:$0xff]  ;;  %v2545_v38 = vld [vmem:[#allocation5 + $0x960] sm:$0xff] }
 0x45a   :  { %v10910_v3 = vpop.f32.mrb[111].mxu0 }
 0x45b   :  { %v10911_v43 = vadd.f32 %v10910_v3, %v10909_v5  ;;  %13058 = vmatprep.mubr.f32.mxu0 %v1781_v55  ;;  %v2550_v55 = vld [vmem:[#allocation5 + $0x988] sm:$0xff]  ;;  %v2549_v5 = vld [vmem:[#allocation5 + $0x980] sm:$0xff] }
 0x45c   :  { %v2554_v3 = vld [vmem:[#allocation5 + $0x9a8] sm:$0xff] }
 0x45d   :  { %v1786_v56 = vadd.f32 %v10911_v43, %v18473_v58  ;;  %v2859_v58 = vld [vmem:[#allocation7 + $0x218] sm:$0xff]  ;;  %v2553_v43 = vld [vmem:[#allocation5 + $0x9a0] sm:$0xff] }
 0x45f   :  { %13059 = vmatmul.mubr.f32.gmra.mrb[78].mxu0 %v1786_v56  ;;  %v2558_v56 = vld [vmem:[#allocation5 + $0x9c8] sm:$0xff] }
 0x460   :  { %13093 = vmatprep.mubr.f32.mxu0 %v18504_v63  ;;  %v2857_v63 = vld [vmem:[#allocation7 + $0x208] sm:$0xff] }
 0x463   :  { %13094 = vmatmul.mubr.f32.vlgmr.msra.gmra.mrb[64].mxu0 %v18507_v11  ;;  %v19712_v11 = vld [vmem:[#allocation72_spill] sm:$0xff] }
 0x464   :  { %13096 = vmatprep.mubr.f32.mxu0 %v18509_v47  ;;  %15382 = vmatpush3.bf16.msra.mxu0 %v18186_v8  ;;  %v19713_v47 = vld [vmem:[#allocation70_spill] sm:$0xff] }
 0x465   :  { %15384 = vmatprep.subr.bf16.mxu0 %v18193_v16 }
 0x467   :  { %13097 = vmatmul.mubr.f32.gmra.mrb[66].mxu0 %v18511_v51  ;;  %v2856_v51 = vld [vmem:[#allocation7 + $0x200] sm:$0xff] }
 0x468   :  { %13099 = vmatprep.mubr.f32.mxu0 %v18514_v31  ;;  %15386 = vmatpush3.bf16.msra.mxu0 %v18198_v21  ;;  %v15443_v9 = vpack.c.bf16 %v2857_v63, %v2856_v51  ;;  %v2501_v31 = vld [vmem:[#allocation5 + $0x800] sm:$0xff]  ;;  %v2562_v63 = vld [vmem:[#allocation5 + $0x9e8] sm:$0xff] }
 0x469   :  { %15388 = vmatprep.subr.bf16.mxu0 %v18204_v26  ;;  %v2557_v51 = vld [vmem:[#allocation5 + $0x9c0] sm:$0xff] }
 0x46b   :  { %13100 = vmatmul.mubr.f32.gmra.mrb[68].mxu0 %v18517_v53  ;;  %v2506_v53 = vld [vmem:[#allocation5 + $0x828] sm:$0xff] }
 0x46c   :  { %13102 = vmatprep.mubr.f32.mxu0 %v18520_v33  ;;  %15390 = vmatpush3.bf16.msra.mxu0 %v18209_v34  ;;  %v15447_v33 = vpack.c.bf16 %v2859_v58, %v2858_v62  ;;  %v2868_v62 = vld [vmem:[#allocation7 + $0x260] sm:$0xff]  ;;  %v2869_v58 = vld [vmem:[#allocation7 + $0x268] sm:$0xff] }
 0x46d   :  { %15392 = vmatprep.subr.bf16.mxu0 %v18215_v39 }
 0x46f   :  { %13103 = vmatmul.mubr.f32.gmra.mrb[70].mxu0 %v18526_v48  ;;  %v2860_v48 = vld [vmem:[#allocation7 + $0x220] sm:$0xff] }
 0x470   :  { %13105 = vmatprep.mubr.f32.mxu0 %v18529_v44  ;;  %15394 = vmatpush3.bf16.msra.mxu0 %v18221_v50  ;;  %v2861_v44 = vld [vmem:[#allocation7 + $0x228] sm:$0xff] }
 0x471   :  { %15396 = vmatprep.subr.bf16.mxu0 %v18227_v52 }
 0x473   :  { %13106 = vmatmul.mubr.f32.gmra.mrb[72].mxu0 %v18532_v10  ;;  %v2505_v10 = vld [vmem:[#allocation5 + $0x820] sm:$0xff] }
 0x474   :  { %13108 = vmatprep.mubr.f32.mxu0 %v18535_v59  ;;  %15398 = vmatpush3.bf16.msra.mxu0 %v19704_v40  ;;  %v2510_v59 = vld [vmem:[#allocation5 + $0x848] sm:$0xff] }
 0x475   :  { %15400 = vmatprep.subr.bf16.mxu0 %v19705_v54 }
 0x477   :  { %13109 = vmatmul.mubr.f32.gmra.mrb[74].mxu0 %v18538_v19  ;;  %v15451_v19 = vpack.c.bf16 %v2861_v44, %v2860_v48  ;;  %v2870_v48 = vld [vmem:[#allocation7 + $0x270] sm:$0xff]  ;;  %v2871_v44 = vld [vmem:[#allocation7 + $0x278] sm:$0xff] }
 0x478   :  { %13111 = vmatprep.mubr.f32.mxu0 %v18541_v13  ;;  %15402 = vmatpush3.bf16.msra.mxu0 %v19706_v22  ;;  %v2862_v13 = vld [vmem:[#allocation7 + $0x230] sm:$0xff] }
 0x479   :  { %15404 = vmatprep.subr.bf16.mxu0 %v19707_v32 }
 0x47b   :  { %13112 = vmatmul.mubr.f32.gmra.mrb[76].mxu0 %v18544_v20  ;;  %v2863_v20 = vld [vmem:[#allocation7 + $0x238] sm:$0xff] }
 0x47c   :  { %13114 = vmatprep.mubr.f32.mxu0 %v18547_v28  ;;  %15406 = vmatpush3.bf16.msra.mxu0 %v19708_v24  ;;  %v2509_v28 = vld [vmem:[#allocation5 + $0x840] sm:$0xff]  ;;  %v15455_v25 = vpack.c.bf16 %v2863_v20, %v2862_v13 }
 0x47d   :  { %15408 = vmatprep.subr.bf16.mxu0 %v19709_v41 }
 0x47f   :  { %13115 = vmatmul.mubr.f32.gmra.mrb[78].mxu0 %v19712_v11 }
 0x480   :  { %15410 = vmatpush3.bf16.msra.mxu0 %v19713_v47  ;;  %2629 = vmatprep.mubr.f32.mxu0 %v2502_v60  ;;  %v2561_v60 = vld [vmem:[#allocation5 + $0x9e0] sm:$0xff] }
 0x481   :  { %15444 = vmatprep.subr.bf16.mxu0 %v15443_v9 }
 0x483   :  { %2630 = vmatmul.mubr.f32.vlgmr.msra.gmra.mrb[112].mxu0 %v2501_v31  ;;  %v15467_v31 = vpack.c.bf16 %v2869_v58, %v2868_v62 }
 0x484   :  { %2634 = vmatprep.mubr.f32.mxu0 %v2506_v53  ;;  %15446 = vmatpush3.bf16.msra.mxu0 %v15443_v9 }
 0x485   :  { %15448 = vmatprep.subr.bf16.mxu0 %v15447_v33 }
 0x487   :  { %2635 = vmatmul.mubr.f32.gmra.mrb[114].mxu0 %v2505_v10 }
 0x488   :  { %2639 = vmatprep.mubr.f32.mxu0 %v2510_v59  ;;  %15450 = vmatpush3.bf16.msra.mxu0 %v15447_v33  ;;  %v15471_v59 = vpack.c.bf16 %v2871_v44, %v2870_v48  ;;  %v3035_v44 = vld [vmem:[#allocation5 + $0xa08] sm:$0xff] }
 0x489   :  { %15452 = vmatprep.subr.bf16.mxu0 %v15451_v19  ;;  %3162 = vmatprep.mubr.f32.mxu1 %v3035_v44  ;;  %v3094_v44 = vld [vmem:[#allocation5 + $0xbe0] sm:$0xff] }
 0x48b   :  { %2640 = vmatmul.mubr.f32.gmra.mrb[116].mxu0 %v2509_v28  ;;  %v19714_v28 = vld [vmem:[#allocation49_spill] sm:$0xff] }
 0x48c   :  { %2644 = vmatprep.mubr.f32.mxu0 %v2514_v57  ;;  %15454 = vmatpush3.bf16.msra.mxu0 %v15451_v19 }
 0x48d   :  { %15456 = vmatprep.subr.bf16.mxu0 %v15455_v25 }
 0x48f   :  { %2645 = vmatmul.mubr.f32.gmra.mrb[118].mxu0 %v2513_v17 }
 0x490   :  { %2649 = vmatprep.mubr.f32.mxu0 %v2518_v27  ;;  %15458 = vmatpush3.bf16.msra.mxu0 %v15455_v25 }
 0x491   :  { %15460 = vmatprep.subr.bf16.mxu0 %v15459_v15 }
 0x493   :  { %2650 = vmatmul.mubr.f32.gmra.mrb[120].mxu0 %v2517_v1 }
 0x494   :  { %2654 = vmatprep.mubr.f32.mxu0 %v2522_v14  ;;  %15462 = vmatpush3.bf16.msra.mxu0 %v15459_v15 }
 0x495   :  { %15464 = vmatprep.subr.bf16.mxu0 %v15463_v46 }
 0x497   :  { %2655 = vmatmul.mubr.f32.gmra.mrb[122].mxu0 %v2521_v49 }
 0x498   :  { %2659 = vmatprep.mubr.f32.mxu0 %v2526_v35  ;;  %15466 = vmatpush3.bf16.msra.mxu0 %v15463_v46 }
 0x499   :  { %15468 = vmatprep.subr.bf16.mxu0 %v15467_v31 }
 0x49b   :  { %2660 = vmatmul.mubr.f32.gmra.mrb[124].mxu0 %v2525_v23 }
 0x49c   :  { %2664 = vmatprep.mubr.f32.mxu0 %v2530_v36  ;;  %15470 = vmatpush3.bf16.msra.mxu0 %v15467_v31 }
 0x49d   :  { %15472 = vmatprep.subr.bf16.mxu0 %v15471_v59 }
 0x49f   :  { %2665 = vmatmul.mubr.f32.gmra.mrb[126].mxu0 %v2529_v7 }
 0x4a0   :  { %2669 = vmatprep.mubr.f32.mxu0 %v2534_v18  ;;  %15474 = vmatpush3.bf16.msra.mxu0 %v15471_v59  ;;  %v3039_v59 = vld [vmem:[#allocation5 + $0xa28] sm:$0xff] }
 0x4a1   :  { %15508 = vmatprep.subr.bf16.mxu0 %v19714_v28 }
 0x4a3   :  { %2670 = vmatmul.mubr.f32.gmra.mrb[128].mxu0 %v2533_v42 }
 0x4a4   :  { %2674 = vmatprep.mubr.f32.mxu0 %v2538_v4 }
 0x4a7   :  { %2675 = vmatmul.mubr.f32.gmra.mrb[130].mxu0 %v2537_v2 }
 0x4a8   :  { %2679 = vmatprep.mubr.f32.mxu0 %v2542_v45 }
 0x4ab   :  { %2680 = vmatmul.mubr.f32.gmra.mrb[132].mxu0 %v2541_v12 }
 0x4ac   :  { %2684 = vmatprep.mubr.f32.mxu0 %v2546_v6 }
 0x4ad   :  { %v11248_v9 = vpop.f32.mrb[160].mxu1 }
 0x4ae   :  { %v11249_v11 = vpop.f32.mrb[161].mxu1 }
 0x4af   :  { %2685 = vmatmul.mubr.f32.gmra.mrb[134].mxu0 %v2545_v38  ;;  %v18617_v53 = vadd.f32 %v11249_v11, %v11248_v9 }
 0x4b0   :  { %2689 = vmatprep.mubr.f32.mxu0 %v2550_v55 }
 0x4b1   :  { %v11251_v33 = vpop.f32.mrb[162].mxu1 }
 0x4b2   :  { %v11252_v10 = vpop.f32.mrb[163].mxu1 }
 0x4b3   :  { %2690 = vmatmul.mubr.f32.gmra.mrb[136].mxu0 %v2549_v5  ;;  %v18619_v19 = vadd.f32 %v11252_v10, %v11251_v33  ;;  %v3034_v10 = vld [vmem:[#allocation5 + $0xa00] sm:$0xff] }
 0x4b4   :  { %2694 = vmatprep.mubr.f32.mxu0 %v2554_v3  ;;  %3163 = vmatmul.mubr.f32.vlgmr.msra.gmra.mrb[192].mxu1 %v3034_v10 }
 0x4b5   :  { %v11254_v13 = vpop.f32.mrb[164].mxu1  ;;  %15574 = vmatpush3.bf16.msra.mxu1 %v18186_v8  ;;  %3167 = vmatprep.mubr.f32.mxu1 %v3039_v59 }
 0x4b6   :  { %v11255_v20 = vpop.f32.mrb[165].mxu1  ;;  %15576 = vmatprep.subr.bf16.mxu1 %v18193_v16 }
 0x4b7   :  { %2695 = vmatmul.mubr.f32.gmra.mrb[138].mxu0 %v2553_v43  ;;  %v18622_v57 = vadd.f32 %v11255_v20, %v11254_v13  ;;  %v3038_v13 = vld [vmem:[#allocation5 + $0xa20] sm:$0xff]  ;;  %v3043_v20 = vld [vmem:[#allocation5 + $0xa48] sm:$0xff] }
 0x4b8   :  { %2699 = vmatprep.mubr.f32.mxu0 %v2558_v56  ;;  %3168 = vmatmul.mubr.f32.gmra.mrb[194].mxu1 %v3038_v13 }
 0x4b9   :  { %v11257_v25 = vpop.f32.mrb[166].mxu1  ;;  %15578 = vmatpush3.bf16.msra.mxu1 %v18198_v21  ;;  %3172 = vmatprep.mubr.f32.mxu1 %v3043_v20  ;;  %v3568_v20 = vld [vmem:[#allocation5 + $0xc08] sm:$0xff] }
 0x4ba   :  { %v11258_v37 = vpop.f32.mrb[167].mxu1  ;;  %15580 = vmatprep.subr.bf16.mxu1 %v18204_v26 }
 0x4bb   :  { %2700 = vmatmul.mubr.f32.gmra.mrb[140].mxu0 %v2557_v51  ;;  %v18624_v30 = vadd.f32 %v11258_v37, %v11257_v25  ;;  %v3042_v25 = vld [vmem:[#allocation5 + $0xa40] sm:$0xff]  ;;  %v3047_v37 = vld [vmem:[#allocation5 + $0xa68] sm:$0xff] }
 0x4bc   :  { %2704 = vmatprep.mubr.f32.mxu0 %v2562_v63  ;;  %3173 = vmatmul.mubr.f32.gmra.mrb[196].mxu1 %v3042_v25  ;;  %v3567_v25 = vld [vmem:[#allocation5 + $0xc00] sm:$0xff] }
 0x4bd   :  { %v11260_v17 = vpop.f32.mrb[168].mxu1  ;;  %15582 = vmatpush3.bf16.msra.mxu1 %v18209_v34  ;;  %3177 = vmatprep.mubr.f32.mxu1 %v3047_v37  ;;  %v3572_v37 = vld [vmem:[#allocation5 + $0xc28] sm:$0xff] }
 0x4be   :  { %v11261_v27 = vpop.f32.mrb[169].mxu1  ;;  %15584 = vmatprep.subr.bf16.mxu1 %v18215_v39 }
 0x4bf   :  { %2705 = vmatmul.mubr.f32.gmra.mrb[142].mxu0 %v2561_v60  ;;  %v18626_v15 = vadd.f32 %v11261_v27, %v11260_v17  ;;  %v3046_v17 = vld [vmem:[#allocation5 + $0xa60] sm:$0xff]  ;;  %v3051_v27 = vld [vmem:[#allocation5 + $0xa88] sm:$0xff] }
 0x4c0   :  { %3178 = vmatmul.mubr.f32.gmra.mrb[198].mxu1 %v3046_v17 }
 0x4c1   :  { %v11263_v61 = vpop.f32.mrb[170].mxu1  ;;  %15586 = vmatpush3.bf16.msra.mxu1 %v18221_v50  ;;  %3182 = vmatprep.mubr.f32.mxu1 %v3051_v27 }
 0x4c2   :  { %v11264_v29 = vpop.f32.mrb[171].mxu1  ;;  %15588 = vmatprep.subr.bf16.mxu1 %v18227_v52 }
 0x4c3   :  { %v18628_v1 = vadd.f32 %v11264_v29, %v11263_v61  ;;  %v3050_v61 = vld [vmem:[#allocation5 + $0xa80] sm:$0xff]  ;;  %v3055_v29 = vld [vmem:[#allocation5 + $0xaa8] sm:$0xff] }
 0x4c4   :  { %3183 = vmatmul.mubr.f32.gmra.mrb[200].mxu1 %v3050_v61 }
 0x4c5   :  { %v11266_v14 = vpop.f32.mrb[172].mxu1  ;;  %15590 = vmatpush3.bf16.msra.mxu1 %v19704_v40  ;;  %3187 = vmatprep.mubr.f32.mxu1 %v3055_v29  ;;  %v3571_v29 = vld [vmem:[#allocation5 + $0xc20] sm:$0xff] }
 0x4c6   :  { %v11267_v46 = vpop.f32.mrb[173].mxu1  ;;  %15592 = vmatprep.subr.bf16.mxu1 %v19705_v54 }
 0x4c7   :  { %v18630_v49 = vadd.f32 %v11267_v46, %v11266_v14  ;;  %v3054_v14 = vld [vmem:[#allocation5 + $0xaa0] sm:$0xff]  ;;  %v3059_v46 = vld [vmem:[#allocation5 + $0xac8] sm:$0xff] }
 0x4c8   :  { %3188 = vmatmul.mubr.f32.gmra.mrb[202].mxu1 %v3054_v14 }
 0x4c9   :  { %v11269_v35 = vpop.f32.mrb[174].mxu1  ;;  %15594 = vmatpush3.bf16.msra.mxu1 %v19706_v22  ;;  %3192 = vmatprep.mubr.f32.mxu1 %v3059_v46  ;;  %v3576_v46 = vld [vmem:[#allocation5 + $0xc48] sm:$0xff] }
 0x4ca   :  { %v11270_v23 = vpop.f32.mrb[175].mxu1  ;;  %15596 = vmatprep.subr.bf16.mxu1 %v19707_v32 }
 0x4cb   :  { %v18632_v36 = vadd.f32 %v11270_v23, %v11269_v35  ;;  %v3058_v35 = vld [vmem:[#allocation5 + $0xac0] sm:$0xff]  ;;  %v3063_v23 = vld [vmem:[#allocation5 + $0xae8] sm:$0xff] }
 0x4cc   :  { %3193 = vmatmul.mubr.f32.gmra.mrb[204].mxu1 %v3058_v35 }
 0x4cd   :  { %v11272_v7 = vpop.f32.mrb[176].mxu1  ;;  %15598 = vmatpush3.bf16.msra.mxu1 %v19708_v24  ;;  %3197 = vmatprep.mubr.f32.mxu1 %v3063_v23 }
 0x4ce   :  { %v11273_v18 = vpop.f32.mrb[177].mxu1  ;;  %15600 = vmatprep.subr.bf16.mxu1 %v19709_v41 }
 0x4cf   :  { %v18634_v42 = vadd.f32 %v11273_v18, %v11272_v7  ;;  %v3062_v7 = vld [vmem:[#allocation5 + $0xae0] sm:$0xff]  ;;  %v3067_v18 = vld [vmem:[#allocation5 + $0xb08] sm:$0xff] }
 0x4d0   :  { %3198 = vmatmul.mubr.f32.gmra.mrb[206].mxu1 %v3062_v7 }
 0x4d1   :  { %v11275_v4 = vpop.f32.mrb[178].mxu1  ;;  %15602 = vmatpush3.bf16.msra.mxu1 %v19713_v47  ;;  %3202 = vmatprep.mubr.f32.mxu1 %v3067_v18  ;;  %v3575_v18 = vld [vmem:[#allocation5 + $0xc40] sm:$0xff] }
 0x4d2   :  { %v11276_v2 = vpop.f32.mrb[179].mxu1  ;;  %15668 = vmatprep.subr.bf16.mxu1 %v19711_v0 }
 0x4d3   :  { %v18636_v45 = vadd.f32 %v11276_v2, %v11275_v4  ;;  %v3066_v4 = vld [vmem:[#allocation5 + $0xb00] sm:$0xff]  ;;  %v3071_v2 = vld [vmem:[#allocation5 + $0xb28] sm:$0xff] }
 0x4d4   :  { %3203 = vmatmul.mubr.f32.gmra.mrb[208].mxu1 %v3066_v4  ;;  %v3580_v4 = vld [vmem:[#allocation5 + $0xc68] sm:$0xff] }
 0x4d5   :  { %3207 = vmatprep.mubr.f32.mxu1 %v3071_v2  ;;  %v19715_v2 = vld [vmem:[#allocation50_spill] sm:$0xff] }
 0x4f6   :  { %v11278_v12 = vpop.f32.mrb[180].mxu1 }
 0x4f7   :  { %v11279_v6 = vpop.f32.mrb[181].mxu1 }
 0x4f8   :  { %v18638_v38 = vadd.f32 %v11279_v6, %v11278_v12  ;;  %v3070_v12 = vld [vmem:[#allocation5 + $0xb20] sm:$0xff]  ;;  %v3075_v6 = vld [vmem:[#allocation5 + $0xb48] sm:$0xff] }
 0x4f9   :  { %3208 = vmatmul.mubr.f32.gmra.mrb[210].mxu1 %v3070_v12 }
 0x4fa   :  { %v11281_v55 = vpop.f32.mrb[182].mxu1  ;;  %3212 = vmatprep.mubr.f32.mxu1 %v3075_v6 }
 0x4fb   :  { %v11282_v5 = vpop.f32.mrb[183].mxu1 }
 0x4fc   :  { %v18640_v3 = vadd.f32 %v11282_v5, %v11281_v55  ;;  %v3074_v55 = vld [vmem:[#allocation5 + $0xb40] sm:$0xff]  ;;  %v3079_v5 = vld [vmem:[#allocation5 + $0xb68] sm:$0xff] }
 0x4fd   :  { %3213 = vmatmul.mubr.f32.gmra.mrb[212].mxu1 %v3074_v55  ;;  %v19716_v55 = vld [vmem:[#allocation51_spill] sm:$0xff] }
 0x4fe   :  { %v11284_v43 = vpop.f32.mrb[184].mxu1  ;;  %3217 = vmatprep.mubr.f32.mxu1 %v3079_v5  ;;  %v3579_v5 = vld [vmem:[#allocation5 + $0xc60] sm:$0xff] }
 0x4ff   :  { %v11285_v56 = vpop.f32.mrb[185].mxu1 }
 0x500   :  { %v18642_v51 = vadd.f32 %v11285_v56, %v11284_v43  ;;  %v3078_v43 = vld [vmem:[#allocation5 + $0xb60] sm:$0xff]  ;;  %v3083_v56 = vld [vmem:[#allocation5 + $0xb88] sm:$0xff] }
 0x501   :  { %3218 = vmatmul.mubr.f32.gmra.mrb[214].mxu1 %v3078_v43 }
 0x502   :  { %v11287_v63 = vpop.f32.mrb[186].mxu1  ;;  %3222 = vmatprep.mubr.f32.mxu1 %v3083_v56  ;;  %v3584_v56 = vld [vmem:[#allocation5 + $0xc88] sm:$0xff] }
 0x503   :  { %v11288_v60 = vpop.f32.mrb[187].mxu1 }
 0x504   :  { %v18644_v9 = vadd.f32 %v11288_v60, %v11287_v63  ;;  %v3082_v63 = vld [vmem:[#allocation5 + $0xb80] sm:$0xff]  ;;  %v3087_v60 = vld [vmem:[#allocation5 + $0xba8] sm:$0xff] }
 0x505   :  { %3223 = vmatmul.mubr.f32.gmra.mrb[216].mxu1 %v3082_v63  ;;  %v19717_v63 = vld [vmem:[#allocation52_spill] sm:$0xff] }
 0x506   :  { %v11290_v62 = vpop.f32.mrb[188].mxu1  ;;  %3227 = vmatprep.mubr.f32.mxu1 %v3087_v60 }
 0x507   :  { %v11291_v58 = vpop.f32.mrb[189].mxu1 }
 0x508   :  { %v18646_v11 = vadd.f32 %v11291_v58, %v11290_v62  ;;  %v3086_v62 = vld [vmem:[#allocation5 + $0xba0] sm:$0xff]  ;;  %v3091_v58 = vld [vmem:[#allocation5 + $0xbc8] sm:$0xff] }
 0x509   :  { %3228 = vmatmul.mubr.f32.gmra.mrb[218].mxu1 %v3086_v62 }
 0x50a   :  { %v11293_v31 = vpop.f32.mrb[190].mxu1  ;;  %3232 = vmatprep.mubr.f32.mxu1 %v3091_v58 }
 0x50b   :  { %v11294_v33 = vpop.f32.mrb[191].mxu1 }
 0x50c   :  { %v18648_v48 = vadd.f32 %v11294_v33, %v11293_v31  ;;  %v3090_v31 = vld [vmem:[#allocation5 + $0xbc0] sm:$0xff]  ;;  %v3095_v33 = vld [vmem:[#allocation5 + $0xbe8] sm:$0xff] }
 0x50d   :  { %3233 = vmatmul.mubr.f32.gmra.mrb[220].mxu1 %v3090_v31  ;;  %v3583_v31 = vld [vmem:[#allocation5 + $0xc80] sm:$0xff] }
 0x50e   :  { %3237 = vmatprep.mubr.f32.mxu1 %v3095_v33 }
 0x511   :  { %3238 = vmatmul.mubr.f32.gmra.mrb[222].mxu1 %v3094_v44  ;;  %v3588_v44 = vld [vmem:[#allocation5 + $0xca8] sm:$0xff] }
 0x512   :  { %3695 = vmatprep.mubr.f32.mxu1 %v3568_v20 }
 0x515   :  { %3696 = vmatmul.mubr.f32.vlgmr.msra.gmra.mrb[224].mxu1 %v3567_v25  ;;  %v3587_v25 = vld [vmem:[#allocation5 + $0xca0] sm:$0xff] }
 0x516   :  { %3700 = vmatprep.mubr.f32.mxu1 %v3572_v37  ;;  %15670 = vmatpush3.bf16.msra.mxu1 %v18186_v8 }
 0x517   :  { %15672 = vmatprep.subr.bf16.mxu1 %v18193_v16 }
 0x519   :  { %3701 = vmatmul.mubr.f32.gmra.mrb[226].mxu1 %v3571_v29 }
 0x51a   :  { %3705 = vmatprep.mubr.f32.mxu1 %v3576_v46  ;;  %15674 = vmatpush3.bf16.msra.mxu1 %v18198_v21  ;;  %v3591_v46 = vld [vmem:[#allocation5 + $0xcc0] sm:$0xff] }
 0x51b   :  { %15676 = vmatprep.subr.bf16.mxu1 %v18204_v26 }
 0x51d   :  { %3706 = vmatmul.mubr.f32.gmra.mrb[228].mxu1 %v3575_v18 }
 0x51e   :  { %3710 = vmatprep.mubr.f32.mxu1 %v3580_v4  ;;  %15678 = vmatpush3.bf16.msra.mxu1 %v18209_v34 }
 0x51f   :  { %15680 = vmatprep.subr.bf16.mxu1 %v18215_v39 }
 0x521   :  { %3711 = vmatmul.mubr.f32.gmra.mrb[230].mxu1 %v3579_v5  ;;  %v19725_v5 = vld [vmem:[#allocation63_spill] sm:$0xff] }
 0x522   :  { %3715 = vmatprep.mubr.f32.mxu1 %v3584_v56  ;;  %15682 = vmatpush3.bf16.msra.mxu1 %v18221_v50 }
 0x523   :  { %15684 = vmatprep.subr.bf16.mxu1 %v18227_v52 }
 0x525   :  { %3716 = vmatmul.mubr.f32.gmra.mrb[232].mxu1 %v3583_v31  ;;  %v3390_v31 = vld [vmem:[#allocation7 + $0x288] sm:$0xff] }
 0x526   :  { %3720 = vmatprep.mubr.f32.mxu1 %v3588_v44  ;;  %15686 = vmatpush3.bf16.msra.mxu1 %v19704_v40  ;;  %v3604_v44 = vld [vmem:[#allocation5 + $0xd28] sm:$0xff] }
 0x527   :  { %15688 = vmatprep.subr.bf16.mxu1 %v19705_v54 }
 0x529   :  { %3721 = vmatmul.mubr.f32.gmra.mrb[234].mxu1 %v3587_v25 }
 0x52a   :  { %15690 = vmatpush3.bf16.msra.mxu1 %v19706_v22 }
 0x52b   :  { %15692 = vmatprep.subr.bf16.mxu1 %v19707_v32 }
 0x52e   :  { %15694 = vmatpush3.bf16.msra.mxu1 %v19708_v24 }
 0x52f   :  { %15696 = vmatprep.subr.bf16.mxu1 %v19709_v41 }
 0x532   :  { %15698 = vmatpush3.bf16.msra.mxu1 %v19713_v47 }
 0x533   :  { %15700 = vmatprep.subr.bf16.mxu1 %v19714_v28 }
 0x556   :  { %v11168_v10 = vpop.f32.mrb[112].mxu0 }
 0x557   :  { %v11169_v59 = vpop.f32.mrb[113].mxu0 }
 0x558   :  { %v11170_v13 = vadd.f32 %v11169_v59, %v11168_v10  ;;  %v19719_v10 = vld [vmem:[#allocation54_spill] sm:$0xff] }
 0x55a   :  { %v2777_v17 = vadd.f32 %v18617_v53, %v11170_v13  ;;  %v11171_v27 = vpop.f32.mrb[114].mxu0 }
 0x55b   :  { %v11172_v61 = vpop.f32.mrb[115].mxu0 }
 0x55c   :  { %v11173_v14 = vadd.f32 %v11172_v61, %v11171_v27  ;;  %13149 = vmatprep.mubr.f32.mxu0 %v2777_v17  ;;  %v3592_v17 = vld [vmem:[#allocation5 + $0xcc8] sm:$0xff] }
 0x55d   :  { %v19721_v27 = vld [vmem:[#allocation56_spill] sm:$0xff]  ;;  %3725 = vmatprep.mubr.f32.mxu1 %v3592_v17  ;;  %v3603_v17 = vld [vmem:[#allocation5 + $0xd20] sm:$0xff] }
 0x55e   :  { %v2782_v35 = vadd.f32 %v18619_v19, %v11173_v14  ;;  %v11174_v23 = vpop.f32.mrb[116].mxu0  ;;  %3726 = vmatmul.mubr.f32.gmra.mrb[236].mxu1 %v3591_v46 }
 0x55f   :  { %v11175_v7 = vpop.f32.mrb[117].mxu0 }
 0x560   :  { %v11176_v53 = vadd.f32 %v11175_v7, %v11174_v23  ;;  %13150 = vmatmul.mubr.f32.vlgmr.msra.gmra.mrb[64].mxu0 %v2782_v35  ;;  %v3596_v23 = vld [vmem:[#allocation5 + $0xce8] sm:$0xff]  ;;  %v19723_v7 = vld [vmem:[#allocation59_spill] sm:$0xff] }
 0x561   :  { %15510 = vmatpush3.bf16.msra.mxu0 %v19715_v2  ;;  %3730 = vmatprep.mubr.f32.mxu1 %v3596_v23  ;;  %v3607_v23 = vld [vmem:[#allocation5 + $0xd40] sm:$0xff] }
 0x562   :  { %v2787_v12 = vadd.f32 %v18622_v57, %v11176_v53  ;;  %v11177_v6 = vpop.f32.mrb[118].mxu0  ;;  %15512 = vmatprep.subr.bf16.mxu0 %v19716_v55  ;;  %v19718_v57 = vld [vmem:[#allocation53_spill] sm:$0xff] }
 0x563   :  { %v11178_v19 = vpop.f32.mrb[119].mxu0 }
 0x564   :  { %v11179_v43 = vadd.f32 %v11178_v19, %v11177_v6  ;;  %13152 = vmatprep.mubr.f32.mxu0 %v2787_v12  ;;  %v3595_v12 = vld [vmem:[#allocation5 + $0xce0] sm:$0xff]  ;;  %v3600_v19 = vld [vmem:[#allocation5 + $0xd08] sm:$0xff] }
 0x565   :  { %15514 = vmatpush3.bf16.msra.mxu0 %v19717_v63  ;;  %3731 = vmatmul.mubr.f32.gmra.mrb[238].mxu1 %v3595_v12 }
 0x566   :  { %v2792_v60 = vadd.f32 %v18624_v30, %v11179_v43  ;;  %v11180_v62 = vpop.f32.mrb[120].mxu0  ;;  %15516 = vmatprep.subr.bf16.mxu0 %v19718_v57  ;;  %v19720_v30 = vld [vmem:[#allocation55_spill] sm:$0xff]  ;;  %3735 = vmatprep.mubr.f32.mxu1 %v3600_v19 }
 0x567   :  { %v11181_v58 = vpop.f32.mrb[121].mxu0  ;;  %v3611_v19 = vld [vmem:[#allocation5 + $0xd60] sm:$0xff] }
 0x568   :  { %v11182_v33 = vadd.f32 %v11181_v58, %v11180_v62  ;;  %13153 = vmatmul.mubr.f32.gmra.mrb[66].mxu0 %v2792_v60  ;;  %v3599_v62 = vld [vmem:[#allocation5 + $0xd00] sm:$0xff] }
 0x569   :  { %15518 = vmatpush3.bf16.msra.mxu0 %v19719_v10  ;;  %v3389_v58 = vld [vmem:[#allocation7 + $0x280] sm:$0xff]  ;;  %3736 = vmatmul.mubr.f32.gmra.mrb[240].mxu1 %v3599_v62 }
 0x56a   :  { %v2797_v59 = vadd.f32 %v18626_v15, %v11182_v33  ;;  %v11183_v13 = vpop.f32.mrb[122].mxu0  ;;  %15520 = vmatprep.subr.bf16.mxu0 %v19720_v30  ;;  %v19722_v15 = vld [vmem:[#allocation57_spill] sm:$0xff]  ;;  %v18705_v25 = vpack.c.bf16 %v3390_v31, %v3389_v58  ;;  %3740 = vmatprep.mubr.f32.mxu1 %v3604_v44  ;;  %v3615_v58 = vld [vmem:[#allocation5 + $0xd80] sm:$0xff] }
 0x56b   :  { %v11184_v20 = vpop.f32.mrb[123].mxu0 }
 0x56c   :  { %v11185_v37 = vadd.f32 %v11184_v20, %v11183_v13  ;;  %13155 = vmatprep.mubr.f32.mxu0 %v2797_v59  ;;  %v19727_v59 = vld [vmem:[#allocation67_spill] sm:$0xff]  ;;  %v19728_v20 = vld [vmem:[#allocation69_spill] sm:$0xff] }
 0x56d   :  { %15522 = vmatpush3.bf16.msra.mxu0 %v19721_v27  ;;  %3741 = vmatmul.mubr.f32.gmra.mrb[242].mxu1 %v3603_v17  ;;  %v3624_v17 = vld [vmem:[#allocation5 + $0xdc8] sm:$0xff] }
 0x56e   :  { %v2802_v61 = vadd.f32 %v18628_v1, %v11185_v37  ;;  %v11186_v29 = vpop.f32.mrb[124].mxu0  ;;  %15524 = vmatprep.subr.bf16.mxu0 %v19722_v15  ;;  %v19724_v1 = vld [vmem:[#allocation61_spill] sm:$0xff] }
 0x56f   :  { %v11187_v14 = vpop.f32.mrb[125].mxu0 }
 0x570   :  { %v11188_v35 = vadd.f32 %v11187_v14, %v11186_v29  ;;  %13156 = vmatmul.mubr.f32.gmra.mrb[68].mxu0 %v2802_v61  ;;  %v3608_v29 = vld [vmem:[#allocation5 + $0xd48] sm:$0xff]  ;;  %v19729_v14 = vld [vmem:[#allocation71_spill] sm:$0xff] }
 0x571   :  { %15526 = vmatpush3.bf16.msra.mxu0 %v19723_v7  ;;  %3745 = vmatprep.mubr.f32.mxu1 %v3608_v29 }
 0x572   :  { %v2807_v18 = vadd.f32 %v18630_v49, %v11188_v35  ;;  %v11189_v53 = vpop.f32.mrb[126].mxu0  ;;  %15528 = vmatprep.subr.bf16.mxu0 %v19724_v1  ;;  %v19726_v49 = vld [vmem:[#allocation65_spill] sm:$0xff]  ;;  %3746 = vmatmul.mubr.f32.gmra.mrb[244].mxu1 %v3607_v23 }
 0x573   :  { %v11190_v4 = vpop.f32.mrb[127].mxu0 }
 0x574   :  { %v11191_v6 = vadd.f32 %v11190_v4, %v11189_v53  ;;  %13158 = vmatprep.mubr.f32.mxu0 %v2807_v18  ;;  %v3612_v53 = vld [vmem:[#allocation5 + $0xd68] sm:$0xff] }
 0x575   :  { %15530 = vmatpush3.bf16.msra.mxu0 %v19725_v5  ;;  %3750 = vmatprep.mubr.f32.mxu1 %v3612_v53  ;;  %v3627_v53 = vld [vmem:[#allocation5 + $0xde0] sm:$0xff] }
 0x576   :  { %v2812_v43 = vadd.f32 %v18632_v36, %v11191_v6  ;;  %v11192_v56 = vpop.f32.mrb[128].mxu0  ;;  %15532 = vmatprep.subr.bf16.mxu0 %v19726_v49  ;;  %3751 = vmatmul.mubr.f32.gmra.mrb[246].mxu1 %v3611_v19  ;;  %v4100_v19 = vld [vmem:[#allocation5 + $0xe00] sm:$0xff] }
 0x577   :  { %v11193_v60 = vpop.f32.mrb[129].mxu0 }
 0x578   :  { %v11194_v33 = vadd.f32 %v11193_v60, %v11192_v56  ;;  %13159 = vmatmul.mubr.f32.gmra.mrb[70].mxu0 %v2812_v43 }
 0x579   :  { %15534 = vmatpush3.bf16.msra.mxu0 %v19727_v59 }
 0x57a   :  { %v2817_v36 = vadd.f32 %v18634_v42, %v11194_v33  ;;  %v11195_v13 = vpop.f32.mrb[130].mxu0  ;;  %15536 = vmatprep.subr.bf16.mxu0 %v19728_v20  ;;  %v3620_v33 = vld [vmem:[#allocation5 + $0xda8] sm:$0xff] }
 0x57b   :  { %v11196_v37 = vpop.f32.mrb[131].mxu0 }
 0x57c   :  { %v11197_v61 = vadd.f32 %v11196_v37, %v11195_v13  ;;  %13161 = vmatprep.mubr.f32.mxu0 %v2817_v36  ;;  %v3619_v13 = vld [vmem:[#allocation5 + $0xda0] sm:$0xff] }
 0x57d   :  { %15538 = vmatpush3.bf16.msra.mxu0 %v19729_v14 }
 0x57e   :  { %v2822_v46 = vadd.f32 %v18636_v45, %v11197_v61  ;;  %v11198_v35 = vpop.f32.mrb[132].mxu0  ;;  %15540 = vmatprep.subr.bf16.mxu0 %v18705_v25  ;;  %v3616_v45 = vld [vmem:[#allocation5 + $0xd88] sm:$0xff] }
 0x57f   :  { %v11199_v42 = vpop.f32.mrb[133].mxu0  ;;  %3755 = vmatprep.mubr.f32.mxu1 %v3616_v45  ;;  %v3392_v45 = vld [vmem:[#allocation7 + $0x298] sm:$0xff] }
 0x580   :  { %v11200_v18 = vadd.f32 %v11199_v42, %v11198_v35  ;;  %13162 = vmatmul.mubr.f32.gmra.mrb[72].mxu0 %v2822_v46  ;;  %3756 = vmatmul.mubr.f32.gmra.mrb[248].mxu1 %v3615_v58  ;;  %v3623_v46 = vld [vmem:[#allocation5 + $0xdc0] sm:$0xff]  ;;  %v3628_v42 = vld [vmem:[#allocation5 + $0xde8] sm:$0xff] }
 0x581   :  { %3760 = vmatprep.mubr.f32.mxu1 %v3620_v33  ;;  %v4104_v58 = vld [vmem:[#allocation5 + $0xe20] sm:$0xff]  ;;  %v3394_v33 = vld [vmem:[#allocation7 + $0x2a8] sm:$0xff] }
 0x582   :  { %v2827_v4 = vadd.f32 %v18638_v38, %v11200_v18  ;;  %v11201_v12 = vpop.f32.mrb[134].mxu0 }
 0x583   :  { %v11202_v6 = vpop.f32.mrb[135].mxu0 }
 0x584   :  { %v11203_v43 = vadd.f32 %v11202_v6, %v11201_v12  ;;  %13164 = vmatprep.mubr.f32.mxu0 %v2827_v4  ;;  %3761 = vmatmul.mubr.f32.gmra.mrb[250].mxu1 %v3619_v13  ;;  %v4101_v12 = vld [vmem:[#allocation5 + $0xe08] sm:$0xff]  ;;  %v3037_v6 = vld [vmem:[#allocation5 + $0xa18] sm:$0xff]  ;;  %v4108_v13 = vld [vmem:[#allocation5 + $0xe40] sm:$0xff] }
 0x585   :  { %3765 = vmatprep.mubr.f32.mxu1 %v3624_v17  ;;  %v3396_v17 = vld [vmem:[#allocation7 + $0x2b8] sm:$0xff] }
 0x586   :  { %v2832_v56 = vadd.f32 %v18640_v3, %v11203_v43  ;;  %v11204_v60 = vpop.f32.mrb[136].mxu0  ;;  %v3391_v43 = vld [vmem:[#allocation7 + $0x290] sm:$0xff] }
 0x587   :  { %v11205_v62 = vpop.f32.mrb[137].mxu0 }
 0x588   :  { %v11206_v31 = vadd.f32 %v11205_v62, %v11204_v60  ;;  %13165 = vmatmul.mubr.f32.gmra.mrb[74].mxu0 %v2832_v56  ;;  %3766 = vmatmul.mubr.f32.gmra.mrb[252].mxu1 %v3623_v46  ;;  %v4105_v56 = vld [vmem:[#allocation5 + $0xe28] sm:$0xff]  ;;  %v3041_v60 = vld [vmem:[#allocation5 + $0xa38] sm:$0xff]  ;;  %v15543_v62 = vpack.c.bf16 %v3392_v45, %v3391_v43  ;;  %v4112_v46 = vld [vmem:[#allocation5 + $0xe60] sm:$0xff] }
 0x589   :  { %3770 = vmatprep.mubr.f32.mxu1 %v3628_v42  ;;  %v3398_v42 = vld [vmem:[#allocation7 + $0x2c8] sm:$0xff]  ;;  %v3057_v43 = vld [vmem:[#allocation5 + $0xab8] sm:$0xff] }
 0x58a   :  { %v2837_v38 = vadd.f32 %v18642_v51, %v11206_v31  ;;  %v11207_v44 = vpop.f32.mrb[138].mxu0  ;;  %v3393_v31 = vld [vmem:[#allocation7 + $0x2a0] sm:$0xff] }
 0x58b   :  { %v11208_v36 = vpop.f32.mrb[139].mxu0 }
 0x58c   :  { %v11209_v37 = vadd.f32 %v11208_v36, %v11207_v44  ;;  %13167 = vmatprep.mubr.f32.mxu0 %v2837_v38  ;;  %3771 = vmatmul.mubr.f32.gmra.mrb[254].mxu1 %v3627_v53  ;;  %v3040_v38 = vld [vmem:[#allocation5 + $0xa30] sm:$0xff]  ;;  %v3045_v44 = vld [vmem:[#allocation5 + $0xa58] sm:$0xff]  ;;  %v15547_v36 = vpack.c.bf16 %v3394_v33, %v3393_v31 }
 0x58d   :  { %4228 = vmatprep.mubr.f32.mxu1 %v4101_v12  ;;  %v3399_v12 = vld [vmem:[#allocation7 + $0x2d0] sm:$0xff]  ;;  %v3065_v33 = vld [vmem:[#allocation5 + $0xaf8] sm:$0xff] }
 0x58e   :  { %v2842_v3 = vadd.f32 %v18644_v9, %v11209_v37  ;;  %v11210_v61 = vpop.f32.mrb[140].mxu0  ;;  %v3395_v37 = vld [vmem:[#allocation7 + $0x2b0] sm:$0xff] }
 0x58f   :  { %v11211_v29 = vpop.f32.mrb[141].mxu0  ;;  %v3060_v31 = vld [vmem:[#allocation5 + $0xad0] sm:$0xff] }
 0x590   :  { %v11212_v35 = vadd.f32 %v11211_v29, %v11210_v61  ;;  %13168 = vmatmul.mubr.f32.gmra.mrb[76].mxu0 %v2842_v3  ;;  %4229 = vmatmul.mubr.f32.vlgmr.msra.gmra.mrb[0].mxu1 %v4100_v19  ;;  %v4113_v3 = vld [vmem:[#allocation5 + $0xe68] sm:$0xff]  ;;  %v3044_v61 = vld [vmem:[#allocation5 + $0xa50] sm:$0xff]  ;;  %v3049_v29 = vld [vmem:[#allocation5 + $0xa78] sm:$0xff] }
 0x591   :  { %4233 = vmatprep.mubr.f32.mxu1 %v4105_v56  ;;  %15702 = vmatpush3.bf16.msra.mxu1 %v19715_v2  ;;  %v3052_v19 = vld [vmem:[#allocation5 + $0xa90] sm:$0xff]  ;;  %v4120_v56 = vld [vmem:[#allocation5 + $0xea0] sm:$0xff] }
 0x592   :  { %v2847_v51 = vadd.f32 %v18646_v11, %v11212_v35  ;;  %v11213_v23 = vpop.f32.mrb[142].mxu0  ;;  %v3036_v11 = vld [vmem:[#allocation5 + $0xa10] sm:$0xff]  ;;  %15704 = vmatprep.subr.bf16.mxu1 %v19716_v55  ;;  %v3397_v35 = vld [vmem:[#allocation7 + $0x2c0] sm:$0xff] }
 0x593   :  { %v11214_v18 = vpop.f32.mrb[143].mxu0  ;;  %v15555_v53 = vpack.c.bf16 %v3398_v42, %v3397_v35  ;;  %v3088_v35 = vld [vmem:[#allocation5 + $0xbb0] sm:$0xff]  ;;  %v3093_v42 = vld [vmem:[#allocation5 + $0xbd8] sm:$0xff] }
 0x594   :  { %v11215_v4 = vadd.f32 %v11214_v18, %v11213_v23  ;;  %13170 = vmatprep.mubr.f32.mxu0 %v2847_v51  ;;  %4234 = vmatmul.mubr.f32.gmra.mrb[2].mxu1 %v4104_v58  ;;  %v4117_v51 = vld [vmem:[#allocation5 + $0xe88] sm:$0xff]  ;;  %v3048_v23 = vld [vmem:[#allocation5 + $0xa70] sm:$0xff]  ;;  %v3053_v18 = vld [vmem:[#allocation5 + $0xa98] sm:$0xff] }
 0x595   :  { %15706 = vmatpush3.bf16.msra.mxu1 %v19717_v63  ;;  %v4124_v58 = vld [vmem:[#allocation5 + $0xec0] sm:$0xff] }
 0x596   :  { %v2852_v9 = vadd.f32 %v18648_v48, %v11215_v4  ;;  %v4109_v48 = vld [vmem:[#allocation5 + $0xe48] sm:$0xff]  ;;  %15708 = vmatprep.subr.bf16.mxu1 %v19718_v57  ;;  %v4116_v4 = vld [vmem:[#allocation5 + $0xe80] sm:$0xff] }
 0x597   :  { %4238 = vmatprep.mubr.f32.mxu1 %v4109_v48  ;;  %v3064_v48 = vld [vmem:[#allocation5 + $0xaf0] sm:$0xff] }
 0x598   :  { %13171 = vmatmul.mubr.f32.gmra.mrb[78].mxu0 %v2852_v9  ;;  %4239 = vmatmul.mubr.f32.gmra.mrb[4].mxu1 %v4108_v13  ;;  %v3400_v9 = vld [vmem:[#allocation7 + $0x2d8] sm:$0xff]  ;;  %v3072_v13 = vld [vmem:[#allocation5 + $0xb30] sm:$0xff] }
 0x599   :  { %3307 = vmatprep.mubr.f32.mxu0 %v3037_v6  ;;  %4243 = vmatprep.mubr.f32.mxu1 %v4113_v3  ;;  %v4121_v6 = vld [vmem:[#allocation5 + $0xea8] sm:$0xff]  ;;  %v15559_v45 = vpack.c.bf16 %v3400_v9, %v3399_v12  ;;  %v3081_v3 = vld [vmem:[#allocation5 + $0xb78] sm:$0xff]  ;;  %v3401_v9 = vld [vmem:[#allocation7 + $0x2e0] sm:$0xff] }
 0x59a   :  { %15710 = vmatpush3.bf16.msra.mxu1 %v19719_v10  ;;  %v4129_v12 = vld [vmem:[#allocation5 + $0xee8] sm:$0xff] }
 0x59b   :  { %15712 = vmatprep.subr.bf16.mxu1 %v19720_v30 }
 0x59c   :  { %3308 = vmatmul.mubr.f32.vlgmr.msra.gmra.mrb[144].mxu0 %v3036_v11  ;;  %4244 = vmatmul.mubr.f32.gmra.mrb[6].mxu1 %v4112_v46  ;;  %v4125_v11 = vld [vmem:[#allocation5 + $0xec8] sm:$0xff]  ;;  %v3089_v46 = vld [vmem:[#allocation5 + $0xbb8] sm:$0xff] }
 0x59d   :  { %3312 = vmatprep.mubr.f32.mxu0 %v3041_v60  ;;  %15542 = vmatpush3.bf16.msra.mxu0 %v18705_v25  ;;  %v15551_v25 = vpack.c.bf16 %v3396_v17, %v3395_v37  ;;  %v3056_v60 = vld [vmem:[#allocation5 + $0xab0] sm:$0xff]  ;;  %v3077_v37 = vld [vmem:[#allocation5 + $0xb58] sm:$0xff] }
 0x59e   :  { %15544 = vmatprep.subr.bf16.mxu0 %v15543_v62  ;;  %4248 = vmatprep.mubr.f32.mxu1 %v4117_v51  ;;  %v3076_v17 = vld [vmem:[#allocation5 + $0xb50] sm:$0xff] }
 0x59f   :  { %15714 = vmatpush3.bf16.msra.mxu1 %v19721_v27  ;;  %v3092_v51 = vld [vmem:[#allocation5 + $0xbd0] sm:$0xff] }
 0x5a0   :  { %3313 = vmatmul.mubr.f32.gmra.mrb[146].mxu0 %v3040_v38  ;;  %15716 = vmatprep.subr.bf16.mxu1 %v19722_v15  ;;  %v3069_v38 = vld [vmem:[#allocation5 + $0xb18] sm:$0xff] }
 0x5a1   :  { %3317 = vmatprep.mubr.f32.mxu0 %v3045_v44  ;;  %15546 = vmatpush3.bf16.msra.mxu0 %v15543_v62  ;;  %v3061_v62 = vld [vmem:[#allocation5 + $0xad8] sm:$0xff]  ;;  %v3068_v44 = vld [vmem:[#allocation5 + $0xb10] sm:$0xff] }
 0x5a2   :  { %15548 = vmatprep.subr.bf16.mxu0 %v15547_v36  ;;  %4249 = vmatmul.mubr.f32.gmra.mrb[8].mxu1 %v4116_v4 }
 0x5a3   :  { %4253 = vmatprep.mubr.f32.mxu1 %v4121_v6  ;;  %15718 = vmatpush3.bf16.msra.mxu1 %v19723_v7  ;;  %v3402_v6 = vld [vmem:[#allocation7 + $0x2e8] sm:$0xff] }
 0x5a4   :  { %3318 = vmatmul.mubr.f32.gmra.mrb[148].mxu0 %v3044_v61  ;;  %15720 = vmatprep.subr.bf16.mxu1 %v19724_v1  ;;  %v3080_v61 = vld [vmem:[#allocation5 + $0xb70] sm:$0xff] }
 0x5a5   :  { %3322 = vmatprep.mubr.f32.mxu0 %v3049_v29  ;;  %15550 = vmatpush3.bf16.msra.mxu0 %v15547_v36  ;;  %v3073_v36 = vld [vmem:[#allocation5 + $0xb38] sm:$0xff] }
 0x5a6   :  { %15552 = vmatprep.subr.bf16.mxu0 %v15551_v25  ;;  %4254 = vmatmul.mubr.f32.gmra.mrb[10].mxu1 %v4120_v56  ;;  %v3085_v29 = vld [vmem:[#allocation5 + $0xb98] sm:$0xff] }
 0x5a7   :  { %4258 = vmatprep.mubr.f32.mxu1 %v4125_v11  ;;  %15722 = vmatpush3.bf16.msra.mxu1 %v19725_v5  ;;  %v4133_v11 = vld [vmem:[#allocation5 + $0xf08] sm:$0xff] }
 0x5a8   :  { %3323 = vmatmul.mubr.f32.gmra.mrb[150].mxu0 %v3048_v23  ;;  %15724 = vmatprep.subr.bf16.mxu1 %v19726_v49  ;;  %v3097_v23 = vld [vmem:[#allocation5 + $0xbf8] sm:$0xff] }
 0x5a9   :  { %3327 = vmatprep.mubr.f32.mxu0 %v3053_v18  ;;  %15554 = vmatpush3.bf16.msra.mxu0 %v15551_v25  ;;  %v3084_v25 = vld [vmem:[#allocation5 + $0xb90] sm:$0xff] }
 0x5aa   :  { %15556 = vmatprep.subr.bf16.mxu0 %v15555_v53  ;;  %4259 = vmatmul.mubr.f32.gmra.mrb[12].mxu1 %v4124_v58  ;;  %v3096_v18 = vld [vmem:[#allocation5 + $0xbf0] sm:$0xff] }
 0x5ab   :  { %15726 = vmatpush3.bf16.msra.mxu1 %v19727_v59  ;;  %4263 = vmatprep.mubr.f32.mxu1 %v4129_v12 }
 0x5ac   :  { %3328 = vmatmul.mubr.f32.gmra.mrb[152].mxu0 %v3052_v19  ;;  %15728 = vmatprep.subr.bf16.mxu1 %v19728_v20 }
 0x5ad   :  { %3332 = vmatprep.mubr.f32.mxu0 %v3057_v43  ;;  %15558 = vmatpush3.bf16.msra.mxu0 %v15555_v53  ;;  %v11360_v53 = vpop.f32.mrb[192].mxu1  ;;  %v4128_v43 = vld [vmem:[#allocation5 + $0xee0] sm:$0xff] }
 0x5ae   :  { %15560 = vmatprep.subr.bf16.mxu0 %v15559_v45  ;;  %v11361_v4 = vpop.f32.mrb[193].mxu1  ;;  %4264 = vmatmul.mubr.f32.gmra.mrb[14].mxu1 %v4128_v43 }
 0x5af   :  { %15730 = vmatpush3.bf16.msra.mxu1 %v19729_v14  ;;  %v18733_v19 = vadd.f32 %v11361_v4, %v11360_v53  ;;  %v11363_v56 = vpop.f32.mrb[194].mxu1  ;;  %4268 = vmatprep.mubr.f32.mxu1 %v4133_v11  ;;  %v4148_v4 = vld [vmem:[#allocation5 + $0xf80] sm:$0xff] }
 0x5b0   :  { %3333 = vmatmul.mubr.f32.gmra.mrb[154].mxu0 %v3056_v60  ;;  %15796 = vmatprep.subr.bf16.mxu1 %v19714_v28  ;;  %v3403_v60 = vld [vmem:[#allocation7 + $0x2f0] sm:$0xff]  ;;  %v11364_v58 = vpop.f32.mrb[195].mxu1 }
 0x5b1   :  { %3337 = vmatprep.mubr.f32.mxu0 %v3061_v62  ;;  %15562 = vmatpush3.bf16.msra.mxu0 %v15559_v45  ;;  %v15563_v45 = vpack.c.bf16 %v3402_v6, %v3401_v9  ;;  %v3404_v62 = vld [vmem:[#allocation7 + $0x2f8] sm:$0xff]  ;;  %v4153_v6 = vld [vmem:[#allocation5 + $0xfa8] sm:$0xff] }
 0x5b3   :  { %15564 = vmatprep.subr.bf16.mxu0 %v15563_v45 }
 0x5b4   :  { %3338 = vmatmul.mubr.f32.gmra.mrb[156].mxu0 %v3060_v31  ;;  %v4132_v31 = vld [vmem:[#allocation5 + $0xf00] sm:$0xff] }
 0x5b5   :  { %3342 = vmatprep.mubr.f32.mxu0 %v3065_v33  ;;  %15566 = vmatpush3.bf16.msra.mxu0 %v15563_v45  ;;  %v15567_v33 = vpack.c.bf16 %v3404_v62, %v3403_v60  ;;  %v4152_v45 = vld [vmem:[#allocation5 + $0xfa0] sm:$0xff]  ;;  %v4157_v60 = vld [vmem:[#allocation5 + $0xfc8] sm:$0xff] }
 0x5b6   :  { %4269 = vmatmul.mubr.f32.gmra.mrb[16].mxu1 %v4132_v31 }
 0x5b7   :  { %15568 = vmatprep.subr.bf16.mxu0 %v15567_v33 }
 0x5b8   :  { %3343 = vmatmul.mubr.f32.gmra.mrb[158].mxu0 %v3064_v48  ;;  %v18735_v48 = vadd.f32 %v11364_v58, %v11363_v56  ;;  %v4156_v58 = vld [vmem:[#allocation5 + $0xfc0] sm:$0xff] }
 0x5b9   :  { %3347 = vmatprep.mubr.f32.mxu0 %v3069_v38  ;;  %v11366_v38 = vpop.f32.mrb[196].mxu1  ;;  %15570 = vmatpush3.bf16.msra.mxu0 %v15567_v33 }
 0x5ba   :  { %15604 = vmatprep.subr.bf16.mxu0 %v19714_v28 }
 0x5bc   :  { %3348 = vmatmul.mubr.f32.gmra.mrb[160].mxu0 %v3068_v44  ;;  %v4137_v44 = vld [vmem:[#allocation5 + $0xf28] sm:$0xff] }
 0x5bd   :  { %3352 = vmatprep.mubr.f32.mxu0 %v3073_v36  ;;  %v11367_v36 = vpop.f32.mrb[197].mxu1  ;;  %4273 = vmatprep.mubr.f32.mxu1 %v4137_v44 }
 0x5c0   :  { %3353 = vmatmul.mubr.f32.gmra.mrb[162].mxu0 %v3072_v13  ;;  %v4136_v13 = vld [vmem:[#allocation5 + $0xf20] sm:$0xff] }
 0x5c1   :  { %3357 = vmatprep.mubr.f32.mxu0 %v3077_v37  ;;  %v18738_v37 = vadd.f32 %v11367_v36, %v11366_v38  ;;  %4274 = vmatmul.mubr.f32.gmra.mrb[18].mxu1 %v4136_v13  ;;  %v4161_v38 = vld [vmem:[#allocation5 + $0xfe8] sm:$0xff]  ;;  %v4160_v36 = vld [vmem:[#allocation5 + $0xfe0] sm:$0xff] }
 0x5c4   :  { %3358 = vmatmul.mubr.f32.gmra.mrb[164].mxu0 %v3076_v17  ;;  %v11369_v17 = vpop.f32.mrb[198].mxu1 }
 0x5c5   :  { %3362 = vmatprep.mubr.f32.mxu0 %v3081_v3  ;;  %v4141_v3 = vld [vmem:[#allocation5 + $0xf48] sm:$0xff] }
 0x5c6   :  { %4278 = vmatprep.mubr.f32.mxu1 %v4141_v3  ;;  %v4103_v3 = vld [vmem:[#allocation5 + $0xe18] sm:$0xff] }
 0x5c8   :  { %3363 = vmatmul.mubr.f32.gmra.mrb[166].mxu0 %v3080_v61  ;;  %v11370_v61 = vpop.f32.mrb[199].mxu1 }
 0x5c9   :  { %3367 = vmatprep.mubr.f32.mxu0 %v3085_v29  ;;  %v4140_v29 = vld [vmem:[#allocation5 + $0xf40] sm:$0xff] }
 0x5ca   :  { %4279 = vmatmul.mubr.f32.gmra.mrb[20].mxu1 %v4140_v29  ;;  %v4102_v29 = vld [vmem:[#allocation5 + $0xe10] sm:$0xff] }
 0x5cc   :  { %3368 = vmatmul.mubr.f32.gmra.mrb[168].mxu0 %v3084_v25  ;;  %v18740_v25 = vadd.f32 %v11370_v61, %v11369_v17 }
 0x5cd   :  { %3372 = vmatprep.mubr.f32.mxu0 %v3089_v46  ;;  %v11372_v46 = vpop.f32.mrb[200].mxu1 }
 0x5d0   :  { %3373 = vmatmul.mubr.f32.gmra.mrb[170].mxu0 %v3088_v35  ;;  %v4145_v35 = vld [vmem:[#allocation5 + $0xf68] sm:$0xff] }
 0x5d1   :  { %3377 = vmatprep.mubr.f32.mxu0 %v3093_v42  ;;  %v11373_v42 = vpop.f32.mrb[201].mxu1  ;;  %4283 = vmatprep.mubr.f32.mxu1 %v4145_v35 }
 0x5d2   :  { %v11375_v28 = vpop.f32.mrb[202].mxu1 }
 0x5d3   :  { %v11376_v53 = vpop.f32.mrb[203].mxu1 }
 0x5d4   :  { %3378 = vmatmul.mubr.f32.gmra.mrb[172].mxu0 %v3092_v51  ;;  %v4144_v51 = vld [vmem:[#allocation5 + $0xf60] sm:$0xff]  ;;  %v18744_v12 = vadd.f32 %v11376_v53, %v11375_v28  ;;  %v11378_v9 = vpop.f32.mrb[204].mxu1  ;;  %v4106_v28 = vld [vmem:[#allocation5 + $0xe30] sm:$0xff] }
 0x5d5   :  { %3382 = vmatprep.mubr.f32.mxu0 %v3097_v23  ;;  %v18742_v23 = vadd.f32 %v11373_v42, %v11372_v46  ;;  %4284 = vmatmul.mubr.f32.gmra.mrb[22].mxu1 %v4144_v51  ;;  %v11379_v43 = vpop.f32.mrb[205].mxu1  ;;  %v4107_v42 = vld [vmem:[#allocation5 + $0xe38] sm:$0xff] }
 0x5d6   :  { %v18746_v56 = vadd.f32 %v11379_v43, %v11378_v9  ;;  %v11381_v11 = vpop.f32.mrb[206].mxu1 }
 0x5d7   :  { %v11382_v62 = vpop.f32.mrb[207].mxu1 }
 0x5d8   :  { %3383 = vmatmul.mubr.f32.gmra.mrb[174].mxu0 %v3096_v18  ;;  %v4149_v18 = vld [vmem:[#allocation5 + $0xf88] sm:$0xff]  ;;  %v18748_v31 = vadd.f32 %v11382_v62, %v11381_v11  ;;  %v11384_v33 = vpop.f32.mrb[208].mxu1  ;;  %v4115_v11 = vld [vmem:[#allocation5 + $0xe78] sm:$0xff]  ;;  %v4114_v62 = vld [vmem:[#allocation5 + $0xe70] sm:$0xff] }
 0x5d9   :  { %4288 = vmatprep.mubr.f32.mxu1 %v4149_v18  ;;  %v11385_v44 = vpop.f32.mrb[209].mxu1 }
 0x5da   :  { %4289 = vmatmul.mubr.f32.gmra.mrb[24].mxu1 %v4148_v4  ;;  %v18750_v13 = vadd.f32 %v11385_v44, %v11384_v33  ;;  %v11387_v17 = vpop.f32.mrb[210].mxu1  ;;  %v4111_v4 = vld [vmem:[#allocation5 + $0xe58] sm:$0xff] }
 0x5db   :  { %4293 = vmatprep.mubr.f32.mxu1 %v4153_v6  ;;  %v11388_v61 = vpop.f32.mrb[211].mxu1  ;;  %v4110_v6 = vld [vmem:[#allocation5 + $0xe50] sm:$0xff] }
 0x5dc   :  { %v18752_v46 = vadd.f32 %v11388_v61, %v11387_v17  ;;  %v11390_v35 = vpop.f32.mrb[212].mxu1  ;;  %v4123_v61 = vld [vmem:[#allocation5 + $0xeb8] sm:$0xff] }
 0x5dd   :  { %v11391_v51 = vpop.f32.mrb[213].mxu1 }
 0x5de   :  { %4294 = vmatmul.mubr.f32.gmra.mrb[26].mxu1 %v4152_v45  ;;  %v18756_v18 = vadd.f32 %v11391_v51, %v11390_v35  ;;  %v11393_v53 = vpop.f32.mrb[214].mxu1  ;;  %v4122_v35 = vld [vmem:[#allocation5 + $0xeb0] sm:$0xff] }
 0x5df   :  { %4298 = vmatprep.mubr.f32.mxu1 %v4157_v60  ;;  %v11394_v9 = vpop.f32.mrb[215].mxu1 }
 0x5e0   :  { %v18760_v43 = vadd.f32 %v11394_v9, %v11393_v53  ;;  %v11396_v45 = vpop.f32.mrb[216].mxu1 }
 0x5e1   :  { %v11397_v60 = vpop.f32.mrb[217].mxu1 }
 0x5e2   :  { %4299 = vmatmul.mubr.f32.gmra.mrb[28].mxu1 %v4156_v58  ;;  %v18764_v58 = vadd.f32 %v11397_v60, %v11396_v45  ;;  %v11399_v33 = vpop.f32.mrb[218].mxu1  ;;  %v4130_v45 = vld [vmem:[#allocation5 + $0xef0] sm:$0xff] }
 0x5e3   :  { %4303 = vmatprep.mubr.f32.mxu1 %v4161_v38  ;;  %v4119_v38 = vld [vmem:[#allocation5 + $0xe98] sm:$0xff]  ;;  %v11400_v44 = vpop.f32.mrb[219].mxu1  ;;  %v4134_v60 = vld [vmem:[#allocation5 + $0xf10] sm:$0xff] }
 0x5e4   :  { %v18768_v17 = vadd.f32 %v11400_v44, %v11399_v33  ;;  %v4138_v33 = vld [vmem:[#allocation5 + $0xf30] sm:$0xff] }
 0x5e5   :  { %v4142_v44 = vld [vmem:[#allocation5 + $0xf50] sm:$0xff] }
 0x5e6   :  { %4304 = vmatmul.mubr.f32.gmra.mrb[30].mxu1 %v4160_v36  ;;  %v4118_v36 = vld [vmem:[#allocation5 + $0xe90] sm:$0xff] }
 0x5e7   :  { %4373 = vmatprep.mubr.f32.mxu1 %v4103_v3  ;;  %v11402_v3 = vpop.f32.mrb[220].mxu1 }
 0x5ea   :  { %4374 = vmatmul.mubr.f32.vlgmr.msra.gmra.mrb[32].mxu1 %v4102_v29  ;;  %v11403_v29 = vpop.f32.mrb[221].mxu1 }
 0x5eb   :  { %15798 = vmatpush3.bf16.msra.mxu1 %v19715_v2  ;;  %4378 = vmatprep.mubr.f32.mxu1 %v4107_v42  ;;  %v18772_v42 = vadd.f32 %v11403_v29, %v11402_v3  ;;  %v11405_v51 = vpop.f32.mrb[222].mxu1  ;;  %v4146_v3 = vld [vmem:[#allocation5 + $0xf70] sm:$0xff] }
 0x5ec   :  { %15800 = vmatprep.subr.bf16.mxu1 %v19716_v55  ;;  %v11406_v53 = vpop.f32.mrb[223].mxu1  ;;  %v4150_v29 = vld [vmem:[#allocation5 + $0xf90] sm:$0xff] }
 0x5ed   :  { %v18776_v9 = vadd.f32 %v11406_v53, %v11405_v51  ;;  %v4154_v51 = vld [vmem:[#allocation5 + $0xfb0] sm:$0xff] }
 0x5ee   :  { %4379 = vmatmul.mubr.f32.gmra.mrb[34].mxu1 %v4106_v28  ;;  %v4127_v28 = vld [vmem:[#allocation5 + $0xed8] sm:$0xff]  ;;  %v4158_v53 = vld [vmem:[#allocation5 + $0xfd0] sm:$0xff] }
 0x5ef   :  { %15802 = vmatpush3.bf16.msra.mxu1 %v19717_v63  ;;  %4383 = vmatprep.mubr.f32.mxu1 %v4111_v4  ;;  %v4126_v4 = vld [vmem:[#allocation5 + $0xed0] sm:$0xff] }
 0x5f0   :  { %15804 = vmatprep.subr.bf16.mxu1 %v19718_v57 }
 0x5f2   :  { %4384 = vmatmul.mubr.f32.gmra.mrb[36].mxu1 %v4110_v6  ;;  %v4131_v6 = vld [vmem:[#allocation5 + $0xef8] sm:$0xff] }
 0x5f3   :  { %15806 = vmatpush3.bf16.msra.mxu1 %v19719_v10  ;;  %4388 = vmatprep.mubr.f32.mxu1 %v4115_v11  ;;  %v4135_v11 = vld [vmem:[#allocation5 + $0xf18] sm:$0xff] }
 0x5f4   :  { %15808 = vmatprep.subr.bf16.mxu1 %v19720_v30 }
 0x5f6   :  { %4389 = vmatmul.mubr.f32.gmra.mrb[38].mxu1 %v4114_v62  ;;  %v4139_v62 = vld [vmem:[#allocation5 + $0xf38] sm:$0xff] }
 0x5f7   :  { %15810 = vmatpush3.bf16.msra.mxu1 %v19721_v27  ;;  %4393 = vmatprep.mubr.f32.mxu1 %v4119_v38  ;;  %v4143_v38 = vld [vmem:[#allocation5 + $0xf58] sm:$0xff] }
 0x5f8   :  { %15812 = vmatprep.subr.bf16.mxu1 %v19722_v15 }
 0x5fa   :  { %4394 = vmatmul.mubr.f32.gmra.mrb[40].mxu1 %v4118_v36  ;;  %v4147_v36 = vld [vmem:[#allocation5 + $0xf78] sm:$0xff] }
 0x5fb   :  { %15814 = vmatpush3.bf16.msra.mxu1 %v19723_v7  ;;  %4398 = vmatprep.mubr.f32.mxu1 %v4123_v61  ;;  %v4151_v61 = vld [vmem:[#allocation5 + $0xf98] sm:$0xff] }
 0x5fc   :  { %15816 = vmatprep.subr.bf16.mxu1 %v19724_v1 }
 0x5fe   :  { %4399 = vmatmul.mubr.f32.gmra.mrb[42].mxu1 %v4122_v35  ;;  %v4155_v35 = vld [vmem:[#allocation5 + $0xfb8] sm:$0xff] }
 0x5ff   :  { %15818 = vmatpush3.bf16.msra.mxu1 %v19725_v5  ;;  %4403 = vmatprep.mubr.f32.mxu1 %v4127_v28  ;;  %v4159_v28 = vld [vmem:[#allocation5 + $0xfd8] sm:$0xff] }
 0x600   :  { %15820 = vmatprep.subr.bf16.mxu1 %v19726_v49 }
 0x602   :  { %4404 = vmatmul.mubr.f32.gmra.mrb[44].mxu1 %v4126_v4  ;;  %v4163_v4 = vld [vmem:[#allocation5 + $0xff8] sm:$0xff] }
 0x603   :  { %15822 = vmatpush3.bf16.msra.mxu1 %v19727_v59  ;;  %4408 = vmatprep.mubr.f32.mxu1 %v4131_v6  ;;  %v4162_v6 = vld [vmem:[#allocation5 + $0xff0] sm:$0xff] }
 0x604   :  { %15824 = vmatprep.subr.bf16.mxu1 %v19728_v20 }
 0x606   :  { %4409 = vmatmul.mubr.f32.gmra.mrb[46].mxu1 %v4130_v45 }
 0x607   :  { %15826 = vmatpush3.bf16.msra.mxu1 %v19729_v14  ;;  %4413 = vmatprep.mubr.f32.mxu1 %v4135_v11 }
 0x60a   :  { %4414 = vmatmul.mubr.f32.gmra.mrb[48].mxu1 %v4134_v60 }
 0x60b   :  { %4418 = vmatprep.mubr.f32.mxu1 %v4139_v62  ;;  %v11552_v62 = vpop.f32.mrb[224].mxu1 }
 0x60e   :  { %4419 = vmatmul.mubr.f32.gmra.mrb[50].mxu1 %v4138_v33  ;;  %v11553_v33 = vpop.f32.mrb[225].mxu1 }
 0x60f   :  { %4423 = vmatprep.mubr.f32.mxu1 %v4143_v38 }
 0x612   :  { %4424 = vmatmul.mubr.f32.gmra.mrb[52].mxu1 %v4142_v44 }
 0x613   :  { %4428 = vmatprep.mubr.f32.mxu1 %v4147_v36  ;;  %v18782_v36 = vadd.f32 %v11553_v33, %v11552_v62 }
 0x616   :  { %4429 = vmatmul.mubr.f32.gmra.mrb[54].mxu1 %v4146_v3  ;;  %v11555_v3 = vpop.f32.mrb[226].mxu1 }
 0x617   :  { %4433 = vmatprep.mubr.f32.mxu1 %v4151_v61 }
 0x61a   :  { %4434 = vmatmul.mubr.f32.gmra.mrb[56].mxu1 %v4150_v29  ;;  %v11556_v29 = vpop.f32.mrb[227].mxu1 }
 0x61b   :  { %4438 = vmatprep.mubr.f32.mxu1 %v4155_v35 }
 0x61e   :  { %4439 = vmatmul.mubr.f32.gmra.mrb[58].mxu1 %v4154_v51  ;;  %v18784_v51 = vadd.f32 %v11556_v29, %v11555_v3 }
 0x61f   :  { %4443 = vmatprep.mubr.f32.mxu1 %v4159_v28  ;;  %v11558_v28 = vpop.f32.mrb[228].mxu1 }
 0x622   :  { %4444 = vmatmul.mubr.f32.gmra.mrb[60].mxu1 %v4158_v53  ;;  %v11559_v53 = vpop.f32.mrb[229].mxu1 }
 0x623   :  { %4448 = vmatprep.mubr.f32.mxu1 %v4163_v4 }
 0x626   :  { %4449 = vmatmul.mubr.f32.gmra.mrb[62].mxu1 %v4162_v6 }
 0x66f   :  { %v11440_v45 = vpop.f32.mrb[144].mxu0 }
 0x670   :  { %v11441_v11 = vpop.f32.mrb[145].mxu0 }
 0x671   :  { %v11442_v60 = vadd.f32 %v11441_v11, %v11440_v45  ;;  %v18787_v45 = vadd.f32 %v11559_v53, %v11558_v28  ;;  %v11561_v11 = vpop.f32.mrb[230].mxu1 }
 0x673   :  { %v3310_v38 = vadd.f32 %v11442_v60, %v18733_v19  ;;  %v11443_v44 = vpop.f32.mrb[146].mxu0  ;;  %v11562_v19 = vpop.f32.mrb[231].mxu1 }
 0x674   :  { %v11444_v61 = vpop.f32.mrb[147].mxu0  ;;  %v18789_v62 = vadd.f32 %v11562_v19, %v11561_v11  ;;  %v11564_v33 = vpop.f32.mrb[232].mxu1 }
 0x675   :  { %v11445_v35 = vadd.f32 %v11444_v61, %v11443_v44  ;;  %13205 = vmatprep.mubr.f32.mxu0 %v3310_v38  ;;  %v11565_v38 = vpop.f32.mrb[233].mxu1 }
 0x676   :  { %v11567_v61 = vpop.f32.mrb[234].mxu1 }
 0x677   :  { %v3315_v4 = vadd.f32 %v11445_v35, %v18735_v48  ;;  %v11446_v6 = vpop.f32.mrb[148].mxu0  ;;  %v18794_v48 = vadd.f32 %v11565_v38, %v11564_v33  ;;  %v11568_v35 = vpop.f32.mrb[235].mxu1 }
 0x678   :  { %v11447_v47 = vpop.f32.mrb[149].mxu0  ;;  %v11570_v53 = vpop.f32.mrb[236].mxu1 }
 0x679   :  { %v11448_v60 = vadd.f32 %v11447_v47, %v11446_v6  ;;  %13206 = vmatmul.mubr.f32.vlgmr.msra.gmra.mrb[64].mxu0 %v3315_v4  ;;  %v18796_v47 = vadd.f32 %v11568_v35, %v11567_v61  ;;  %v11571_v4 = vpop.f32.mrb[237].mxu1 }
 0x67a   :  { %15606 = vmatpush3.bf16.msra.mxu0 %v19715_v2 }
 0x67b   :  { %v3320_v44 = vadd.f32 %v11448_v60, %v18738_v37  ;;  %v11449_v3 = vpop.f32.mrb[150].mxu0  ;;  %15608 = vmatprep.subr.bf16.mxu0 %v19716_v55  ;;  %v18801_v37 = vadd.f32 %v11571_v4, %v11570_v53  ;;  %v11573_v55 = vpop.f32.mrb[238].mxu1 }
 0x67c   :  { %v11450_v29 = vpop.f32.mrb[151].mxu0  ;;  %v11574_v19 = vpop.f32.mrb[239].mxu1 }
 0x67d   :  { %v11451_v28 = vadd.f32 %v11450_v29, %v11449_v3  ;;  %13208 = vmatprep.mubr.f32.mxu0 %v3320_v44  ;;  %v18803_v33 = vadd.f32 %v11574_v19, %v11573_v55  ;;  %v11576_v38 = vpop.f32.mrb[240].mxu1 }
 0x67e   :  { %15610 = vmatpush3.bf16.msra.mxu0 %v19717_v63  ;;  %v11577_v44 = vpop.f32.mrb[241].mxu1 }
 0x67f   :  { %v3325_v2 = vadd.f32 %v11451_v28, %v18740_v25  ;;  %v11452_v6 = vpop.f32.mrb[152].mxu0  ;;  %15612 = vmatprep.subr.bf16.mxu0 %v19718_v57  ;;  %v18808_v25 = vadd.f32 %v11577_v44, %v11576_v38  ;;  %v11579_v57 = vpop.f32.mrb[242].mxu1 }
 0x680   :  { %v11453_v11 = vpop.f32.mrb[153].mxu0  ;;  %v11580_v29 = vpop.f32.mrb[243].mxu1 }
 0x681   :  { %v11454_v60 = vadd.f32 %v11453_v11, %v11452_v6  ;;  %13209 = vmatmul.mubr.f32.gmra.mrb[66].mxu0 %v3325_v2  ;;  %v18810_v28 = vadd.f32 %v11580_v29, %v11579_v57  ;;  %v11582_v53 = vpop.f32.mrb[244].mxu1 }
 0x682   :  { %15614 = vmatpush3.bf16.msra.mxu0 %v19719_v10  ;;  %v11583_v4 = vpop.f32.mrb[245].mxu1 }
 0x683   :  { %v3330_v63 = vadd.f32 %v11454_v60, %v18742_v23  ;;  %v11455_v3 = vpop.f32.mrb[154].mxu0  ;;  %15616 = vmatprep.subr.bf16.mxu0 %v19720_v30  ;;  %v18815_v23 = vadd.f32 %v11583_v4, %v11582_v53  ;;  %v11585_v30 = vpop.f32.mrb[246].mxu1 }
 0x684   :  { %v11456_v61 = vpop.f32.mrb[155].mxu0  ;;  %v11586_v55 = vpop.f32.mrb[247].mxu1 }
 0x685   :  { %v11457_v35 = vadd.f32 %v11456_v61, %v11455_v3  ;;  %13211 = vmatprep.mubr.f32.mxu0 %v3330_v63  ;;  %v18817_v19 = vadd.f32 %v11586_v55, %v11585_v30  ;;  %v11588_v60 = vpop.f32.mrb[248].mxu1  ;;  %v3923_v30 = vld [vmem:[#allocation7 + $0x308] sm:$0xff] }
 0x686   :  { %15618 = vmatpush3.bf16.msra.mxu0 %v19721_v27  ;;  %v11589_v38 = vpop.f32.mrb[249].mxu1 }
 0x687   :  { %v3335_v10 = vadd.f32 %v11457_v35, %v18744_v12  ;;  %v11458_v2 = vpop.f32.mrb[156].mxu0  ;;  %15620 = vmatprep.subr.bf16.mxu0 %v19722_v15  ;;  %v18822_v12 = vadd.f32 %v11589_v38, %v11588_v60  ;;  %v11591_v15 = vpop.f32.mrb[250].mxu1 }
 0x688   :  { %v11459_v6 = vpop.f32.mrb[157].mxu0  ;;  %v11592_v3 = vpop.f32.mrb[251].mxu1 }
 0x689   :  { %v11460_v11 = vadd.f32 %v11459_v6, %v11458_v2  ;;  %13212 = vmatmul.mubr.f32.gmra.mrb[68].mxu0 %v3335_v10  ;;  %v18824_v61 = vadd.f32 %v11592_v3, %v11591_v15  ;;  %v11594_v29 = vpop.f32.mrb[252].mxu1  ;;  %v3922_v2 = vld [vmem:[#allocation7 + $0x300] sm:$0xff] }
 0x68a   :  { %15622 = vmatpush3.bf16.msra.mxu0 %v19723_v7  ;;  %v11595_v35 = vpop.f32.mrb[253].mxu1 }
 0x68b   :  { %v3340_v27 = vadd.f32 %v11460_v11, %v18746_v56  ;;  %v11461_v44 = vpop.f32.mrb[158].mxu0  ;;  %15624 = vmatprep.subr.bf16.mxu0 %v19724_v1  ;;  %v18829_v56 = vadd.f32 %v11595_v35, %v11594_v29  ;;  %v11597_v1 = vpop.f32.mrb[254].mxu1 }
 0x68c   :  { %v11462_v63 = vpop.f32.mrb[159].mxu0  ;;  %v11598_v10 = vpop.f32.mrb[255].mxu1 }
 0x68d   :  { %v11463_v57 = vadd.f32 %v11462_v63, %v11461_v44  ;;  %13214 = vmatprep.mubr.f32.mxu0 %v3340_v27  ;;  %v18831_v55 = vadd.f32 %v11598_v10, %v11597_v1  ;;  %v11744_v11 = vpop.f32.mrb[0].mxu1  ;;  %v18838_v27 = vpack.c.bf16 %v3923_v30, %v3922_v2 }
 0x68e   :  { %15626 = vmatpush3.bf16.msra.mxu0 %v19725_v5  ;;  %v11745_v5 = vpop.f32.mrb[1].mxu1 }
 0x68f   :  { %v3345_v7 = vadd.f32 %v11463_v57, %v18748_v31  ;;  %v11464_v53 = vpop.f32.mrb[160].mxu0  ;;  %15628 = vmatprep.subr.bf16.mxu0 %v19726_v49  ;;  %v18836_v49 = vadd.f32 %v11745_v5, %v11744_v11  ;;  %v11747_v38 = vpop.f32.mrb[2].mxu1 }
 0x690   :  { %v11465_v4 = vpop.f32.mrb[161].mxu0  ;;  %v11748_v15 = vpop.f32.mrb[3].mxu1 }
 0x691   :  { %v11466_v6 = vadd.f32 %v11465_v4, %v11464_v53  ;;  %13215 = vmatmul.mubr.f32.gmra.mrb[70].mxu0 %v3345_v7  ;;  %v18840_v3 = vadd.f32 %v11748_v15, %v11747_v38  ;;  %v11750_v57 = vpop.f32.mrb[4].mxu1 }
 0x692   :  { %15630 = vmatpush3.bf16.msra.mxu0 %v19727_v59  ;;  %v11751_v59 = vpop.f32.mrb[5].mxu1 }
 0x693   :  { %v3350_v31 = vadd.f32 %v11466_v6, %v18750_v13  ;;  %v11467_v60 = vpop.f32.mrb[162].mxu0  ;;  %15632 = vmatprep.subr.bf16.mxu0 %v19728_v20  ;;  %v18844_v35 = vadd.f32 %v11751_v59, %v11750_v57  ;;  %v11753_v20 = vpop.f32.mrb[6].mxu1 }
 0x694   :  { %v11468_v44 = vpop.f32.mrb[163].mxu0  ;;  %v11754_v53 = vpop.f32.mrb[7].mxu1 }
 0x695   :  { %v11469_v63 = vadd.f32 %v11468_v44, %v11467_v60  ;;  %13217 = vmatprep.mubr.f32.mxu0 %v3350_v31  ;;  %v18847_v4 = vadd.f32 %v11754_v53, %v11753_v20  ;;  %v11756_v10 = vpop.f32.mrb[8].mxu1 }
 0x696   :  { %15634 = vmatpush3.bf16.msra.mxu0 %v19729_v14  ;;  %v11757_v2 = vpop.f32.mrb[9].mxu1 }
 0x697   :  { %v3355_v13 = vadd.f32 %v11469_v63, %v18752_v46  ;;  %v11470_v29 = vpop.f32.mrb[164].mxu0  ;;  %15636 = vmatprep.subr.bf16.mxu0 %v18838_v27  ;;  %v18850_v6 = vadd.f32 %v11757_v2, %v11756_v10  ;;  %v11759_v46 = vpop.f32.mrb[10].mxu1 }
 0x698   :  { %v11471_v7 = vpop.f32.mrb[165].mxu0  ;;  %v11760_v5 = vpop.f32.mrb[11].mxu1 }
 0x699   :  { %v11472_v1 = vadd.f32 %v11471_v7, %v11470_v29  ;;  %13218 = vmatmul.mubr.f32.gmra.mrb[72].mxu0 %v3355_v13  ;;  %v18852_v60 = vadd.f32 %v11760_v5, %v11759_v46  ;;  %v11762_v38 = vpop.f32.mrb[12].mxu1  ;;  %v3570_v5 = vld [vmem:[#allocation5 + $0xc18] sm:$0xff] }
 0x69a   :  { %v11763_v44 = vpop.f32.mrb[13].mxu1 }
 0x69b   :  { %v3360_v30 = vadd.f32 %v11472_v1, %v18756_v18  ;;  %v11473_v14 = vpop.f32.mrb[166].mxu0  ;;  %v18855_v57 = vadd.f32 %v11763_v44, %v11762_v38  ;;  %v3569_v38 = vld [vmem:[#allocation5 + $0xc10] sm:$0xff]  ;;  %v3574_v44 = vld [vmem:[#allocation5 + $0xc38] sm:$0xff] }
 0x69c   :  { %v11474_v11 = vpop.f32.mrb[167].mxu0 }
 0x69d   :  { %v11475_v31 = vadd.f32 %v11474_v11, %v11473_v14  ;;  %13220 = vmatprep.mubr.f32.mxu0 %v3360_v30 }
 0x69f   :  { %v3365_v15 = vadd.f32 %v11475_v31, %v18760_v43  ;;  %v11476_v63 = vpop.f32.mrb[168].mxu0  ;;  %v3925_v31 = vld [vmem:[#allocation7 + $0x318] sm:$0xff] }
 0x6a0   :  { %v11477_v59 = vpop.f32.mrb[169].mxu0 }
 0x6a1   :  { %v11478_v13 = vadd.f32 %v11477_v59, %v11476_v63  ;;  %13221 = vmatmul.mubr.f32.gmra.mrb[74].mxu0 %v3365_v15  ;;  %v3926_v15 = vld [vmem:[#allocation7 + $0x320] sm:$0xff]  ;;  %v3927_v63 = vld [vmem:[#allocation7 + $0x328] sm:$0xff]  ;;  %v3573_v59 = vld [vmem:[#allocation5 + $0xc30] sm:$0xff] }
 0x6a3   :  { %v3370_v18 = vadd.f32 %v11478_v13, %v18764_v58  ;;  %v11479_v29 = vpop.f32.mrb[170].mxu0  ;;  %v3924_v58 = vld [vmem:[#allocation7 + $0x310] sm:$0xff]  ;;  %v15643_v13 = vpack.c.bf16 %v3927_v63, %v3926_v15 }
 0x6a4   :  { %v11480_v20 = vpop.f32.mrb[171].mxu0 }
 0x6a5   :  { %v11481_v7 = vadd.f32 %v11480_v20, %v11479_v29  ;;  %13223 = vmatprep.mubr.f32.mxu0 %v3370_v18  ;;  %v3928_v18 = vld [vmem:[#allocation7 + $0x330] sm:$0xff]  ;;  %v3582_v20 = vld [vmem:[#allocation5 + $0xc78] sm:$0xff] }
 0x6a6   :  { %v3577_v29 = vld [vmem:[#allocation5 + $0xc50] sm:$0xff] }
 0x6a7   :  { %v3375_v53 = vadd.f32 %v11481_v7, %v18768_v17  ;;  %v11482_v1 = vpop.f32.mrb[172].mxu0  ;;  %v15639_v17 = vpack.c.bf16 %v3925_v31, %v3924_v58 }
 0x6a8   :  { %v11483_v10 = vpop.f32.mrb[173].mxu0 }
 0x6a9   :  { %v11484_v2 = vadd.f32 %v11483_v10, %v11482_v1  ;;  %13224 = vmatmul.mubr.f32.gmra.mrb[76].mxu0 %v3375_v53  ;;  %v3930_v53 = vld [vmem:[#allocation7 + $0x340] sm:$0xff]  ;;  %v3931_v1 = vld [vmem:[#allocation7 + $0x348] sm:$0xff]  ;;  %v3581_v10 = vld [vmem:[#allocation5 + $0xc70] sm:$0xff] }
 0x6ab   :  { %v3380_v43 = vadd.f32 %v11484_v2, %v18772_v42  ;;  %v11485_v30 = vpop.f32.mrb[174].mxu0  ;;  %v3578_v42 = vld [vmem:[#allocation5 + $0xc58] sm:$0xff] }
 0x6ac   :  { %v11486_v14 = vpop.f32.mrb[175].mxu0  ;;  %v3586_v2 = vld [vmem:[#allocation5 + $0xc98] sm:$0xff] }
 0x6ad   :  { %v11487_v46 = vadd.f32 %v11486_v14, %v11485_v30  ;;  %13226 = vmatprep.mubr.f32.mxu0 %v3380_v43  ;;  %v3932_v43 = vld [vmem:[#allocation7 + $0x350] sm:$0xff]  ;;  %v3933_v30 = vld [vmem:[#allocation7 + $0x358] sm:$0xff] }
 0x6ae   :  { %v3585_v14 = vld [vmem:[#allocation5 + $0xc90] sm:$0xff] }
 0x6af   :  { %v3385_v11 = vadd.f32 %v11487_v46, %v18776_v9  ;;  %v3929_v9 = vld [vmem:[#allocation7 + $0x338] sm:$0xff] }
 0x6b0   :  { %v15647_v7 = vpack.c.bf16 %v3929_v9, %v3928_v18  ;;  %v3590_v46 = vld [vmem:[#allocation5 + $0xcb8] sm:$0xff] }
 0x6b1   :  { %13227 = vmatmul.mubr.f32.gmra.mrb[78].mxu0 %v3385_v11  ;;  %v11765_v11 = vpop.f32.mrb[14].mxu1 }
 0x6b2   :  { %3840 = vmatprep.mubr.f32.mxu0 %v3570_v5  ;;  %v15655_v5 = vpack.c.bf16 %v3933_v30, %v3932_v43  ;;  %v11766_v58 = vpop.f32.mrb[15].mxu1 }
 0x6b3   :  { %v18862_v31 = vadd.f32 %v11766_v58, %v11765_v11 }
 0x6b5   :  { %3841 = vmatmul.mubr.f32.vlgmr.msra.gmra.mrb[176].mxu0 %v3569_v38  ;;  %v3589_v38 = vld [vmem:[#allocation5 + $0xcb0] sm:$0xff] }
 0x6b6   :  { %3845 = vmatprep.mubr.f32.mxu0 %v3574_v44  ;;  %15638 = vmatpush3.bf16.msra.mxu0 %v18838_v27  ;;  %v15651_v27 = vpack.c.bf16 %v3931_v1, %v3930_v53  ;;  %v3594_v44 = vld [vmem:[#allocation5 + $0xcd8] sm:$0xff] }
 0x6b7   :  { %15640 = vmatprep.subr.bf16.mxu0 %v15639_v17 }
 0x6b9   :  { %3846 = vmatmul.mubr.f32.gmra.mrb[178].mxu0 %v3573_v59  ;;  %v3593_v59 = vld [vmem:[#allocation5 + $0xcd0] sm:$0xff] }
 0x6ba   :  { %3850 = vmatprep.mubr.f32.mxu0 %v3578_v42  ;;  %15642 = vmatpush3.bf16.msra.mxu0 %v15639_v17  ;;  %v11768_v17 = vpop.f32.mrb[16].mxu1  ;;  %v3598_v42 = vld [vmem:[#allocation5 + $0xcf8] sm:$0xff] }
 0x6bb   :  { %15644 = vmatprep.subr.bf16.mxu0 %v15643_v13  ;;  %v11769_v15 = vpop.f32.mrb[17].mxu1 }
 0x6bc   :  { %v18864_v63 = vadd.f32 %v11769_v15, %v11768_v17 }
 0x6bd   :  { %3851 = vmatmul.mubr.f32.gmra.mrb[180].mxu0 %v3577_v29  ;;  %v3597_v29 = vld [vmem:[#allocation5 + $0xcf0] sm:$0xff] }
 0x6be   :  { %3855 = vmatprep.mubr.f32.mxu0 %v3582_v20  ;;  %15646 = vmatpush3.bf16.msra.mxu0 %v15643_v13  ;;  %v11771_v13 = vpop.f32.mrb[18].mxu1  ;;  %v3602_v20 = vld [vmem:[#allocation5 + $0xd18] sm:$0xff] }
 0x6bf   :  { %15648 = vmatprep.subr.bf16.mxu0 %v15647_v7  ;;  %v11772_v18 = vpop.f32.mrb[19].mxu1 }
 0x6c0   :  { %v18866_v9 = vadd.f32 %v11772_v18, %v11771_v13  ;;  %v3618_v13 = vld [vmem:[#allocation5 + $0xd98] sm:$0xff] }
 0x6c1   :  { %3856 = vmatmul.mubr.f32.gmra.mrb[182].mxu0 %v3581_v10  ;;  %v3601_v10 = vld [vmem:[#allocation5 + $0xd10] sm:$0xff] }
 0x6c2   :  { %3860 = vmatprep.mubr.f32.mxu0 %v3586_v2  ;;  %15650 = vmatpush3.bf16.msra.mxu0 %v15647_v7  ;;  %v11774_v7 = vpop.f32.mrb[20].mxu1  ;;  %v3606_v2 = vld [vmem:[#allocation5 + $0xd38] sm:$0xff] }
 0x6c3   :  { %15652 = vmatprep.subr.bf16.mxu0 %v15651_v27  ;;  %v11775_v53 = vpop.f32.mrb[21].mxu1 }
 0x6c4   :  { %v18868_v1 = vadd.f32 %v11775_v53, %v11774_v7  ;;  %v3617_v7 = vld [vmem:[#allocation5 + $0xd90] sm:$0xff]  ;;  %v3622_v53 = vld [vmem:[#allocation5 + $0xdb8] sm:$0xff] }
 0x6c5   :  { %3861 = vmatmul.mubr.f32.gmra.mrb[184].mxu0 %v3585_v14  ;;  %v3605_v14 = vld [vmem:[#allocation5 + $0xd30] sm:$0xff] }
 0x6c6   :  { %3865 = vmatprep.mubr.f32.mxu0 %v3590_v46  ;;  %15654 = vmatpush3.bf16.msra.mxu0 %v15651_v27  ;;  %v11777_v27 = vpop.f32.mrb[22].mxu1  ;;  %v3610_v46 = vld [vmem:[#allocation5 + $0xd58] sm:$0xff] }
 0x6c7   :  { %15656 = vmatprep.subr.bf16.mxu0 %v15655_v5  ;;  %v11778_v43 = vpop.f32.mrb[23].mxu1 }
 0x6c8   :  { %v18870_v30 = vadd.f32 %v11778_v43, %v11777_v27  ;;  %v11780_v11 = vpop.f32.mrb[24].mxu1  ;;  %v3621_v43 = vld [vmem:[#allocation5 + $0xdb0] sm:$0xff] }
 0x6c9   :  { %3866 = vmatmul.mubr.f32.gmra.mrb[186].mxu0 %v3589_v38  ;;  %v3609_v38 = vld [vmem:[#allocation5 + $0xd50] sm:$0xff] }
 0x6ca   :  { %3870 = vmatprep.mubr.f32.mxu0 %v3594_v44  ;;  %15658 = vmatpush3.bf16.msra.mxu0 %v15655_v5  ;;  %v11781_v5 = vpop.f32.mrb[25].mxu1  ;;  %v3614_v44 = vld [vmem:[#allocation5 + $0xd78] sm:$0xff] }
 0x6cb   :  { %v18872_v58 = vadd.f32 %v11781_v5, %v11780_v11  ;;  %v11783_v17 = vpop.f32.mrb[26].mxu1 }
 0x6cc   :  { %v11784_v15 = vpop.f32.mrb[27].mxu1 }
 0x6cd   :  { %3871 = vmatmul.mubr.f32.gmra.mrb[188].mxu0 %v3593_v59  ;;  %v18874_v59 = vadd.f32 %v11784_v15, %v11783_v17  ;;  %v11786_v18 = vpop.f32.mrb[28].mxu1 }
 0x6ce   :  { %3875 = vmatprep.mubr.f32.mxu0 %v3598_v42  ;;  %v3613_v42 = vld [vmem:[#allocation5 + $0xd70] sm:$0xff] }
 0x6d1   :  { %3876 = vmatmul.mubr.f32.gmra.mrb[190].mxu0 %v3597_v29  ;;  %v11787_v29 = vpop.f32.mrb[29].mxu1 }
 0x6d2   :  { %3880 = vmatprep.mubr.f32.mxu0 %v3602_v20  ;;  %v18876_v20 = vadd.f32 %v11787_v29, %v11786_v18  ;;  %v3629_v18 = vld [vmem:[#allocation5 + $0xdf0] sm:$0xff] }
 0x6d5   :  { %3881 = vmatmul.mubr.f32.gmra.mrb[192].mxu0 %v3601_v10  ;;  %v11789_v10 = vpop.f32.mrb[30].mxu1 }
 0x6d6   :  { %3885 = vmatprep.mubr.f32.mxu0 %v3606_v2  ;;  %v11790_v2 = vpop.f32.mrb[31].mxu1 }
 0x6d7   :  { %v18878_v27 = vadd.f32 %v11790_v2, %v11789_v10 }
 0x6d9   :  { %3886 = vmatmul.mubr.f32.gmra.mrb[194].mxu0 %v3605_v14  ;;  %v3626_v14 = vld [vmem:[#allocation5 + $0xdd8] sm:$0xff] }
 0x6da   :  { %3890 = vmatprep.mubr.f32.mxu0 %v3610_v46  ;;  %v11824_v46 = vpop.f32.mrb[32].mxu1 }
 0x6db   :  { %v11825_v11 = vpop.f32.mrb[33].mxu1 }
 0x6dc   :  { %v11826_v5 = vadd.f32 %v11825_v11, %v11824_v46  ;;  %v11827_v15 = vpop.f32.mrb[34].mxu1 }
 0x6dd   :  { %3891 = vmatmul.mubr.f32.gmra.mrb[196].mxu0 %v3609_v38  ;;  %v3625_v38 = vld [vmem:[#allocation5 + $0xdd0] sm:$0xff] }
 0x6de   :  { %3895 = vmatprep.mubr.f32.mxu0 %v3614_v44  ;;  %v3630_v44 = vld [vmem:[#allocation5 + $0xdf8] sm:$0xff]  ;;  %v18881_v17 = vadd.f32 %v11826_v5, %v18836_v49 }
 0x6e1   :  { %3896 = vmatmul.mubr.f32.gmra.mrb[198].mxu0 %v3613_v42  ;;  %v11828_v42 = vpop.f32.mrb[35].mxu1 }
 0x6e2   :  { %3900 = vmatprep.mubr.f32.mxu0 %v3618_v13  ;;  %v11829_v13 = vadd.f32 %v11828_v42, %v11827_v15 }
 0x6e4   :  { %v18884_v29 = vadd.f32 %v11829_v13, %v18840_v3 }
 0x6e5   :  { %3901 = vmatmul.mubr.f32.gmra.mrb[200].mxu0 %v3617_v7  ;;  %v11830_v7 = vpop.f32.mrb[36].mxu1 }
 0x6e6   :  { %3905 = vmatprep.mubr.f32.mxu0 %v3622_v53  ;;  %v11831_v53 = vpop.f32.mrb[37].mxu1 }
 0x6e7   :  { %v11832_v10 = vadd.f32 %v11831_v53, %v11830_v7 }
 0x6e9   :  { %3906 = vmatmul.mubr.f32.gmra.mrb[202].mxu0 %v3621_v43  ;;  %v18887_v2 = vadd.f32 %v11832_v10, %v18844_v35  ;;  %v11833_v43 = vpop.f32.mrb[38].mxu1 }
 0x6ea   :  { %3910 = vmatprep.mubr.f32.mxu0 %v3626_v14  ;;  %v11834_v14 = vpop.f32.mrb[39].mxu1 }
 0x6eb   :  { %v11835_v49 = vadd.f32 %v11834_v14, %v11833_v43  ;;  %v11836_v11 = vpop.f32.mrb[40].mxu1 }
 0x6ec   :  { %v11837_v5 = vpop.f32.mrb[41].mxu1 }
 0x6ed   :  { %3911 = vmatmul.mubr.f32.gmra.mrb[204].mxu0 %v3625_v38  ;;  %v18890_v46 = vadd.f32 %v11835_v49, %v18847_v4  ;;  %v11838_v38 = vadd.f32 %v11837_v5, %v11836_v11  ;;  %v11839_v3 = vpop.f32.mrb[42].mxu1  ;;  %v3934_v49 = vld [vmem:[#allocation7 + $0x360] sm:$0xff]  ;;  %v3935_v11 = vld [vmem:[#allocation7 + $0x368] sm:$0xff] }
 0x6ee   :  { %3915 = vmatprep.mubr.f32.mxu0 %v3630_v44  ;;  %v11840_v15 = vpop.f32.mrb[43].mxu1 }
 0x6ef   :  { %v18893_v44 = vadd.f32 %v11838_v38, %v18850_v6  ;;  %v11841_v42 = vadd.f32 %v11840_v15, %v11839_v3  ;;  %v11842_v35 = vpop.f32.mrb[44].mxu1  ;;  %v15659_v38 = vpack.c.bf16 %v3935_v11, %v3934_v49 }
 0x6f1   :  { %3916 = vmatmul.mubr.f32.gmra.mrb[206].mxu0 %v3629_v18  ;;  %v18896_v13 = vadd.f32 %v11841_v42, %v18852_v60  ;;  %v11843_v18 = vpop.f32.mrb[45].mxu1  ;;  %15660 = vmatprep.subr.bf16.mxu0 %v15659_v38  ;;  %v3937_v42 = vld [vmem:[#allocation7 + $0x378] sm:$0xff] }
 0x6f2   :  { %v11844_v7 = vadd.f32 %v11843_v18, %v11842_v35  ;;  %v11845_v4 = vpop.f32.mrb[46].mxu1  ;;  %15662 = vmatpush3.bf16.msra.mxu0 %v15659_v38 }
 0x6f3   :  { %v11846_v10 = vpop.f32.mrb[47].mxu1 }
 0x6f4   :  { %v18899_v53 = vadd.f32 %v11844_v7, %v18855_v57  ;;  %v11847_v43 = vadd.f32 %v11846_v10, %v11845_v4  ;;  %v11848_v6 = vpop.f32.mrb[48].mxu1  ;;  %v3936_v57 = vld [vmem:[#allocation7 + $0x370] sm:$0xff] }
 0x6f5   :  { %v11849_v5 = vpop.f32.mrb[49].mxu1  ;;  %v15663_v18 = vpack.c.bf16 %v3937_v42, %v3936_v57 }
 0x6f6   :  { %v18902_v14 = vadd.f32 %v11847_v43, %v18862_v31  ;;  %v11850_v3 = vadd.f32 %v11849_v5, %v11848_v6  ;;  %v11851_v15 = vpop.f32.mrb[50].mxu1 }
 0x6f7   :  { %v11852_v35 = vpop.f32.mrb[51].mxu1  ;;  %15664 = vmatprep.subr.bf16.mxu0 %v15663_v18 }
 0x6f8   :  { %v18905_v60 = vadd.f32 %v11850_v3, %v18864_v63  ;;  %v11853_v7 = vadd.f32 %v11852_v35, %v11851_v15  ;;  %15666 = vmatpush3.bf16.msra.mxu0 %v15663_v18  ;;  %v11854_v4 = vpop.f32.mrb[52].mxu1 }
 0x6f9   :  { %v11855_v10 = vpop.f32.mrb[53].mxu1 }
 0x6fa   :  { %v18908_v31 = vadd.f32 %v11853_v7, %v18866_v9  ;;  %v11856_v43 = vadd.f32 %v11855_v10, %v11854_v4  ;;  %v11857_v63 = vpop.f32.mrb[54].mxu1 }
 0x6fb   :  { %v11858_v49 = vpop.f32.mrb[55].mxu1 }
 0x6fc   :  { %v18911_v6 = vadd.f32 %v11856_v43, %v18868_v1  ;;  %v11859_v11 = vadd.f32 %v11858_v49, %v11857_v63  ;;  %v11860_v38 = vpop.f32.mrb[56].mxu1 }
 0x6fd   :  { %v11861_v3 = vpop.f32.mrb[57].mxu1 }
 0x6fe   :  { %v18914_v5 = vadd.f32 %v11859_v11, %v18870_v30  ;;  %v11862_v15 = vadd.f32 %v11861_v3, %v11860_v38  ;;  %v11863_v9 = vpop.f32.mrb[58].mxu1  ;;  %v4456_v11 = vld [vmem:[#allocation7 + $0x388] sm:$0xff]  ;;  %v4636_v3 = vld [vmem:[#allocation5 + $0x1018] sm:$0xff] }
 0x6ff   :  { %v11864_v42 = vpop.f32.mrb[59].mxu1  ;;  %4906 = vmatprep.mubr.f32.mxu1 %v4636_v3 }
 0x700   :  { %v18917_v57 = vadd.f32 %v11862_v15, %v18872_v58  ;;  %v11865_v35 = vadd.f32 %v11864_v42, %v11863_v9  ;;  %v11866_v1 = vpop.f32.mrb[60].mxu1  ;;  %v4455_v58 = vld [vmem:[#allocation7 + $0x380] sm:$0xff]  ;;  %v4635_v15 = vld [vmem:[#allocation5 + $0x1010] sm:$0xff] }
 0x701   :  { %v11867_v7 = vpop.f32.mrb[61].mxu1  ;;  %v15731_v38 = vpack.c.bf16 %v4456_v11, %v4455_v58  ;;  %4907 = vmatmul.mubr.f32.vlgmr.msra.gmra.mrb[64].mxu1 %v4635_v15  ;;  %v4639_v9 = vld [vmem:[#allocation5 + $0x1030] sm:$0xff]  ;;  %v4664_v58 = vld [vmem:[#allocation5 + $0x10f8] sm:$0xff] }
 0x702   :  { %v18920_v18 = vadd.f32 %v11865_v35, %v18874_v59  ;;  %v11868_v4 = vadd.f32 %v11867_v7, %v11866_v1  ;;  %v11869_v30 = vpop.f32.mrb[62].mxu1  ;;  %v4640_v59 = vld [vmem:[#allocation5 + $0x1038] sm:$0xff]  ;;  %v4643_v42 = vld [vmem:[#allocation5 + $0x1050] sm:$0xff] }
 0x703   :  { %v11870_v43 = vpop.f32.mrb[63].mxu1  ;;  %15732 = vmatprep.subr.bf16.mxu0 %v15731_v38  ;;  %4911 = vmatprep.mubr.f32.mxu1 %v4640_v59  ;;  %v4648_v35 = vld [vmem:[#allocation5 + $0x1078] sm:$0xff]  ;;  %v4651_v7 = vld [vmem:[#allocation5 + $0x1090] sm:$0xff] }
 0x704   :  { %v18923_v10 = vadd.f32 %v11868_v4, %v18876_v20  ;;  %v11871_v63 = vadd.f32 %v11870_v43, %v11869_v30  ;;  %v4644_v20 = vld [vmem:[#allocation5 + $0x1058] sm:$0xff]  ;;  %v4655_v30 = vld [vmem:[#allocation5 + $0x10b0] sm:$0xff] }
 0x705   :  { %4912 = vmatmul.mubr.f32.gmra.mrb[66].mxu1 %v4639_v9  ;;  %v4652_v1 = vld [vmem:[#allocation5 + $0x1098] sm:$0xff]  ;;  %v4663_v11 = vld [vmem:[#allocation5 + $0x10f0] sm:$0xff] }
 0x706   :  { %v18926_v49 = vadd.f32 %v11871_v63, %v18878_v27  ;;  %4916 = vmatprep.mubr.f32.mxu1 %v4644_v20  ;;  %v4647_v27 = vld [vmem:[#allocation5 + $0x1070] sm:$0xff]  ;;  %v4656_v4 = vld [vmem:[#allocation5 + $0x10b8] sm:$0xff] }
 0x707   :  { %v4660_v43 = vld [vmem:[#allocation5 + $0x10d8] sm:$0xff]  ;;  %v4659_v63 = vld [vmem:[#allocation5 + $0x10d0] sm:$0xff] }
 0x708   :  { %19730 = vst [vmem:[#allocation58_spill] sm:$0xff] %v18926_v49  ;;  %v4668_v9 = vld [vmem:[#allocation5 + $0x1118] sm:$0xff]  ;;  %v4667_v20 = vld [vmem:[#allocation5 + $0x1110] sm:$0xff] }
 0x709   :  { %4917 = vmatmul.mubr.f32.gmra.mrb[68].mxu1 %v4643_v42 }
 0x70a   :  { %4921 = vmatprep.mubr.f32.mxu1 %v4648_v35 }
 0x70d   :  { %4922 = vmatmul.mubr.f32.gmra.mrb[70].mxu1 %v4647_v27 }
 0x70e   :  { %4926 = vmatprep.mubr.f32.mxu1 %v4652_v1  ;;  %v4457_v1 = vld [vmem:[#allocation7 + $0x390] sm:$0xff] }
 0x711   :  { %4927 = vmatmul.mubr.f32.gmra.mrb[72].mxu1 %v4651_v7  ;;  %v4458_v7 = vld [vmem:[#allocation7 + $0x398] sm:$0xff] }
 0x712   :  { %4931 = vmatprep.mubr.f32.mxu1 %v4656_v4 }
 0x715   :  { %4932 = vmatmul.mubr.f32.gmra.mrb[74].mxu1 %v4655_v30  ;;  %v4672_v30 = vld [vmem:[#allocation5 + $0x1138] sm:$0xff] }
 0x716   :  { %4936 = vmatprep.mubr.f32.mxu1 %v4660_v43  ;;  %v4671_v43 = vld [vmem:[#allocation5 + $0x1130] sm:$0xff] }
 0x719   :  { %4937 = vmatmul.mubr.f32.gmra.mrb[76].mxu1 %v4659_v63 }
 0x71a   :  { %4941 = vmatprep.mubr.f32.mxu1 %v4664_v58 }
 0x71d   :  { %4942 = vmatmul.mubr.f32.gmra.mrb[78].mxu1 %v4663_v11  ;;  %v15735_v11 = vpack.c.bf16 %v4458_v7, %v4457_v1  ;;  %v4680_v7 = vld [vmem:[#allocation5 + $0x1178] sm:$0xff] }
 0x71e   :  { %4946 = vmatprep.mubr.f32.mxu1 %v4668_v9  ;;  %v4460_v9 = vld [vmem:[#allocation7 + $0x3a8] sm:$0xff] }
 0x721   :  { %4947 = vmatmul.mubr.f32.gmra.mrb[80].mxu1 %v4667_v20 }
 0x722   :  { %4951 = vmatprep.mubr.f32.mxu1 %v4672_v30  ;;  %v4461_v30 = vld [vmem:[#allocation7 + $0x3b0] sm:$0xff] }
 0x725   :  { %4952 = vmatmul.mubr.f32.gmra.mrb[82].mxu1 %v4671_v43 }
 0x788   :  { %v11632_v3 = vpop.f32.mrb[176].mxu0 }
 0x789   :  { %v11633_v15 = vpop.f32.mrb[177].mxu0 }
 0x78a   :  { %v11634_v59 = vadd.f32 %v11633_v15, %v11632_v3  ;;  %v4459_v15 = vld [vmem:[#allocation7 + $0x3a0] sm:$0xff] }
 0x78c   :  { %v3843_v42 = vadd.f32 %v11634_v59, %v18782_v36  ;;  %v11635_v35 = vpop.f32.mrb[178].mxu0  ;;  %v4676_v36 = vld [vmem:[#allocation5 + $0x1158] sm:$0xff]  ;;  %v4675_v59 = vld [vmem:[#allocation5 + $0x1150] sm:$0xff] }
 0x78d   :  { %v11636_v27 = vpop.f32.mrb[179].mxu0  ;;  %4956 = vmatprep.mubr.f32.mxu1 %v4676_v36 }
 0x78e   :  { %v11637_v4 = vadd.f32 %v11636_v27, %v11635_v35  ;;  %13261 = vmatprep.mubr.f32.mxu0 %v3843_v42  ;;  %v15739_v35 = vpack.c.bf16 %v4460_v9, %v4459_v15  ;;  %4957 = vmatmul.mubr.f32.gmra.mrb[84].mxu1 %v4675_v59  ;;  %v4684_v15 = vld [vmem:[#allocation5 + $0x1198] sm:$0xff]  ;;  %v4683_v9 = vld [vmem:[#allocation5 + $0x1190] sm:$0xff] }
 0x78f   :  { %4961 = vmatprep.mubr.f32.mxu1 %v4680_v7 }
 0x790   :  { %v3848_v63 = vadd.f32 %v11637_v4, %v18784_v51  ;;  %v11638_v58 = vpop.f32.mrb[180].mxu0  ;;  %v4462_v51 = vld [vmem:[#allocation7 + $0x3b8] sm:$0xff]  ;;  %v4679_v4 = vld [vmem:[#allocation5 + $0x1170] sm:$0xff] }
 0x791   :  { %v11639_v3 = vpop.f32.mrb[181].mxu0 }
 0x792   :  { %v11640_v49 = vadd.f32 %v11639_v3, %v11638_v58  ;;  %13262 = vmatmul.mubr.f32.vlgmr.msra.gmra.mrb[64].mxu0 %v3848_v63  ;;  %v15743_v63 = vpack.c.bf16 %v4462_v51, %v4461_v30  ;;  %4962 = vmatmul.mubr.f32.gmra.mrb[86].mxu1 %v4679_v4  ;;  %v4688_v30 = vld [vmem:[#allocation5 + $0x11b8] sm:$0xff]  ;;  %v4687_v51 = vld [vmem:[#allocation5 + $0x11b0] sm:$0xff] }
 0x793   :  { %15734 = vmatpush3.bf16.msra.mxu0 %v15731_v38  ;;  %4966 = vmatprep.mubr.f32.mxu1 %v4684_v15 }
 0x794   :  { %v3853_v20 = vadd.f32 %v11640_v49, %v18787_v45  ;;  %v11641_v42 = vpop.f32.mrb[182].mxu0  ;;  %15736 = vmatprep.subr.bf16.mxu0 %v15735_v11  ;;  %v4463_v45 = vld [vmem:[#allocation7 + $0x3c0] sm:$0xff]  ;;  %v4464_v49 = vld [vmem:[#allocation7 + $0x3c8] sm:$0xff] }
 0x795   :  { %v11642_v27 = vpop.f32.mrb[183].mxu0  ;;  %v15747_v59 = vpack.c.bf16 %v4464_v49, %v4463_v45  ;;  %v4691_v45 = vld [vmem:[#allocation5 + $0x11d0] sm:$0xff] }
 0x796   :  { %v11643_v1 = vadd.f32 %v11642_v27, %v11641_v42  ;;  %13264 = vmatprep.mubr.f32.mxu0 %v3853_v20  ;;  %v4466_v42 = vld [vmem:[#allocation7 + $0x3d8] sm:$0xff]  ;;  %4967 = vmatmul.mubr.f32.gmra.mrb[88].mxu1 %v4683_v9 }
 0x797   :  { %15738 = vmatpush3.bf16.msra.mxu0 %v15735_v11  ;;  %4971 = vmatprep.mubr.f32.mxu1 %v4688_v30  ;;  %v4470_v9 = vld [vmem:[#allocation7 + $0x3f8] sm:$0xff] }
 0x798   :  { %v3858_v43 = vadd.f32 %v11643_v1, %v18789_v62  ;;  %v11644_v38 = vpop.f32.mrb[184].mxu0  ;;  %15740 = vmatprep.subr.bf16.mxu0 %v15739_v35  ;;  %v4465_v62 = vld [vmem:[#allocation7 + $0x3d0] sm:$0xff] }
 0x799   :  { %v11645_v58 = vpop.f32.mrb[185].mxu0  ;;  %v15751_v7 = vpack.c.bf16 %v4466_v42, %v4465_v62 }
 0x79a   :  { %v11646_v3 = vadd.f32 %v11645_v58, %v11644_v38  ;;  %13265 = vmatmul.mubr.f32.gmra.mrb[66].mxu0 %v3858_v43  ;;  %v4468_v43 = vld [vmem:[#allocation7 + $0x3e8] sm:$0xff]  ;;  %4972 = vmatmul.mubr.f32.gmra.mrb[90].mxu1 %v4687_v51  ;;  %v4692_v58 = vld [vmem:[#allocation5 + $0x11d8] sm:$0xff] }
 0x79b   :  { %15742 = vmatpush3.bf16.msra.mxu0 %v15739_v35  ;;  %4976 = vmatprep.mubr.f32.mxu1 %v4692_v58 }
 0x79c   :  { %v3863_v36 = vadd.f32 %v11646_v3, %v18794_v48  ;;  %v11647_v11 = vpop.f32.mrb[186].mxu0  ;;  %15744 = vmatprep.subr.bf16.mxu0 %v15743_v63  ;;  %v4467_v48 = vld [vmem:[#allocation7 + $0x3e0] sm:$0xff] }
 0x79d   :  { %v11648_v20 = vpop.f32.mrb[187].mxu0  ;;  %v15755_v3 = vpack.c.bf16 %v4468_v43, %v4467_v48 }
 0x79e   :  { %v11649_v27 = vadd.f32 %v11648_v20, %v11647_v11  ;;  %13267 = vmatprep.mubr.f32.mxu0 %v3863_v36  ;;  %4977 = vmatmul.mubr.f32.gmra.mrb[92].mxu1 %v4691_v45  ;;  %v4696_v11 = vld [vmem:[#allocation5 + $0x11f8] sm:$0xff]  ;;  %v4695_v20 = vld [vmem:[#allocation5 + $0x11f0] sm:$0xff] }
 0x79f   :  { %15746 = vmatpush3.bf16.msra.mxu0 %v15743_v63  ;;  %4981 = vmatprep.mubr.f32.mxu1 %v4696_v11 }
 0x7a0   :  { %v3868_v1 = vadd.f32 %v11649_v27, %v18796_v47  ;;  %v11650_v35 = vpop.f32.mrb[188].mxu0  ;;  %15748 = vmatprep.subr.bf16.mxu0 %v15747_v59  ;;  %v4469_v47 = vld [vmem:[#allocation7 + $0x3f0] sm:$0xff] }
 0x7a1   :  { %v11651_v4 = vpop.f32.mrb[189].mxu0  ;;  %v15759_v42 = vpack.c.bf16 %v4470_v9, %v4469_v47 }
 0x7a2   :  { %v11652_v38 = vadd.f32 %v11651_v4, %v11650_v35  ;;  %13268 = vmatmul.mubr.f32.gmra.mrb[68].mxu0 %v3868_v1  ;;  %4982 = vmatmul.mubr.f32.gmra.mrb[94].mxu1 %v4695_v20 }
 0x7a3   :  { %15750 = vmatpush3.bf16.msra.mxu0 %v15747_v59 }
 0x7a4   :  { %v3873_v49 = vadd.f32 %v11652_v38, %v18801_v37  ;;  %v11653_v63 = vpop.f32.mrb[190].mxu0  ;;  %15752 = vmatprep.subr.bf16.mxu0 %v15751_v7 }
 0x7a5   :  { %v11654_v15 = vpop.f32.mrb[191].mxu0 }
 0x7a6   :  { %v11655_v36 = vadd.f32 %v11654_v15, %v11653_v63  ;;  %13270 = vmatprep.mubr.f32.mxu0 %v3873_v49 }
 0x7a7   :  { %15754 = vmatpush3.bf16.msra.mxu0 %v15751_v7 }
 0x7a8   :  { %v3878_v62 = vadd.f32 %v11655_v36, %v18803_v33  ;;  %v11656_v59 = vpop.f32.mrb[192].mxu0  ;;  %15756 = vmatprep.subr.bf16.mxu0 %v15755_v3 }
 0x7a9   :  { %v11657_v27 = vpop.f32.mrb[193].mxu0 }
 0x7aa   :  { %v11658_v37 = vadd.f32 %v11657_v27, %v11656_v59  ;;  %13271 = vmatmul.mubr.f32.gmra.mrb[70].mxu0 %v3878_v62  ;;  %v4657_v27 = vld [vmem:[#allocation5 + $0x10c0] sm:$0xff] }
 0x7ab   :  { %15758 = vmatpush3.bf16.msra.mxu0 %v15755_v3 }
 0x7ac   :  { %v3883_v30 = vadd.f32 %v11658_v37, %v18808_v25  ;;  %v11659_v51 = vpop.f32.mrb[194].mxu0  ;;  %15760 = vmatprep.subr.bf16.mxu0 %v15759_v42  ;;  %v4662_v37 = vld [vmem:[#allocation5 + $0x10e8] sm:$0xff] }
 0x7ad   :  { %v11660_v1 = vpop.f32.mrb[195].mxu0 }
 0x7ae   :  { %v11661_v35 = vadd.f32 %v11660_v1, %v11659_v51  ;;  %13273 = vmatprep.mubr.f32.mxu0 %v3883_v30  ;;  %v4661_v30 = vld [vmem:[#allocation5 + $0x10e0] sm:$0xff]  ;;  %v4666_v51 = vld [vmem:[#allocation5 + $0x1108] sm:$0xff] }
 0x7af   :  { %15762 = vmatpush3.bf16.msra.mxu0 %v15759_v42  ;;  %v4665_v1 = vld [vmem:[#allocation5 + $0x1100] sm:$0xff] }
 0x7b0   :  { %v3888_v7 = vadd.f32 %v11661_v35, %v18810_v28  ;;  %v11662_v4 = vpop.f32.mrb[196].mxu0  ;;  %15764 = vmatprep.subr.bf16.mxu0 %v19711_v0  ;;  %v4670_v35 = vld [vmem:[#allocation5 + $0x1128] sm:$0xff] }
 0x7b1   :  { %v11663_v33 = vpop.f32.mrb[197].mxu0 }
 0x7b2   :  { %v11664_v48 = vadd.f32 %v11663_v33, %v11662_v4  ;;  %13274 = vmatmul.mubr.f32.gmra.mrb[72].mxu0 %v3888_v7  ;;  %v4669_v7 = vld [vmem:[#allocation5 + $0x1120] sm:$0xff]  ;;  %v4674_v4 = vld [vmem:[#allocation5 + $0x1148] sm:$0xff] }
 0x7b3   :  { %v4673_v33 = vld [vmem:[#allocation5 + $0x1140] sm:$0xff] }
 0x7b4   :  { %v3893_v43 = vadd.f32 %v11664_v48, %v18815_v23  ;;  %v11665_v38 = vpop.f32.mrb[198].mxu0  ;;  %v4678_v48 = vld [vmem:[#allocation5 + $0x1168] sm:$0xff] }
 0x7b5   :  { %v11666_v58 = vpop.f32.mrb[199].mxu0 }
 0x7b6   :  { %v11667_v45 = vadd.f32 %v11666_v58, %v11665_v38  ;;  %13276 = vmatprep.mubr.f32.mxu0 %v3893_v43  ;;  %v4677_v43 = vld [vmem:[#allocation5 + $0x1160] sm:$0xff]  ;;  %v4682_v38 = vld [vmem:[#allocation5 + $0x1188] sm:$0xff] }
 0x7b7   :  { %v4681_v58 = vld [vmem:[#allocation5 + $0x1180] sm:$0xff] }
 0x7b8   :  { %v3898_v25 = vadd.f32 %v11667_v45, %v18817_v19  ;;  %v11668_v49 = vpop.f32.mrb[200].mxu0  ;;  %v4686_v45 = vld [vmem:[#allocation5 + $0x11a8] sm:$0xff] }
 0x7b9   :  { %v11669_v63 = vpop.f32.mrb[201].mxu0 }
 0x7ba   :  { %v11670_v3 = vadd.f32 %v11669_v63, %v11668_v49  ;;  %13277 = vmatmul.mubr.f32.gmra.mrb[74].mxu0 %v3898_v25  ;;  %v4685_v25 = vld [vmem:[#allocation5 + $0x11a0] sm:$0xff]  ;;  %v4690_v49 = vld [vmem:[#allocation5 + $0x11c8] sm:$0xff] }
 0x7bb   :  { %v4689_v63 = vld [vmem:[#allocation5 + $0x11c0] sm:$0xff] }
 0x7bc   :  { %v3903_v28 = vadd.f32 %v11670_v3, %v18822_v12  ;;  %v11671_v15 = vpop.f32.mrb[202].mxu0  ;;  %v4993_v12 = vld [vmem:[#allocation7 + $0x428] sm:$0xff] }
 0x7bd   :  { %v11672_v47 = vpop.f32.mrb[203].mxu0  ;;  %v4694_v3 = vld [vmem:[#allocation5 + $0x11e8] sm:$0xff] }
 0x7be   :  { %v11673_v0 = vadd.f32 %v11672_v47, %v11671_v15  ;;  %13279 = vmatprep.mubr.f32.mxu0 %v3903_v28  ;;  %v4693_v28 = vld [vmem:[#allocation5 + $0x11e0] sm:$0xff] }
 0x7bf   :  { %v5000_v47 = vld [vmem:[#allocation7 + $0x460] sm:$0xff] }
 0x7c0   :  { %v3908_v9 = vadd.f32 %v11673_v0, %v18824_v61  ;;  %v11674_v36 = vpop.f32.mrb[204].mxu0  ;;  %v5001_v0 = vld [vmem:[#allocation7 + $0x468] sm:$0xff] }
 0x7c1   :  { %v11675_v23 = vpop.f32.mrb[205].mxu0 }
 0x7c2   :  { %v11676_v11 = vadd.f32 %v11675_v23, %v11674_v36  ;;  %13280 = vmatmul.mubr.f32.gmra.mrb[76].mxu0 %v3908_v9  ;;  %v15851_v36 = vpack.c.bf16 %v5001_v0, %v5000_v47 }
 0x7c4   :  { %v3913_v20 = vadd.f32 %v11676_v11, %v18829_v56  ;;  %v11677_v62 = vpop.f32.mrb[206].mxu0  ;;  %v4994_v56 = vld [vmem:[#allocation7 + $0x430] sm:$0xff] }
 0x7c5   :  { %v11678_v19 = vpop.f32.mrb[207].mxu0 }
 0x7c6   :  { %v11679_v59 = vadd.f32 %v11678_v19, %v11677_v62  ;;  %13282 = vmatprep.mubr.f32.mxu0 %v3913_v20  ;;  %v5002_v20 = vld [vmem:[#allocation7 + $0x470] sm:$0xff]  ;;  %v5003_v62 = vld [vmem:[#allocation7 + $0x478] sm:$0xff] }
 0x7c8   :  { %v3918_v42 = vadd.f32 %v11679_v59, %v18831_v55  ;;  %v4995_v55 = vld [vmem:[#allocation7 + $0x438] sm:$0xff]  ;;  %v15855_v59 = vpack.c.bf16 %v5003_v62, %v5002_v20 }
 0x7ca   :  { %13283 = vmatmul.mubr.f32.gmra.mrb[78].mxu0 %v3918_v42 }
 0x7cb   :  { %13317 = vmatprep.mubr.f32.mxu0 %v18881_v17  ;;  %v4641_v17 = vld [vmem:[#allocation5 + $0x1040] sm:$0xff] }
 0x7ce   :  { %13318 = vmatmul.mubr.f32.vlgmr.msra.gmra.mrb[64].mxu0 %v18884_v29  ;;  %v4646_v29 = vld [vmem:[#allocation5 + $0x1068] sm:$0xff] }
 0x7cf   :  { %13320 = vmatprep.mubr.f32.mxu0 %v18887_v2  ;;  %15766 = vmatpush3.bf16.msra.mxu0 %v18186_v8  ;;  %v4988_v8 = vld [vmem:[#allocation7 + $0x400] sm:$0xff]  ;;  %v15839_v2 = vpack.c.bf16 %v4995_v55, %v4994_v56 }
 0x7d0   :  { %15768 = vmatprep.subr.bf16.mxu0 %v18193_v16  ;;  %v4989_v16 = vld [vmem:[#allocation7 + $0x408] sm:$0xff] }
 0x7d2   :  { %13321 = vmatmul.mubr.f32.gmra.mrb[66].mxu0 %v18890_v46  ;;  %v4996_v46 = vld [vmem:[#allocation7 + $0x440] sm:$0xff] }
 0x7d3   :  { %13323 = vmatprep.mubr.f32.mxu0 %v18893_v44  ;;  %15770 = vmatpush3.bf16.msra.mxu0 %v18198_v21  ;;  %v4634_v21 = vld [vmem:[#allocation5 + $0x1008] sm:$0xff] }
 0x7d4   :  { %15772 = vmatprep.subr.bf16.mxu0 %v18204_v26  ;;  %v15827_v26 = vpack.c.bf16 %v4989_v16, %v4988_v8  ;;  %v4997_v44 = vld [vmem:[#allocation7 + $0x448] sm:$0xff]  ;;  %v12016_v15 = vpop.f32.mrb[64].mxu1 }
 0x7d5   :  { %v12017_v9 = vpop.f32.mrb[65].mxu1 }
 0x7d6   :  { %13324 = vmatmul.mubr.f32.gmra.mrb[68].mxu0 %v18896_v13  ;;  %v4645_v13 = vld [vmem:[#allocation5 + $0x1060] sm:$0xff]  ;;  %v12018_v23 = vadd.f32 %v12017_v9, %v12016_v15 }
 0x7d7   :  { %13326 = vmatprep.mubr.f32.mxu0 %v18899_v53  ;;  %15774 = vmatpush3.bf16.msra.mxu0 %v18209_v34  ;;  %v4990_v34 = vld [vmem:[#allocation7 + $0x410] sm:$0xff]  ;;  %v4650_v53 = vld [vmem:[#allocation5 + $0x1088] sm:$0xff] }
 0x7d8   :  { %15776 = vmatprep.subr.bf16.mxu0 %v18215_v39  ;;  %v4991_v39 = vld [vmem:[#allocation7 + $0x418] sm:$0xff]  ;;  %v12019_v11 = vpop.f32.mrb[66].mxu1 }
 0x7d9   :  { %v12020_v19 = vpop.f32.mrb[67].mxu1 }
 0x7da   :  { %13327 = vmatmul.mubr.f32.gmra.mrb[70].mxu0 %v18902_v14  ;;  %v15843_v14 = vpack.c.bf16 %v4997_v44, %v4996_v46  ;;  %v12021_v42 = vadd.f32 %v12020_v19, %v12019_v11 }
 0x7db   :  { %13329 = vmatprep.mubr.f32.mxu0 %v18905_v60  ;;  %15778 = vmatpush3.bf16.msra.mxu0 %v18221_v50  ;;  %v19731_v50 = vld [vmem:[#allocation58_spill] sm:$0xff]  ;;  %v4998_v60 = vld [vmem:[#allocation7 + $0x450] sm:$0xff] }
 0x7dc   :  { %15780 = vmatprep.subr.bf16.mxu0 %v18227_v52  ;;  %v19732_v52 = vld [vmem:[#allocation70_spill] sm:$0xff]  ;;  %v12022_v8 = vpop.f32.mrb[68].mxu1 }
 0x7dd   :  { %v12023_v16 = vpop.f32.mrb[69].mxu1 }
 0x7de   :  { %13330 = vmatmul.mubr.f32.gmra.mrb[72].mxu0 %v18908_v31  ;;  %v4999_v31 = vld [vmem:[#allocation7 + $0x458] sm:$0xff] }
 0x7df   :  { %13332 = vmatprep.mubr.f32.mxu0 %v18911_v6  ;;  %15782 = vmatpush3.bf16.msra.mxu0 %v19704_v40  ;;  %v4633_v40 = vld [vmem:[#allocation5 + $0x1000] sm:$0xff] }
 0x7e0   :  { %15784 = vmatprep.subr.bf16.mxu0 %v19705_v54  ;;  %v4638_v54 = vld [vmem:[#allocation5 + $0x1028] sm:$0xff]  ;;  %v4649_v6 = vld [vmem:[#allocation5 + $0x1080] sm:$0xff] }
 0x7e2   :  { %13333 = vmatmul.mubr.f32.gmra.mrb[74].mxu0 %v18914_v5  ;;  %v4654_v5 = vld [vmem:[#allocation5 + $0x10a8] sm:$0xff] }
 0x7e3   :  { %13335 = vmatprep.mubr.f32.mxu0 %v18917_v57  ;;  %15786 = vmatpush3.bf16.msra.mxu0 %v19706_v22  ;;  %v15831_v22 = vpack.c.bf16 %v4991_v39, %v4990_v34  ;;  %v15847_v57 = vpack.c.bf16 %v4999_v31, %v4998_v60 }
 0x7e4   :  { %15788 = vmatprep.subr.bf16.mxu0 %v19707_v32  ;;  %v4992_v32 = vld [vmem:[#allocation7 + $0x420] sm:$0xff] }
 0x7e5   :  { %v15835_v61 = vpack.c.bf16 %v4993_v12, %v4992_v32 }
 0x7e6   :  { %13336 = vmatmul.mubr.f32.gmra.mrb[76].mxu0 %v18920_v18  ;;  %v4653_v18 = vld [vmem:[#allocation5 + $0x10a0] sm:$0xff] }
 0x7e7   :  { %13338 = vmatprep.mubr.f32.mxu0 %v18923_v10  ;;  %15790 = vmatpush3.bf16.msra.mxu0 %v19708_v24  ;;  %v4637_v24 = vld [vmem:[#allocation5 + $0x1020] sm:$0xff]  ;;  %v4658_v10 = vld [vmem:[#allocation5 + $0x10c8] sm:$0xff] }
 0x7e8   :  { %15792 = vmatprep.subr.bf16.mxu0 %v19709_v41  ;;  %v4642_v41 = vld [vmem:[#allocation5 + $0x1048] sm:$0xff] }
 0x7ea   :  { %13339 = vmatmul.mubr.f32.gmra.mrb[78].mxu0 %v19731_v50 }
 0x7eb   :  { %15794 = vmatpush3.bf16.msra.mxu0 %v19732_v52  ;;  %4761 = vmatprep.mubr.f32.mxu0 %v4634_v21  ;;  %v12024_v21 = vadd.f32 %v12023_v16, %v12022_v8 }
 0x7ec   :  { %15828 = vmatprep.subr.bf16.mxu0 %v15827_v26 }
 0x7ee   :  { %4762 = vmatmul.mubr.f32.vlgmr.msra.gmra.mrb[208].mxu0 %v4633_v40 }
 0x7ef   :  { %4766 = vmatprep.mubr.f32.mxu0 %v4638_v54  ;;  %15830 = vmatpush3.bf16.msra.mxu0 %v15827_v26  ;;  %v12025_v26 = vpop.f32.mrb[70].mxu1 }
 0x7f0   :  { %15832 = vmatprep.subr.bf16.mxu0 %v15831_v22  ;;  %v12026_v34 = vpop.f32.mrb[71].mxu1 }
 0x7f1   :  { %v12027_v39 = vadd.f32 %v12026_v34, %v12025_v26  ;;  %v12028_v50 = vpop.f32.mrb[72].mxu1 }
 0x7f2   :  { %4767 = vmatmul.mubr.f32.gmra.mrb[210].mxu0 %v4637_v24  ;;  %v12029_v52 = vpop.f32.mrb[73].mxu1 }
 0x7f3   :  { %4771 = vmatprep.mubr.f32.mxu0 %v4642_v41  ;;  %15834 = vmatpush3.bf16.msra.mxu0 %v15831_v22  ;;  %v12030_v40 = vadd.f32 %v12029_v52, %v12028_v50  ;;  %v12031_v54 = vpop.f32.mrb[74].mxu1 }
 0x7f4   :  { %15836 = vmatprep.subr.bf16.mxu0 %v15835_v61  ;;  %v12032_v22 = vpop.f32.mrb[75].mxu1 }
 0x7f5   :  { %v12033_v32 = vadd.f32 %v12032_v22, %v12031_v54  ;;  %v12034_v12 = vpop.f32.mrb[76].mxu1 }
 0x7f6   :  { %4772 = vmatmul.mubr.f32.gmra.mrb[212].mxu0 %v4641_v17  ;;  %v12035_v24 = vpop.f32.mrb[77].mxu1 }
 0x7f7   :  { %4776 = vmatprep.mubr.f32.mxu0 %v4646_v29  ;;  %15838 = vmatpush3.bf16.msra.mxu0 %v15835_v61  ;;  %v12036_v41 = vadd.f32 %v12035_v24, %v12034_v12  ;;  %v12037_v61 = vpop.f32.mrb[78].mxu1 }
 0x7f8   :  { %15840 = vmatprep.subr.bf16.mxu0 %v15839_v2  ;;  %v12038_v56 = vpop.f32.mrb[79].mxu1 }
 0x7f9   :  { %v18976_v55 = vadd.f32 %v12038_v56, %v12037_v61  ;;  %v12040_v17 = vpop.f32.mrb[80].mxu1 }
 0x7fa   :  { %4777 = vmatmul.mubr.f32.gmra.mrb[214].mxu0 %v4645_v13  ;;  %v12041_v29 = vpop.f32.mrb[81].mxu1 }
 0x7fb   :  { %4781 = vmatprep.mubr.f32.mxu0 %v4650_v53  ;;  %15842 = vmatpush3.bf16.msra.mxu0 %v15839_v2  ;;  %v18978_v2 = vadd.f32 %v12041_v29, %v12040_v17  ;;  %v12043_v46 = vpop.f32.mrb[82].mxu1 }
 0x7fc   :  { %15844 = vmatprep.subr.bf16.mxu0 %v15843_v14  ;;  %v12044_v44 = vpop.f32.mrb[83].mxu1 }
 0x7fd   :  { %v18980_v13 = vadd.f32 %v12044_v44, %v12043_v46 }
 0x7fe   :  { %4782 = vmatmul.mubr.f32.gmra.mrb[216].mxu0 %v4649_v6 }
 0x7ff   :  { %4786 = vmatprep.mubr.f32.mxu0 %v4654_v5  ;;  %15846 = vmatpush3.bf16.msra.mxu0 %v15843_v14 }
 0x800   :  { %15848 = vmatprep.subr.bf16.mxu0 %v15847_v57 }
 0x802   :  { %4787 = vmatmul.mubr.f32.gmra.mrb[218].mxu0 %v4653_v18 }
 0x803   :  { %4791 = vmatprep.mubr.f32.mxu0 %v4658_v10  ;;  %15850 = vmatpush3.bf16.msra.mxu0 %v15847_v57 }
 0x804   :  { %15852 = vmatprep.subr.bf16.mxu0 %v15851_v36 }
 0x806   :  { %4792 = vmatmul.mubr.f32.gmra.mrb[220].mxu0 %v4657_v27 }
 0x807   :  { %4796 = vmatprep.mubr.f32.mxu0 %v4662_v37  ;;  %15854 = vmatpush3.bf16.msra.mxu0 %v15851_v36 }
 0x808   :  { %15856 = vmatprep.subr.bf16.mxu0 %v15855_v59 }
 0x80a   :  { %4797 = vmatmul.mubr.f32.gmra.mrb[222].mxu0 %v4661_v30 }
 0x80b   :  { %4801 = vmatprep.mubr.f32.mxu0 %v4666_v51  ;;  %15858 = vmatpush3.bf16.msra.mxu0 %v15855_v59 }
 0x80e   :  { %4802 = vmatmul.mubr.f32.gmra.mrb[224].mxu0 %v4665_v1 }
 0x80f   :  { %4806 = vmatprep.mubr.f32.mxu0 %v4670_v35 }
 0x812   :  { %4807 = vmatmul.mubr.f32.gmra.mrb[226].mxu0 %v4669_v7 }
 0x813   :  { %4811 = vmatprep.mubr.f32.mxu0 %v4674_v4 }
 0x816   :  { %4812 = vmatmul.mubr.f32.gmra.mrb[228].mxu0 %v4673_v33 }
 0x817   :  { %4816 = vmatprep.mubr.f32.mxu0 %v4678_v48 }
 0x81a   :  { %4817 = vmatmul.mubr.f32.gmra.mrb[230].mxu0 %v4677_v43 }
 0x81b   :  { %4821 = vmatprep.mubr.f32.mxu0 %v4682_v38 }
 0x81e   :  { %4822 = vmatmul.mubr.f32.gmra.mrb[232].mxu0 %v4681_v58 }
 0x81f   :  { %4826 = vmatprep.mubr.f32.mxu0 %v4686_v45 }
 0x822   :  { %4827 = vmatmul.mubr.f32.gmra.mrb[234].mxu0 %v4685_v25 }
 0x823   :  { %4831 = vmatprep.mubr.f32.mxu0 %v4690_v49 }
 0x826   :  { %4832 = vmatmul.mubr.f32.gmra.mrb[236].mxu0 %v4689_v63 }
 0x827   :  { %4836 = vmatprep.mubr.f32.mxu0 %v4694_v3 }
 0x82a   :  { %4837 = vmatmul.mubr.f32.gmra.mrb[238].mxu0 %v4693_v28 }
 0x861   :  { %v12046_v53 = vpop.f32.mrb[84].mxu1 }
 0x862   :  { %v12047_v14 = vpop.f32.mrb[85].mxu1 }
 0x863   :  { %v18982_v60 = vadd.f32 %v12047_v14, %v12046_v53 }
 0x865   :  { %v12049_v31 = vpop.f32.mrb[86].mxu1 }
 0x866   :  { %v12050_v6 = vpop.f32.mrb[87].mxu1 }
 0x867   :  { %v18984_v5 = vadd.f32 %v12050_v6, %v12049_v31 }
 0x869   :  { %v12052_v57 = vpop.f32.mrb[88].mxu1 }
 0x86a   :  { %v12053_v18 = vpop.f32.mrb[89].mxu1 }
 0x86b   :  { %v18986_v10 = vadd.f32 %v12053_v18, %v12052_v57 }
 0x86d   :  { %v12055_v27 = vpop.f32.mrb[90].mxu1 }
 0x86e   :  { %v12056_v37 = vpop.f32.mrb[91].mxu1 }
 0x86f   :  { %v18988_v30 = vadd.f32 %v12056_v37, %v12055_v27 }
 0x871   :  { %v12058_v51 = vpop.f32.mrb[92].mxu1 }
 0x872   :  { %v12059_v1 = vpop.f32.mrb[93].mxu1 }
 0x873   :  { %v18990_v35 = vadd.f32 %v12059_v1, %v12058_v51 }
 0x875   :  { %v12061_v7 = vpop.f32.mrb[94].mxu1 }
 0x876   :  { %v12062_v4 = vpop.f32.mrb[95].mxu1 }
 0x877   :  { %v18992_v33 = vadd.f32 %v12062_v4, %v12061_v7 }
 0x8c1   :  { %v11936_v48 = vpop.f32.mrb[208].mxu0 }
 0x8c2   :  { %v11937_v43 = vpop.f32.mrb[209].mxu0 }
 0x8c3   :  { %v11938_v38 = vadd.f32 %v11937_v43, %v11936_v48 }
 0x8c5   :  { %v4909_v58 = vadd.f32 %v12018_v23, %v11938_v38  ;;  %v11939_v45 = vpop.f32.mrb[210].mxu0 }
 0x8c6   :  { %v11940_v25 = vpop.f32.mrb[211].mxu0 }
 0x8c7   :  { %v11941_v49 = vadd.f32 %v11940_v25, %v11939_v45  ;;  %13373 = vmatprep.mubr.f32.mxu0 %v4909_v58  ;;  %v5204_v45 = vld [vmem:[#allocation10] sm:$0xff]  ;;  %v19003_v25 = vld [vmem:[#allocation8] ss:$0 sm:$0xff] }
 0x8c8   :  { %13429 = vmatprep.mubr.f32.mxu1 %v5204_v45  ;;  %v5587_v45 = vld [vmem:[#allocation10 + $0x40] sm:$0xff] }
 0x8c9   :  { %v4914_v63 = vadd.f32 %v12021_v42, %v11941_v49  ;;  %v11942_v3 = vpop.f32.mrb[212].mxu0 }
 0x8ca   :  { %v11943_v28 = vpop.f32.mrb[213].mxu0 }
 0x8cb   :  { %v11944_v15 = vadd.f32 %v11943_v28, %v11942_v3  ;;  %13374 = vmatmul.mubr.f32.vlgmr.msra.gmra.mrb[64].mxu0 %v4914_v63 }
 0x8cd   :  { %v4919_v47 = vadd.f32 %v12024_v21, %v11944_v15  ;;  %v11945_v0 = vpop.f32.mrb[214].mxu0 }
 0x8ce   :  { %v11946_v9 = vpop.f32.mrb[215].mxu0 }
 0x8cf   :  { %v11947_v36 = vadd.f32 %v11946_v9, %v11945_v0  ;;  %13376 = vmatprep.mubr.f32.mxu0 %v4919_v47 }
 0x8d1   :  { %v4924_v11 = vadd.f32 %v12027_v39, %v11947_v36  ;;  %v11948_v20 = vpop.f32.mrb[216].mxu0 }
 0x8d2   :  { %v11949_v62 = vpop.f32.mrb[217].mxu0 }
 0x8d3   :  { %v11950_v19 = vadd.f32 %v11949_v62, %v11948_v20  ;;  %13377 = vmatmul.mubr.f32.gmra.mrb[66].mxu0 %v4924_v11 }
 0x8d5   :  { %v4929_v23 = vadd.f32 %v12030_v40, %v11950_v19  ;;  %v11951_v59 = vpop.f32.mrb[218].mxu0 }
 0x8d6   :  { %v11952_v8 = vpop.f32.mrb[219].mxu0 }
 0x8d7   :  { %v11953_v16 = vadd.f32 %v11952_v8, %v11951_v59  ;;  %13379 = vmatprep.mubr.f32.mxu0 %v4929_v23 }
 0x8d9   :  { %v4934_v42 = vadd.f32 %v12033_v32, %v11953_v16  ;;  %v11954_v26 = vpop.f32.mrb[220].mxu0 }
 0x8da   :  { %v11955_v34 = vpop.f32.mrb[221].mxu0 }
 0x8db   :  { %v11956_v50 = vadd.f32 %v11955_v34, %v11954_v26  ;;  %13380 = vmatmul.mubr.f32.gmra.mrb[68].mxu0 %v4934_v42 }
 0x8dd   :  { %v4939_v21 = vadd.f32 %v12036_v41, %v11956_v50  ;;  %v11957_v52 = vpop.f32.mrb[222].mxu0 }
 0x8de   :  { %v11958_v54 = vpop.f32.mrb[223].mxu0 }
 0x8df   :  { %v11959_v22 = vadd.f32 %v11958_v54, %v11957_v52  ;;  %13382 = vmatprep.mubr.f32.mxu0 %v4939_v21 }
 0x8e1   :  { %v4944_v39 = vadd.f32 %v18976_v55, %v11959_v22  ;;  %v11960_v12 = vpop.f32.mrb[224].mxu0 }
 0x8e2   :  { %v11961_v24 = vpop.f32.mrb[225].mxu0 }
 0x8e3   :  { %v11962_v61 = vadd.f32 %v11961_v24, %v11960_v12  ;;  %13383 = vmatmul.mubr.f32.gmra.mrb[70].mxu0 %v4944_v39 }
 0x8e5   :  { %v4949_v40 = vadd.f32 %v18978_v2, %v11962_v61  ;;  %v11963_v56 = vpop.f32.mrb[226].mxu0 }
 0x8e6   :  { %v11964_v17 = vpop.f32.mrb[227].mxu0 }
 0x8e7   :  { %v11965_v32 = vadd.f32 %v11964_v17, %v11963_v56  ;;  %13385 = vmatprep.mubr.f32.mxu0 %v4949_v40 }
 0x8e9   :  { %v4954_v29 = vadd.f32 %v18980_v13, %v11965_v32  ;;  %v11966_v46 = vpop.f32.mrb[228].mxu0 }
 0x8ea   :  { %v11967_v41 = vpop.f32.mrb[229].mxu0 }
 0x8eb   :  { %v11968_v44 = vadd.f32 %v11967_v41, %v11966_v46  ;;  %13386 = vmatmul.mubr.f32.gmra.mrb[72].mxu0 %v4954_v29 }
 0x8ed   :  { %v4959_v53 = vadd.f32 %v18982_v60, %v11968_v44  ;;  %v11969_v14 = vpop.f32.mrb[230].mxu0 }
 0x8ee   :  { %v11970_v55 = vpop.f32.mrb[231].mxu0 }
 0x8ef   :  { %v11971_v31 = vadd.f32 %v11970_v55, %v11969_v14  ;;  %13388 = vmatprep.mubr.f32.mxu0 %v4959_v53 }
 0x8f1   :  { %v4964_v6 = vadd.f32 %v18984_v5, %v11971_v31  ;;  %v11972_v57 = vpop.f32.mrb[232].mxu0 }
 0x8f2   :  { %v11973_v2 = vpop.f32.mrb[233].mxu0 }
 0x8f3   :  { %v11974_v18 = vadd.f32 %v11973_v2, %v11972_v57  ;;  %13389 = vmatmul.mubr.f32.gmra.mrb[74].mxu0 %v4964_v6 }
 0x8f5   :  { %v4969_v27 = vadd.f32 %v18986_v10, %v11974_v18  ;;  %v11975_v37 = vpop.f32.mrb[234].mxu0  ;;  %v5310_v10 = vld [vmem:[#allocation10 + $0x20] sm:$0xff] }
 0x8f6   :  { %v11976_v13 = vpop.f32.mrb[235].mxu0 }
 0x8f7   :  { %v11977_v51 = vadd.f32 %v11976_v13, %v11975_v37  ;;  %13391 = vmatprep.mubr.f32.mxu0 %v4969_v27 }
 0x8f9   :  { %v4974_v1 = vadd.f32 %v18988_v30, %v11977_v51  ;;  %v11978_v7 = vpop.f32.mrb[236].mxu0 }
 0x8fa   :  { %v11979_v60 = vpop.f32.mrb[237].mxu0 }
 0x8fb   :  { %v11980_v4 = vadd.f32 %v11979_v60, %v11978_v7  ;;  %13392 = vmatmul.mubr.f32.gmra.mrb[76].mxu0 %v4974_v1 }
 0x8fd   :  { %v4979_v48 = vadd.f32 %v18990_v35, %v11980_v4  ;;  %v11981_v43 = vpop.f32.mrb[238].mxu0 }
 0x8fe   :  { %v11982_v5 = vpop.f32.mrb[239].mxu0 }
 0x8ff   :  { %v11983_v38 = vadd.f32 %v11982_v5, %v11981_v43  ;;  %13394 = vmatprep.mubr.f32.mxu0 %v4979_v48  ;;  %v5311_v48 = vld [vmem:[#allocation10 + $0x28] sm:$0xff]  ;;  %v5312_v5 = vld [vmem:[#allocation10 + $0x30] sm:$0xff] }
 0x900   :  { %v5205_v43 = vld [vmem:[#allocation10 + $0x8] sm:$0xff] }
 0x901   :  { %v4984_v58 = vadd.f32 %v18992_v33, %v11983_v38  ;;  %v5206_v38 = vld [vmem:[#allocation10 + $0x10] sm:$0xff] }
 0x903   :  { %13395 = vmatmul.mubr.f32.gmra.mrb[78].mxu0 %v4984_v58  ;;  %v5313_v58 = vld [vmem:[#allocation10 + $0x38] sm:$0xff] }
 0x904   :  { %13467 = vmatprep.mubr.f32.mxu0 %v5310_v10  ;;  %v5207_v10 = vld [vmem:[#allocation10 + $0x18] sm:$0xff] }
 0x99e   :  { %v13375_v30 = vpop.f32.mrb[64].mxu0 }
 0x99f   :  { %v5173_v49 = vadd.f32 %v13375_v30, %v19003_v25  ;;  %v5070_v63 = vpop.f32.mrb[65].mxu0  ;;  %v5589_v30 = vld [vmem:[#allocation10 + $0x50] sm:$0xff] }
 0x9a0   :  { %v5172_v3 = vadd.f32 %v19003_v25, %v5070_v63  ;;  %v5783_v63 = vld [vmem:[#allocation10 + $0x60] sm:$0xff] }
 0x9a1   :  { %v5189_v35 = vmax.f32 %v5173_v49, 0.0  ;;  %v5590_v49 = vld [vmem:[#allocation10 + $0x58] sm:$0xff] }
 0x9a2   :  { %v5188_v28 = vmax.f32 %v5172_v3, 0.0  ;;  %v5400_v3 = vld [vmem:[#allocation11 + $0x80] sm:$0xff] }
 0x9a4   :  { %v19007_v15 = vpack.c.bf16 %v5189_v35, %v5188_v28  ;;  %v5401_v35 = vld [vmem:[#allocation11 + $0x88] sm:$0xff] }
 0x9a5   :  { %v15923_v28 = vpack.c.bf16 %v5401_v35, %v5400_v3  ;;  %v5299_v3 = vld [vmem:[#allocation11 + $0x30] sm:$0xff]  ;;  %v5300_v35 = vld [vmem:[#allocation11 + $0x38] sm:$0xff] }
 0x9a6   :  { %v13378_v47 = vpop.f32.mrb[66].mxu0  ;;  %15860 = vmatprep.subr.bf16.mxu1 %v19007_v15  ;;  %15892 = vmatprep.subr.bf16.mxu0 %v19007_v15 }
 0x9a7   :  { %v5175_v33 = vadd.f32 %v13378_v47, %v19003_v25  ;;  %v5080_v0 = vpop.f32.mrb[67].mxu0  ;;  %15862 = vmatpush3.bf16.msra.mxu1 %v19007_v15  ;;  %15894 = vmatpush3.bf16.msra.mxu0 %v19007_v15  ;;  %v5402_v47 = vld [vmem:[#allocation11 + $0x90] sm:$0xff] }
 0x9a8   :  { %v5174_v9 = vadd.f32 %v19003_v25, %v5080_v0 }
 0x9a9   :  { %v5191_v36 = vmax.f32 %v5175_v33, 0.0  ;;  %v5403_v33 = vld [vmem:[#allocation11 + $0x98] sm:$0xff] }
 0x9aa   :  { %v5190_v11 = vmax.f32 %v5174_v9, 0.0  ;;  %v15927_v0 = vpack.c.bf16 %v5403_v33, %v5402_v47  ;;  %v5404_v9 = vld [vmem:[#allocation11 + $0xa0] sm:$0xff]  ;;  %v5302_v47 = vld [vmem:[#allocation11 + $0x48] sm:$0xff] }
 0x9ab   :  { %v6764_v33 = vld [vmem:[#allocation10 + $0x108] sm:$0xff] }
 0x9ac   :  { %v19015_v20 = vpack.c.bf16 %v5191_v36, %v5190_v11  ;;  %v5405_v36 = vld [vmem:[#allocation11 + $0xa8] sm:$0xff] }
 0x9ad   :  { %v15931_v11 = vpack.c.bf16 %v5405_v36, %v5404_v9  ;;  %v5304_v36 = vld [vmem:[#allocation11 + $0x58] sm:$0xff] }
 0x9ae   :  { %v13381_v62 = vpop.f32.mrb[68].mxu0  ;;  %15864 = vmatprep.subr.bf16.mxu1 %v19015_v20  ;;  %15896 = vmatprep.subr.bf16.mxu0 %v19015_v20 }
 0x9af   :  { %v5177_v19 = vadd.f32 %v13381_v62, %v19003_v25  ;;  %v5090_v23 = vpop.f32.mrb[69].mxu0  ;;  %15866 = vmatpush3.bf16.msra.mxu1 %v19015_v20  ;;  %15898 = vmatpush3.bf16.msra.mxu0 %v19015_v20  ;;  %v5784_v62 = vld [vmem:[#allocation10 + $0x68] sm:$0xff] }
 0x9b0   :  { %v5176_v59 = vadd.f32 %v19003_v25, %v5090_v23  ;;  %v5406_v23 = vld [vmem:[#allocation11 + $0xb0] sm:$0xff] }
 0x9b1   :  { %v5193_v8 = vmax.f32 %v5177_v19, 0.0  ;;  %v5785_v19 = vld [vmem:[#allocation10 + $0x70] sm:$0xff] }
 0x9b2   :  { %v5192_v16 = vmax.f32 %v5176_v59, 0.0  ;;  %v5407_v59 = vld [vmem:[#allocation11 + $0xb8] sm:$0xff] }
 0x9b4   :  { %v19023_v42 = vpack.c.bf16 %v5193_v8, %v5192_v16  ;;  %v15935_v8 = vpack.c.bf16 %v5407_v59, %v5406_v23  ;;  %v5786_v16 = vld [vmem:[#allocation10 + $0x78] sm:$0xff]  ;;  %v5306_v23 = vld [vmem:[#allocation11 + $0x68] sm:$0xff]  ;;  %v5307_v59 = vld [vmem:[#allocation11 + $0x70] sm:$0xff] }
 0x9b6   :  { %v13384_v26 = vpop.f32.mrb[70].mxu0  ;;  %15868 = vmatprep.subr.bf16.mxu1 %v19023_v42  ;;  %15900 = vmatprep.subr.bf16.mxu0 %v19023_v42 }
 0x9b7   :  { %v5179_v34 = vadd.f32 %v13384_v26, %v19003_v25  ;;  %v5100_v50 = vpop.f32.mrb[71].mxu0  ;;  %15870 = vmatpush3.bf16.msra.mxu1 %v19023_v42  ;;  %15902 = vmatpush3.bf16.msra.mxu0 %v19023_v42  ;;  %v5979_v26 = vld [vmem:[#allocation10 + $0x80] sm:$0xff] }
 0x9b8   :  { %v5178_v21 = vadd.f32 %v19003_v25, %v5100_v50  ;;  %v5409_v50 = vld [vmem:[#allocation11 + $0xc8] sm:$0xff] }
 0x9b9   :  { %v5195_v52 = vmax.f32 %v5179_v34, 0.0  ;;  %v5408_v34 = vld [vmem:[#allocation11 + $0xc0] sm:$0xff] }
 0x9ba   :  { %v5194_v54 = vmax.f32 %v5178_v21, 0.0  ;;  %v15939_v21 = vpack.c.bf16 %v5409_v50, %v5408_v34  ;;  %v5678_v34 = vld [vmem:[#allocation11 + $0x108] sm:$0xff] }
 0x9bc   :  { %v19031_v22 = vpack.c.bf16 %v5195_v52, %v5194_v54  ;;  %v5410_v52 = vld [vmem:[#allocation11 + $0xd0] sm:$0xff]  ;;  %v5411_v54 = vld [vmem:[#allocation11 + $0xd8] sm:$0xff] }
 0x9be   :  { %v13387_v39 = vpop.f32.mrb[72].mxu0  ;;  %15872 = vmatprep.subr.bf16.mxu1 %v19031_v22  ;;  %15904 = vmatprep.subr.bf16.mxu0 %v19031_v22 }
 0x9bf   :  { %v5181_v12 = vadd.f32 %v13387_v39, %v19003_v25  ;;  %v5110_v24 = vpop.f32.mrb[73].mxu0  ;;  %15874 = vmatpush3.bf16.msra.mxu1 %v19031_v22  ;;  %15906 = vmatpush3.bf16.msra.mxu0 %v19031_v22  ;;  %v15943_v39 = vpack.c.bf16 %v5411_v54, %v5410_v52  ;;  %v5680_v52 = vld [vmem:[#allocation11 + $0x118] sm:$0xff] }
 0x9c0   :  { %v5180_v61 = vadd.f32 %v19003_v25, %v5110_v24  ;;  %v5413_v24 = vld [vmem:[#allocation11 + $0xe8] sm:$0xff] }
 0x9c1   :  { %v5197_v40 = vmax.f32 %v5181_v12, 0.0  ;;  %v5412_v12 = vld [vmem:[#allocation11 + $0xe0] sm:$0xff] }
 0x9c2   :  { %v5196_v56 = vmax.f32 %v5180_v61, 0.0  ;;  %v15947_v61 = vpack.c.bf16 %v5413_v24, %v5412_v12  ;;  %v5681_v24 = vld [vmem:[#allocation11 + $0x120] sm:$0xff] }
 0x9c4   :  { %v19039_v17 = vpack.c.bf16 %v5197_v40, %v5196_v56  ;;  %v5414_v40 = vld [vmem:[#allocation11 + $0xf0] sm:$0xff]  ;;  %v5415_v56 = vld [vmem:[#allocation11 + $0xf8] sm:$0xff] }
 0x9c6   :  { %v13390_v32 = vpop.f32.mrb[74].mxu0  ;;  %15876 = vmatprep.subr.bf16.mxu1 %v19039_v17  ;;  %15908 = vmatprep.subr.bf16.mxu0 %v19039_v17 }
 0x9c7   :  { %v5183_v29 = vadd.f32 %v13390_v32, %v19003_v25  ;;  %v5120_v46 = vpop.f32.mrb[75].mxu0  ;;  %15878 = vmatpush3.bf16.msra.mxu1 %v19039_v17  ;;  %15910 = vmatpush3.bf16.msra.mxu0 %v19039_v17  ;;  %v15951_v32 = vpack.c.bf16 %v5415_v56, %v5414_v40 }
 0x9c8   :  { %v5182_v41 = vadd.f32 %v19003_v25, %v5120_v46  ;;  %v5294_v46 = vld [vmem:[#allocation11 + $0x8] sm:$0xff] }
 0x9c9   :  { %v5199_v44 = vmax.f32 %v5183_v29, 0.0  ;;  %v5293_v29 = vld [vmem:[#allocation11] sm:$0xff] }
 0x9ca   :  { %v5198_v53 = vmax.f32 %v5182_v41, 0.0  ;;  %v19112_v41 = vpack.c.bf16 %v5294_v46, %v5293_v29  ;;  %v5683_v29 = vld [vmem:[#allocation11 + $0x130] sm:$0xff]  ;;  %v5684_v46 = vld [vmem:[#allocation11 + $0x138] sm:$0xff] }
 0x9cc   :  { %v19047_v14 = vpack.c.bf16 %v5199_v44, %v5198_v53  ;;  %v5980_v44 = vld [vmem:[#allocation10 + $0x88] sm:$0xff]  ;;  %v5981_v53 = vld [vmem:[#allocation10 + $0x90] sm:$0xff] }
 0x9ce   :  { %v13393_v55 = vpop.f32.mrb[76].mxu0  ;;  %15880 = vmatprep.subr.bf16.mxu1 %v19047_v14  ;;  %15912 = vmatprep.subr.bf16.mxu0 %v19047_v14 }
 0x9cf   :  { %v5185_v31 = vadd.f32 %v13393_v55, %v19003_v25  ;;  %v5130_v6 = vpop.f32.mrb[77].mxu0  ;;  %15882 = vmatpush3.bf16.msra.mxu1 %v19047_v14  ;;  %15914 = vmatpush3.bf16.msra.mxu0 %v19047_v14  ;;  %v5982_v55 = vld [vmem:[#allocation10 + $0x98] sm:$0xff] }
 0x9d0   :  { %v5184_v57 = vadd.f32 %v19003_v25, %v5130_v6  ;;  %v6176_v6 = vld [vmem:[#allocation10 + $0xa8] sm:$0xff] }
 0x9d1   :  { %v5201_v2 = vmax.f32 %v5185_v31, 0.0  ;;  %v6175_v31 = vld [vmem:[#allocation10 + $0xa0] sm:$0xff] }
 0x9d2   :  { %v5200_v18 = vmax.f32 %v5184_v57, 0.0  ;;  %v6177_v57 = vld [vmem:[#allocation10 + $0xb0] sm:$0xff] }
 0x9d4   :  { %v19055_v27 = vpack.c.bf16 %v5201_v2, %v5200_v18  ;;  %v6178_v2 = vld [vmem:[#allocation10 + $0xb8] sm:$0xff]  ;;  %v6371_v18 = vld [vmem:[#allocation10 + $0xc0] sm:$0xff] }
 0x9d6   :  { %v13396_v37 = vpop.f32.mrb[78].mxu0  ;;  %15884 = vmatprep.subr.bf16.mxu1 %v19055_v27  ;;  %15916 = vmatprep.subr.bf16.mxu0 %v19055_v27 }
 0x9d7   :  { %v5187_v13 = vadd.f32 %v13396_v37, %v19003_v25  ;;  %v5140_v51 = vpop.f32.mrb[79].mxu0  ;;  %15886 = vmatpush3.bf16.msra.mxu1 %v19055_v27  ;;  %15918 = vmatpush3.bf16.msra.mxu0 %v19055_v27  ;;  %v6372_v37 = vld [vmem:[#allocation10 + $0xc8] sm:$0xff] }
 0x9d8   :  { %v5186_v1 = vadd.f32 %v19003_v25, %v5140_v51  ;;  %v5588_v25 = vld [vmem:[#allocation10 + $0x48] sm:$0xff]  ;;  %v6374_v51 = vld [vmem:[#allocation10 + $0xd8] sm:$0xff] }
 0x9d9   :  { %v5203_v7 = vmax.f32 %v5187_v13, 0.0  ;;  %v6373_v13 = vld [vmem:[#allocation10 + $0xd0] sm:$0xff] }
 0x9da   :  { %v5202_v60 = vmax.f32 %v5186_v1, 0.0  ;;  %v6567_v1 = vld [vmem:[#allocation10 + $0xe0] sm:$0xff] }
 0x9dc   :  { %v19063_v4 = vpack.c.bf16 %v5203_v7, %v5202_v60  ;;  %v6568_v7 = vld [vmem:[#allocation10 + $0xe8] sm:$0xff]  ;;  %v6569_v60 = vld [vmem:[#allocation10 + $0xf0] sm:$0xff] }
 0x9de   :  { %15888 = vmatprep.subr.bf16.mxu1 %v19063_v4  ;;  %15920 = vmatprep.subr.bf16.mxu0 %v19063_v4 }
 0x9df   :  { %15890 = vmatpush3.bf16.msra.mxu1 %v19063_v4  ;;  %15922 = vmatpush3.bf16.msra.mxu0 %v19063_v4 }
 0x9e0   :  { %15988 = vmatprep.subr.bf16.mxu0 %v19007_v15  ;;  %15924 = vmatprep.subr.bf16.mxu1 %v15923_v28 }
 0x9e2   :  { %13468 = vmatmul.mubr.f32.vlgmr.msra.gmra.mrb[240].mxu0 %v5311_v48  ;;  %13430 = vmatmul.mubr.f32.vlgmr.msra.gmra.mrb[96].mxu1 %v5205_v43  ;;  %v6570_v48 = vld [vmem:[#allocation10 + $0xf8] sm:$0xff]  ;;  %v6763_v43 = vld [vmem:[#allocation10 + $0x100] sm:$0xff] }
 0x9e3   :  { %15990 = vmatpush3.bf16.msra.mxu0 %v19007_v15  ;;  %13470 = vmatprep.mubr.f32.mxu0 %v5312_v5  ;;  %v5296_v5 = vld [vmem:[#allocation11 + $0x18] sm:$0xff] }
 0x9e4   :  { %15992 = vmatprep.subr.bf16.mxu0 %v19015_v20  ;;  %13432 = vmatprep.mubr.f32.mxu1 %v5206_v38 }
 0x9e5   :  { %15926 = vmatpush3.bf16.msra.mxu1 %v15923_v28  ;;  %v5301_v28 = vld [vmem:[#allocation11 + $0x40] sm:$0xff] }
 0x9e6   :  { %13471 = vmatmul.mubr.f32.gmra.mrb[242].mxu0 %v5313_v58  ;;  %13433 = vmatmul.mubr.f32.gmra.mrb[98].mxu1 %v5207_v10  ;;  %v15971_v9 = vpack.c.bf16 %v5302_v47, %v5301_v28  ;;  %v5885_v47 = vld [vmem:[#allocation11 + $0x1e0] sm:$0xff] }
 0x9e7   :  { %15994 = vmatpush3.bf16.msra.mxu0 %v19015_v20  ;;  %13581 = vmatprep.mubr.f32.mxu0 %v5587_v45 }
 0x9e8   :  { %15996 = vmatprep.subr.bf16.mxu0 %v19023_v42  ;;  %15928 = vmatprep.subr.bf16.mxu1 %v15927_v0 }
 0x9e9   :  { %15930 = vmatpush3.bf16.msra.mxu1 %v15927_v0  ;;  %v6765_v0 = vld [vmem:[#allocation10 + $0x110] sm:$0xff] }
 0x9ea   :  { %15932 = vmatprep.subr.bf16.mxu1 %v15931_v11 }
 0x9eb   :  { %15998 = vmatpush3.bf16.msra.mxu0 %v19023_v42 }
 0x9ec   :  { %16000 = vmatprep.subr.bf16.mxu0 %v19031_v22 }
 0x9ed   :  { %15934 = vmatpush3.bf16.msra.mxu1 %v15931_v11  ;;  %v6766_v11 = vld [vmem:[#allocation10 + $0x118] sm:$0xff] }
 0x9ee   :  { %15936 = vmatprep.subr.bf16.mxu1 %v15935_v8 }
 0x9ef   :  { %16002 = vmatpush3.bf16.msra.mxu0 %v19031_v22 }
 0x9f0   :  { %16004 = vmatprep.subr.bf16.mxu0 %v19039_v17 }
 0x9f1   :  { %15938 = vmatpush3.bf16.msra.mxu1 %v15935_v8  ;;  %v5308_v8 = vld [vmem:[#allocation11 + $0x78] sm:$0xff] }
 0x9f2   :  { %15940 = vmatprep.subr.bf16.mxu1 %v15939_v21 }
 0x9f3   :  { %16006 = vmatpush3.bf16.msra.mxu0 %v19039_v17 }
 0x9f4   :  { %16008 = vmatprep.subr.bf16.mxu0 %v19047_v14 }
 0x9f5   :  { %15942 = vmatpush3.bf16.msra.mxu1 %v15939_v21  ;;  %v5679_v21 = vld [vmem:[#allocation11 + $0x110] sm:$0xff] }
 0x9f6   :  { %15944 = vmatprep.subr.bf16.mxu1 %v15943_v39 }
 0x9f7   :  { %16010 = vmatpush3.bf16.msra.mxu0 %v19047_v14 }
 0x9f8   :  { %16012 = vmatprep.subr.bf16.mxu0 %v19055_v27 }
 0x9f9   :  { %15946 = vmatpush3.bf16.msra.mxu1 %v15943_v39  ;;  %v16023_v39 = vpack.c.bf16 %v5680_v52, %v5679_v21 }
 0x9fa   :  { %15948 = vmatprep.subr.bf16.mxu1 %v15947_v61 }
 0x9fb   :  { %16014 = vmatpush3.bf16.msra.mxu0 %v19055_v27 }
 0x9fc   :  { %16016 = vmatprep.subr.bf16.mxu0 %v19063_v4 }
 0x9fd   :  { %15950 = vmatpush3.bf16.msra.mxu1 %v15947_v61  ;;  %v5682_v61 = vld [vmem:[#allocation11 + $0x128] sm:$0xff] }
 0x9fe   :  { %15952 = vmatprep.subr.bf16.mxu1 %v15951_v32  ;;  %v16027_v56 = vpack.c.bf16 %v5682_v61, %v5681_v24  ;;  %v6077_v24 = vld [vmem:[#allocation11 + $0x240] sm:$0xff]  ;;  %v6078_v61 = vld [vmem:[#allocation11 + $0x248] sm:$0xff] }
 0x9ff   :  { %16018 = vmatpush3.bf16.msra.mxu0 %v19063_v4 }
 0xa00   :  { %16052 = vmatprep.subr.bf16.mxu0 %v19007_v15 }
 0xa01   :  { %15954 = vmatpush3.bf16.msra.mxu1 %v15951_v32 }
 0xa02   :  { %13582 = vmatmul.mubr.f32.vlgmr.msra.gmra.mrb[244].mxu0 %v5588_v25  ;;  %15956 = vmatprep.subr.bf16.mxu1 %v19112_v41  ;;  %v5298_v25 = vld [vmem:[#allocation11 + $0x28] sm:$0xff] }
 0xa03   :  { %16054 = vmatpush3.bf16.msra.mxu0 %v19007_v15  ;;  %13584 = vmatprep.mubr.f32.mxu0 %v5589_v30 }
 0xa04   :  { %16056 = vmatprep.subr.bf16.mxu0 %v19015_v20 }
 0xa06   :  { %13585 = vmatmul.mubr.f32.gmra.mrb[246].mxu0 %v5590_v49 }
 0xa07   :  { %16058 = vmatpush3.bf16.msra.mxu0 %v19015_v20  ;;  %13657 = vmatprep.mubr.f32.mxu0 %v5783_v63 }
 0xa08   :  { %16060 = vmatprep.subr.bf16.mxu0 %v19023_v42 }
 0xa0b   :  { %16062 = vmatpush3.bf16.msra.mxu0 %v19023_v42 }
 0xa0c   :  { %16064 = vmatprep.subr.bf16.mxu0 %v19031_v22 }
 0xa0f   :  { %16066 = vmatpush3.bf16.msra.mxu0 %v19031_v22 }
 0xa10   :  { %16068 = vmatprep.subr.bf16.mxu0 %v19039_v17 }
 0xa13   :  { %16070 = vmatpush3.bf16.msra.mxu0 %v19039_v17 }
 0xa14   :  { %16072 = vmatprep.subr.bf16.mxu0 %v19047_v14 }
 0xa17   :  { %16074 = vmatpush3.bf16.msra.mxu0 %v19047_v14 }
 0xa18   :  { %16076 = vmatprep.subr.bf16.mxu0 %v19055_v27 }
 0xa1b   :  { %16078 = vmatpush3.bf16.msra.mxu0 %v19055_v27 }
 0xa1c   :  { %16080 = vmatprep.subr.bf16.mxu0 %v19063_v4 }
 0xa1f   :  { %16082 = vmatpush3.bf16.msra.mxu0 %v19063_v4 }
 0xa20   :  { %16116 = vmatprep.subr.bf16.mxu0 %v19007_v15 }
 0xa22   :  { %13658 = vmatmul.mubr.f32.vlgmr.msra.gmra.mrb[248].mxu0 %v5784_v62 }
 0xa23   :  { %16118 = vmatpush3.bf16.msra.mxu0 %v19007_v15  ;;  %13660 = vmatprep.mubr.f32.mxu0 %v5785_v19  ;;  %v5305_v19 = vld [vmem:[#allocation11 + $0x60] sm:$0xff] }
 0xa24   :  { %16120 = vmatprep.subr.bf16.mxu0 %v19015_v20 }
 0xa26   :  { %13661 = vmatmul.mubr.f32.gmra.mrb[250].mxu0 %v5786_v16  ;;  %v15983_v16 = vpack.c.bf16 %v5308_v8, %v5307_v59 }
 0xa27   :  { %16122 = vmatpush3.bf16.msra.mxu0 %v19015_v20  ;;  %13733 = vmatprep.mubr.f32.mxu0 %v5979_v26  ;;  %v5677_v26 = vld [vmem:[#allocation11 + $0x100] sm:$0xff] }
 0xa28   :  { %16124 = vmatprep.subr.bf16.mxu0 %v19023_v42  ;;  %v16019_v50 = vpack.c.bf16 %v5678_v34, %v5677_v26  ;;  %v6073_v26 = vld [vmem:[#allocation11 + $0x220] sm:$0xff]  ;;  %v6074_v34 = vld [vmem:[#allocation11 + $0x228] sm:$0xff] }
 0xa29   :  { %v16155_v21 = vpack.c.bf16 %v6074_v34, %v6073_v26  ;;  %v6469_v26 = vld [vmem:[#allocation11 + $0x340] sm:$0xff]  ;;  %v6470_v34 = vld [vmem:[#allocation11 + $0x348] sm:$0xff] }
 0xa2b   :  { %16126 = vmatpush3.bf16.msra.mxu0 %v19023_v42 }
 0xa2c   :  { %16128 = vmatprep.subr.bf16.mxu0 %v19031_v22 }
 0xa2f   :  { %16130 = vmatpush3.bf16.msra.mxu0 %v19031_v22 }
 0xa30   :  { %16132 = vmatprep.subr.bf16.mxu0 %v19039_v17 }
 0xa33   :  { %16134 = vmatpush3.bf16.msra.mxu0 %v19039_v17 }
 0xa34   :  { %16136 = vmatprep.subr.bf16.mxu0 %v19047_v14 }
 0xa37   :  { %16138 = vmatpush3.bf16.msra.mxu0 %v19047_v14 }
 0xa38   :  { %16140 = vmatprep.subr.bf16.mxu0 %v19055_v27 }
 0xa3b   :  { %16142 = vmatpush3.bf16.msra.mxu0 %v19055_v27 }
 0xa3c   :  { %16144 = vmatprep.subr.bf16.mxu0 %v19063_v4 }
 0xa3f   :  { %16146 = vmatpush3.bf16.msra.mxu0 %v19063_v4 }
 0xa40   :  { %16180 = vmatprep.subr.bf16.mxu0 %v19007_v15 }
 0xa42   :  { %13734 = vmatmul.mubr.f32.vlgmr.msra.gmra.mrb[252].mxu0 %v5980_v44  ;;  %v5685_v44 = vld [vmem:[#allocation11 + $0x140] sm:$0xff] }
 0xa43   :  { %16182 = vmatpush3.bf16.msra.mxu0 %v19007_v15  ;;  %13736 = vmatprep.mubr.f32.mxu0 %v5981_v53  ;;  %v5686_v53 = vld [vmem:[#allocation11 + $0x148] sm:$0xff] }
 0xa44   :  { %16184 = vmatprep.subr.bf16.mxu0 %v19015_v20 }
 0xa46   :  { %13737 = vmatmul.mubr.f32.gmra.mrb[254].mxu0 %v5982_v55  ;;  %v16035_v55 = vpack.c.bf16 %v5686_v53, %v5685_v44  ;;  %v6083_v53 = vld [vmem:[#allocation11 + $0x270] sm:$0xff] }
 0xa47   :  { %16186 = vmatpush3.bf16.msra.mxu0 %v19015_v20  ;;  %13809 = vmatprep.mubr.f32.mxu0 %v6175_v31  ;;  %v5687_v31 = vld [vmem:[#allocation11 + $0x150] sm:$0xff] }
 0xa48   :  { %16188 = vmatprep.subr.bf16.mxu0 %v19023_v42 }
 0xa4b   :  { %16190 = vmatpush3.bf16.msra.mxu0 %v19023_v42 }
 0xa4c   :  { %16192 = vmatprep.subr.bf16.mxu0 %v19031_v22 }
 0xa4f   :  { %16194 = vmatpush3.bf16.msra.mxu0 %v19031_v22 }
 0xa50   :  { %16196 = vmatprep.subr.bf16.mxu0 %v19039_v17 }
 0xa53   :  { %16198 = vmatpush3.bf16.msra.mxu0 %v19039_v17 }
 0xa54   :  { %16200 = vmatprep.subr.bf16.mxu0 %v19047_v14 }
 0xa57   :  { %16202 = vmatpush3.bf16.msra.mxu0 %v19047_v14 }
 0xa58   :  { %16204 = vmatprep.subr.bf16.mxu0 %v19055_v27 }
 0xa5b   :  { %16206 = vmatpush3.bf16.msra.mxu0 %v19055_v27 }
 0xa5c   :  { %16208 = vmatprep.subr.bf16.mxu0 %v19063_v4 }
 0xa5f   :  { %16210 = vmatpush3.bf16.msra.mxu0 %v19063_v4 }
 0xa60   :  { %16244 = vmatprep.subr.bf16.mxu0 %v19007_v15 }
 0xa62   :  { %13810 = vmatmul.mubr.f32.vlgmr.msra.gmra.mrb[0].mxu0 %v6176_v6  ;;  %v5688_v6 = vld [vmem:[#allocation11 + $0x158] sm:$0xff] }
 0xa63   :  { %16246 = vmatpush3.bf16.msra.mxu0 %v19007_v15  ;;  %13812 = vmatprep.mubr.f32.mxu0 %v6177_v57  ;;  %v16039_v57 = vpack.c.bf16 %v5688_v6, %v5687_v31  ;;  %v6265_v6 = vld [vmem:[#allocation11 + $0x280] sm:$0xff] }
 0xa64   :  { %16248 = vmatprep.subr.bf16.mxu0 %v19015_v20 }
 0xa66   :  { %13813 = vmatmul.mubr.f32.gmra.mrb[2].mxu0 %v6178_v2  ;;  %v5689_v2 = vld [vmem:[#allocation11 + $0x160] sm:$0xff] }
 0xa67   :  { %16250 = vmatpush3.bf16.msra.mxu0 %v19015_v20  ;;  %13885 = vmatprep.mubr.f32.mxu0 %v6371_v18  ;;  %v5690_v18 = vld [vmem:[#allocation11 + $0x168] sm:$0xff] }
 0xa68   :  { %16252 = vmatprep.subr.bf16.mxu0 %v19023_v42 }
 0xa6b   :  { %16254 = vmatpush3.bf16.msra.mxu0 %v19023_v42 }
 0xa6c   :  { %16256 = vmatprep.subr.bf16.mxu0 %v19031_v22 }
 0xa6f   :  { %16258 = vmatpush3.bf16.msra.mxu0 %v19031_v22 }
 0xa70   :  { %16260 = vmatprep.subr.bf16.mxu0 %v19039_v17 }
 0xa73   :  { %16262 = vmatpush3.bf16.msra.mxu0 %v19039_v17 }
 0xa74   :  { %16264 = vmatprep.subr.bf16.mxu0 %v19047_v14 }
 0xa77   :  { %16266 = vmatpush3.bf16.msra.mxu0 %v19047_v14 }
 0xa78   :  { %16268 = vmatprep.subr.bf16.mxu0 %v19055_v27 }
 0xa7b   :  { %16270 = vmatpush3.bf16.msra.mxu0 %v19055_v27 }
 0xa7c   :  { %16272 = vmatprep.subr.bf16.mxu0 %v19063_v4 }
 0xa7f   :  { %16274 = vmatpush3.bf16.msra.mxu0 %v19063_v4 }
 0xa80   :  { %16308 = vmatprep.subr.bf16.mxu0 %v19007_v15 }
 0xa82   :  { %13886 = vmatmul.mubr.f32.vlgmr.msra.gmra.mrb[4].mxu0 %v6372_v37  ;;  %v16043_v37 = vpack.c.bf16 %v5690_v18, %v5689_v2  ;;  %v6267_v18 = vld [vmem:[#allocation11 + $0x290] sm:$0xff] }
 0xa83   :  { %16310 = vmatpush3.bf16.msra.mxu0 %v19007_v15  ;;  %13888 = vmatprep.mubr.f32.mxu0 %v6373_v13  ;;  %v5691_v13 = vld [vmem:[#allocation11 + $0x170] sm:$0xff] }
 0xa84   :  { %16312 = vmatprep.subr.bf16.mxu0 %v19015_v20 }
 0xa86   :  { %13889 = vmatmul.mubr.f32.gmra.mrb[6].mxu0 %v6374_v51  ;;  %v5692_v51 = vld [vmem:[#allocation11 + $0x178] sm:$0xff] }
 0xa87   :  { %16314 = vmatpush3.bf16.msra.mxu0 %v19015_v20  ;;  %13961 = vmatprep.mubr.f32.mxu0 %v6567_v1  ;;  %v16047_v1 = vpack.c.bf16 %v5692_v51, %v5691_v13 }
 0xa88   :  { %16316 = vmatprep.subr.bf16.mxu0 %v19023_v42 }
 0xa8b   :  { %16318 = vmatpush3.bf16.msra.mxu0 %v19023_v42 }
 0xa8c   :  { %16320 = vmatprep.subr.bf16.mxu0 %v19031_v22 }
 0xa8f   :  { %16322 = vmatpush3.bf16.msra.mxu0 %v19031_v22 }
 0xa90   :  { %16324 = vmatprep.subr.bf16.mxu0 %v19039_v17 }
 0xa93   :  { %16326 = vmatpush3.bf16.msra.mxu0 %v19039_v17 }
 0xa94   :  { %16328 = vmatprep.subr.bf16.mxu0 %v19047_v14 }
 0xa97   :  { %16330 = vmatpush3.bf16.msra.mxu0 %v19047_v14 }
 0xa98   :  { %16332 = vmatprep.subr.bf16.mxu0 %v19055_v27 }
 0xa9b   :  { %16334 = vmatpush3.bf16.msra.mxu0 %v19055_v27 }
 0xa9c   :  { %16336 = vmatprep.subr.bf16.mxu0 %v19063_v4 }
 0xa9f   :  { %16338 = vmatpush3.bf16.msra.mxu0 %v19063_v4 }
 0xaa0   :  { %16372 = vmatprep.subr.bf16.mxu0 %v19007_v15 }
 0xaa2   :  { %13962 = vmatmul.mubr.f32.vlgmr.msra.gmra.mrb[8].mxu0 %v6568_v7  ;;  %v5873_v7 = vld [vmem:[#allocation11 + $0x180] sm:$0xff] }
 0xaa3   :  { %16374 = vmatpush3.bf16.msra.mxu0 %v19007_v15  ;;  %13964 = vmatprep.mubr.f32.mxu0 %v6569_v60  ;;  %v5295_v15 = vld [vmem:[#allocation11 + $0x10] sm:$0xff]  ;;  %v5874_v60 = vld [vmem:[#allocation11 + $0x188] sm:$0xff] }
 0xaa4   :  { %16376 = vmatprep.subr.bf16.mxu0 %v19015_v20  ;;  %v15959_v10 = vpack.c.bf16 %v5296_v5, %v5295_v15  ;;  %v5876_v15 = vld [vmem:[#allocation11 + $0x198] sm:$0xff] }
 0xaa6   :  { %13965 = vmatmul.mubr.f32.gmra.mrb[10].mxu0 %v6570_v48  ;;  %v16083_v48 = vpack.c.bf16 %v5874_v60, %v5873_v7  ;;  %v6269_v7 = vld [vmem:[#allocation11 + $0x2a0] sm:$0xff]  ;;  %v6270_v60 = vld [vmem:[#allocation11 + $0x2a8] sm:$0xff] }
 0xaa7   :  { %16378 = vmatpush3.bf16.msra.mxu0 %v19015_v20  ;;  %14037 = vmatprep.mubr.f32.mxu0 %v6763_v43  ;;  %v5875_v43 = vld [vmem:[#allocation11 + $0x190] sm:$0xff] }
 0xaa8   :  { %16380 = vmatprep.subr.bf16.mxu0 %v19023_v42 }
 0xaab   :  { %16382 = vmatpush3.bf16.msra.mxu0 %v19023_v42  ;;  %v5297_v42 = vld [vmem:[#allocation11 + $0x20] sm:$0xff] }
 0xaac   :  { %16384 = vmatprep.subr.bf16.mxu0 %v19031_v22  ;;  %v15963_v30 = vpack.c.bf16 %v5298_v25, %v5297_v42 }
 0xaaf   :  { %16386 = vmatpush3.bf16.msra.mxu0 %v19031_v22 }
 0xab0   :  { %16388 = vmatprep.subr.bf16.mxu0 %v19039_v17 }
 0xab3   :  { %16390 = vmatpush3.bf16.msra.mxu0 %v19039_v17 }
 0xab4   :  { %16392 = vmatprep.subr.bf16.mxu0 %v19047_v14 }
 0xab5   :  { %v13469_v38 = vpop.f32.mrb[240].mxu0  ;;  %v19179_v58 = vpop.f32.mrb[96].mxu1 }
 0xab6   :  { %v5380_v20 = vpop.f32.mrb[241].mxu0  ;;  %v5274_v45 = vpop.f32.mrb[97].mxu1 }
 0xab7   :  { %13505 = vmatprep.mubr.f32.mxu1 %v5380_v20  ;;  %16394 = vmatpush3.bf16.msra.mxu0 %v19047_v14  ;;  %v15967_v14 = vpack.c.bf16 %v5300_v35, %v5299_v3  ;;  %v5877_v20 = vld [vmem:[#allocation11 + $0x1a0] sm:$0xff]  ;;  %v5883_v35 = vld [vmem:[#allocation11 + $0x1d0] sm:$0xff] }
 0xab8   :  { %13506 = vmatmul.mubr.f32.vlgmr.msra.gmra.mrb[100].mxu1 %v13469_v38  ;;  %16396 = vmatprep.subr.bf16.mxu0 %v19055_v27  ;;  %v16087_v38 = vpack.c.bf16 %v5876_v15, %v5875_v43  ;;  %v16219_v43 = vpack.c.bf16 %v6270_v60, %v6269_v7  ;;  %v6665_v7 = vld [vmem:[#allocation11 + $0x3c0] sm:$0xff]  ;;  %v6666_v60 = vld [vmem:[#allocation11 + $0x3c8] sm:$0xff] }
 0xab9   :  { %15958 = vmatpush3.bf16.msra.mxu1 %v19112_v41  ;;  %v13472_v22 = vpop.f32.mrb[242].mxu0  ;;  %v19184_v17 = vpop.f32.mrb[98].mxu1  ;;  %v16031_v41 = vpack.c.bf16 %v5684_v46, %v5683_v29  ;;  %v6081_v46 = vld [vmem:[#allocation11 + $0x260] sm:$0xff] }
 0xaba   :  { %15960 = vmatprep.subr.bf16.mxu1 %v15959_v10  ;;  %v5390_v49 = vpop.f32.mrb[243].mxu0  ;;  %v5284_v63 = vpop.f32.mrb[99].mxu1 }
 0xabb   :  { %16398 = vmatpush3.bf16.msra.mxu0 %v19055_v27  ;;  %13508 = vmatprep.mubr.f32.mxu1 %v5390_v49  ;;  %v5303_v27 = vld [vmem:[#allocation11 + $0x50] sm:$0xff]  ;;  %v5881_v49 = vld [vmem:[#allocation11 + $0x1c0] sm:$0xff] }
 0xabc   :  { %16400 = vmatprep.subr.bf16.mxu0 %v19063_v4  ;;  %13509 = vmatmul.mubr.f32.gmra.mrb[102].mxu1 %v13472_v22  ;;  %v15975_v62 = vpack.c.bf16 %v5304_v36, %v5303_v27  ;;  %v5879_v22 = vld [vmem:[#allocation11 + $0x1b0] sm:$0xff]  ;;  %v5888_v27 = vld [vmem:[#allocation11 + $0x1f8] sm:$0xff] }
 0xabd   :  { %15962 = vmatpush3.bf16.msra.mxu1 %v15959_v10  ;;  %13543 = vmatprep.mubr.f32.mxu1 %v5274_v45  ;;  %v5878_v10 = vld [vmem:[#allocation11 + $0x1a8] sm:$0xff] }
 0xabe   :  { %15964 = vmatprep.subr.bf16.mxu1 %v15963_v30  ;;  %v16091_v42 = vpack.c.bf16 %v5878_v10, %v5877_v20  ;;  %v6273_v20 = vld [vmem:[#allocation11 + $0x2c0] sm:$0xff]  ;;  %v6274_v10 = vld [vmem:[#allocation11 + $0x2c8] sm:$0xff] }
 0xabf   :  { %16402 = vmatpush3.bf16.msra.mxu0 %v19063_v4  ;;  %v15979_v4 = vpack.c.bf16 %v5306_v23, %v5305_v19  ;;  %v6071_v23 = vld [vmem:[#allocation11 + $0x210] sm:$0xff] }
 0xac1   :  { %15966 = vmatpush3.bf16.msra.mxu1 %v15963_v30 }
 0xac2   :  { %15968 = vmatprep.subr.bf16.mxu1 %v15967_v14  ;;  %14038 = vmatmul.mubr.f32.vlgmr.msra.gmra.mrb[12].mxu0 %v6764_v33  ;;  %v5886_v33 = vld [vmem:[#allocation11 + $0x1e8] sm:$0xff] }
 0xac3   :  { %14040 = vmatprep.mubr.f32.mxu0 %v6765_v0  ;;  %v16107_v0 = vpack.c.bf16 %v5886_v33, %v5885_v47  ;;  %v6463_v33 = vld [vmem:[#allocation11 + $0x310] sm:$0xff] }
 0xac5   :  { %15970 = vmatpush3.bf16.msra.mxu1 %v15967_v14  ;;  %v5884_v14 = vld [vmem:[#allocation11 + $0x1d8] sm:$0xff] }
 0xac6   :  { %15972 = vmatprep.subr.bf16.mxu1 %v15971_v9  ;;  %14041 = vmatmul.mubr.f32.gmra.mrb[14].mxu0 %v6766_v11  ;;  %v16103_v28 = vpack.c.bf16 %v5884_v14, %v5883_v35  ;;  %v6069_v11 = vld [vmem:[#allocation11 + $0x200] sm:$0xff] }
 0xac7   :  { %v6461_v14 = vld [vmem:[#allocation11 + $0x300] sm:$0xff] }
 0xac9   :  { %15974 = vmatpush3.bf16.msra.mxu1 %v15971_v9  ;;  %v5887_v9 = vld [vmem:[#allocation11 + $0x1f0] sm:$0xff] }
 0xaca   :  { %15976 = vmatprep.subr.bf16.mxu1 %v15975_v62  ;;  %v16111_v36 = vpack.c.bf16 %v5888_v27, %v5887_v9 }
 0xacd   :  { %15978 = vmatpush3.bf16.msra.mxu1 %v15975_v62  ;;  %v6070_v62 = vld [vmem:[#allocation11 + $0x208] sm:$0xff] }
 0xace   :  { %15980 = vmatprep.subr.bf16.mxu1 %v15979_v4  ;;  %v16147_v19 = vpack.c.bf16 %v6070_v62, %v6069_v11  ;;  %v6465_v11 = vld [vmem:[#allocation11 + $0x320] sm:$0xff]  ;;  %v6466_v62 = vld [vmem:[#allocation11 + $0x328] sm:$0xff] }
 0xad1   :  { %15982 = vmatpush3.bf16.msra.mxu1 %v15979_v4  ;;  %v6072_v4 = vld [vmem:[#allocation11 + $0x218] sm:$0xff] }
 0xad2   :  { %15984 = vmatprep.subr.bf16.mxu1 %v15983_v16  ;;  %v16151_v8 = vpack.c.bf16 %v6072_v4, %v6071_v23  ;;  %v16283_v23 = vpack.c.bf16 %v6466_v62, %v6465_v11  ;;  %v6861_v11 = vld [vmem:[#allocation11 + $0x440] sm:$0xff]  ;;  %v6862_v62 = vld [vmem:[#allocation11 + $0x448] sm:$0xff] }
 0xad5   :  { %15986 = vmatpush3.bf16.msra.mxu1 %v15983_v16  ;;  %v13583_v54 = vpop.f32.mrb[244].mxu0 }
 0xad6   :  { %16020 = vmatprep.subr.bf16.mxu1 %v16019_v50  ;;  %v5657_v12 = vpop.f32.mrb[245].mxu0 }
 0xad8   :  { %13544 = vmatmul.mubr.f32.vlgmr.msra.gmra.mrb[100].mxu1 %v19179_v58 }
 0xad9   :  { %16022 = vmatpush3.bf16.msra.mxu1 %v16019_v50  ;;  %13546 = vmatprep.mubr.f32.mxu1 %v5284_v63  ;;  %v13586_v40 = vpop.f32.mrb[246].mxu0  ;;  %v5882_v63 = vld [vmem:[#allocation11 + $0x1c8] sm:$0xff] }
 0xada   :  { %16024 = vmatprep.subr.bf16.mxu1 %v16023_v39  ;;  %v5667_v32 = vpop.f32.mrb[247].mxu0  ;;  %v16099_v3 = vpack.c.bf16 %v5882_v63, %v5881_v49  ;;  %v6279_v63 = vld [vmem:[#allocation11 + $0x2f0] sm:$0xff] }
 0xadc   :  { %13547 = vmatmul.mubr.f32.gmra.mrb[102].mxu1 %v19184_v17  ;;  %v5880_v17 = vld [vmem:[#allocation11 + $0x1b8] sm:$0xff] }
 0xadd   :  { %16026 = vmatpush3.bf16.msra.mxu1 %v16023_v39  ;;  %13619 = vmatprep.mubr.f32.mxu1 %v5657_v12  ;;  %v16095_v30 = vpack.c.bf16 %v5880_v17, %v5879_v22  ;;  %v6076_v39 = vld [vmem:[#allocation11 + $0x238] sm:$0xff]  ;;  %v6277_v17 = vld [vmem:[#allocation11 + $0x2e0] sm:$0xff] }
 0xade   :  { %16028 = vmatprep.subr.bf16.mxu1 %v16027_v56 }
 0xae1   :  { %16030 = vmatpush3.bf16.msra.mxu1 %v16027_v56  ;;  %v6079_v56 = vld [vmem:[#allocation11 + $0x250] sm:$0xff] }
 0xae2   :  { %16032 = vmatprep.subr.bf16.mxu1 %v16031_v41 }
 0xae5   :  { %16034 = vmatpush3.bf16.msra.mxu1 %v16031_v41  ;;  %v6082_v41 = vld [vmem:[#allocation11 + $0x268] sm:$0xff] }
 0xae6   :  { %16036 = vmatprep.subr.bf16.mxu1 %v16035_v55  ;;  %v16171_v44 = vpack.c.bf16 %v6082_v41, %v6081_v46  ;;  %v6659_v41 = vld [vmem:[#allocation11 + $0x390] sm:$0xff] }
 0xae9   :  { %16038 = vmatpush3.bf16.msra.mxu1 %v16035_v55  ;;  %v6084_v55 = vld [vmem:[#allocation11 + $0x278] sm:$0xff] }
 0xaea   :  { %16040 = vmatprep.subr.bf16.mxu1 %v16039_v57  ;;  %v16175_v31 = vpack.c.bf16 %v6084_v55, %v6083_v53 }
 0xaed   :  { %16042 = vmatpush3.bf16.msra.mxu1 %v16039_v57  ;;  %v6266_v57 = vld [vmem:[#allocation11 + $0x288] sm:$0xff] }
 0xaee   :  { %16044 = vmatprep.subr.bf16.mxu1 %v16043_v37  ;;  %v16211_v2 = vpack.c.bf16 %v6266_v57, %v6265_v6  ;;  %v6661_v6 = vld [vmem:[#allocation11 + $0x3a0] sm:$0xff]  ;;  %v6662_v57 = vld [vmem:[#allocation11 + $0x3a8] sm:$0xff] }
 0xaf1   :  { %16046 = vmatpush3.bf16.msra.mxu1 %v16043_v37  ;;  %v6268_v37 = vld [vmem:[#allocation11 + $0x298] sm:$0xff] }
 0xaf2   :  { %16048 = vmatprep.subr.bf16.mxu1 %v16047_v1  ;;  %v16215_v51 = vpack.c.bf16 %v6268_v37, %v6267_v18  ;;  %v16347_v18 = vpack.c.bf16 %v6662_v57, %v6661_v6  ;;  %v7058_v57 = vld [vmem:[#allocation16 + $0x50] sm:$0xff] }
 0xaf5   :  { %16050 = vmatpush3.bf16.msra.mxu1 %v16047_v1  ;;  %v13659_v5 = vpop.f32.mrb[248].mxu0 }
 0xaf6   :  { %16084 = vmatprep.subr.bf16.mxu1 %v16083_v48  ;;  %v5853_v58 = vpop.f32.mrb[249].mxu0 }
 0xaf8   :  { %13620 = vmatmul.mubr.f32.vlgmr.msra.gmra.mrb[100].mxu1 %v13583_v54  ;;  %v6075_v54 = vld [vmem:[#allocation11 + $0x230] sm:$0xff] }
 0xaf9   :  { %16086 = vmatpush3.bf16.msra.mxu1 %v16083_v48  ;;  %13622 = vmatprep.mubr.f32.mxu1 %v5667_v32  ;;  %v13662_v45 = vpop.f32.mrb[250].mxu0  ;;  %v16159_v12 = vpack.c.bf16 %v6076_v39, %v6075_v54  ;;  %v6080_v32 = vld [vmem:[#allocation11 + $0x258] sm:$0xff]  ;;  %v6473_v39 = vld [vmem:[#allocation11 + $0x360] sm:$0xff] }
 0xafa   :  { %16088 = vmatprep.subr.bf16.mxu1 %v16087_v38  ;;  %v5863_v25 = vpop.f32.mrb[251].mxu0  ;;  %v16167_v29 = vpack.c.bf16 %v6080_v32, %v6079_v56  ;;  %v6657_v32 = vld [vmem:[#allocation11 + $0x380] sm:$0xff] }
 0xafc   :  { %13623 = vmatmul.mubr.f32.gmra.mrb[102].mxu1 %v13586_v40  ;;  %v16163_v40 = vpack.c.bf16 %v6078_v61, %v6077_v24  ;;  %v6475_v61 = vld [vmem:[#allocation11 + $0x370] sm:$0xff] }
 0xafd   :  { %16090 = vmatpush3.bf16.msra.mxu1 %v16087_v38  ;;  %13695 = vmatprep.mubr.f32.mxu1 %v5853_v58  ;;  %v6272_v38 = vld [vmem:[#allocation11 + $0x2b8] sm:$0xff] }
 0xafe   :  { %16092 = vmatprep.subr.bf16.mxu1 %v16091_v42 }
 0xb01   :  { %16094 = vmatpush3.bf16.msra.mxu1 %v16091_v42  ;;  %v6275_v42 = vld [vmem:[#allocation11 + $0x2d0] sm:$0xff] }
 0xb02   :  { %16096 = vmatprep.subr.bf16.mxu1 %v16095_v30 }
 0xb05   :  { %16098 = vmatpush3.bf16.msra.mxu1 %v16095_v30  ;;  %v6278_v30 = vld [vmem:[#allocation11 + $0x2e8] sm:$0xff] }
 0xb06   :  { %16100 = vmatprep.subr.bf16.mxu1 %v16099_v3  ;;  %v16235_v49 = vpack.c.bf16 %v6278_v30, %v6277_v17  ;;  %v6855_v30 = vld [vmem:[#allocation11 + $0x410] sm:$0xff] }
 0xb09   :  { %16102 = vmatpush3.bf16.msra.mxu1 %v16099_v3  ;;  %v6280_v3 = vld [vmem:[#allocation11 + $0x2f8] sm:$0xff] }
 0xb0a   :  { %16104 = vmatprep.subr.bf16.mxu1 %v16103_v28  ;;  %v16239_v35 = vpack.c.bf16 %v6280_v3, %v6279_v63 }
 0xb0d   :  { %16106 = vmatpush3.bf16.msra.mxu1 %v16103_v28  ;;  %v6462_v28 = vld [vmem:[#allocation11 + $0x308] sm:$0xff] }
 0xb0e   :  { %16108 = vmatprep.subr.bf16.mxu1 %v16107_v0  ;;  %v16275_v47 = vpack.c.bf16 %v6462_v28, %v6461_v14  ;;  %v6857_v14 = vld [vmem:[#allocation11 + $0x420] sm:$0xff]  ;;  %v6858_v28 = vld [vmem:[#allocation11 + $0x428] sm:$0xff] }
 0xb11   :  { %16110 = vmatpush3.bf16.msra.mxu1 %v16107_v0  ;;  %v6464_v0 = vld [vmem:[#allocation11 + $0x318] sm:$0xff] }
 0xb12   :  { %16112 = vmatprep.subr.bf16.mxu1 %v16111_v36  ;;  %v16279_v27 = vpack.c.bf16 %v6464_v0, %v6463_v33  ;;  %v16411_v33 = vpack.c.bf16 %v6858_v28, %v6857_v14  ;;  %v7065_v14 = vld [vmem:[#allocation14 + $0x8] sm:$0xff] }
 0xb15   :  { %16114 = vmatpush3.bf16.msra.mxu1 %v16111_v36  ;;  %v13735_v59 = vpop.f32.mrb[252].mxu0 }
 0xb16   :  { %16148 = vmatprep.subr.bf16.mxu1 %v16147_v19  ;;  %v6049_v16 = vpop.f32.mrb[253].mxu0 }
 0xb18   :  { %13696 = vmatmul.mubr.f32.vlgmr.msra.gmra.mrb[100].mxu1 %v13659_v5  ;;  %v6271_v5 = vld [vmem:[#allocation11 + $0x2b0] sm:$0xff] }
 0xb19   :  { %16150 = vmatpush3.bf16.msra.mxu1 %v16147_v19  ;;  %13698 = vmatprep.mubr.f32.mxu1 %v5863_v25  ;;  %v13738_v50 = vpop.f32.mrb[254].mxu0  ;;  %v16223_v58 = vpack.c.bf16 %v6272_v38, %v6271_v5  ;;  %v6276_v25 = vld [vmem:[#allocation11 + $0x2d8] sm:$0xff]  ;;  %v6669_v38 = vld [vmem:[#allocation11 + $0x3e0] sm:$0xff] }
 0xb1a   :  { %16152 = vmatprep.subr.bf16.mxu1 %v16151_v8  ;;  %v6059_v52 = vpop.f32.mrb[255].mxu0  ;;  %v16231_v22 = vpack.c.bf16 %v6276_v25, %v6275_v42  ;;  %v6853_v25 = vld [vmem:[#allocation11 + $0x400] sm:$0xff] }
 0xb1c   :  { %13699 = vmatmul.mubr.f32.gmra.mrb[102].mxu1 %v13662_v45  ;;  %v16227_v45 = vpack.c.bf16 %v6274_v10, %v6273_v20  ;;  %v6671_v10 = vld [vmem:[#allocation11 + $0x3f0] sm:$0xff] }
 0xb1d   :  { %16154 = vmatpush3.bf16.msra.mxu1 %v16151_v8  ;;  %13771 = vmatprep.mubr.f32.mxu1 %v6049_v16  ;;  %v6468_v8 = vld [vmem:[#allocation11 + $0x338] sm:$0xff] }
 0xb1e   :  { %16156 = vmatprep.subr.bf16.mxu1 %v16155_v21 }
 0xb21   :  { %16158 = vmatpush3.bf16.msra.mxu1 %v16155_v21  ;;  %v6471_v21 = vld [vmem:[#allocation11 + $0x350] sm:$0xff] }
 0xb22   :  { %16160 = vmatprep.subr.bf16.mxu1 %v16159_v12 }
 0xb25   :  { %16162 = vmatpush3.bf16.msra.mxu1 %v16159_v12  ;;  %v6474_v12 = vld [vmem:[#allocation11 + $0x368] sm:$0xff] }
 0xb26   :  { %16164 = vmatprep.subr.bf16.mxu1 %v16163_v40  ;;  %v16299_v24 = vpack.c.bf16 %v6474_v12, %v6473_v39  ;;  %v7048_v39 = vld [vmem:[#allocation16] sm:$0xff]  ;;  %v7049_v12 = vld [vmem:[#allocation16 + $0x8] sm:$0xff] }
 0xb29   :  { %16166 = vmatpush3.bf16.msra.mxu1 %v16163_v40  ;;  %v6476_v40 = vld [vmem:[#allocation11 + $0x378] sm:$0xff] }
 0xb2a   :  { %16168 = vmatprep.subr.bf16.mxu1 %v16167_v29  ;;  %v16303_v56 = vpack.c.bf16 %v6476_v40, %v6475_v61  ;;  %v16472_v61 = vpack.c.bf16 %v7049_v12, %v7048_v39  ;;  %v7051_v40 = vld [vmem:[#allocation16 + $0x18] sm:$0xff]  ;;  %v7154_v39 = vld [vmem:[#allocation16 + $0xf0] sm:$0xff] }
 0xb2b   :  { %v7155_v12 = vld [vmem:[#allocation16 + $0xf8] sm:$0xff] }
 0xb2d   :  { %16170 = vmatpush3.bf16.msra.mxu1 %v16167_v29  ;;  %v6658_v29 = vld [vmem:[#allocation11 + $0x388] sm:$0xff] }
 0xb2e   :  { %16172 = vmatprep.subr.bf16.mxu1 %v16171_v44  ;;  %v16339_v46 = vpack.c.bf16 %v6658_v29, %v6657_v32  ;;  %v7052_v32 = vld [vmem:[#allocation16 + $0x20] sm:$0xff]  ;;  %v7053_v29 = vld [vmem:[#allocation16 + $0x28] sm:$0xff] }
 0xb31   :  { %16174 = vmatpush3.bf16.msra.mxu1 %v16171_v44  ;;  %v6660_v44 = vld [vmem:[#allocation11 + $0x398] sm:$0xff] }
 0xb32   :  { %16176 = vmatprep.subr.bf16.mxu1 %v16175_v31  ;;  %v16343_v55 = vpack.c.bf16 %v6660_v44, %v6659_v41  ;;  %v7054_v41 = vld [vmem:[#allocation16 + $0x30] sm:$0xff]  ;;  %v7055_v44 = vld [vmem:[#allocation16 + $0x38] sm:$0xff] }
 0xb35   :  { %16178 = vmatpush3.bf16.msra.mxu1 %v16175_v31  ;;  %v13811_v13 = vpop.f32.mrb[0].mxu0 }
 0xb36   :  { %16212 = vmatprep.subr.bf16.mxu1 %v16211_v2  ;;  %v6245_v1 = vpop.f32.mrb[1].mxu0 }
 0xb38   :  { %13772 = vmatmul.mubr.f32.vlgmr.msra.gmra.mrb[100].mxu1 %v13735_v59  ;;  %v6467_v59 = vld [vmem:[#allocation11 + $0x330] sm:$0xff] }
 0xb39   :  { %16214 = vmatpush3.bf16.msra.mxu1 %v16211_v2  ;;  %13774 = vmatprep.mubr.f32.mxu1 %v6059_v52  ;;  %v13814_v48 = vpop.f32.mrb[2].mxu0  ;;  %v16287_v16 = vpack.c.bf16 %v6468_v8, %v6467_v59  ;;  %v6472_v52 = vld [vmem:[#allocation11 + $0x358] sm:$0xff]  ;;  %v6865_v8 = vld [vmem:[#allocation11 + $0x460] sm:$0xff] }
 0xb3a   :  { %16216 = vmatprep.subr.bf16.mxu1 %v16215_v51  ;;  %v6255_v15 = vpop.f32.mrb[3].mxu0  ;;  %v16295_v54 = vpack.c.bf16 %v6472_v52, %v6471_v21  ;;  %v17743_v52 = vmov 0.0|0.0  }
 0xb3b   :  { %16435 = vmatprep.subr.bf16.mxu0 %v17743_v52 }
 0xb3c   :  { %13775 = vmatmul.mubr.f32.gmra.mrb[102].mxu1 %v13738_v50  ;;  %v16291_v50 = vpack.c.bf16 %v6470_v34, %v6469_v26  ;;  %v6867_v34 = vld [vmem:[#allocation11 + $0x470] sm:$0xff] }
 0xb3d   :  { %16218 = vmatpush3.bf16.msra.mxu1 %v16215_v51  ;;  %13847 = vmatprep.mubr.f32.mxu1 %v6245_v1  ;;  %v6664_v51 = vld [vmem:[#allocation11 + $0x3b8] sm:$0xff] }
 0xb3e   :  { %16220 = vmatprep.subr.bf16.mxu1 %v16219_v43 }
 0xb41   :  { %16222 = vmatpush3.bf16.msra.mxu1 %v16219_v43  ;;  %v6667_v43 = vld [vmem:[#allocation11 + $0x3d0] sm:$0xff] }
 0xb42   :  { %16224 = vmatprep.subr.bf16.mxu1 %v16223_v58 }
 0xb45   :  { %16226 = vmatpush3.bf16.msra.mxu1 %v16223_v58  ;;  %v6670_v58 = vld [vmem:[#allocation11 + $0x3e8] sm:$0xff] }
 0xb46   :  { %16228 = vmatprep.subr.bf16.mxu1 %v16227_v45  ;;  %v16363_v20 = vpack.c.bf16 %v6670_v58, %v6669_v38 }
 0xb49   :  { %16230 = vmatpush3.bf16.msra.mxu1 %v16227_v45  ;;  %v6672_v45 = vld [vmem:[#allocation11 + $0x3f8] sm:$0xff] }
 0xb4a   :  { %16232 = vmatprep.subr.bf16.mxu1 %v16231_v22  ;;  %v16367_v42 = vpack.c.bf16 %v6672_v45, %v6671_v10 }
 0xb4d   :  { %16234 = vmatpush3.bf16.msra.mxu1 %v16231_v22  ;;  %v6854_v22 = vld [vmem:[#allocation11 + $0x408] sm:$0xff] }
 0xb4e   :  { %16236 = vmatprep.subr.bf16.mxu1 %v16235_v49  ;;  %v16403_v17 = vpack.c.bf16 %v6854_v22, %v6853_v25 }
 0xb51   :  { %16238 = vmatpush3.bf16.msra.mxu1 %v16235_v49  ;;  %v6856_v49 = vld [vmem:[#allocation11 + $0x418] sm:$0xff] }
 0xb52   :  { %16240 = vmatprep.subr.bf16.mxu1 %v16239_v35  ;;  %v16407_v3 = vpack.c.bf16 %v6856_v49, %v6855_v30 }
 0xb55   :  { %16242 = vmatpush3.bf16.msra.mxu1 %v16239_v35  ;;  %v13887_v9 = vpop.f32.mrb[4].mxu0 }
 0xb56   :  { %16276 = vmatprep.subr.bf16.mxu1 %v16275_v47  ;;  %v6441_v36 = vpop.f32.mrb[5].mxu0 }
 0xb58   :  { %13848 = vmatmul.mubr.f32.vlgmr.msra.gmra.mrb[100].mxu1 %v13811_v13  ;;  %v6663_v13 = vld [vmem:[#allocation11 + $0x3b0] sm:$0xff] }
 0xb59   :  { %16278 = vmatpush3.bf16.msra.mxu1 %v16275_v47  ;;  %13850 = vmatprep.mubr.f32.mxu1 %v6255_v15  ;;  %v13890_v19 = vpop.f32.mrb[6].mxu0  ;;  %v16351_v1 = vpack.c.bf16 %v6664_v51, %v6663_v13  ;;  %v6668_v15 = vld [vmem:[#allocation11 + $0x3d8] sm:$0xff] }
 0xb5a   :  { %16280 = vmatprep.subr.bf16.mxu1 %v16279_v27  ;;  %v6451_v4 = vpop.f32.mrb[7].mxu0  ;;  %v16359_v5 = vpack.c.bf16 %v6668_v15, %v6667_v43  ;;  %v7061_v13 = vld [vmem:[#allocation16 + $0x68] sm:$0xff] }
 0xb5c   :  { %13851 = vmatmul.mubr.f32.gmra.mrb[102].mxu1 %v13814_v48  ;;  %v16355_v48 = vpack.c.bf16 %v6666_v60, %v6665_v7  ;;  %v7063_v7 = vld [vmem:[#allocation16 + $0x78] sm:$0xff] }
 0xb5d   :  { %16282 = vmatpush3.bf16.msra.mxu1 %v16279_v27  ;;  %13923 = vmatprep.mubr.f32.mxu1 %v6441_v36  ;;  %v6860_v27 = vld [vmem:[#allocation11 + $0x438] sm:$0xff] }
 0xb5e   :  { %16284 = vmatprep.subr.bf16.mxu1 %v16283_v23 }
 0xb61   :  { %16286 = vmatpush3.bf16.msra.mxu1 %v16283_v23  ;;  %v6863_v23 = vld [vmem:[#allocation11 + $0x450] sm:$0xff] }
 0xb62   :  { %16288 = vmatprep.subr.bf16.mxu1 %v16287_v16 }
 0xb65   :  { %16290 = vmatpush3.bf16.msra.mxu1 %v16287_v16  ;;  %v6866_v16 = vld [vmem:[#allocation11 + $0x468] sm:$0xff] }
 0xb66   :  { %16292 = vmatprep.subr.bf16.mxu1 %v16291_v50  ;;  %v16427_v26 = vpack.c.bf16 %v6866_v16, %v6865_v8  ;;  %v7150_v8 = vld [vmem:[#allocation16 + $0xd0] sm:$0xff]  ;;  %v7151_v16 = vld [vmem:[#allocation16 + $0xd8] sm:$0xff] }
 0xb69   :  { %16294 = vmatpush3.bf16.msra.mxu1 %v16291_v50  ;;  %v6868_v50 = vld [vmem:[#allocation11 + $0x478] sm:$0xff] }
 0xb6a   :  { %16296 = vmatprep.subr.bf16.mxu1 %v16295_v54  ;;  %v16431_v21 = vpack.c.bf16 %v6868_v50, %v6867_v34  ;;  %v7152_v34 = vld [vmem:[#allocation16 + $0xe0] sm:$0xff]  ;;  %v7153_v50 = vld [vmem:[#allocation16 + $0xe8] sm:$0xff] }
 0xb6d   :  { %16298 = vmatpush3.bf16.msra.mxu1 %v16295_v54  ;;  %v17745_v54 = vmov 0.0  }
 0xb6e   :  { %16300 = vmatprep.subr.bf16.mxu1 %v16299_v24  ;;  %14089 = vmatprep.mubr.msk.f32.mxu0 %vm17744_vm0, %v17745_v54 }
 0xb71   :  { %16302 = vmatpush3.bf16.msra.mxu1 %v16299_v24  ;;  %v7050_v24 = vld [vmem:[#allocation16 + $0x10] sm:$0xff] }
 0xb72   :  { %16304 = vmatprep.subr.bf16.mxu1 %v16303_v56 }
 0xb75   :  { %16306 = vmatpush3.bf16.msra.mxu1 %v16303_v56  ;;  %v13963_v53 = vpop.f32.mrb[8].mxu0  ;;  %v16475_v56 = vpack.c.bf16 %v7051_v40, %v7050_v24  ;;  %v16469_v24 = vpack.c.bf16 %v7155_v12, %v7154_v39  ;;  %v7623_v39 = vld [vmem:[#allocation14 + $0x20] sm:$0xff] }
 0xb76   :  { %16340 = vmatprep.subr.bf16.mxu1 %v16339_v46  ;;  %v6637_v31 = vpop.f32.mrb[9].mxu0 }
 0xb78   :  { %13924 = vmatmul.mubr.f32.vlgmr.msra.gmra.mrb[100].mxu1 %v13887_v9  ;;  %v6859_v9 = vld [vmem:[#allocation11 + $0x430] sm:$0xff] }
 0xb79   :  { %16342 = vmatpush3.bf16.msra.mxu1 %v16339_v46  ;;  %13926 = vmatprep.mubr.f32.mxu1 %v6451_v4  ;;  %v13966_v2 = vpop.f32.mrb[10].mxu0  ;;  %v16415_v36 = vpack.c.bf16 %v6860_v27, %v6859_v9  ;;  %v6864_v4 = vld [vmem:[#allocation11 + $0x458] sm:$0xff]  ;;  %v16478_v46 = vpack.c.bf16 %v7053_v29, %v7052_v32  ;;  %v7144_v9 = vld [vmem:[#allocation16 + $0xa0] sm:$0xff] }
 0xb7a   :  { %16344 = vmatprep.subr.bf16.mxu1 %v16343_v55  ;;  %v6647_v37 = vpop.f32.mrb[11].mxu0  ;;  %v16423_v59 = vpack.c.bf16 %v6864_v4, %v6863_v23  ;;  %v7145_v27 = vld [vmem:[#allocation16 + $0xa8] sm:$0xff]  ;;  %v7148_v23 = vld [vmem:[#allocation16 + $0xc0] sm:$0xff] }
 0xb7b   :  { %v7149_v4 = vld [vmem:[#allocation16 + $0xc8] sm:$0xff]  ;;  %v7372_v29 = vld [vmem:[#allocation16 + $0x100] sm:$0xff] }
 0xb7c   :  { %13927 = vmatmul.mubr.f32.gmra.mrb[102].mxu1 %v13890_v19  ;;  %v16419_v19 = vpack.c.bf16 %v6862_v62, %v6861_v11  ;;  %v7146_v11 = vld [vmem:[#allocation16 + $0xb0] sm:$0xff]  ;;  %v7147_v62 = vld [vmem:[#allocation16 + $0xb8] sm:$0xff] }
 0xb7d   :  { %16346 = vmatpush3.bf16.msra.mxu1 %v16343_v55  ;;  %13999 = vmatprep.mubr.f32.mxu1 %v6637_v31  ;;  %v7056_v55 = vld [vmem:[#allocation16 + $0x40] sm:$0xff]  ;;  %v7057_v31 = vld [vmem:[#allocation16 + $0x48] sm:$0xff] }
 0xb7e   :  { %16348 = vmatprep.subr.bf16.mxu1 %v16347_v18  ;;  %v16484_v6 = vpack.c.bf16 %v7057_v31, %v7056_v55  ;;  %v7375_v55 = vld [vmem:[#allocation16 + $0x118] sm:$0xff] }
 0xb81   :  { %16350 = vmatpush3.bf16.msra.mxu1 %v16347_v18 }
 0xb82   :  { %16352 = vmatprep.subr.bf16.mxu1 %v16351_v1 }
 0xb85   :  { %16354 = vmatpush3.bf16.msra.mxu1 %v16351_v1  ;;  %v7062_v1 = vld [vmem:[#allocation16 + $0x70] sm:$0xff] }
 0xb86   :  { %16356 = vmatprep.subr.bf16.mxu1 %v16355_v48  ;;  %v16493_v60 = vpack.c.bf16 %v7063_v7, %v7062_v1  ;;  %v7381_v1 = vld [vmem:[#allocation16 + $0x148] sm:$0xff] }
 0xb89   :  { %16358 = vmatpush3.bf16.msra.mxu1 %v16355_v48  ;;  %v10335_v48 = vld [vmem:[#allocation13] ss:$0 sm:$0xff] }
 0xb8a   :  { %16360 = vmatprep.subr.bf16.mxu1 %v16359_v5 }
 0xb8d   :  { %16362 = vmatpush3.bf16.msra.mxu1 %v16359_v5 }
 0xb8e   :  { %16364 = vmatprep.subr.bf16.mxu1 %v16363_v20 }
 0xb91   :  { %16366 = vmatpush3.bf16.msra.mxu1 %v16363_v20 }
 0xb92   :  { %16368 = vmatprep.subr.bf16.mxu1 %v16367_v42 }
 0xb95   :  { %16370 = vmatpush3.bf16.msra.mxu1 %v16367_v42  ;;  %v14039_v63 = vpop.f32.mrb[12].mxu0 }
 0xb96   :  { %16404 = vmatprep.subr.bf16.mxu1 %v16403_v17  ;;  %v6833_v35 = vpop.f32.mrb[13].mxu0 }
 0xb98   :  { %14000 = vmatmul.mubr.f32.vlgmr.msra.gmra.mrb[100].mxu1 %v13963_v53  ;;  %v16481_v53 = vpack.c.bf16 %v7055_v44, %v7054_v41  ;;  %v7297_v41 = vld [vmem:[#allocation14 + $0x10] sm:$0xff] }
 0xb99   :  { %16406 = vmatpush3.bf16.msra.mxu1 %v16403_v17  ;;  %14002 = vmatprep.mubr.f32.mxu1 %v6647_v37  ;;  %v14042_v47 = vpop.f32.mrb[14].mxu0  ;;  %v7060_v37 = vld [vmem:[#allocation16 + $0x60] sm:$0xff] }
 0xb9a   :  { %16408 = vmatprep.subr.bf16.mxu1 %v16407_v3  ;;  %v6843_v0 = vpop.f32.mrb[15].mxu0  ;;  %v16490_v51 = vpack.c.bf16 %v7061_v13, %v7060_v37  ;;  %v7379_v37 = vld [vmem:[#allocation16 + $0x138] sm:$0xff] }
 0xb9c   :  { %14003 = vmatmul.mubr.f32.gmra.mrb[102].mxu1 %v13966_v2  ;;  %v7059_v2 = vld [vmem:[#allocation16 + $0x58] sm:$0xff] }
 0xb9d   :  { %16410 = vmatpush3.bf16.msra.mxu1 %v16407_v3  ;;  %14075 = vmatprep.mubr.f32.mxu1 %v6833_v35  ;;  %v16487_v18 = vpack.c.bf16 %v7059_v2, %v7058_v57  ;;  %v7140_v3 = vld [vmem:[#allocation16 + $0x80] sm:$0xff]  ;;  %v7141_v35 = vld [vmem:[#allocation16 + $0x88] sm:$0xff] }
 0xb9e   :  { %16412 = vmatprep.subr.bf16.mxu1 %v16411_v33  ;;  %v16448_v28 = vpack.c.bf16 %v7141_v35, %v7140_v3  ;;  %v7377_v57 = vld [vmem:[#allocation16 + $0x128] sm:$0xff]  ;;  %v7539_v3 = vld [vmem:[#allocation16 + $0x1a0] sm:$0xff] }
 0xb9f   :  { %v7540_v35 = vld [vmem:[#allocation16 + $0x1a8] sm:$0xff] }
 0xba1   :  { %16414 = vmatpush3.bf16.msra.mxu1 %v16411_v33  ;;  %v7143_v33 = vld [vmem:[#allocation16 + $0x98] sm:$0xff] }
 0xba2   :  { %16416 = vmatprep.subr.bf16.mxu1 %v16415_v36 }
 0xba5   :  { %16418 = vmatpush3.bf16.msra.mxu1 %v16415_v36  ;;  %v16454_v36 = vpack.c.bf16 %v7145_v27, %v7144_v9  ;;  %v7544_v9 = vld [vmem:[#allocation16 + $0x1c8] sm:$0xff] }
 0xba6   :  { %16420 = vmatprep.subr.bf16.mxu1 %v16419_v19 }
 0xba9   :  { %16422 = vmatpush3.bf16.msra.mxu1 %v16419_v19  ;;  %v16457_v19 = vpack.c.bf16 %v7147_v62, %v7146_v11  ;;  %v7546_v11 = vld [vmem:[#allocation16 + $0x1d8] sm:$0xff] }
 0xbaa   :  { %16424 = vmatprep.subr.bf16.mxu1 %v16423_v59 }
 0xbad   :  { %16426 = vmatpush3.bf16.msra.mxu1 %v16423_v59  ;;  %v16460_v59 = vpack.c.bf16 %v7149_v4, %v7148_v23 }
 0xbae   :  { %16428 = vmatprep.subr.bf16.mxu1 %v16427_v26 }
 0xbb1   :  { %16430 = vmatpush3.bf16.msra.mxu1 %v16427_v26  ;;  %v16463_v26 = vpack.c.bf16 %v7151_v16, %v7150_v8 }
 0xbb2   :  { %16432 = vmatprep.subr.bf16.mxu1 %v16431_v21 }
 0xbb5   :  { %16434 = vmatpush3.bf16.msra.mxu1 %v16431_v21  ;;  %v16466_v21 = vpack.c.bf16 %v7153_v50, %v7152_v34  ;;  %v7460_v34 = vld [vmem:[#allocation14 + $0x18] sm:$0xff]  ;;  %v7698_v50 = vld [vmem:[#allocation16 + $0x200] sm:$0xff] }
 0xbb6   :  { %16471 = vmatprep.subr.bf16.mxu1 %v17743_v52 }
 0xbb8   :  { %14076 = vmatmul.mubr.f32.vlgmr.msra.gmra.mrb[100].mxu1 %v14039_v63  ;;  %v6973_v63 = vld [vmem:[#allocation14] sm:$0xff] }
 0xbb9   :  { %14078 = vmatprep.mubr.f32.mxu1 %v6843_v0  ;;  %16473 = vmatpush3.bf16.msra.mxu1 %v16472_v61 }
 0xbba   :  { %16474 = vmatprep.subr.bf16.mxu1 %v17743_v52 }
 0xbbc   :  { %14079 = vmatmul.mubr.f32.gmra.mrb[102].mxu1 %v14042_v47  ;;  %v7142_v47 = vld [vmem:[#allocation16 + $0x90] sm:$0xff] }
 0xbbd   :  { %14170 = vmatprep.mubr.msk.f32.mxu1 %vm17744_vm0, %v17745_v54  ;;  %16476 = vmatpush3.bf16.msra.mxu1 %v16475_v56  ;;  %v16451_v0 = vpack.c.bf16 %v7143_v33, %v7142_v47  ;;  %v7542_v47 = vld [vmem:[#allocation16 + $0x1b8] sm:$0xff] }
 0xbbe   :  { %16477 = vmatprep.subr.bf16.mxu1 %v17743_v52 }
 0xbc1   :  { %16479 = vmatpush3.bf16.msra.mxu1 %v16478_v46  ;;  %v7373_v46 = vld [vmem:[#allocation16 + $0x108] sm:$0xff] }
 0xbc2   :  { %16480 = vmatprep.subr.bf16.mxu1 %v17743_v52  ;;  %v16502_v44 = vpack.c.bf16 %v7373_v46, %v7372_v29  ;;  %v7704_v46 = vld [vmem:[#allocation16 + $0x230] sm:$0xff] }
 0xbc5   :  { %16482 = vmatpush3.bf16.msra.mxu1 %v16481_v53  ;;  %v7374_v53 = vld [vmem:[#allocation16 + $0x110] sm:$0xff] }
 0xbc6   :  { %16483 = vmatprep.subr.bf16.mxu1 %v17743_v52  ;;  %v16505_v31 = vpack.c.bf16 %v7375_v55, %v7374_v53  ;;  %v7547_v53 = vld [vmem:[#allocation16 + $0x1e0] sm:$0xff]  ;;  %v7548_v55 = vld [vmem:[#allocation16 + $0x1e8] sm:$0xff] }
 0xbc9   :  { %16485 = vmatpush3.bf16.msra.mxu1 %v16484_v6  ;;  %v7376_v6 = vld [vmem:[#allocation16 + $0x120] sm:$0xff] }
 0xbca   :  { %16486 = vmatprep.subr.bf16.mxu1 %v17743_v52  ;;  %v16508_v2 = vpack.c.bf16 %v7377_v57, %v7376_v6  ;;  %v16550_v6 = vpack.c.bf16 %v7548_v55, %v7547_v53  ;;  %v7707_v57 = vld [vmem:[#allocation16 + $0x248] sm:$0xff] }
 0xbcb   :  { %v8033_v55 = vld [vmem:[#allocation16 + $0x348] sm:$0xff] }
 0xbcd   :  { %16488 = vmatpush3.bf16.msra.mxu1 %v16487_v18  ;;  %v7378_v18 = vld [vmem:[#allocation16 + $0x130] sm:$0xff] }
 0xbce   :  { %16489 = vmatprep.subr.bf16.mxu1 %v17743_v52  ;;  %v16511_v13 = vpack.c.bf16 %v7379_v37, %v7378_v18  ;;  %v7549_v18 = vld [vmem:[#allocation16 + $0x1f0] sm:$0xff]  ;;  %v7550_v37 = vld [vmem:[#allocation16 + $0x1f8] sm:$0xff] }
 0xbd1   :  { %16491 = vmatpush3.bf16.msra.mxu1 %v16490_v51  ;;  %v7380_v51 = vld [vmem:[#allocation16 + $0x140] sm:$0xff] }
 0xbd2   :  { %16492 = vmatprep.subr.bf16.mxu1 %v17743_v52  ;;  %v16514_v7 = vpack.c.bf16 %v7381_v1, %v7380_v51  ;;  %v16553_v51 = vpack.c.bf16 %v7550_v37, %v7549_v18  ;;  %v7709_v1 = vld [vmem:[#allocation16 + $0x258] sm:$0xff] }
 0xbd3   :  { %v8035_v37 = vld [vmem:[#allocation16 + $0x358] sm:$0xff] }
 0xbd5   :  { %16494 = vmatpush3.bf16.msra.mxu1 %v16493_v60  ;;  %v7382_v60 = vld [vmem:[#allocation16 + $0x150] sm:$0xff] }
 0xbd6   :  { %16531 = vmatprep.subr.bf16.mxu1 %v17743_v52 }
 0xc8b   :  { %v14077_v43 = vpop.f32.mrb[100].mxu1 }
 0xc8c   :  { %v6966_v15 = vadd.f32 %v14077_v43, %v10335_v48  ;;  %v6935_v5 = vpop.f32.mrb[101].mxu1 }
 0xc8d   :  { %v6965_v38 = vadd.f32 %v10335_v48, %v6935_v5  ;;  %v7385_v5 = vld [vmem:[#allocation16 + $0x168] sm:$0xff] }
 0xc8e   :  { %v6970_v58 = vmax.f32 %v6966_v15, 0.0  ;;  %v7384_v15 = vld [vmem:[#allocation16 + $0x160] sm:$0xff] }
 0xc8f   :  { %v6969_v20 = vmax.f32 %v6965_v38, 0.0  ;;  %v14080_v10 = vpop.f32.mrb[102].mxu1  ;;  %v16520_v38 = vpack.c.bf16 %v7385_v5, %v7384_v15  ;;  %v7712_v15 = vld [vmem:[#allocation16 + $0x270] sm:$0xff]  ;;  %v7713_v5 = vld [vmem:[#allocation16 + $0x278] sm:$0xff] }
 0xc90   :  { %v6968_v45 = vadd.f32 %v14080_v10, %v10335_v48  ;;  %v6945_v42 = vpop.f32.mrb[103].mxu1 }
 0xc91   :  { %v19205_v25 = vpack.c.bf16 %v6970_v58, %v6969_v20  ;;  %v6967_v22 = vadd.f32 %v10335_v48, %v6945_v42  ;;  %v7383_v48 = vld [vmem:[#allocation16 + $0x158] sm:$0xff]  ;;  %v7386_v58 = vld [vmem:[#allocation16 + $0x170] sm:$0xff]  ;;  %v7536_v42 = vld [vmem:[#allocation16 + $0x188] sm:$0xff] }
 0xc92   :  { %v6972_v17 = vmax.f32 %v6968_v45, 0.0  ;;  %v16517_v43 = vpack.c.bf16 %v7383_v48, %v7382_v60  ;;  %v7387_v20 = vld [vmem:[#allocation16 + $0x178] sm:$0xff]  ;;  %v7535_v45 = vld [vmem:[#allocation16 + $0x180] sm:$0xff]  ;;  %v7711_v48 = vld [vmem:[#allocation16 + $0x268] sm:$0xff] }
 0xc93   :  { %v6971_v30 = vmax.f32 %v6967_v22, 0.0  ;;  %16437 = vmatpush3.bf16.msra.mxu0 %v19205_v25  ;;  %v16523_v10 = vpack.c.bf16 %v7387_v20, %v7386_v58  ;;  %v7537_v22 = vld [vmem:[#allocation16 + $0x190] sm:$0xff]  ;;  %v7710_v60 = vld [vmem:[#allocation16 + $0x260] sm:$0xff] }
 0xc94   :  { %16438 = vmatprep.subr.bf16.mxu0 %v17743_v52 }
 0xc95   :  { %v19209_v49 = vpack.c.bf16 %v6972_v17, %v6971_v30  ;;  %v16532_v17 = vpack.c.bf16 %v7536_v42, %v7535_v45  ;;  %v7538_v30 = vld [vmem:[#allocation16 + $0x198] sm:$0xff] }
 0xc97   :  { %16440 = vmatpush3.bf16.msra.mxu0 %v19209_v49 }
 0xc98   :  { %16441 = vmatprep.subr.bf16.mxu0 %v17743_v52 }
 0xc9a   :  { %14090 = vmatmul.mubr.msk.f32.vlgmr.msra.gmra.mrb[16].mxu0 %vm6974_vm1, %v6973_v63  ;;  %v16535_v63 = vpack.c.bf16 %v7538_v30, %v7537_v22  ;;  %v7861_v22 = vld [vmem:[#allocation16 + $0x280] sm:$0xff] }
 0xc9b   :  { %16443 = vmatpush3.bf16.msra.mxu0 %v19205_v25  ;;  %14100 = vmatprep.mubr.msk.f32.mxu0 %vm17744_vm0, %v17745_v54  ;;  %v7786_v30 = vld [vmem:[#allocation14 + $0x28] sm:$0xff] }
 0xc9c   :  { %16444 = vmatprep.subr.bf16.mxu0 %v17743_v52 }
 0xc9f   :  { %16446 = vmatpush3.bf16.msra.mxu0 %v19209_v49 }
 0xca0   :  { %16447 = vmatprep.subr.bf16.mxu0 %v17743_v52 }
 0xca2   :  { %14101 = vmatmul.mubr.msk.f32.vlgmr.msra.gmra.mrb[18].mxu0 %vm6974_vm1, %v7065_v14  ;;  %v16538_v14 = vpack.c.bf16 %v7540_v35, %v7539_v3  ;;  %v7863_v35 = vld [vmem:[#allocation16 + $0x290] sm:$0xff] }
 0xca3   :  { %16449 = vmatpush3.bf16.msra.mxu0 %v16448_v28  ;;  %14135 = vmatprep.mubr.msk.f32.mxu0 %vm17744_vm0, %v17745_v54  ;;  %v7541_v28 = vld [vmem:[#allocation16 + $0x1b0] sm:$0xff] }
 0xca4   :  { %16450 = vmatprep.subr.bf16.mxu0 %v17743_v52  ;;  %v16541_v33 = vpack.c.bf16 %v7542_v47, %v7541_v28 }
 0xca7   :  { %16452 = vmatpush3.bf16.msra.mxu0 %v16451_v0  ;;  %v7543_v0 = vld [vmem:[#allocation16 + $0x1c0] sm:$0xff] }
 0xca8   :  { %16453 = vmatprep.subr.bf16.mxu0 %v17743_v52  ;;  %v16544_v27 = vpack.c.bf16 %v7544_v9, %v7543_v0  ;;  %v8025_v0 = vld [vmem:[#allocation16 + $0x308] sm:$0xff]  ;;  %v7865_v9 = vld [vmem:[#allocation16 + $0x2a0] sm:$0xff] }
 0xcab   :  { %16455 = vmatpush3.bf16.msra.mxu0 %v16454_v36  ;;  %v7545_v36 = vld [vmem:[#allocation16 + $0x1d0] sm:$0xff] }
 0xcac   :  { %16456 = vmatprep.subr.bf16.mxu0 %v17743_v52  ;;  %v16547_v62 = vpack.c.bf16 %v7546_v11, %v7545_v36  ;;  %v7949_v36 = vld [vmem:[#allocation14 + $0x30] sm:$0xff] }
 0xcaf   :  { %16458 = vmatpush3.bf16.msra.mxu0 %v16457_v19 }
 0xcb0   :  { %16459 = vmatprep.subr.bf16.mxu0 %v17743_v52 }
 0xcb3   :  { %16461 = vmatpush3.bf16.msra.mxu0 %v16460_v59 }
 0xcb4   :  { %16462 = vmatprep.subr.bf16.mxu0 %v17743_v52 }
 0xcb7   :  { %16464 = vmatpush3.bf16.msra.mxu0 %v16463_v26 }
 0xcb8   :  { %16465 = vmatprep.subr.bf16.mxu0 %v17743_v52 }
 0xcbb   :  { %16467 = vmatpush3.bf16.msra.mxu0 %v16466_v21  ;;  %v7699_v21 = vld [vmem:[#allocation16 + $0x208] sm:$0xff] }
 0xcbc   :  { %16468 = vmatprep.subr.bf16.mxu0 %v17743_v52  ;;  %v16562_v12 = vpack.c.bf16 %v7699_v21, %v7698_v50  ;;  %v7869_v50 = vld [vmem:[#allocation16 + $0x2c0] sm:$0xff]  ;;  %v7870_v21 = vld [vmem:[#allocation16 + $0x2c8] sm:$0xff] }
 0xcbf   :  { %16470 = vmatpush3.bf16.msra.mxu0 %v16469_v24  ;;  %v7700_v24 = vld [vmem:[#allocation16 + $0x210] sm:$0xff] }
 0xcc0   :  { %16495 = vmatprep.subr.bf16.mxu0 %v17743_v52 }
 0xd6d   :  { %v7044_v61 = vpop.f32.mrb[16].mxu0 }
 0xd6e   :  { %v14091_v40 = vpop.f32.mrb[17].mxu0  ;;  %14171 = vmatmul.mubr.f32.vlgmr.msra.gmra.mrb[104].mxu1 %v7044_v61  ;;  %v7701_v61 = vld [vmem:[#allocation16 + $0x218] sm:$0xff] }
 0xd6f   :  { %14262 = vmatprep.mubr.msk.f32.mxu1 %vm17744_vm0, %v17745_v54  ;;  %16533 = vmatpush3.bf16.msra.mxu1 %v16532_v17  ;;  %v16565_v40 = vpack.c.bf16 %v7701_v61, %v7700_v24  ;;  %v7862_v17 = vld [vmem:[#allocation16 + $0x288] sm:$0xff]  ;;  %v8030_v24 = vld [vmem:[#allocation16 + $0x330] sm:$0xff]  ;;  %v8031_v61 = vld [vmem:[#allocation16 + $0x338] sm:$0xff] }
 0xd70   :  { %16534 = vmatprep.subr.bf16.mxu1 %v17743_v52 }
 0xd73   :  { %16536 = vmatpush3.bf16.msra.mxu1 %v16535_v63  ;;  %v16592_v63 = vpack.c.bf16 %v7862_v17, %v7861_v22  ;;  %v8187_v17 = vld [vmem:[#allocation16 + $0x380] sm:$0xff] }
 0xd74   :  { %16537 = vmatprep.subr.bf16.mxu1 %v17743_v52 }
 0xd75   :  { %v7135_v56 = vpop.f32.mrb[18].mxu0 }
 0xd76   :  { %v14102_v32 = vpop.f32.mrb[19].mxu0  ;;  %14136 = vmatmul.mubr.f32.vlgmr.msra.gmra.mrb[20].mxu0 %v7135_v56  ;;  %v7702_v56 = vld [vmem:[#allocation16 + $0x220] sm:$0xff] }
 0xd77   :  { %16497 = vmatpush3.bf16.msra.mxu0 %v19205_v25  ;;  %14181 = vmatprep.mubr.msk.f32.mxu0 %vm17744_vm0, %v17745_v54  ;;  %v7703_v32 = vld [vmem:[#allocation16 + $0x228] sm:$0xff] }
 0xd78   :  { %16498 = vmatprep.subr.bf16.mxu0 %v17743_v52  ;;  %16539 = vmatpush3.bf16.msra.mxu1 %v16538_v14  ;;  %v16568_v29 = vpack.c.bf16 %v7703_v32, %v7702_v56  ;;  %v7864_v14 = vld [vmem:[#allocation16 + $0x298] sm:$0xff]  ;;  %v16631_v32 = vpack.c.bf16 %v8031_v61, %v8030_v24  ;;  %v8197_v24 = vld [vmem:[#allocation16 + $0x3d0] sm:$0xff] }
 0xd79   :  { %16540 = vmatprep.subr.bf16.mxu1 %v17743_v52  ;;  %v16595_v47 = vpack.c.bf16 %v7864_v14, %v7863_v35  ;;  %v7872_v56 = vld [vmem:[#allocation16 + $0x2d8] sm:$0xff]  ;;  %v8189_v35 = vld [vmem:[#allocation16 + $0x390] sm:$0xff] }
 0xd7a   :  { %v8190_v14 = vld [vmem:[#allocation16 + $0x398] sm:$0xff] }
 0xd7b   :  { %16500 = vmatpush3.bf16.msra.mxu0 %v19209_v49  ;;  %v8198_v61 = vld [vmem:[#allocation16 + $0x3d8] sm:$0xff] }
 0xd7c   :  { %16501 = vmatprep.subr.bf16.mxu0 %v17743_v52  ;;  %16542 = vmatpush3.bf16.msra.mxu1 %v16541_v33  ;;  %v8024_v33 = vld [vmem:[#allocation16 + $0x300] sm:$0xff] }
 0xd7d   :  { %16543 = vmatprep.subr.bf16.mxu1 %v17743_v52  ;;  %v16622_v11 = vpack.c.bf16 %v8025_v0, %v8024_v33  ;;  %v8350_v33 = vld [vmem:[#allocation16 + $0x400] sm:$0xff]  ;;  %v8351_v0 = vld [vmem:[#allocation16 + $0x408] sm:$0xff] }
 0xd7e   :  { %14182 = vmatmul.mubr.msk.f32.vlgmr.msra.gmra.mrb[22].mxu0 %vm6974_vm1, %v7297_v41  ;;  %v7705_v41 = vld [vmem:[#allocation16 + $0x238] sm:$0xff] }
 0xd7f   :  { %16503 = vmatpush3.bf16.msra.mxu0 %v16502_v44  ;;  %14216 = vmatprep.mubr.msk.f32.mxu0 %vm17744_vm0, %v17745_v54  ;;  %v16571_v44 = vpack.c.bf16 %v7705_v41, %v7704_v46  ;;  %v7873_v46 = vld [vmem:[#allocation16 + $0x2e0] sm:$0xff]  ;;  %v7874_v41 = vld [vmem:[#allocation16 + $0x2e8] sm:$0xff] }
 0xd80   :  { %16504 = vmatprep.subr.bf16.mxu0 %v17743_v52  ;;  %16545 = vmatpush3.bf16.msra.mxu1 %v16544_v27  ;;  %v7866_v27 = vld [vmem:[#allocation16 + $0x2a8] sm:$0xff]  ;;  %v16610_v53 = vpack.c.bf16 %v7874_v41, %v7873_v46  ;;  %v8358_v46 = vld [vmem:[#allocation16 + $0x440] sm:$0xff] }
 0xd81   :  { %16546 = vmatprep.subr.bf16.mxu1 %v17743_v52 }
 0xd83   :  { %16506 = vmatpush3.bf16.msra.mxu0 %v16505_v31  ;;  %v7706_v31 = vld [vmem:[#allocation16 + $0x240] sm:$0xff] }
 0xd84   :  { %16507 = vmatprep.subr.bf16.mxu0 %v17743_v52  ;;  %16548 = vmatpush3.bf16.msra.mxu1 %v16547_v62  ;;  %v16598_v62 = vpack.c.bf16 %v7866_v27, %v7865_v9  ;;  %v8191_v9 = vld [vmem:[#allocation16 + $0x3a0] sm:$0xff]  ;;  %v8192_v27 = vld [vmem:[#allocation16 + $0x3a8] sm:$0xff] }
 0xd85   :  { %16549 = vmatprep.subr.bf16.mxu1 %v17743_v52 }
 0xd87   :  { %16509 = vmatpush3.bf16.msra.mxu0 %v16508_v2  ;;  %v16574_v2 = vpack.c.bf16 %v7707_v57, %v7706_v31  ;;  %v7876_v57 = vld [vmem:[#allocation16 + $0x2f8] sm:$0xff] }
 0xd88   :  { %16510 = vmatprep.subr.bf16.mxu0 %v17743_v52  ;;  %16551 = vmatpush3.bf16.msra.mxu1 %v16550_v6  ;;  %v7875_v6 = vld [vmem:[#allocation16 + $0x2f0] sm:$0xff] }
 0xd89   :  { %16552 = vmatprep.subr.bf16.mxu1 %v17743_v52  ;;  %v16613_v18 = vpack.c.bf16 %v7876_v57, %v7875_v6  ;;  %v8360_v6 = vld [vmem:[#allocation16 + $0x450] sm:$0xff] }
 0xd8b   :  { %16512 = vmatpush3.bf16.msra.mxu0 %v16511_v13  ;;  %v7708_v13 = vld [vmem:[#allocation16 + $0x250] sm:$0xff] }
 0xd8c   :  { %16513 = vmatprep.subr.bf16.mxu0 %v17743_v52  ;;  %16554 = vmatpush3.bf16.msra.mxu1 %v16553_v51  ;;  %v8036_v51 = vld [vmem:[#allocation16 + $0x360] sm:$0xff] }
 0xd8d   :  { %16585 = vmatprep.subr.bf16.mxu1 %v17743_v52 }
 0xd8f   :  { %16515 = vmatpush3.bf16.msra.mxu0 %v16514_v7  ;;  %v16577_v7 = vpack.c.bf16 %v7709_v1, %v7708_v13  ;;  %v8037_v1 = vld [vmem:[#allocation16 + $0x368] sm:$0xff] }
 0xd90   :  { %16516 = vmatprep.subr.bf16.mxu0 %v17743_v52 }
 0xd93   :  { %16518 = vmatpush3.bf16.msra.mxu0 %v16517_v43  ;;  %v16580_v43 = vpack.c.bf16 %v7711_v48, %v7710_v60  ;;  %v8038_v60 = vld [vmem:[#allocation16 + $0x370] sm:$0xff]  ;;  %v8039_v48 = vld [vmem:[#allocation16 + $0x378] sm:$0xff] }
 0xd94   :  { %16519 = vmatprep.subr.bf16.mxu0 %v17743_v52 }
 0xd97   :  { %16521 = vmatpush3.bf16.msra.mxu0 %v16520_v38  ;;  %v16583_v38 = vpack.c.bf16 %v7713_v5, %v7712_v15 }
 0xd98   :  { %16522 = vmatprep.subr.bf16.mxu0 %v17743_v52 }
 0xd9b   :  { %16524 = vmatpush3.bf16.msra.mxu0 %v16523_v10 }
 0xd9c   :  { %16525 = vmatprep.subr.bf16.mxu0 %v17743_v52 }
 0xe41   :  { %v7292_v19 = vpop.f32.mrb[104].mxu1 }
 0xe42   :  { %v14172_v23 = vpop.f32.mrb[105].mxu1 }
 0xe43   :  { %v8027_v23 = vld [vmem:[#allocation16 + $0x318] sm:$0xff] }
 0xe49   :  { %v7222_v4 = vpop.f32.mrb[20].mxu0 }
 0xe4a   :  { %v19256_v59 = vadd.f32 %v7292_v19, %v7222_v4  ;;  %v14137_v8 = vpop.f32.mrb[21].mxu0  ;;  %v8026_v19 = vld [vmem:[#allocation16 + $0x310] sm:$0xff] }
 0xe4b   :  { %v7867_v4 = vld [vmem:[#allocation16 + $0x2b0] sm:$0xff]  ;;  %v16625_v8 = vpack.c.bf16 %v8027_v23, %v8026_v19  ;;  %v8353_v19 = vld [vmem:[#allocation16 + $0x418] sm:$0xff] }
 0xe4c   :  { %v8193_v23 = vld [vmem:[#allocation16 + $0x3b0] sm:$0xff] }
 0xe51   :  { %v7367_v16 = vpop.f32.mrb[22].mxu0 }
 0xe52   :  { %v14183_v26 = vpop.f32.mrb[23].mxu0  ;;  %14217 = vmatmul.mubr.f32.vlgmr.msra.gmra.mrb[24].mxu0 %v7367_v16 }
 0xe53   :  { %16527 = vmatpush3.bf16.msra.mxu0 %v19205_v25  ;;  %14227 = vmatprep.mubr.msk.f32.mxu0 %vm17744_vm0, %v17745_v54  ;;  %v8028_v26 = vld [vmem:[#allocation16 + $0x320] sm:$0xff] }
 0xe54   :  { %16528 = vmatprep.subr.bf16.mxu0 %v17743_v52 }
 0xe57   :  { %16530 = vmatpush3.bf16.msra.mxu0 %v19209_v49 }
 0xe58   :  { %16555 = vmatprep.subr.bf16.mxu0 %v17743_v52 }
 0xe5a   :  { %14228 = vmatmul.mubr.msk.f32.vlgmr.msra.gmra.mrb[26].mxu0 %vm6974_vm1, %v7460_v34  ;;  %v8029_v34 = vld [vmem:[#allocation16 + $0x328] sm:$0xff] }
 0xe5b   :  { %16557 = vmatpush3.bf16.msra.mxu0 %v19205_v25  ;;  %14273 = vmatprep.mubr.msk.f32.mxu0 %vm17744_vm0, %v17745_v54 }
 0xe5c   :  { %16558 = vmatprep.subr.bf16.mxu0 %v17743_v52 }
 0xe5f   :  { %16560 = vmatpush3.bf16.msra.mxu0 %v19209_v49 }
 0xe60   :  { %16561 = vmatprep.subr.bf16.mxu0 %v17743_v52 }
 0xe62   :  { %14274 = vmatmul.mubr.msk.f32.vlgmr.msra.gmra.mrb[28].mxu0 %vm6974_vm1, %v7623_v39  ;;  %v16628_v39 = vpack.c.bf16 %v8029_v34, %v8028_v26  ;;  %v8195_v26 = vld [vmem:[#allocation16 + $0x3c0] sm:$0xff]  ;;  %v8196_v34 = vld [vmem:[#allocation16 + $0x3c8] sm:$0xff] }
 0xe63   :  { %16563 = vmatpush3.bf16.msra.mxu0 %v16562_v12  ;;  %14308 = vmatprep.mubr.msk.f32.mxu0 %vm17744_vm0, %v17745_v54  ;;  %v16604_v12 = vpack.c.bf16 %v7870_v21, %v7869_v50  ;;  %v16664_v21 = vpack.c.bf16 %v8196_v34, %v8195_v26 }
 0xe64   :  { %16564 = vmatprep.subr.bf16.mxu0 %v17743_v52 }
 0xe67   :  { %16566 = vmatpush3.bf16.msra.mxu0 %v16565_v40  ;;  %v7871_v40 = vld [vmem:[#allocation16 + $0x2d0] sm:$0xff] }
 0xe68   :  { %16567 = vmatprep.subr.bf16.mxu0 %v17743_v52 }
 0xe6b   :  { %16569 = vmatpush3.bf16.msra.mxu0 %v16568_v29  ;;  %v16607_v29 = vpack.c.bf16 %v7872_v56, %v7871_v40  ;;  %v16667_v56 = vpack.c.bf16 %v8198_v61, %v8197_v24 }
 0xe6c   :  { %16570 = vmatprep.subr.bf16.mxu0 %v17743_v52 }
 0xe6f   :  { %16572 = vmatpush3.bf16.msra.mxu0 %v16571_v44  ;;  %v8032_v44 = vld [vmem:[#allocation16 + $0x340] sm:$0xff] }
 0xe70   :  { %16573 = vmatprep.subr.bf16.mxu0 %v17743_v52  ;;  %v16634_v31 = vpack.c.bf16 %v8033_v55, %v8032_v44  ;;  %v8359_v44 = vld [vmem:[#allocation16 + $0x448] sm:$0xff]  ;;  %v8201_v55 = vld [vmem:[#allocation16 + $0x3f0] sm:$0xff] }
 0xe73   :  { %16575 = vmatpush3.bf16.msra.mxu0 %v16574_v2  ;;  %v8034_v2 = vld [vmem:[#allocation16 + $0x350] sm:$0xff] }
 0xe74   :  { %16576 = vmatprep.subr.bf16.mxu0 %v17743_v52  ;;  %v16637_v13 = vpack.c.bf16 %v8035_v37, %v8034_v2  ;;  %v8361_v2 = vld [vmem:[#allocation16 + $0x458] sm:$0xff]  ;;  %v8362_v37 = vld [vmem:[#allocation16 + $0x460] sm:$0xff] }
 0xe77   :  { %16578 = vmatpush3.bf16.msra.mxu0 %v16577_v7  ;;  %v16640_v7 = vpack.c.bf16 %v8037_v1, %v8036_v51  ;;  %v8364_v1 = vld [vmem:[#allocation16 + $0x470] sm:$0xff] }
 0xe78   :  { %16579 = vmatprep.subr.bf16.mxu0 %v17743_v52 }
 0xe7b   :  { %16581 = vmatpush3.bf16.msra.mxu0 %v16580_v43  ;;  %v16643_v43 = vpack.c.bf16 %v8039_v48, %v8038_v60 }
 0xe7c   :  { %16582 = vmatprep.subr.bf16.mxu0 %v17743_v52 }
 0xe7f   :  { %16584 = vmatpush3.bf16.msra.mxu0 %v16583_v38 }
 0xe80   :  { %16615 = vmatprep.subr.bf16.mxu0 %v17743_v52 }
 0xf25   :  { %v7454_v58 = vpop.f32.mrb[24].mxu0 }
 0xf26   :  { %v19285_v20 = vadd.f32 %v7454_v58, %v19256_v59  ;;  %v14218_v10 = vpop.f32.mrb[25].mxu0  ;;  %v7868_v59 = vld [vmem:[#allocation16 + $0x2b8] sm:$0xff] }
 0xf27   :  { %v16601_v16 = vpack.c.bf16 %v7868_v59, %v7867_v4  ;;  %v8194_v4 = vld [vmem:[#allocation16 + $0x3b8] sm:$0xff] }
 0xf2d   :  { %v7530_v45 = vpop.f32.mrb[26].mxu0 }
 0xf2e   :  { %v14229_v42 = vpop.f32.mrb[27].mxu0  ;;  %14263 = vmatmul.mubr.f32.vlgmr.msra.gmra.mrb[106].mxu1 %v7530_v45 }
 0xf2f   :  { %16587 = vmatpush3.bf16.msra.mxu1 %v19205_v25  ;;  %14319 = vmatprep.mubr.msk.f32.mxu1 %vm17744_vm0, %v17745_v54 }
 0xf30   :  { %16588 = vmatprep.subr.bf16.mxu1 %v17743_v52 }
 0xf33   :  { %16590 = vmatpush3.bf16.msra.mxu1 %v19209_v49 }
 0xf34   :  { %16591 = vmatprep.subr.bf16.mxu1 %v17743_v52 }
 0xf35   :  { %v7693_v3 = vpop.f32.mrb[28].mxu0 }
 0xf36   :  { %14320 = vmatmul.mubr.msk.f32.vlgmr.msra.gmra.mrb[108].mxu1 %vm6974_vm1, %v7786_v30  ;;  %v14275_v28 = vpop.f32.mrb[29].mxu0  ;;  %14309 = vmatmul.mubr.f32.vlgmr.msra.gmra.mrb[30].mxu0 %v7693_v3  ;;  %v8188_v30 = vld [vmem:[#allocation16 + $0x388] sm:$0xff] }
 0xf37   :  { %16617 = vmatpush3.bf16.msra.mxu0 %v19205_v25  ;;  %14365 = vmatprep.mubr.msk.f32.mxu0 %vm17744_vm0, %v17745_v54 }
 0xf38   :  { %16618 = vmatprep.subr.bf16.mxu0 %v17743_v52  ;;  %16593 = vmatpush3.bf16.msra.mxu1 %v16592_v63  ;;  %v16652_v63 = vpack.c.bf16 %v8188_v30, %v8187_v17  ;;  %v8521_v30 = vld [vmem:[#allocation19] sm:$0xff] }
 0xf39   :  { %16594 = vmatprep.subr.bf16.mxu1 %v17743_v52  ;;  %14354 = vmatprep.mubr.msk.f32.mxu1 %vm17744_vm0, %v17745_v54 }
 0xf3b   :  { %16620 = vmatpush3.bf16.msra.mxu0 %v19209_v49 }
 0xf3c   :  { %16596 = vmatpush3.bf16.msra.mxu1 %v16595_v47  ;;  %16621 = vmatprep.subr.bf16.mxu0 %v17743_v52  ;;  %v16655_v47 = vpack.c.bf16 %v8190_v14, %v8189_v35  ;;  %v8525_v14 = vld [vmem:[#allocation19 + $0x20] sm:$0xff] }
 0xf3d   :  { %16597 = vmatprep.subr.bf16.mxu1 %v17743_v52 }
 0xf3e   :  { %14366 = vmatmul.mubr.msk.f32.vlgmr.msra.gmra.mrb[32].mxu0 %vm6974_vm1, %v7949_v36  ;;  %v8275_v36 = vld [vmem:[#allocation14 + $0x40] sm:$0xff] }
 0xf3f   :  { %16623 = vmatpush3.bf16.msra.mxu0 %v16622_v11  ;;  %14400 = vmatprep.mubr.msk.f32.mxu0 %vm17744_vm0, %v17745_v54  ;;  %v16658_v11 = vpack.c.bf16 %v8192_v27, %v8191_v9  ;;  %v8529_v27 = vld [vmem:[#allocation19 + $0x40] sm:$0xff] }
 0xf40   :  { %16599 = vmatpush3.bf16.msra.mxu1 %v16598_v62  ;;  %16624 = vmatprep.subr.bf16.mxu0 %v17743_v52  ;;  %v8352_v62 = vld [vmem:[#allocation16 + $0x410] sm:$0xff] }
 0xf41   :  { %16600 = vmatprep.subr.bf16.mxu1 %v17743_v52  ;;  %v16685_v59 = vpack.c.bf16 %v8353_v19, %v8352_v62  ;;  %v8532_v62 = vld [vmem:[#allocation19 + $0x58] sm:$0xff] }
 0xf43   :  { %16626 = vmatpush3.bf16.msra.mxu0 %v16625_v8  ;;  %v8354_v8 = vld [vmem:[#allocation16 + $0x420] sm:$0xff] }
 0xf44   :  { %16602 = vmatpush3.bf16.msra.mxu1 %v16601_v16  ;;  %16627 = vmatprep.subr.bf16.mxu0 %v17743_v52  ;;  %v8355_v16 = vld [vmem:[#allocation16 + $0x428] sm:$0xff] }
 0xf45   :  { %16603 = vmatprep.subr.bf16.mxu1 %v17743_v52  ;;  %v16688_v50 = vpack.c.bf16 %v8355_v16, %v8354_v8  ;;  %v8536_v8 = vld [vmem:[#allocation19 + $0x78] sm:$0xff] }
 0xf47   :  { %16629 = vmatpush3.bf16.msra.mxu0 %v16628_v39  ;;  %v8356_v39 = vld [vmem:[#allocation16 + $0x430] sm:$0xff] }
 0xf48   :  { %16605 = vmatpush3.bf16.msra.mxu1 %v16604_v12  ;;  %16630 = vmatprep.subr.bf16.mxu0 %v17743_v52  ;;  %v8357_v12 = vld [vmem:[#allocation16 + $0x438] sm:$0xff] }
 0xf49   :  { %16606 = vmatprep.subr.bf16.mxu1 %v17743_v52  ;;  %v16691_v40 = vpack.c.bf16 %v8357_v12, %v8356_v39  ;;  %v10345_v39 = vld [vmem:[#allocation17] ss:$0 sm:$0xff] }
 0xf4b   :  { %16632 = vmatpush3.bf16.msra.mxu0 %v16631_v32  ;;  %v8199_v32 = vld [vmem:[#allocation16 + $0x3e0] sm:$0xff] }
 0xf4c   :  { %16608 = vmatpush3.bf16.msra.mxu1 %v16607_v29  ;;  %16633 = vmatprep.subr.bf16.mxu0 %v17743_v52  ;;  %v8200_v29 = vld [vmem:[#allocation16 + $0x3e8] sm:$0xff] }
 0xf4d   :  { %16609 = vmatprep.subr.bf16.mxu1 %v17743_v52  ;;  %v16670_v41 = vpack.c.bf16 %v8200_v29, %v8199_v32  ;;  %v8613_v32 = vld [vmem:[#allocation19 + $0x80] sm:$0xff]  ;;  %v8614_v29 = vld [vmem:[#allocation19 + $0x88] sm:$0xff] }
 0xf4f   :  { %16635 = vmatpush3.bf16.msra.mxu0 %v16634_v31  ;;  %v8202_v31 = vld [vmem:[#allocation16 + $0x3f8] sm:$0xff] }
 0xf50   :  { %16611 = vmatpush3.bf16.msra.mxu1 %v16610_v53  ;;  %16636 = vmatprep.subr.bf16.mxu0 %v17743_v52  ;;  %v16694_v53 = vpack.c.bf16 %v8359_v44, %v8358_v46  ;;  %v16673_v57 = vpack.c.bf16 %v8202_v31, %v8201_v55  ;;  %v10347_v46 = vld [vmem:[%s19733_s7 + $0x8] sm:$0xff]  ;;  %v8615_v44 = vld [vmem:[#allocation19 + $0x90] sm:$0xff] }
 0xf51   :  { %16612 = vmatprep.subr.bf16.mxu1 %v17743_v52  ;;  %v8617_v31 = vld [vmem:[#allocation19 + $0xa0] sm:$0xff] }
 0xf53   :  { %16638 = vmatpush3.bf16.msra.mxu0 %v16637_v13  ;;  %v8363_v13 = vld [vmem:[#allocation16 + $0x468] sm:$0xff] }
 0xf54   :  { %16614 = vmatpush3.bf16.msra.mxu1 %v16613_v18  ;;  %16639 = vmatprep.subr.bf16.mxu0 %v17743_v52  ;;  %v16697_v18 = vpack.c.bf16 %v8361_v2, %v8360_v6  ;;  %v16700_v51 = vpack.c.bf16 %v8363_v13, %v8362_v37  ;;  %v8618_v6 = vld [vmem:[#allocation19 + $0xa8] sm:$0xff]  ;;  %v8619_v2 = vld [vmem:[#allocation19 + $0xb0] sm:$0xff]  ;;  %v8621_v13 = vld [vmem:[#allocation19 + $0xc0] sm:$0xff] }
 0xf55   :  { %16645 = vmatprep.subr.bf16.mxu1 %v17743_v52 }
 0xf57   :  { %16641 = vmatpush3.bf16.msra.mxu0 %v16640_v7  ;;  %v8365_v7 = vld [vmem:[#allocation16 + $0x478] sm:$0xff] }
 0xf58   :  { %16642 = vmatprep.subr.bf16.mxu0 %v17743_v52  ;;  %v16703_v60 = vpack.c.bf16 %v8365_v7, %v8364_v1  ;;  %v8623_v7 = vld [vmem:[#allocation19 + $0xd0] sm:$0xff] }
 0xf5b   :  { %16644 = vmatpush3.bf16.msra.mxu0 %v16643_v43 }
 0xf5c   :  { %16675 = vmatprep.subr.bf16.mxu0 %v17743_v52 }
0x1001   :  { %v7617_v15 = vpop.f32.mrb[106].mxu1 }
0x1002   :  { %v7621_v5 = vadd.f32 %v7617_v15, %v19285_v20  ;;  %v14264_v38 = vpop.f32.mrb[107].mxu1  ;;  %v8112_v20 = vld [vmem:[#allocation14 + $0x38] sm:$0xff] }
0x1009   :  { %v7856_v58 = vpop.f32.mrb[108].mxu1  ;;  %v7780_v10 = vpop.f32.mrb[30].mxu0 }
0x100a   :  { %v19322_v45 = vadd.f32 %v7780_v10, %v7621_v5  ;;  %14355 = vmatmul.mubr.f32.vlgmr.msra.gmra.mrb[110].mxu1 %v7856_v58  ;;  %v14310_v42 = vpop.f32.mrb[31].mxu0  ;;  %v14321_v22 = vpop.f32.mrb[109].mxu1 }
0x100b   :  { %16647 = vmatpush3.bf16.msra.mxu1 %v19205_v25  ;;  %14411 = vmatprep.mubr.msk.f32.mxu1 %vm17744_vm0, %v17745_v54 }
0x100c   :  { %16648 = vmatprep.subr.bf16.mxu1 %v17743_v52 }
0x100f   :  { %16650 = vmatpush3.bf16.msra.mxu1 %v19209_v49 }
0x1010   :  { %16651 = vmatprep.subr.bf16.mxu1 %v17743_v52 }
0x1011   :  { %v8019_v3 = vpop.f32.mrb[32].mxu0 }
0x1012   :  { %14412 = vmatmul.mubr.msk.f32.vlgmr.msra.gmra.mrb[112].mxu1 %vm6974_vm1, %v8112_v20  ;;  %v14367_v28 = vpop.f32.mrb[33].mxu0  ;;  %14401 = vmatmul.mubr.f32.vlgmr.msra.gmra.mrb[34].mxu0 %v8019_v3  ;;  %v8522_v20 = vld [vmem:[#allocation19 + $0x8] sm:$0xff]  ;;  %v8524_v3 = vld [vmem:[#allocation19 + $0x18] sm:$0xff] }
0x1013   :  { %16677 = vmatpush3.bf16.msra.mxu0 %v19205_v25  ;;  %14457 = vmatprep.mubr.msk.f32.mxu0 %vm17744_vm0, %v17745_v54  ;;  %v16682_v25 = vpack.c.bf16 %v8351_v0, %v8350_v33  ;;  %v8526_v28 = vld [vmem:[#allocation19 + $0x28] sm:$0xff]  ;;  %v8527_v33 = vld [vmem:[#allocation19 + $0x30] sm:$0xff]  ;;  %v8528_v0 = vld [vmem:[#allocation19 + $0x38] sm:$0xff] }
0x1014   :  { %16678 = vmatprep.subr.bf16.mxu0 %v17743_v52  ;;  %16653 = vmatpush3.bf16.msra.mxu1 %v16652_v63  ;;  %v16730_v63 = vpack.c.bf16 %v8522_v20, %v8521_v30  ;;  %v16739_v9 = vpack.c.bf16 %v8528_v0, %v8527_v33  ;;  %v10351_v20 = vld [vmem:[%s19733_s7 + $0x18] sm:$0xff]  ;;  %v10349_v33 = vld [vmem:[%s19733_s7 + $0x10] sm:$0xff] }
0x1015   :  { %16654 = vmatprep.subr.bf16.mxu1 %v17743_v52  ;;  %14446 = vmatprep.mubr.msk.f32.mxu1 %vm17744_vm0, %v17745_v54 }
0x1017   :  { %16680 = vmatpush3.bf16.msra.mxu0 %v19209_v49  ;;  %v16661_v49 = vpack.c.bf16 %v8194_v4, %v8193_v23  ;;  %v8533_v23 = vld [vmem:[#allocation19 + $0x60] sm:$0xff]  ;;  %v8534_v4 = vld [vmem:[#allocation19 + $0x68] sm:$0xff] }
0x1018   :  { %16656 = vmatpush3.bf16.msra.mxu1 %v16655_v47  ;;  %16681 = vmatprep.subr.bf16.mxu0 %v17743_v52  ;;  %v16736_v47 = vpack.c.bf16 %v8526_v28, %v8525_v14  ;;  %v9010_v14 = vld [vmem:[#allocation19 + $0x190] sm:$0xff]  ;;  %v9011_v28 = vld [vmem:[#allocation19 + $0x198] sm:$0xff] }
0x1019   :  { %16657 = vmatprep.subr.bf16.mxu1 %v17743_v52 }
0x101a   :  { %14458 = vmatmul.mubr.msk.f32.vlgmr.msra.gmra.mrb[36].mxu0 %vm6974_vm1, %v8275_v36  ;;  %v8530_v36 = vld [vmem:[#allocation19 + $0x48] sm:$0xff] }
0x101b   :  { %16683 = vmatpush3.bf16.msra.mxu0 %v16682_v25  ;;  %14492 = vmatprep.mubr.msk.f32.mxu0 %vm17744_vm0, %v17745_v54  ;;  %v16742_v25 = vpack.c.bf16 %v8530_v36, %v8529_v27  ;;  %v8847_v27 = vld [vmem:[#allocation19 + $0x110] sm:$0xff]  ;;  %v8848_v36 = vld [vmem:[#allocation19 + $0x118] sm:$0xff] }
0x101c   :  { %16659 = vmatpush3.bf16.msra.mxu1 %v16658_v11  ;;  %16684 = vmatprep.subr.bf16.mxu0 %v17743_v52  ;;  %v8531_v11 = vld [vmem:[#allocation19 + $0x50] sm:$0xff] }
0x101d   :  { %16660 = vmatprep.subr.bf16.mxu1 %v17743_v52  ;;  %v16745_v19 = vpack.c.bf16 %v8532_v62, %v8531_v11  ;;  %v9013_v11 = vld [vmem:[#allocation19 + $0x1a8] sm:$0xff]  ;;  %v16757_v62 = vpack.c.bf16 %v8848_v36, %v8847_v27  ;;  %v9338_v27 = vld [vmem:[#allocation19 + $0x2a0] sm:$0xff] }
0x101e   :  { %v9339_v36 = vld [vmem:[#allocation19 + $0x2a8] sm:$0xff] }
0x101f   :  { %16686 = vmatpush3.bf16.msra.mxu0 %v16685_v59  ;;  %v16748_v59 = vpack.c.bf16 %v8534_v4, %v8533_v23  ;;  %v8849_v23 = vld [vmem:[#allocation19 + $0x120] sm:$0xff]  ;;  %v8850_v4 = vld [vmem:[#allocation19 + $0x128] sm:$0xff] }
0x1020   :  { %16662 = vmatpush3.bf16.msra.mxu1 %v16661_v49  ;;  %16687 = vmatprep.subr.bf16.mxu0 %v17743_v52  ;;  %v8535_v49 = vld [vmem:[#allocation19 + $0x70] sm:$0xff] }
0x1021   :  { %16663 = vmatprep.subr.bf16.mxu1 %v17743_v52  ;;  %v16751_v16 = vpack.c.bf16 %v8536_v8, %v8535_v49  ;;  %v9015_v49 = vld [vmem:[#allocation19 + $0x1b8] sm:$0xff]  ;;  %v16760_v8 = vpack.c.bf16 %v8850_v4, %v8849_v23  ;;  %v9340_v23 = vld [vmem:[#allocation19 + $0x2b0] sm:$0xff] }
0x1022   :  { %v9341_v4 = vld [vmem:[#allocation19 + $0x2b8] sm:$0xff] }
0x1023   :  { %16689 = vmatpush3.bf16.msra.mxu0 %v16688_v50 }
0x1024   :  { %16665 = vmatpush3.bf16.msra.mxu1 %v16664_v21  ;;  %16690 = vmatprep.subr.bf16.mxu0 %v17743_v52 }
0x1025   :  { %16666 = vmatprep.subr.bf16.mxu1 %v17743_v52 }
0x1027   :  { %16692 = vmatpush3.bf16.msra.mxu0 %v16691_v40 }
0x1028   :  { %16668 = vmatpush3.bf16.msra.mxu1 %v16667_v56  ;;  %16693 = vmatprep.subr.bf16.mxu0 %v17743_v52  ;;  %v8446_v56 = vld [vmem:[%s19733_s7] sm:$0xff] }
0x1029   :  { %16669 = vmatprep.subr.bf16.mxu1 %v17743_v52 }
0x102b   :  { %16695 = vmatpush3.bf16.msra.mxu0 %v16694_v53  ;;  %v8616_v53 = vld [vmem:[#allocation19 + $0x98] sm:$0xff] }
0x102c   :  { %16671 = vmatpush3.bf16.msra.mxu1 %v16670_v41  ;;  %16696 = vmatprep.subr.bf16.mxu0 %v17743_v52  ;;  %v16706_v41 = vpack.c.bf16 %v8614_v29, %v8613_v32  ;;  %v16709_v55 = vpack.c.bf16 %v8616_v53, %v8615_v44  ;;  %v9019_v32 = vld [vmem:[#allocation19 + $0x1d8] sm:$0xff]  ;;  %v9020_v53 = vld [vmem:[#allocation19 + $0x1e0] sm:$0xff] }
0x102d   :  { %16672 = vmatprep.subr.bf16.mxu1 %v17743_v52  ;;  %v8856_v44 = vld [vmem:[#allocation19 + $0x158] sm:$0xff] }
0x102f   :  { %16698 = vmatpush3.bf16.msra.mxu0 %v16697_v18  ;;  %v8620_v18 = vld [vmem:[#allocation19 + $0xb8] sm:$0xff] }
0x1030   :  { %16674 = vmatpush3.bf16.msra.mxu1 %v16673_v57  ;;  %16699 = vmatprep.subr.bf16.mxu0 %v17743_v52  ;;  %v16712_v57 = vpack.c.bf16 %v8618_v6, %v8617_v31  ;;  %v16715_v37 = vpack.c.bf16 %v8620_v18, %v8619_v2  ;;  %v8858_v2 = vld [vmem:[#allocation19 + $0x168] sm:$0xff]  ;;  %v9022_v18 = vld [vmem:[#allocation19 + $0x1f0] sm:$0xff] }
0x1031   :  { %14495 = vmatprep.subr.mxu1 %v17745_v54 }
0x1033   :  { %16701 = vmatpush3.bf16.msra.mxu0 %v16700_v51  ;;  %v8622_v51 = vld [vmem:[#allocation19 + $0xc8] sm:$0xff] }
0x1034   :  { %16702 = vmatprep.subr.bf16.mxu0 %v17743_v52  ;;  %v16718_v1 = vpack.c.bf16 %v8622_v51, %v8621_v13 }
0x1037   :  { %16704 = vmatpush3.bf16.msra.mxu0 %v16703_v60  ;;  %v8624_v60 = vld [vmem:[#allocation19 + $0xd8] sm:$0xff] }
0x1038   :  { %16729 = vmatprep.subr.bf16.mxu0 %v17743_v52 }
0x10dd   :  { %v7943_v48 = vpop.f32.mrb[110].mxu1 }
0x10de   :  { %v7947_v43 = vadd.f32 %v7943_v48, %v19322_v45  ;;  %v14356_v15 = vpop.f32.mrb[111].mxu1  ;;  %v8523_v45 = vld [vmem:[#allocation19 + $0x10] sm:$0xff]  ;;  %v16721_v48 = vpack.c.bf16 %v8624_v60, %v8623_v7  ;;  %v8860_v7 = vld [vmem:[#allocation19 + $0x178] sm:$0xff] }
0x10df   :  { %v16733_v35 = vpack.c.bf16 %v8524_v3, %v8523_v45  ;;  %v8626_v15 = vld [vmem:[#allocation19 + $0xe8] sm:$0xff]  ;;  %v8845_v45 = vld [vmem:[#allocation19 + $0x100] sm:$0xff] }
0x10e0   :  { %v8846_v3 = vld [vmem:[#allocation19 + $0x108] sm:$0xff] }
0x10e1   :  { %v16754_v0 = vpack.c.bf16 %v8846_v3, %v8845_v45  ;;  %v9336_v3 = vld [vmem:[#allocation19 + $0x290] sm:$0xff] }
0x10e5   :  { %v8182_v5 = vpop.f32.mrb[112].mxu1  ;;  %v8106_v38 = vpop.f32.mrb[34].mxu0 }
0x10e6   :  { %v8110_v58 = vadd.f32 %v8106_v38, %v7947_v43  ;;  %14447 = vmatmul.mubr.f32.vlgmr.msra.gmra.mrb[114].mxu1 %v8182_v5  ;;  %v14402_v10 = vpop.f32.mrb[35].mxu0  ;;  %v14413_v42 = vpop.f32.mrb[113].mxu1  ;;  %v8625_v43 = vld [vmem:[#allocation19 + $0xe0] sm:$0xff]  ;;  %v8627_v38 = vld [vmem:[#allocation19 + $0xf0] sm:$0xff] }
0x10e7   :  { %14497 = vmatprep.mubr.msk.f32.mxu1 %vm17744_vm0, %v17745_v54  ;;  %v16724_v5 = vpack.c.bf16 %v8626_v15, %v8625_v43 }
0x10ed   :  { %v8345_v22 = vpop.f32.mrb[36].mxu0 }
0x10ee   :  { %v14459_v17 = vpop.f32.mrb[37].mxu0  ;;  %14493 = vmatmul.mubr.f32.vlgmr.msra.gmra.mrb[38].mxu0 %v8345_v22  ;;  %v9008_v22 = vld [vmem:[#allocation19 + $0x180] sm:$0xff] }
0x10ef   :  { %14572 = vmatprep.mubr.msk.f32.mxu0 %vm17744_vm0, %v17745_v54  ;;  %16731 = vmatpush3.bf16.msra.mxu0 %v16730_v63  ;;  %v9009_v17 = vld [vmem:[#allocation19 + $0x188] sm:$0xff] }
0x10f0   :  { %16732 = vmatprep.subr.bf16.mxu0 %v17743_v52  ;;  %v16778_v63 = vpack.c.bf16 %v9009_v17, %v9008_v22  ;;  %v10355_v17 = vld [vmem:[%s19733_s7 + $0x28] sm:$0xff] }
0x10f3   :  { %16734 = vmatpush3.bf16.msra.mxu0 %v16733_v35 }
0x10f4   :  { %16735 = vmatprep.subr.bf16.mxu0 %v17743_v52 }
0x10f7   :  { %16737 = vmatpush3.bf16.msra.mxu0 %v16736_v47 }
0x10f8   :  { %16738 = vmatprep.subr.bf16.mxu0 %v17743_v52 }
0x10fb   :  { %16740 = vmatpush3.bf16.msra.mxu0 %v16739_v9  ;;  %v16781_v9 = vpack.c.bf16 %v9011_v28, %v9010_v14  ;;  %v10353_v28 = vld [vmem:[%s19733_s7 + $0x20] sm:$0xff] }
0x10fc   :  { %16741 = vmatprep.subr.bf16.mxu0 %v17743_v52 }
0x10ff   :  { %16743 = vmatpush3.bf16.msra.mxu0 %v16742_v25  ;;  %v9012_v25 = vld [vmem:[#allocation19 + $0x1a0] sm:$0xff] }
0x1100   :  { %16744 = vmatprep.subr.bf16.mxu0 %v17743_v52 }
0x1103   :  { %16746 = vmatpush3.bf16.msra.mxu0 %v16745_v19  ;;  %v16784_v19 = vpack.c.bf16 %v9013_v11, %v9012_v25  ;;  %v16832_v11 = vpack.c.bf16 %v9339_v36, %v9338_v27  ;;  %v9665_v27 = vld [vmem:[#allocation19 + $0x3a8] sm:$0xff] }
0x1104   :  { %16747 = vmatprep.subr.bf16.mxu0 %v17743_v52 }
0x1107   :  { %16749 = vmatpush3.bf16.msra.mxu0 %v16748_v59  ;;  %v9014_v59 = vld [vmem:[#allocation19 + $0x1b0] sm:$0xff] }
0x1108   :  { %16750 = vmatprep.subr.bf16.mxu0 %v17743_v52 }
0x110b   :  { %16752 = vmatpush3.bf16.msra.mxu0 %v16751_v16  ;;  %v16787_v16 = vpack.c.bf16 %v9015_v49, %v9014_v59  ;;  %v16835_v49 = vpack.c.bf16 %v9341_v4, %v9340_v23  ;;  %v9667_v23 = vld [vmem:[#allocation19 + $0x3b8] sm:$0xff] }
0x110c   :  { %14615 = vmatprep.subr.mxu0 %v17745_v54 }
0x11b9   :  { %v8269_v26 = vpop.f32.mrb[114].mxu1 }
0x11ba   :  { %v8273_v34 = vadd.f32 %v8269_v26, %v8110_v58  ;;  %v14448_v50 = vpop.f32.mrb[115].mxu1  ;;  %v8628_v58 = vld [vmem:[#allocation19 + $0xf8] sm:$0xff]  ;;  %v8851_v26 = vld [vmem:[#allocation19 + $0x130] sm:$0xff] }
0x11bb   :  { %v16727_v10 = vpack.c.bf16 %v8628_v58, %v8627_v38  ;;  %v9016_v50 = vld [vmem:[#allocation19 + $0x1c0] sm:$0xff]  ;;  %v9335_v58 = vld [vmem:[#allocation19 + $0x288] sm:$0xff] }
0x11bc   :  { %v9334_v38 = vld [vmem:[#allocation19 + $0x280] sm:$0xff] }
0x11c1   :  { %v8432_v21 = vpop.f32.mrb[38].mxu0 }
0x11c2   :  { %v8436_v12 = vadd.f32 %v8432_v21, %v8273_v34  ;;  %v14494_v24 = vpop.f32.mrb[39].mxu0  ;;  %v8852_v34 = vld [vmem:[#allocation19 + $0x138] sm:$0xff]  ;;  %v9017_v21 = vld [vmem:[#allocation19 + $0x1c8] sm:$0xff] }
0x11c3   :  { %v8853_v24 = vld [vmem:[#allocation19 + $0x140] sm:$0xff] }
0x11c4   :  { %v8444_v61 = vadd.f32 %v10345_v39, %v8436_v12  ;;  %v16763_v39 = vpack.c.bf16 %v8852_v34, %v8851_v26  ;;  %v16790_v12 = vpack.c.bf16 %v9017_v21, %v9016_v50  ;;  %v9342_v26 = vld [vmem:[#allocation19 + $0x2c0] sm:$0xff]  ;;  %v9343_v34 = vld [vmem:[#allocation19 + $0x2c8] sm:$0xff] }
0x11c5   :  { %v16838_v21 = vpack.c.bf16 %v9343_v34, %v9342_v26  ;;  %v9669_v26 = vld [vmem:[#allocation19 + $0x3c8] sm:$0xff] }
0x11c6   :  { %v19371_v40 = vmax.f32 %v8444_v61, 0.0  ;;  %v8854_v61 = vld [vmem:[#allocation19 + $0x148] sm:$0xff] }
0x11c7   :  { %v16766_v29 = vpack.c.bf16 %v8854_v61, %v8853_v24  ;;  %v9344_v24 = vld [vmem:[#allocation19 + $0x2d0] sm:$0xff]  ;;  %v9345_v61 = vld [vmem:[#allocation19 + $0x2d8] sm:$0xff] }
0x11c8   :  { %14496 = vmatpush3.msra.mxu1 %v19371_v40 }
0x11c9   :  { %14498 = vmatmul.mubr.msk.f32.vlgmr.msra.gmra.mrb[116].mxu1 %vm8447_vm2, %v8446_v56  ;;  %14500 = vmatprep.subr.mxu1 %v17745_v54  ;;  %v9018_v56 = vld [vmem:[#allocation19 + $0x1d0] sm:$0xff] }
0x11ca   :  { %14501 = vmatpush3.msra.mxu1 %v19371_v40  ;;  %14502 = vmatprep.mubr.msk.f32.mxu1 %vm17744_vm0, %v17745_v54 }
0x11cb   :  { %16705 = vmatprep.subr.bf16.mxu1 %v17743_v52 }
0x11cd   :  { %14503 = vmatmul.mubr.msk.f32.vlgmr.msra.gmra.mrb[118].mxu1 %vm8447_vm2, %v10347_v46  ;;  %v16793_v46 = vpack.c.bf16 %v9019_v32, %v9018_v56  ;;  %v16841_v32 = vpack.c.bf16 %v9345_v61, %v9344_v24  ;;  %v9671_v24 = vld [vmem:[#allocation19 + $0x3d8] sm:$0xff] }
0x11ce   :  { %16707 = vmatpush3.bf16.msra.mxu1 %v16706_v41  ;;  %14537 = vmatprep.mubr.msk.f32.mxu1 %vm17744_vm0, %v17745_v54  ;;  %v8855_v41 = vld [vmem:[#allocation19 + $0x150] sm:$0xff] }
0x11cf   :  { %16708 = vmatprep.subr.bf16.mxu1 %v17743_v52  ;;  %v16769_v31 = vpack.c.bf16 %v8856_v44, %v8855_v41  ;;  %v9346_v41 = vld [vmem:[#allocation19 + $0x2e0] sm:$0xff]  ;;  %v9347_v44 = vld [vmem:[#allocation19 + $0x2e8] sm:$0xff] }
0x11d2   :  { %16710 = vmatpush3.bf16.msra.mxu1 %v16709_v55  ;;  %v9021_v55 = vld [vmem:[#allocation19 + $0x1e8] sm:$0xff] }
0x11d3   :  { %16711 = vmatprep.subr.bf16.mxu1 %v17743_v52  ;;  %v16796_v6 = vpack.c.bf16 %v9021_v55, %v9020_v53  ;;  %v16844_v55 = vpack.c.bf16 %v9347_v44, %v9346_v41  ;;  %v9509_v41 = vld [vmem:[#allocation19 + $0x360] sm:$0xff]  ;;  %v9510_v44 = vld [vmem:[#allocation19 + $0x368] sm:$0xff] }
0x11d6   :  { %16713 = vmatpush3.bf16.msra.mxu1 %v16712_v57  ;;  %v8857_v57 = vld [vmem:[#allocation19 + $0x160] sm:$0xff] }
0x11d7   :  { %16714 = vmatprep.subr.bf16.mxu1 %v17743_v52  ;;  %v16772_v13 = vpack.c.bf16 %v8858_v2, %v8857_v57  ;;  %v9348_v57 = vld [vmem:[#allocation19 + $0x2f0] sm:$0xff]  ;;  %v9349_v2 = vld [vmem:[#allocation19 + $0x2f8] sm:$0xff] }
0x11da   :  { %16716 = vmatpush3.bf16.msra.mxu1 %v16715_v37  ;;  %v9023_v37 = vld [vmem:[#allocation19 + $0x1f8] sm:$0xff] }
0x11db   :  { %16717 = vmatprep.subr.bf16.mxu1 %v17743_v52  ;;  %v16799_v51 = vpack.c.bf16 %v9023_v37, %v9022_v18  ;;  %v16847_v37 = vpack.c.bf16 %v9349_v2, %v9348_v57  ;;  %v9511_v57 = vld [vmem:[#allocation19 + $0x370] sm:$0xff]  ;;  %v9512_v2 = vld [vmem:[#allocation19 + $0x378] sm:$0xff] }
0x11de   :  { %16719 = vmatpush3.bf16.msra.mxu1 %v16718_v1  ;;  %v8859_v1 = vld [vmem:[#allocation19 + $0x170] sm:$0xff] }
0x11df   :  { %16720 = vmatprep.subr.bf16.mxu1 %v17743_v52  ;;  %v16775_v60 = vpack.c.bf16 %v8860_v7, %v8859_v1 }
0x11e2   :  { %16722 = vmatpush3.bf16.msra.mxu1 %v16721_v48 }
0x11e3   :  { %16723 = vmatprep.subr.bf16.mxu1 %v17743_v52 }
0x11e6   :  { %16725 = vmatpush3.bf16.msra.mxu1 %v16724_v5 }
0x11e7   :  { %16726 = vmatprep.subr.bf16.mxu1 %v17743_v52 }
0x11ea   :  { %16728 = vmatpush3.bf16.msra.mxu1 %v16727_v10 }
0x11eb   :  { %14575 = vmatprep.subr.mxu1 %v17745_v54 }
0x129c   :  { %v8517_v42 = vpop.f32.mrb[116].mxu1 }
0x129d   :  { %14573 = vmatmul.mubr.f32.vlgmr.msra.gmra.mrb[40].mxu0 %v8517_v42  ;;  %v14499_v30 = vpop.f32.mrb[117].mxu1 }
0x129e   :  { %14616 = vmatpush3.msra.mxu0 %v19371_v40  ;;  %14617 = vmatprep.mubr.msk.f32.mxu0 %vm17744_vm0, %v17745_v54  ;;  %v16826_v30 = vpack.c.bf16 %v9335_v58, %v9334_v38 }
0x129f   :  { %16777 = vmatprep.subr.bf16.mxu0 %v17743_v52 }
0x12a0   :  { %v8608_v35 = vpop.f32.mrb[118].mxu1 }
0x12a1   :  { %14538 = vmatmul.mubr.f32.vlgmr.msra.gmra.mrb[120].mxu1 %v8608_v35  ;;  %14618 = vmatmul.mubr.msk.f32.vlgmr.msra.gmra.mrb[42].mxu0 %vm8447_vm2, %v10351_v20  ;;  %v14504_v47 = vpop.f32.mrb[119].mxu1  ;;  %v9171_v20 = vld [vmem:[#allocation19 + $0x200] sm:$0xff]  ;;  %v9337_v35 = vld [vmem:[#allocation19 + $0x298] sm:$0xff] }
0x12a2   :  { %14576 = vmatpush3.msra.mxu1 %v19371_v40  ;;  %14577 = vmatprep.mubr.msk.f32.mxu1 %vm17744_vm0, %v17745_v54 }
0x12a3   :  { %16779 = vmatpush3.bf16.msra.mxu0 %v16778_v63  ;;  %16753 = vmatprep.subr.bf16.mxu1 %v17743_v52  ;;  %v9172_v63 = vld [vmem:[#allocation19 + $0x208] sm:$0xff] }
0x12a4   :  { %16780 = vmatprep.subr.bf16.mxu0 %v17743_v52  ;;  %14652 = vmatprep.mubr.msk.f32.mxu0 %vm17744_vm0, %v17745_v54  ;;  %v16802_v47 = vpack.c.bf16 %v9172_v63, %v9171_v20 }
0x12a5   :  { %14578 = vmatmul.mubr.msk.f32.vlgmr.msra.gmra.mrb[122].mxu1 %vm8447_vm2, %v10349_v33  ;;  %v16829_v33 = vpack.c.bf16 %v9337_v35, %v9336_v3  ;;  %v9663_v3 = vld [vmem:[#allocation19 + $0x398] sm:$0xff] }
0x12a6   :  { %16755 = vmatpush3.bf16.msra.mxu1 %v16754_v0  ;;  %14612 = vmatprep.mubr.msk.f32.mxu1 %vm17744_vm0, %v17745_v54  ;;  %v9173_v0 = vld [vmem:[#allocation19 + $0x210] sm:$0xff] }
0x12a7   :  { %16782 = vmatpush3.bf16.msra.mxu0 %v16781_v9  ;;  %16756 = vmatprep.subr.bf16.mxu1 %v17743_v52  ;;  %v9174_v9 = vld [vmem:[#allocation19 + $0x218] sm:$0xff] }
0x12a8   :  { %16783 = vmatprep.subr.bf16.mxu0 %v17743_v52  ;;  %v16805_v25 = vpack.c.bf16 %v9174_v9, %v9173_v0  ;;  %v9664_v9 = vld [vmem:[#allocation19 + $0x3a0] sm:$0xff] }
0x12aa   :  { %16758 = vmatpush3.bf16.msra.mxu1 %v16757_v62  ;;  %v9175_v62 = vld [vmem:[#allocation19 + $0x220] sm:$0xff] }
0x12ab   :  { %16785 = vmatpush3.bf16.msra.mxu0 %v16784_v19  ;;  %16759 = vmatprep.subr.bf16.mxu1 %v17743_v52  ;;  %v9176_v19 = vld [vmem:[#allocation19 + $0x228] sm:$0xff] }
0x12ac   :  { %16786 = vmatprep.subr.bf16.mxu0 %v17743_v52  ;;  %v16808_v59 = vpack.c.bf16 %v9176_v19, %v9175_v62  ;;  %v16880_v62 = vpack.c.bf16 %v9665_v27, %v9664_v9  ;;  %v9666_v19 = vld [vmem:[#allocation19 + $0x3b0] sm:$0xff] }
0x12ad   :  { %v9833_v27 = vld [vmem:[#allocation19 + $0x450] sm:$0xff] }
0x12ae   :  { %16761 = vmatpush3.bf16.msra.mxu1 %v16760_v8  ;;  %v9177_v8 = vld [vmem:[#allocation19 + $0x230] sm:$0xff] }
0x12af   :  { %16788 = vmatpush3.bf16.msra.mxu0 %v16787_v16  ;;  %16762 = vmatprep.subr.bf16.mxu1 %v17743_v52  ;;  %v9178_v16 = vld [vmem:[#allocation19 + $0x238] sm:$0xff] }
0x12b0   :  { %16789 = vmatprep.subr.bf16.mxu0 %v17743_v52  ;;  %v16811_v50 = vpack.c.bf16 %v9178_v16, %v9177_v8  ;;  %v16883_v8 = vpack.c.bf16 %v9667_v23, %v9666_v19  ;;  %v9668_v16 = vld [vmem:[#allocation19 + $0x3c0] sm:$0xff]  ;;  %v9837_v23 = vld [vmem:[#allocation19 + $0x470] sm:$0xff] }
0x12b2   :  { %16764 = vmatpush3.bf16.msra.mxu1 %v16763_v39  ;;  %v9179_v39 = vld [vmem:[#allocation19 + $0x240] sm:$0xff] }
0x12b3   :  { %16791 = vmatpush3.bf16.msra.mxu0 %v16790_v12  ;;  %16765 = vmatprep.subr.bf16.mxu1 %v17743_v52  ;;  %v9180_v12 = vld [vmem:[#allocation19 + $0x248] sm:$0xff] }
0x12b4   :  { %16792 = vmatprep.subr.bf16.mxu0 %v17743_v52  ;;  %v16814_v56 = vpack.c.bf16 %v9180_v12, %v9179_v39  ;;  %v16886_v39 = vpack.c.bf16 %v9669_v26, %v9668_v16  ;;  %v9670_v12 = vld [vmem:[#allocation19 + $0x3d0] sm:$0xff] }
0x12b5   :  { %v9921_v16 = vld [vmem:[#allocation22 + $0x10] sm:$0xff] }
0x12b6   :  { %16767 = vmatpush3.bf16.msra.mxu1 %v16766_v29  ;;  %v9181_v29 = vld [vmem:[#allocation19 + $0x250] sm:$0xff] }
0x12b7   :  { %16794 = vmatpush3.bf16.msra.mxu0 %v16793_v46  ;;  %16768 = vmatprep.subr.bf16.mxu1 %v17743_v52  ;;  %v9182_v46 = vld [vmem:[#allocation19 + $0x258] sm:$0xff] }
0x12b8   :  { %16795 = vmatprep.subr.bf16.mxu0 %v17743_v52  ;;  %v16817_v53 = vpack.c.bf16 %v9182_v46, %v9181_v29  ;;  %v16889_v29 = vpack.c.bf16 %v9671_v24, %v9670_v12  ;;  %v9925_v24 = vld [vmem:[#allocation22 + $0x30] sm:$0xff] }
0x12ba   :  { %16770 = vmatpush3.bf16.msra.mxu1 %v16769_v31  ;;  %v9183_v31 = vld [vmem:[#allocation19 + $0x260] sm:$0xff] }
0x12bb   :  { %16797 = vmatpush3.bf16.msra.mxu0 %v16796_v6  ;;  %16771 = vmatprep.subr.bf16.mxu1 %v17743_v52  ;;  %v9184_v6 = vld [vmem:[#allocation19 + $0x268] sm:$0xff] }
0x12bc   :  { %16798 = vmatprep.subr.bf16.mxu0 %v17743_v52  ;;  %v16820_v18 = vpack.c.bf16 %v9184_v6, %v9183_v31  ;;  %v9673_v31 = vld [vmem:[#allocation19 + $0x3e8] sm:$0xff] }
0x12be   :  { %16773 = vmatpush3.bf16.msra.mxu1 %v16772_v13  ;;  %v9185_v13 = vld [vmem:[#allocation19 + $0x270] sm:$0xff] }
0x12bf   :  { %16800 = vmatpush3.bf16.msra.mxu0 %v16799_v51  ;;  %16774 = vmatprep.subr.bf16.mxu1 %v17743_v52  ;;  %v9186_v51 = vld [vmem:[#allocation19 + $0x278] sm:$0xff] }
0x12c0   :  { %14695 = vmatprep.subr.mxu0 %v17745_v54  ;;  %v16823_v1 = vpack.c.bf16 %v9186_v51, %v9185_v13  ;;  %v9675_v13 = vld [vmem:[#allocation19 + $0x3f8] sm:$0xff] }
0x12c2   :  { %16776 = vmatpush3.bf16.msra.mxu1 %v16775_v60 }
0x12c3   :  { %14655 = vmatprep.subr.mxu1 %v17745_v54 }
0x1370   :  { %v8765_v48 = vpop.f32.mrb[40].mxu0 }
0x1371   :  { %v14574_v43 = vpop.f32.mrb[41].mxu0 }
0x1374   :  { %v8695_v15 = vpop.f32.mrb[120].mxu1  ;;  %v9003_v5 = vpop.f32.mrb[42].mxu0 }
0x1375   :  { %v19433_v10 = vadd.f32 %v8765_v48, %v8695_v15  ;;  %14653 = vmatmul.mubr.f32.vlgmr.msra.gmra.mrb[44].mxu0 %v9003_v5  ;;  %v14539_v42 = vpop.f32.mrb[121].mxu1  ;;  %v14619_v22 = vpop.f32.mrb[43].mxu0  ;;  %v9660_v15 = vld [vmem:[#allocation19 + $0x380] sm:$0xff]  ;;  %v9661_v5 = vld [vmem:[#allocation19 + $0x388] sm:$0xff] }
0x1376   :  { %14696 = vmatpush3.msra.mxu0 %v19371_v40  ;;  %14697 = vmatprep.mubr.msk.f32.mxu0 %vm17744_vm0, %v17745_v54  ;;  %v10359_v22 = vld [vmem:[%s19733_s7 + $0x38] sm:$0xff]  ;;  %v16874_v20 = vpack.c.bf16 %v9661_v5, %v9660_v15 }
0x1377   :  { %16825 = vmatprep.subr.bf16.mxu0 %v17743_v52 }
0x1378   :  { %v8840_v45 = vpop.f32.mrb[122].mxu1 }
0x1379   :  { %14613 = vmatmul.mubr.f32.vlgmr.msra.gmra.mrb[124].mxu1 %v8840_v45  ;;  %14698 = vmatmul.mubr.msk.f32.vlgmr.msra.gmra.mrb[46].mxu0 %vm8447_vm2, %v10355_v17  ;;  %v14579_v14 = vpop.f32.mrb[123].mxu1  ;;  %v9497_v17 = vld [vmem:[#allocation19 + $0x300] sm:$0xff]  ;;  %v9662_v45 = vld [vmem:[#allocation19 + $0x390] sm:$0xff] }
0x137a   :  { %14656 = vmatpush3.msra.mxu1 %v19371_v40  ;;  %14657 = vmatprep.mubr.msk.f32.mxu1 %vm17744_vm0, %v17745_v54  ;;  %v10357_v14 = vld [vmem:[%s19733_s7 + $0x30] sm:$0xff]  ;;  %v16877_v0 = vpack.c.bf16 %v9663_v3, %v9662_v45 }
0x137b   :  { %16827 = vmatpush3.bf16.msra.mxu0 %v16826_v30  ;;  %16801 = vmatprep.subr.bf16.mxu1 %v17743_v52  ;;  %v9498_v30 = vld [vmem:[#allocation19 + $0x308] sm:$0xff] }
0x137c   :  { %16828 = vmatprep.subr.bf16.mxu0 %v17743_v52  ;;  %14732 = vmatprep.mubr.msk.f32.mxu0 %vm17744_vm0, %v17745_v54  ;;  %v9828_v3 = vld [vmem:[#allocation19 + $0x428] sm:$0xff] }
0x137d   :  { %14658 = vmatmul.mubr.msk.f32.vlgmr.msra.gmra.mrb[126].mxu1 %vm8447_vm2, %v10353_v28  ;;  %v16850_v28 = vpack.c.bf16 %v9498_v30, %v9497_v17  ;;  %v10361_v30 = vld [vmem:[%s19733_s7 + $0x40] sm:$0xff] }
0x137e   :  { %16803 = vmatpush3.bf16.msra.mxu1 %v16802_v47  ;;  %14692 = vmatprep.mubr.msk.f32.mxu1 %vm17744_vm0, %v17745_v54  ;;  %v9499_v47 = vld [vmem:[#allocation19 + $0x310] sm:$0xff] }
0x137f   :  { %16830 = vmatpush3.bf16.msra.mxu0 %v16829_v33  ;;  %16804 = vmatprep.subr.bf16.mxu1 %v17743_v52  ;;  %v9500_v33 = vld [vmem:[#allocation19 + $0x318] sm:$0xff] }
0x1380   :  { %16831 = vmatprep.subr.bf16.mxu0 %v17743_v52  ;;  %v16853_v36 = vpack.c.bf16 %v9500_v33, %v9499_v47  ;;  %v9831_v33 = vld [vmem:[#allocation19 + $0x440] sm:$0xff] }
0x1382   :  { %16806 = vmatpush3.bf16.msra.mxu1 %v16805_v25  ;;  %v9501_v25 = vld [vmem:[#allocation19 + $0x320] sm:$0xff] }
0x1383   :  { %16833 = vmatpush3.bf16.msra.mxu0 %v16832_v11  ;;  %16807 = vmatprep.subr.bf16.mxu1 %v17743_v52  ;;  %v9502_v11 = vld [vmem:[#allocation19 + $0x328] sm:$0xff] }
0x1384   :  { %16834 = vmatprep.subr.bf16.mxu0 %v17743_v52  ;;  %v16856_v4 = vpack.c.bf16 %v9502_v11, %v9501_v25  ;;  %v9835_v11 = vld [vmem:[#allocation19 + $0x460] sm:$0xff] }
0x1386   :  { %16809 = vmatpush3.bf16.msra.mxu1 %v16808_v59  ;;  %v9503_v59 = vld [vmem:[#allocation19 + $0x330] sm:$0xff] }
0x1387   :  { %16836 = vmatpush3.bf16.msra.mxu0 %v16835_v49  ;;  %16810 = vmatprep.subr.bf16.mxu1 %v17743_v52  ;;  %v9504_v49 = vld [vmem:[#allocation19 + $0x338] sm:$0xff] }
0x1388   :  { %16837 = vmatprep.subr.bf16.mxu0 %v17743_v52  ;;  %v16859_v34 = vpack.c.bf16 %v9504_v49, %v9503_v59  ;;  %v9919_v49 = vld [vmem:[#allocation22] sm:$0xff] }
0x138a   :  { %16812 = vmatpush3.bf16.msra.mxu1 %v16811_v50  ;;  %v9505_v50 = vld [vmem:[#allocation19 + $0x340] sm:$0xff] }
0x138b   :  { %16839 = vmatpush3.bf16.msra.mxu0 %v16838_v21  ;;  %16813 = vmatprep.subr.bf16.mxu1 %v17743_v52  ;;  %v9506_v21 = vld [vmem:[#allocation19 + $0x348] sm:$0xff] }
0x138c   :  { %16840 = vmatprep.subr.bf16.mxu0 %v17743_v52  ;;  %v16862_v61 = vpack.c.bf16 %v9506_v21, %v9505_v50  ;;  %v9923_v21 = vld [vmem:[#allocation22 + $0x20] sm:$0xff] }
0x138e   :  { %16815 = vmatpush3.bf16.msra.mxu1 %v16814_v56  ;;  %v9507_v56 = vld [vmem:[#allocation19 + $0x350] sm:$0xff] }
0x138f   :  { %16842 = vmatpush3.bf16.msra.mxu0 %v16841_v32  ;;  %16816 = vmatprep.subr.bf16.mxu1 %v17743_v52  ;;  %v9508_v32 = vld [vmem:[#allocation19 + $0x358] sm:$0xff] }
0x1390   :  { %16843 = vmatprep.subr.bf16.mxu0 %v17743_v52  ;;  %v16865_v46 = vpack.c.bf16 %v9508_v32, %v9507_v56  ;;  %v9927_v32 = vld [vmem:[#allocation22 + $0x40] sm:$0xff] }
0x1392   :  { %16818 = vmatpush3.bf16.msra.mxu1 %v16817_v53  ;;  %v16868_v53 = vpack.c.bf16 %v9510_v44, %v9509_v41  ;;  %v9929_v41 = vld [vmem:[#allocation22 + $0x50] sm:$0xff]  ;;  %v9930_v44 = vld [vmem:[#allocation22 + $0x58] sm:$0xff] }
0x1393   :  { %16845 = vmatpush3.bf16.msra.mxu0 %v16844_v55  ;;  %16819 = vmatprep.subr.bf16.mxu1 %v17743_v52  ;;  %v9672_v55 = vld [vmem:[#allocation19 + $0x3e0] sm:$0xff] }
0x1394   :  { %16846 = vmatprep.subr.bf16.mxu0 %v17743_v52  ;;  %v16892_v6 = vpack.c.bf16 %v9673_v31, %v9672_v55 }
0x1396   :  { %16821 = vmatpush3.bf16.msra.mxu1 %v16820_v18  ;;  %v16871_v18 = vpack.c.bf16 %v9512_v2, %v9511_v57 }
0x1397   :  { %16848 = vmatpush3.bf16.msra.mxu0 %v16847_v37  ;;  %16822 = vmatprep.subr.bf16.mxu1 %v17743_v52  ;;  %v9674_v37 = vld [vmem:[#allocation19 + $0x3f0] sm:$0xff] }
0x1398   :  { %14775 = vmatprep.subr.mxu0 %v17745_v54  ;;  %v16895_v51 = vpack.c.bf16 %v9675_v13, %v9674_v37 }
0x139a   :  { %16824 = vmatpush3.bf16.msra.mxu1 %v16823_v1 }
0x139b   :  { %14735 = vmatprep.subr.mxu1 %v17745_v54 }
0x1448   :  { %v9090_v7 = vpop.f32.mrb[44].mxu0 }
0x1449   :  { %v14654_v60 = vpop.f32.mrb[45].mxu0 }
0x144c   :  { %v8927_v48 = vpop.f32.mrb[124].mxu1  ;;  %v9329_v43 = vpop.f32.mrb[46].mxu0 }
0x144d   :  { %v8931_v38 = vadd.f32 %v8927_v48, %v19433_v10  ;;  %14733 = vmatmul.mubr.f32.vlgmr.msra.gmra.mrb[48].mxu0 %v9329_v43  ;;  %v14614_v58 = vpop.f32.mrb[125].mxu1  ;;  %v14699_v42 = vpop.f32.mrb[47].mxu0 }
0x144e   :  { %14776 = vmatpush3.msra.mxu0 %v19371_v40  ;;  %14777 = vmatprep.mubr.msk.f32.mxu0 %vm17744_vm0, %v17745_v54  ;;  %v9823_v58 = vld [vmem:[#allocation19 + $0x400] sm:$0xff]  ;;  %v9824_v42 = vld [vmem:[#allocation19 + $0x408] sm:$0xff] }
0x144f   :  { %16873 = vmatprep.subr.bf16.mxu0 %v17743_v52  ;;  %v19479_v63 = vadd.f32 %v9090_v7, %v8931_v38 }
0x1450   :  { %v9166_v10 = vpop.f32.mrb[126].mxu1 }
0x1451   :  { %14693 = vmatmul.mubr.f32.vlgmr.msra.gmra.mrb[128].mxu1 %v9166_v10  ;;  %v14659_v35 = vpop.f32.mrb[127].mxu1  ;;  %14778 = vmatmul.mubr.msk.f32.vlgmr.msra.gmra.mrb[50].mxu0 %vm8447_vm2, %v10359_v22  ;;  %v9826_v10 = vld [vmem:[#allocation19 + $0x418] sm:$0xff] }
0x1452   :  { %14736 = vmatpush3.msra.mxu1 %v19371_v40  ;;  %14737 = vmatprep.mubr.msk.f32.mxu1 %vm17744_vm0, %v17745_v54 }
0x1453   :  { %16849 = vmatprep.subr.bf16.mxu1 %v17743_v52  ;;  %16875 = vmatpush3.bf16.msra.mxu0 %v16874_v20  ;;  %v16898_v20 = vpack.c.bf16 %v9824_v42, %v9823_v58  ;;  %v10016_v42 = vld [vmem:[#allocation25 + $0x18] sm:$0xff] }
0x1454   :  { %16876 = vmatprep.subr.bf16.mxu0 %v17743_v52  ;;  %14812 = vmatprep.mubr.msk.f32.mxu0 %vm17744_vm0, %v17745_v54 }
0x1455   :  { %14738 = vmatmul.mubr.msk.f32.vlgmr.msra.gmra.mrb[130].mxu1 %vm8447_vm2, %v10357_v14  ;;  %v9829_v14 = vld [vmem:[#allocation19 + $0x430] sm:$0xff] }
0x1456   :  { %16851 = vmatpush3.bf16.msra.mxu1 %v16850_v28  ;;  %14772 = vmatprep.mubr.msk.f32.mxu1 %vm17744_vm0, %v17745_v54  ;;  %v9830_v28 = vld [vmem:[#allocation19 + $0x438] sm:$0xff] }
0x1457   :  { %16852 = vmatprep.subr.bf16.mxu1 %v17743_v52  ;;  %16878 = vmatpush3.bf16.msra.mxu0 %v16877_v0  ;;  %v16907_v47 = vpack.c.bf16 %v9830_v28, %v9829_v14  ;;  %v9832_v0 = vld [vmem:[#allocation19 + $0x448] sm:$0xff]  ;;  %v10023_v14 = vld [vmem:[#allocation25 + $0x50] sm:$0xff]  ;;  %v10024_v28 = vld [vmem:[#allocation25 + $0x58] sm:$0xff] }
0x1458   :  { %16879 = vmatprep.subr.bf16.mxu0 %v17743_v52  ;;  %v16910_v9 = vpack.c.bf16 %v9832_v0, %v9831_v33  ;;  %v10025_v33 = vld [vmem:[#allocation25 + $0x60] sm:$0xff]  ;;  %v10026_v0 = vld [vmem:[#allocation25 + $0x68] sm:$0xff] }
0x145a   :  { %16854 = vmatpush3.bf16.msra.mxu1 %v16853_v36  ;;  %v9834_v36 = vld [vmem:[#allocation19 + $0x458] sm:$0xff] }
0x145b   :  { %16855 = vmatprep.subr.bf16.mxu1 %v17743_v52  ;;  %16881 = vmatpush3.bf16.msra.mxu0 %v16880_v62  ;;  %v16913_v25 = vpack.c.bf16 %v9834_v36, %v9833_v27  ;;  %v9836_v62 = vld [vmem:[#allocation19 + $0x468] sm:$0xff]  ;;  %v10363_v36 = vld [vmem:[#allocation20] ss:$0 sm:$0xff] }
0x145c   :  { %16882 = vmatprep.subr.bf16.mxu0 %v17743_v52  ;;  %v16916_v19 = vpack.c.bf16 %v9836_v62, %v9835_v11 }
0x145e   :  { %16857 = vmatpush3.bf16.msra.mxu1 %v16856_v4  ;;  %v9838_v4 = vld [vmem:[#allocation19 + $0x478] sm:$0xff] }
0x145f   :  { %16858 = vmatprep.subr.bf16.mxu1 %v17743_v52  ;;  %16884 = vmatpush3.bf16.msra.mxu0 %v16883_v8  ;;  %v16919_v59 = vpack.c.bf16 %v9838_v4, %v9837_v23  ;;  %v9920_v8 = vld [vmem:[#allocation22 + $0x8] sm:$0xff]  ;;  %v10027_v23 = vld [vmem:[#allocation25 + $0x70] sm:$0xff]  ;;  %v10028_v4 = vld [vmem:[#allocation25 + $0x78] sm:$0xff] }
0x1460   :  { %16885 = vmatprep.subr.bf16.mxu0 %v17743_v52  ;;  %v16922_v26 = vpack.c.bf16 %v9920_v8, %v9919_v49  ;;  %v10107_v49 = vld [vmem:[#allocation28] sm:$0xff]  ;;  %v10108_v8 = vld [vmem:[#allocation28 + $0x8] sm:$0xff] }
0x1462   :  { %16860 = vmatpush3.bf16.msra.mxu1 %v16859_v34  ;;  %v9922_v34 = vld [vmem:[#allocation22 + $0x18] sm:$0xff] }
0x1463   :  { %16861 = vmatprep.subr.bf16.mxu1 %v17743_v52  ;;  %16887 = vmatpush3.bf16.msra.mxu0 %v16886_v39  ;;  %v16925_v50 = vpack.c.bf16 %v9922_v34, %v9921_v16  ;;  %v9924_v39 = vld [vmem:[#allocation22 + $0x28] sm:$0xff]  ;;  %v10109_v16 = vld [vmem:[#allocation28 + $0x10] sm:$0xff]  ;;  %v10110_v34 = vld [vmem:[#allocation28 + $0x18] sm:$0xff] }
0x1464   :  { %16888 = vmatprep.subr.bf16.mxu0 %v17743_v52  ;;  %v16928_v12 = vpack.c.bf16 %v9924_v39, %v9923_v21  ;;  %v10111_v21 = vld [vmem:[#allocation28 + $0x20] sm:$0xff]  ;;  %v10112_v39 = vld [vmem:[#allocation28 + $0x28] sm:$0xff] }
0x1466   :  { %16863 = vmatpush3.bf16.msra.mxu1 %v16862_v61  ;;  %v9926_v61 = vld [vmem:[#allocation22 + $0x38] sm:$0xff] }
0x1467   :  { %16864 = vmatprep.subr.bf16.mxu1 %v17743_v52  ;;  %16890 = vmatpush3.bf16.msra.mxu0 %v16889_v29  ;;  %v16931_v56 = vpack.c.bf16 %v9926_v61, %v9925_v24  ;;  %v9928_v29 = vld [vmem:[#allocation22 + $0x48] sm:$0xff]  ;;  %v10113_v24 = vld [vmem:[#allocation28 + $0x30] sm:$0xff]  ;;  %v10114_v61 = vld [vmem:[#allocation28 + $0x38] sm:$0xff] }
0x1468   :  { %16891 = vmatprep.subr.bf16.mxu0 %v17743_v52 }
0x146a   :  { %16866 = vmatpush3.bf16.msra.mxu1 %v16865_v46  ;;  %v16934_v46 = vpack.c.bf16 %v9928_v29, %v9927_v32  ;;  %v10115_v32 = vld [vmem:[#allocation28 + $0x40] sm:$0xff]  ;;  %v10116_v29 = vld [vmem:[#allocation28 + $0x48] sm:$0xff] }
0x146b   :  { %16867 = vmatprep.subr.bf16.mxu1 %v17743_v52  ;;  %16893 = vmatpush3.bf16.msra.mxu0 %v16892_v6 }
0x146c   :  { %16894 = vmatprep.subr.bf16.mxu0 %v17743_v52 }
0x146e   :  { %16869 = vmatpush3.bf16.msra.mxu1 %v16868_v53  ;;  %v16937_v53 = vpack.c.bf16 %v9930_v44, %v9929_v41  ;;  %v10117_v41 = vld [vmem:[#allocation28 + $0x50] sm:$0xff]  ;;  %v10118_v44 = vld [vmem:[#allocation28 + $0x58] sm:$0xff] }
0x146f   :  { %16870 = vmatprep.subr.bf16.mxu1 %v17743_v52  ;;  %16896 = vmatpush3.bf16.msra.mxu0 %v16895_v51  ;;  %v9931_v51 = vld [vmem:[#allocation22 + $0x60] sm:$0xff] }
0x1470   :  { %16921 = vmatprep.subr.bf16.mxu0 %v17743_v52 }
0x1472   :  { %16872 = vmatpush3.bf16.msra.mxu1 %v16871_v18 }
0x1473   :  { %14815 = vmatprep.subr.mxu1 %v17745_v54 }
0x1520   :  { %v9416_v1 = vpop.f32.mrb[48].mxu0 }
0x1521   :  { %v14734_v7 = vpop.f32.mrb[49].mxu0 }
0x1524   :  { %v9253_v60 = vpop.f32.mrb[128].mxu1  ;;  %v9655_v48 = vpop.f32.mrb[50].mxu0 }
0x1525   :  { %v9257_v43 = vadd.f32 %v9253_v60, %v19479_v63  ;;  %v14694_v15 = vpop.f32.mrb[129].mxu1  ;;  %14813 = vmatmul.mubr.f32.vlgmr.msra.gmra.mrb[52].mxu0 %v9655_v48  ;;  %v14779_v5 = vpop.f32.mrb[51].mxu0  ;;  %v9825_v63 = vld [vmem:[#allocation19 + $0x410] sm:$0xff]  ;;  %v9934_v48 = vld [vmem:[#allocation22 + $0x78] sm:$0xff] }
0x1526   :  { %14887 = vmatprep.mubr.msk.f32.mxu0 %vm17744_vm0, %v17745_v54  ;;  %v16901_v45 = vpack.c.bf16 %v9826_v10, %v9825_v63  ;;  %16923 = vmatpush3.bf16.msra.mxu0 %v16922_v26  ;;  %v9933_v60 = vld [vmem:[#allocation22 + $0x70] sm:$0xff]  ;;  %v10013_v15 = vld [vmem:[#allocation25] sm:$0xff]  ;;  %v10020_v10 = vld [vmem:[#allocation25 + $0x38] sm:$0xff]  ;;  %v16970_v26 = vpack.c.bf16 %v10108_v8, %v10107_v49 }
0x1527   :  { %v19513_v38 = vadd.f32 %v9416_v1, %v9257_v43  ;;  %16924 = vmatprep.subr.bf16.mxu0 %v17743_v52  ;;  %v9932_v1 = vld [vmem:[#allocation22 + $0x68] sm:$0xff]  ;;  %v16943_v43 = vpack.c.bf16 %v9934_v48, %v9933_v60  ;;  %v10019_v63 = vld [vmem:[#allocation25 + $0x30] sm:$0xff]  ;;  %v10367_v49 = vld [vmem:[#allocation32] ss:$0 sm:$0xff] }
0x1528   :  { %v9492_v22 = vpop.f32.mrb[130].mxu1  ;;  %v16940_v7 = vpack.c.bf16 %v9932_v1, %v9931_v51  ;;  %v10014_v5 = vld [vmem:[#allocation25 + $0x8] sm:$0xff]  ;;  %v10121_v51 = vld [vmem:[#allocation28 + $0x70] sm:$0xff]  ;;  %v10122_v1 = vld [vmem:[#allocation28 + $0x78] sm:$0xff] }
0x1529   :  { %14773 = vmatmul.mubr.f32.vlgmr.msra.gmra.mrb[132].mxu1 %v9492_v22  ;;  %v14739_v17 = vpop.f32.mrb[131].mxu1  ;;  %v16946_v58 = vpack.c.bf16 %v10014_v5, %v10013_v15  ;;  %v10201_v60 = vld [vmem:[#allocation31] sm:$0xff]  ;;  %v10202_v48 = vld [vmem:[#allocation31 + $0x8] sm:$0xff]  ;;  %v10204_v5 = vld [vmem:[#allocation31 + $0x18] sm:$0xff] }
0x152a   :  { %14816 = vmatpush3.msra.mxu1 %v19371_v40  ;;  %14817 = vmatprep.mubr.msk.f32.mxu1 %vm17744_vm0, %v17745_v54  ;;  %v9827_v40 = vld [vmem:[#allocation19 + $0x420] sm:$0xff]  ;;  %v16994_v15 = vpack.c.bf16 %v10202_v48, %v10201_v60 }
0x152b   :  { %16897 = vmatprep.subr.bf16.mxu1 %v17743_v52  ;;  %v16904_v35 = vpack.c.bf16 %v9828_v3, %v9827_v40  ;;  %16926 = vmatpush3.bf16.msra.mxu0 %v16925_v50  ;;  %v10017_v17 = vld [vmem:[#allocation25 + $0x20] sm:$0xff]  ;;  %v10022_v3 = vld [vmem:[#allocation25 + $0x48] sm:$0xff]  ;;  %v16973_v50 = vpack.c.bf16 %v10110_v34, %v10109_v16 }
0x152c   :  { %16927 = vmatprep.subr.bf16.mxu0 %v17743_v52  ;;  %v10021_v40 = vld [vmem:[#allocation25 + $0x40] sm:$0xff] }
0x152d   :  { %14818 = vmatmul.mubr.msk.f32.vlgmr.msra.gmra.mrb[134].mxu1 %vm8447_vm2, %v10361_v30  ;;  %v10018_v30 = vld [vmem:[#allocation25 + $0x28] sm:$0xff] }
0x152e   :  { %16899 = vmatpush3.bf16.msra.mxu1 %v16898_v20  ;;  %14852 = vmatprep.mubr.msk.f32.mxu1 %vm17744_vm0, %v17745_v54  ;;  %v16952_v20 = vpack.c.bf16 %v10018_v30, %v10017_v17  ;;  %v10208_v17 = vld [vmem:[#allocation31 + $0x38] sm:$0xff]  ;;  %v10294_v16 = vld [vmem:[#allocation34] sm:$0xff] }
0x152f   :  { %16900 = vmatprep.subr.bf16.mxu1 %v17743_v52  ;;  %16929 = vmatpush3.bf16.msra.mxu0 %v16928_v12  ;;  %v16976_v12 = vpack.c.bf16 %v10112_v39, %v10111_v21 }
0x1530   :  { %16930 = vmatprep.subr.bf16.mxu0 %v17743_v52 }
0x1532   :  { %16902 = vmatpush3.bf16.msra.mxu1 %v16901_v45  ;;  %v16955_v45 = vpack.c.bf16 %v10020_v10, %v10019_v63  ;;  %v10210_v63 = vld [vmem:[#allocation31 + $0x48] sm:$0xff] }
0x1533   :  { %16903 = vmatprep.subr.bf16.mxu1 %v17743_v52  ;;  %16932 = vmatpush3.bf16.msra.mxu0 %v16931_v56  ;;  %v16979_v56 = vpack.c.bf16 %v10114_v61, %v10113_v24 }
0x1534   :  { %16933 = vmatprep.subr.bf16.mxu0 %v17743_v52 }
0x1536   :  { %16905 = vmatpush3.bf16.msra.mxu1 %v16904_v35  ;;  %v16958_v35 = vpack.c.bf16 %v10022_v3, %v10021_v40  ;;  %v10212_v40 = vld [vmem:[#allocation31 + $0x58] sm:$0xff] }
0x1537   :  { %16906 = vmatprep.subr.bf16.mxu1 %v17743_v52  ;;  %16935 = vmatpush3.bf16.msra.mxu0 %v16934_v46  ;;  %v16982_v46 = vpack.c.bf16 %v10116_v29, %v10115_v32 }
0x1538   :  { %16936 = vmatprep.subr.bf16.mxu0 %v17743_v52 }
0x153a   :  { %16908 = vmatpush3.bf16.msra.mxu1 %v16907_v47  ;;  %v16961_v47 = vpack.c.bf16 %v10024_v28, %v10023_v14  ;;  %v10214_v14 = vld [vmem:[#allocation31 + $0x68] sm:$0xff] }
0x153b   :  { %16909 = vmatprep.subr.bf16.mxu1 %v17743_v52  ;;  %16938 = vmatpush3.bf16.msra.mxu0 %v16937_v53  ;;  %v16985_v53 = vpack.c.bf16 %v10118_v44, %v10117_v41 }
0x153c   :  { %16939 = vmatprep.subr.bf16.mxu0 %v17743_v52 }
0x153e   :  { %16911 = vmatpush3.bf16.msra.mxu1 %v16910_v9  ;;  %v16964_v9 = vpack.c.bf16 %v10026_v0, %v10025_v33 }
0x153f   :  { %16912 = vmatprep.subr.bf16.mxu1 %v17743_v52  ;;  %16941 = vmatpush3.bf16.msra.mxu0 %v16940_v7  ;;  %v16991_v7 = vpack.c.bf16 %v10122_v1, %v10121_v51 }
0x1540   :  { %16942 = vmatprep.subr.bf16.mxu0 %v17743_v52 }
0x1542   :  { %16914 = vmatpush3.bf16.msra.mxu1 %v16913_v25 }
0x1543   :  { %16915 = vmatprep.subr.bf16.mxu1 %v17743_v52  ;;  %16944 = vmatpush3.bf16.msra.mxu0 %v16943_v43  ;;  %v10203_v43 = vld [vmem:[#allocation31 + $0x10] sm:$0xff] }
0x1544   :  { %16969 = vmatprep.subr.bf16.mxu0 %v17743_v52 }
0x1546   :  { %16917 = vmatpush3.bf16.msra.mxu1 %v16916_v19 }
0x1547   :  { %16918 = vmatprep.subr.bf16.mxu1 %v17743_v52 }
0x154a   :  { %16920 = vmatpush3.bf16.msra.mxu1 %v16919_v59  ;;  %v16967_v59 = vpack.c.bf16 %v10028_v4, %v10027_v23 }
0x154b   :  { %16945 = vmatprep.subr.bf16.mxu1 %v17743_v52 }
0x15f8   :  { %v9742_v55 = vpop.f32.mrb[52].mxu0 }
0x15f9   :  { %v14814_v31 = vpop.f32.mrb[53].mxu0 }
0x15fa   :  { %v10120_v31 = vld [vmem:[#allocation28 + $0x68] sm:$0xff] }
0x15fc   :  { %v9579_v6 = vpop.f32.mrb[132].mxu1 }
0x15fd   :  { %v9583_v57 = vadd.f32 %v9579_v6, %v19513_v38  ;;  %v14774_v2 = vpop.f32.mrb[133].mxu1  ;;  %v10015_v38 = vld [vmem:[#allocation25 + $0x10] sm:$0xff] }
0x15fe   :  { %v16949_v22 = vpack.c.bf16 %v10016_v42, %v10015_v38  ;;  %v16997_v38 = vpack.c.bf16 %v10204_v5, %v10203_v43  ;;  %v10206_v42 = vld [vmem:[#allocation31 + $0x28] sm:$0xff] }
0x15ff   :  { %v9746_v18 = vadd.f32 %v9742_v55, %v9583_v57  ;;  %v10119_v55 = vld [vmem:[#allocation28 + $0x60] sm:$0xff]  ;;  %v10364_v57 = vld [vmem:[#allocation23] ss:$0 sm:$0xff] }
0x1600   :  { %v9818_v37 = vpop.f32.mrb[134].mxu1  ;;  %v16988_v6 = vpack.c.bf16 %v10120_v31, %v10119_v55 }
0x1601   :  { %14853 = vmatmul.mubr.f32.vlgmr.msra.gmra.mrb[136].mxu1 %v9818_v37  ;;  %v14819_v13 = vpop.f32.mrb[135].mxu1 }
0x1602   :  { %14922 = vmatprep.mubr.msk.f32.mxu1 %vm17744_vm0, %v17745_v54  ;;  %16947 = vmatpush3.bf16.msra.mxu1 %v16946_v58  ;;  %v10205_v58 = vld [vmem:[#allocation31 + $0x20] sm:$0xff] }
0x1603   :  { %16948 = vmatprep.subr.bf16.mxu1 %v17743_v52 }
0x1606   :  { %16950 = vmatpush3.bf16.msra.mxu1 %v16949_v22  ;;  %v17000_v22 = vpack.c.bf16 %v10206_v42, %v10205_v58 }
0x1607   :  { %16951 = vmatprep.subr.bf16.mxu1 %v17743_v52 }
0x160a   :  { %16953 = vmatpush3.bf16.msra.mxu1 %v16952_v20  ;;  %v10209_v20 = vld [vmem:[#allocation31 + $0x40] sm:$0xff] }
0x160b   :  { %16954 = vmatprep.subr.bf16.mxu1 %v17743_v52  ;;  %v17006_v10 = vpack.c.bf16 %v10210_v63, %v10209_v20 }
0x160e   :  { %16956 = vmatpush3.bf16.msra.mxu1 %v16955_v45  ;;  %v10211_v45 = vld [vmem:[#allocation31 + $0x50] sm:$0xff] }
0x160f   :  { %16957 = vmatprep.subr.bf16.mxu1 %v17743_v52  ;;  %v17009_v3 = vpack.c.bf16 %v10212_v40, %v10211_v45 }
0x1612   :  { %16959 = vmatpush3.bf16.msra.mxu1 %v16958_v35  ;;  %v10213_v35 = vld [vmem:[#allocation31 + $0x60] sm:$0xff] }
0x1613   :  { %16960 = vmatprep.subr.bf16.mxu1 %v17743_v52  ;;  %v17012_v28 = vpack.c.bf16 %v10214_v14, %v10213_v35 }
0x1616   :  { %16962 = vmatpush3.bf16.msra.mxu1 %v16961_v47  ;;  %v10365_v47 = vld [vmem:[#allocation26] ss:$0 sm:$0xff] }
0x1617   :  { %16963 = vmatprep.subr.bf16.mxu1 %v17743_v52 }
0x161a   :  { %16965 = vmatpush3.bf16.msra.mxu1 %v16964_v9 }
0x161b   :  { %16966 = vmatprep.subr.bf16.mxu1 %v17743_v52 }
0x161e   :  { %16968 = vmatpush3.bf16.msra.mxu1 %v16967_v59 }
0x161f   :  { %16993 = vmatprep.subr.bf16.mxu1 %v17743_v52 }
0x16d4   :  { %v9905_v27 = vpop.f32.mrb[136].mxu1 }
0x16d5   :  { %v9909_v25 = vadd.f32 %v9905_v27, %v9746_v18  ;;  %v14854_v11 = vpop.f32.mrb[137].mxu1 }
0x16d7   :  { %v9917_v62 = vadd.f32 %v10363_v36, %v9909_v25  ;;  %v10215_v36 = vld [vmem:[#allocation31 + $0x70] sm:$0xff]  ;;  %v10216_v25 = vld [vmem:[#allocation31 + $0x78] sm:$0xff] }
0x16d8   :  { %v17015_v11 = vpack.c.bf16 %v10216_v25, %v10215_v36 }
0x16d9   :  { %v9918_v19 = vmax.f32 %v9917_v62, 0.0  ;;  %v10366_v62 = vld [vmem:[#allocation29] ss:$0 sm:$0xff] }
0x16db   :  { %14888 = vmatmul.mubr.f32.vlgmr.msra.gmra.mrb[54].mxu0 %v9918_v19 }
0x16dc   :  { %14957 = vmatprep.mubr.msk.f32.mxu0 %vm17744_vm0, %v17745_v54  ;;  %16971 = vmatpush3.bf16.msra.mxu0 %v16970_v26 }
0x16dd   :  { %16972 = vmatprep.subr.bf16.mxu0 %v17743_v52 }
0x16e0   :  { %16974 = vmatpush3.bf16.msra.mxu0 %v16973_v50 }
0x16e1   :  { %16975 = vmatprep.subr.bf16.mxu0 %v17743_v52 }
0x16e4   :  { %16977 = vmatpush3.bf16.msra.mxu0 %v16976_v12 }
0x16e5   :  { %16978 = vmatprep.subr.bf16.mxu0 %v17743_v52 }
0x16e8   :  { %16980 = vmatpush3.bf16.msra.mxu0 %v16979_v56 }
0x16e9   :  { %16981 = vmatprep.subr.bf16.mxu0 %v17743_v52 }
0x16ec   :  { %16983 = vmatpush3.bf16.msra.mxu0 %v16982_v46 }
0x16ed   :  { %16984 = vmatprep.subr.bf16.mxu0 %v17743_v52 }
0x16f0   :  { %16986 = vmatpush3.bf16.msra.mxu0 %v16985_v53 }
0x16f1   :  { %16987 = vmatprep.subr.bf16.mxu0 %v17743_v52 }
0x16f4   :  { %16989 = vmatpush3.bf16.msra.mxu0 %v16988_v6 }
0x16f5   :  { %16990 = vmatprep.subr.bf16.mxu0 %v17743_v52 }
0x16f8   :  { %16992 = vmatpush3.bf16.msra.mxu0 %v16991_v7 }
0x17ae   :  { %v10008_v2 = vpop.f32.mrb[54].mxu0 }
0x17af   :  { %v10009_v18 = vadd.f32 %v10364_v57, %v10008_v2  ;;  %v14889_v37 = vpop.f32.mrb[55].mxu0 }
0x17b1   :  { %v10012_v13 = vmax.f32 %v10009_v18, 0.0 }
0x17b3   :  { %14923 = vmatmul.mubr.f32.vlgmr.msra.gmra.mrb[138].mxu1 %v10012_v13 }
0x17b4   :  { %14992 = vmatprep.mubr.msk.f32.mxu1 %vm17744_vm0, %v17745_v54  ;;  %16995 = vmatpush3.bf16.msra.mxu1 %v16994_v15  ;;  %v10207_v54 = vld [vmem:[#allocation31 + $0x30] sm:$0xff] }
0x17b5   :  { %16996 = vmatprep.subr.bf16.mxu1 %v17743_v52  ;;  %v17003_v30 = vpack.c.bf16 %v10208_v17, %v10207_v54 }
0x17b8   :  { %16998 = vmatpush3.bf16.msra.mxu1 %v16997_v38 }
0x17b9   :  { %16999 = vmatprep.subr.bf16.mxu1 %v17743_v52 }
0x17bc   :  { %17001 = vmatpush3.bf16.msra.mxu1 %v17000_v22 }
0x17bd   :  { %17002 = vmatprep.subr.bf16.mxu1 %v17743_v52 }
0x17c0   :  { %17004 = vmatpush3.bf16.msra.mxu1 %v17003_v30 }
0x17c1   :  { %17005 = vmatprep.subr.bf16.mxu1 %v17743_v52 }
0x17c4   :  { %17007 = vmatpush3.bf16.msra.mxu1 %v17006_v10 }
0x17c5   :  { %17008 = vmatprep.subr.bf16.mxu1 %v17743_v52 }
0x17c8   :  { %17010 = vmatpush3.bf16.msra.mxu1 %v17009_v3 }
0x17c9   :  { %17011 = vmatprep.subr.bf16.mxu1 %v17743_v52 }
0x17cc   :  { %17013 = vmatpush3.bf16.msra.mxu1 %v17012_v28 }
0x17cd   :  { %17014 = vmatprep.subr.bf16.mxu1 %v17743_v52 }
0x17d0   :  { %17016 = vmatpush3.bf16.msra.mxu1 %v17015_v11 }
0x1886   :  { %v10102_v33 = vpop.f32.mrb[138].mxu1 }
0x1887   :  { %v10103_v0 = vadd.f32 %v10365_v47, %v10102_v33  ;;  %v14924_v9 = vpop.f32.mrb[139].mxu1 }
0x1889   :  { %v10106_v27 = vmax.f32 %v10103_v0, 0.0 }
0x188b   :  { %14958 = vmatmul.mubr.f32.vlgmr.msra.gmra.mrb[56].mxu0 %v10106_v27 }
0x195e   :  { %v10196_v19 = vpop.f32.mrb[56].mxu0 }
0x195f   :  { %v10197_v23 = vadd.f32 %v10366_v62, %v10196_v19  ;;  %v14959_v4 = vpop.f32.mrb[57].mxu0 }
0x1961   :  { %v10200_v59 = vmax.f32 %v10197_v23, 0.0 }
0x1963   :  { %14993 = vmatmul.mubr.f32.vlgmr.msra.gmra.mrb[140].mxu1 %v10200_v59 }
0x1a36   :  { %v10290_v8 = vpop.f32.mrb[140].mxu1 }
0x1a37   :  { %v10291_v52 = vadd.f32 %v10367_v49, %v10290_v8  ;;  %v14994_v26 = vpop.f32.mrb[141].mxu1 }
0x1a39   :  { %v10295_v34 = vadd.f32 %v10294_v16, %v10291_v52 }
0x1a3b   :  { %10296 = vmax.xlane.f32.xlu0 %v10295_v34 }
0x1ac8   :  { %v10297_v50 = vpop.xlane.xlu0 %10296 }
0x1ac9   :  { %v10298_v21 = vsub.f32 %v10295_v34, %v10297_v50 }
0x1acb   :  { %v10299_v39 = vmul.f32 1.442695, %v10298_v21 }
0x1acd   :  { %17206 = vpow2.f32 %v10299_v39 }
0x1ad7   :  { %v17207_v12 = vpop.eup %17206 }
0x1ad8   :  { %10301 = vadd.xlane.f32.xlu0 %v17207_v12 }
0x1b65   :  { %v10302_v24 = vpop.xlane.xlu0 %10301 }
0x1b66   :  { %17208 = vrcp.f32 %v10302_v24 }
0x1b70   :  { %v17209_v61 = vpop.eup %17208 }
0x1b71   :  { %v10304_v56 = vmul.f32 %v17209_v61, %v10302_v24 }
0x1b73   :  { %v10305_v32 = vsub.f32 2.0, %v10304_v56 }
0x1b75   :  { %v10306_v29 = vmul.f32 %v17209_v61, %v10305_v32 }
0x1b77   :  { %v10307_v46 = vmul.f32 %v17207_v12, %v10306_v29 }
0x1b79   :  { %10308 = vst [vmem:[#allocation35] sm:$0xff] %v10307_v46 }
0x1b7a   :  { %17683 = shalt.err (!%p17680_p4)
}
0x1b7b   :  { %s19734_s12 = sld [smem:[#allocation81_spill]] }
0x1b81   :  { %s17684_s29 = scalar_lea.hbm %s19734_s12, 128 }
0x1b82   :  { %p17685_p5 = scmp.ne.s32.totalorder %s19734_s12, %s17684_s29  ;;  %p17688_p6 = scmp.lt.u32.totalorder %s17684_s29, %s19734_s12 }
0x1b84   :  { %p17690_p7 = pnand %p17688_p6, %p17685_p5 }
0x1b86   :  { %17693 = shalt.err (!%p17690_p7)
}
0x1b87   :  { %10318 = dma.vmem_to_hbm [thread:$0]  %s10316_s13, 128, %s19734_s12, [#allocation4]  }
0x1b88   :  { %17716 = dma.done.wait [#allocation4], 128  }
0x1b89   :  { %17717 = vsyncadd [#allocation4], 4294967168 }
0x1b8a   :  { %10322 = vsyncpa [#allocation3], 1 }
0x1b8b   :  { %10323 = vsyncpa [#allocation6], 1 }
0x1b8c   :  { %10324 = vsyncpa [#allocation9], 1 }
0x1b8d   :  { %10325 = vsyncpa [#allocation12], 1 }
0x1b8e   :  { %10326 = vsyncpa [#allocation15], 1 }
0x1b8f   :  { %10327 = vsyncpa [#allocation18], 1 }
0x1b90   :  { %10328 = vsyncpa [#allocation21], 1 }
0x1b91   :  { %10329 = vsyncpa [#allocation24], 1 }
0x1b92   :  { %10330 = vsyncpa [#allocation27], 1 }
0x1b93   :  { %10331 = vsyncpa [#allocation30], 1 }
0x1b94   :  { %10332 = vsyncpa [#allocation33], 1 }
0x1b95   :  { %10333 = vsyncpa [#allocation4], 1 }

</bundles_post_ra>
